<compile_context>
chip_gen: v7x
topology: tpu7x:2x2x1
jax: 0.10.0
libtpu: 0.0.40
codegen_flags: <defaults>
</compile_context>

<pallas_src>
import functools

import jax
import jax.numpy as jnp
from jax import lax
from jax.experimental import pallas as pl
from jax.experimental.pallas import tpu as pltpu

EMBED_DIM = 128
VOCAB = 23
VPAD = 32            # one-hot width padded to 32
HID = 80             # lstm_output_size
HP = 128             # per-gate padded width (lane-aligned gate slots)
LANES = 128

CONV1_K, CONV2_K, CONV3_K = 10, 8, 5
CONV_C = 10          # all convs have 10 output channels


# ----------------------------------------------------------------------------
# Pallas kernel: one batch tile (BT elements of both proteins -> N = 2*BT seqs).
# ----------------------------------------------------------------------------
def dnn_kernel(oh_ref,
               t1_ref, b1_ref, t2_ref, b2_ref, t3_ref, b3_ref,
               wi_ref, wh_ref, bg_ref,
               fw1_ref, fw2_ref, fcb_ref,
               out_ref, *, n_seq, seq_len):
    N = n_seq            # 2*BT sequences: columns [0:BT)=protein1, [BT:2BT)=protein2
    L = seq_len
    f32 = jnp.float32

    # ---- one-hot tokens (bf16, exact) -> f32 for the folded emb+conv1 matmul ----
    x = oh_ref[0].astype(f32)                                    # (L*N, VPAD)

    def conv_block(x, lc, tbl_ref, b_ref, K, C):
        # Tap-fused conv: single MXU matmul against a (Cin, K*C) table (lane-padded
        # to 128), then K-1 shifted-slice adds.  tbl[:, k*C+o] holds tap k's weights.
        y = jnp.dot(x, tbl_ref[...], preferred_element_type=f32)     # (lc*N, 128)
        lo = lc - K + 1
        acc = y[0:lo * N, 0:C]
        for k in range(1, K):                                        # static unroll
            acc = acc + y[k * N:(k + lo) * N, k * C:(k + 1) * C]
        return jnp.maximum(acc + b_ref[...], 0.0), lo                # (lo*N, C)

    def maxpool2(x, lc):
        # non-overlapping MaxPool1d(2) along time (floor), flat time-major layout.
        p = lc // 2
        co = x.shape[1]
        y = x[0:2 * p * N].reshape(p, 2, N, co)                      # leading-dim split
        return jnp.maximum(y[:, 0], y[:, 1]).reshape(p * N, co), p

    # conv1 has the embedding folded into its table -> no (L*N, 128) activation.
    x, lc = conv_block(x, L, t1_ref, b1_ref, CONV1_K, CONV_C)
    x, lc = maxpool2(x, lc)
    x, lc = conv_block(x, lc, t2_ref, b2_ref, CONV2_K, CONV_C)
    x, lc = maxpool2(x, lc)
    x, lc = conv_block(x, lc, t3_ref, b3_ref, CONV3_K, CONV_C)
    x, lc = maxpool2(x, lc)                                          # (T*N, 10)
    T = lc

    # ---- LSTM: fused 128-padded gate weights, hoisted input projection ----
    xp = jnp.dot(x, wi_ref[...], preferred_element_type=f32)        # (T*N, 4*HP)
    wh = wh_ref[...]                                                 # (HP, 4*HP)
    bg = bg_ref[...]                                                 # (1, 4*HP)

    def cell(h, c, g):
        i = jax.nn.sigmoid(g[:, 0:HP])
        f = jax.nn.sigmoid(g[:, HP:2 * HP])
        gg = jnp.tanh(g[:, 2 * HP:3 * HP])
        o = jax.nn.sigmoid(g[:, 3 * HP:4 * HP])
        c = f * c + i * gg
        return o * jnp.tanh(c), c                                    # padded cols stay 0

    h = jnp.zeros((N, HP), f32)
    c = jnp.zeros((N, HP), f32)
    if T <= 16:
        for t in range(T):                                           # short seq: unroll
            g = xp[t * N:(t + 1) * N] + jnp.dot(h, wh, preferred_element_type=f32) + bg
            h, c = cell(h, c, g)
    else:
        # long sequences: fori_loop bounds live ranges / code size.
        # TODO(synk): for very long L also compute xp in chunks rather than fully hoisted.
        def body(t, hc):
            hh, cc = hc
            xs = lax.dynamic_slice_in_dim(xp, t * N, N, axis=0)
            g = xs + jnp.dot(hh, wh, preferred_element_type=f32) + bg
            return cell(hh, cc, g)
        h, c = lax.fori_loop(0, T, body, (h, c))

    # ---- final Linear(320,1) with folded (h1,h1,h2,h2) concat; sigmoid ----
    dn = (((1,), (1,)), ((), ()))                                    # contract lane dims
    r1 = lax.dot_general(fw1_ref[...], h, dn, preferred_element_type=f32)   # (1, N)
    r2 = lax.dot_general(fw2_ref[...], h, dn, preferred_element_type=f32)   # (1, N)
    bt = N // 2
    logit = r1[:, 0:bt] + r2[:, bt:2 * bt] + fcb_ref[...]
    out_ref[0] = jax.nn.sigmoid(logit)                               # lane-dense (1, BT)


# ----------------------------------------------------------------------------
# Wrapper
# ----------------------------------------------------------------------------
def dnn_forward(tokens1, tokens2, params):
    B, L = tokens1.shape
    f32 = jnp.float32

    # static check that the conv/pool chain leaves >=1 LSTM step (as in PyTorch).
    lo1 = L - CONV1_K + 1
    p1 = lo1 // 2
    lo2 = p1 - CONV2_K + 1
    p2 = lo2 // 2
    lo3 = p2 - CONV3_K + 1
    T = lo3 // 2
    assert T >= 1, f"sequence length {L} too short for the conv/pool chain"

    # ---- batch tiling: lane-dense output (BT up to 128), VMEM-bounded by L ----
    VMEM_LIMIT = 48 * 2 ** 20         # conservative: fits v7x's 64 MiB VMEM
    def peak_bytes(bt):               # rough f32 working set; rows lane-pad to 512 B
        return 5 * L * (2 * bt) * 512
    B8 = ((B + 7) // 8) * 8
    BT = min(128, B8)
    while BT > 8 and peak_bytes(BT) > VMEM_LIMIT - (4 << 20):
        BT = max(8, ((BT // 2) // 8) * 8)
    B_pad = ((B + BT - 1) // BT) * BT
    G = B_pad // BT
    N = 2 * BT
    # NOTE: on v7x (2 TensorCores) prefer a BT that leaves G >= 2 for large batches.

    # ---- compact lane-dense one-hot tokens (bf16 is exact for 0/1) ----
    # flat row index = t*N + n; columns [0:BT)=protein1 tile, [BT:2BT)=protein2 tile.
    pad = B_pad - B
    t1 = jnp.pad(tokens1, ((0, pad), (0, 0))).astype(jnp.int32)
    t2 = jnp.pad(tokens2, ((0, pad), (0, 0))).astype(jnp.int32)
    tk = jnp.concatenate([t1.reshape(G, BT, L), t2.reshape(G, BT, L)], axis=1)  # (G,N,L)
    tk = jnp.transpose(tk, (0, 2, 1))                                           # (G,L,N)
    onehot = jax.nn.one_hot(tk, VPAD, dtype=jnp.bfloat16).reshape(G, L * N, VPAD)
    # NOTE: tokens >= VPAD would silently embed to zero (VOCAB=23 < 32, so fine).

    emb = params["embed"].astype(f32)                       # (23, 128)

    def fold_conv(w):
        # torch (Cout, Cin, K) -> (Cin, K*Cout) with col j = k*Cout + o; lanes pad to 128
        Cout, Cin, K = w.shape
        t = jnp.transpose(w.astype(f32), (1, 2, 0)).reshape(Cin, K * Cout)
        return jnp.pad(t, ((0, 0), (0, LANES - K * Cout)))

    # conv1 with the embedding folded in: tbl1[v, k*10+o] = sum_i emb[v,i]*w1[o,i,k]
    c1 = jnp.transpose(params["conv1_w"].astype(f32), (1, 2, 0)).reshape(
        EMBED_DIM, CONV1_K * CONV_C)
    m1 = jnp.dot(emb, c1, precision=lax.Precision.HIGHEST)           # (23, 100), f32
    tbl1 = jnp.zeros((VPAD, LANES), f32).at[:VOCAB, :CONV1_K * CONV_C].set(m1)
    tbl2 = fold_conv(params["conv2_w"])                               # (10, 128)
    tbl3 = fold_conv(params["conv3_w"])                               # (10, 128)
    b1 = params["conv1_b"].reshape(1, -1).astype(f32)
    b2 = params["conv2_b"].reshape(1, -1).astype(f32)
    b3 = params["conv3_b"].reshape(1, -1).astype(f32)

    # LSTM: fuse gates (order i,f,g,o) into 128-wide lane-aligned slots
    wi_g = params["w_ih"].reshape(4, HID, -1)              # (4, 80, 10)
    wh_g = params["w_hh"].reshape(4, HID, HID)             # (4, 80, 80)
    bg_g = (params["b_ih"] + params["b_hh"]).reshape(4, HID)
    wi_f = jnp.zeros((wi_g.shape[2], 4 * HP), f32)
    wh_f = jnp.zeros((HP, 4 * HP), f32)
    bg_f = jnp.zeros((1, 4 * HP), f32)
    for j in range(4):
        wi_f = wi_f.at[:, j * HP:j * HP + HID].set(wi_g[j].T.astype(f32))
        wh_f = wh_f.at[:HID, j * HP:j * HP + HID].set(wh_g[j].T.astype(f32))
        bg_f = bg_f.at[0, j * HP:j * HP + HID].set(bg_g[j].astype(f32))

    # final Linear(320,1): fold torch.cat((h1,h1,h2,h2)) algebraically, pad to 128
    wfc = params["fc_w"].astype(f32)                       # (1, 320)
    fw1 = jnp.zeros((1, HP), f32).at[0, :HID].set(wfc[0, 0:HID] + wfc[0, HID:2 * HID])
    fw2 = jnp.zeros((1, HP), f32).at[0, :HID].set(
        wfc[0, 2 * HID:3 * HID] + wfc[0, 3 * HID:4 * HID])
    fcb = params["fc_b"].reshape(1, 1).astype(f32)

    def full(arr):
        nd = arr.ndim
        return pl.BlockSpec(arr.shape, lambda i, _n=nd: (0,) * _n)

    kernel = functools.partial(dnn_kernel, n_seq=N, seq_len=L)

    out = pl.pallas_call(
        kernel,
        out_shape=jax.ShapeDtypeStruct((G, 1, BT), f32),
        grid_spec=pltpu.PrefetchScalarGridSpec(
            num_scalar_prefetch=0,
            grid=(G,),
            in_specs=[
                pl.BlockSpec((1, L * N, VPAD), lambda i: (i, 0, 0)),
                full(tbl1), full(b1), full(tbl2), full(b2), full(tbl3), full(b3),
                full(wi_f), full(wh_f), full(bg_f),
                full(fw1), full(fw2), full(fcb),
            ],
            out_specs=pl.BlockSpec((1, 1, BT), lambda i: (i, 0, 0)),
        ),
        compiler_params=pltpu.CompilerParams(
            dimension_semantics=("parallel",),
            vmem_limit_bytes=VMEM_LIMIT,
        ),
    )(onehot, tbl1, b1, tbl2, b2, tbl3, b3, wi_f, wh_f, bg_f, fw1, fw2, fcb)

    return out.reshape(G * BT)[:B].reshape(B, 1)


# ----------------------------------------------------------------------------
# Pure-JAX reference (mirrors the PyTorch forward) for a correctness check.
# ----------------------------------------------------------------------------
def dnn_reference(tokens1, tokens2, params):
    def conv1d(x, w, b):  # x (B, Cin, L), w (Cout, Cin, K)
        K = w.shape[-1]
        Lo = x.shape[-1] - K + 1
        out = sum(jnp.einsum("bcl,oc->bol", x[:, :, k:k + Lo], w[:, :, k])
                  for k in range(K))
        return out + b[None, :, None]

    def maxpool(x):  # (B, C, L)
        P = x.shape[-1] // 2
        return jnp.max(x[..., :2 * P].reshape(x.shape[0], x.shape[1], P, 2), -1)

    def pm(tokens):
        x = params["embed"][tokens]            # (B, L, E)
        x = jnp.transpose(x, (0, 2, 1))        # (B, E, L)
        x = maxpool(jax.nn.relu(conv1d(x, params["conv1_w"], params["conv1_b"])))
        x = maxpool(jax.nn.relu(conv1d(x, params["conv2_w"], params["conv2_b"])))
        x = maxpool(jax.nn.relu(conv1d(x, params["conv3_w"], params["conv3_b"])))
        x = jnp.transpose(x, (0, 2, 1))        # (B, T, 10)
        B, T, _ = x.shape
        h = jnp.zeros((B, HID)); c = jnp.zeros((B, HID))
        for t in range(T):
            g = (x[:, t] @ params["w_ih"].T + params["b_ih"]
                 + h @ params["w_hh"].T + params["b_hh"])
            i = jax.nn.sigmoid(g[:, :HID]); f = jax.nn.sigmoid(g[:, HID:2 * HID])
            gg = jnp.tanh(g[:, 2 * HID:3 * HID]); o = jax.nn.sigmoid(g[:, 3 * HID:])
            c = f * c + i * gg
            h = o * jnp.tanh(c)
        return jnp.concatenate([h, h], axis=1)  # (B, 160)

    feat = jnp.concatenate([pm(tokens1), pm(tokens2)], axis=1)  # (B, 320)
    return jax.nn.sigmoid(feat @ params["fc_w"].T + params["fc_b"])


# ----------------------------------------------------------------------------
def init_params(key):
    ks = jax.random.split(key, 12)
    rn = lambda k, s, sc=0.1: (sc * jax.random.normal(k, s)).astype(jnp.float32)
    return {
        "embed":   rn(ks[0], (VOCAB, EMBED_DIM), 1.0),
        "conv1_w": rn(ks[1], (10, EMBED_DIM, 10)),
        "conv1_b": rn(ks[2], (10,)),
        "conv2_w": rn(ks[3], (10, 10, 8)),
        "conv2_b": rn(ks[4], (10,)),
        "conv3_w": rn(ks[5], (10, 10, 5)),
        "conv3_b": rn(ks[6], (10,)),
        "w_ih":    rn(ks[7], (4 * HID, 10)),
        "w_hh":    rn(ks[8], (4 * HID, HID)),
        "b_ih":    rn(ks[9], (4 * HID,)),
        "b_hh":    rn(ks[10], (4 * HID,)),
        "fc_w":    rn(ks[11], (1, 4 * HID)),   # Linear(320, 1)
        "fc_b":    jnp.zeros((1,), jnp.float32),
    }
    # NOTE: ProteinModel.fc is defined in __init__ but unused in forward -> omitted.
    # NOTE: .cuda() calls in DNN.forward are device moves, not compute -> no-ops here.


if __name__ == "__main__":
    B, L = 2, 64  # L=64 -> conv/pool chain gives LSTM sequence length 3
    key = jax.random.PRNGKey(0)
    kp, k1, k2 = jax.random.split(key, 3)
    params = init_params(kp)
    tokens1 = jax.random.randint(k1, (B, L), 0, VOCAB, dtype=jnp.int32)
    tokens2 = jax.random.randint(k2, (B, L), 0, VOCAB, dtype=jnp.int32)

    out = jax.jit(functools.partial(dnn_forward, params=params))(tokens1, tokens2)
    out = jax.block_until_ready(out)

    ref = dnn_reference(tokens1, tokens2, params)
    assert out.shape == (B, 1), out.shape
    assert jnp.allclose(out, ref, atol=1e-4, rtol=1e-4), (out, ref)
    print("KERNEL_OK")
</pallas_src>

<mosaic_0001>
module attributes {stable_mosaic.version = 11 : i64} {
  func.func @dnn_kernel(%arg0: i32, %arg1: memref<1x1024x32xbf16, #tpu.memory_space<vmem>>, %arg2: memref<32x128xf32, #tpu.memory_space<vmem>>, %arg3: memref<1x10xf32, #tpu.memory_space<vmem>>, %arg4: memref<10x128xf32, #tpu.memory_space<vmem>>, %arg5: memref<1x10xf32, #tpu.memory_space<vmem>>, %arg6: memref<10x128xf32, #tpu.memory_space<vmem>>, %arg7: memref<1x10xf32, #tpu.memory_space<vmem>>, %arg8: memref<10x512xf32, #tpu.memory_space<vmem>>, %arg9: memref<128x512xf32, #tpu.memory_space<vmem>>, %arg10: memref<1x512xf32, #tpu.memory_space<vmem>>, %arg11: memref<1x128xf32, #tpu.memory_space<vmem>>, %arg12: memref<1x128xf32, #tpu.memory_space<vmem>>, %arg13: memref<1x1xf32, #tpu.memory_space<vmem>>, %arg14: memref<1x1x8xf32, #tpu.memory_space<vmem>>) attributes {dimension_semantics = [#tpu.dimension_semantics<parallel>], iteration_bounds = array<i64: 1>, scalar_prefetch = 0 : i64, scratch_operands = 0 : i64, tpu.core_type = #tpu.core_type<tc>, window_params = [{transform_indices = @transform_0, window_bounds = array<i64: 1, 1024, 32>}, {pipeline_mode = #tpu.pipeline_mode<synchronous>, transform_indices = @transform_1, window_bounds = array<i64: 32, 128>}, {pipeline_mode = #tpu.pipeline_mode<synchronous>, transform_indices = @transform_2, window_bounds = array<i64: 1, 10>}, {pipeline_mode = #tpu.pipeline_mode<synchronous>, transform_indices = @transform_3, window_bounds = array<i64: 10, 128>}, {pipeline_mode = #tpu.pipeline_mode<synchronous>, transform_indices = @transform_4, window_bounds = array<i64: 1, 10>}, {pipeline_mode = #tpu.pipeline_mode<synchronous>, transform_indices = @transform_5, window_bounds = array<i64: 10, 128>}, {pipeline_mode = #tpu.pipeline_mode<synchronous>, transform_indices = @transform_6, window_bounds = array<i64: 1, 10>}, {pipeline_mode = #tpu.pipeline_mode<synchronous>, transform_indices = @transform_7, window_bounds = array<i64: 10, 512>}, {pipeline_mode = #tpu.pipeline_mode<synchronous>, transform_indices = @transform_8, window_bounds = array<i64: 128, 512>}, {pipeline_mode = #tpu.pipeline_mode<synchronous>, transform_indices = @transform_9, window_bounds = array<i64: 1, 512>}, {pipeline_mode = #tpu.pipeline_mode<synchronous>, transform_indices = @transform_10, window_bounds = array<i64: 1, 128>}, {pipeline_mode = #tpu.pipeline_mode<synchronous>, transform_indices = @transform_11, window_bounds = array<i64: 1, 128>}, {pipeline_mode = #tpu.pipeline_mode<synchronous>, transform_indices = @transform_12, window_bounds = array<i64: 1, 1>}, {transform_indices = @transform_13, window_bounds = array<i64: 1, 1, 8>}]} {
    %c0 = arith.constant 0 : index
    %c0_0 = arith.constant 0 : index
    %c0_1 = arith.constant 0 : index
    %0 = vector.load %arg1[%c0, %c0_0, %c0_1] : memref<1x1024x32xbf16, #tpu.memory_space<vmem>>, vector<1x1024x32xbf16>
    %1 = vector.shape_cast %0 : vector<1x1024x32xbf16> to vector<1024x32xbf16>
    %2 = arith.extf %1 : vector<1024x32xbf16> to vector<1024x32xf32>
    %c0_2 = arith.constant 0 : index
    %c0_3 = arith.constant 0 : index
    %3 = vector.load %arg2[%c0_2, %c0_3] : memref<32x128xf32, #tpu.memory_space<vmem>>, vector<32x128xf32>
    %cst = arith.constant dense<0.000000e+00> : vector<1024x128xf32>
    %4 = tpu.matmul %2, %3, %cst {dimension_numbers = #tpu.dot_dimension_numbers<[1], [0], [0], [1], [0, 0, 1, 1], [], []>} : vector<1024x32xf32>, vector<32x128xf32>, vector<1024x128xf32> -> vector<1024x128xf32>
    %5 = vector.extract_strided_slice %4 {offsets = [0, 0], sizes = [880, 10], strides = [1, 1]} : vector<1024x128xf32> to vector<880x10xf32>
    %6 = vector.extract_strided_slice %4 {offsets = [16, 10], sizes = [880, 10], strides = [1, 1]} : vector<1024x128xf32> to vector<880x10xf32>
    %7 = arith.addf %5, %6 : vector<880x10xf32>
    %8 = vector.extract_strided_slice %4 {offsets = [32, 20], sizes = [880, 10], strides = [1, 1]} : vector<1024x128xf32> to vector<880x10xf32>
    %9 = arith.addf %7, %8 : vector<880x10xf32>
    %10 = vector.extract_strided_slice %4 {offsets = [48, 30], sizes = [880, 10], strides = [1, 1]} : vector<1024x128xf32> to vector<880x10xf32>
    %11 = arith.addf %9, %10 : vector<880x10xf32>
    %12 = vector.extract_strided_slice %4 {offsets = [64, 40], sizes = [880, 10], strides = [1, 1]} : vector<1024x128xf32> to vector<880x10xf32>
    %13 = arith.addf %11, %12 : vector<880x10xf32>
    %14 = vector.extract_strided_slice %4 {offsets = [80, 50], sizes = [880, 10], strides = [1, 1]} : vector<1024x128xf32> to vector<880x10xf32>
    %15 = arith.addf %13, %14 : vector<880x10xf32>
    %16 = vector.extract_strided_slice %4 {offsets = [96, 60], sizes = [880, 10], strides = [1, 1]} : vector<1024x128xf32> to vector<880x10xf32>
    %17 = arith.addf %15, %16 : vector<880x10xf32>
    %18 = vector.extract_strided_slice %4 {offsets = [112, 70], sizes = [880, 10], strides = [1, 1]} : vector<1024x128xf32> to vector<880x10xf32>
    %19 = arith.addf %17, %18 : vector<880x10xf32>
    %20 = vector.extract_strided_slice %4 {offsets = [128, 80], sizes = [880, 10], strides = [1, 1]} : vector<1024x128xf32> to vector<880x10xf32>
    %21 = arith.addf %19, %20 : vector<880x10xf32>
    %22 = vector.extract_strided_slice %4 {offsets = [144, 90], sizes = [880, 10], strides = [1, 1]} : vector<1024x128xf32> to vector<880x10xf32>
    %23 = arith.addf %21, %22 : vector<880x10xf32>
    %c0_4 = arith.constant 0 : index
    %c0_5 = arith.constant 0 : index
    %24 = vector.load %arg3[%c0_4, %c0_5] : memref<1x10xf32, #tpu.memory_space<vmem>>, vector<1x10xf32>
    %25 = vector.broadcast %24 : vector<1x10xf32> to vector<880x10xf32>
    %26 = arith.addf %23, %25 : vector<880x10xf32>
    %cst_6 = arith.constant 0.000000e+00 : f32
    %27 = vector.broadcast %cst_6 : f32 to vector<880x10xf32>
    %28 = arith.maximumf %26, %27 : vector<880x10xf32>
    %29 = vector.extract_strided_slice %28 {offsets = [0, 0], sizes = [864, 10], strides = [1, 1]} : vector<880x10xf32> to vector<864x10xf32>
    %30 = vector.shape_cast %29 : vector<864x10xf32> to vector<27x2x16x10xf32>
    %31 = vector.extract_strided_slice %30 {offsets = [0, 0, 0, 0], sizes = [27, 1, 16, 10], strides = [1, 1, 1, 1]} : vector<27x2x16x10xf32> to vector<27x1x16x10xf32>
    %32 = vector.shape_cast %31 : vector<27x1x16x10xf32> to vector<27x16x10xf32>
    %33 = vector.extract_strided_slice %30 {offsets = [0, 1, 0, 0], sizes = [27, 1, 16, 10], strides = [1, 1, 1, 1]} : vector<27x2x16x10xf32> to vector<27x1x16x10xf32>
    %34 = vector.shape_cast %33 : vector<27x1x16x10xf32> to vector<27x16x10xf32>
    %35 = arith.maximumf %32, %34 : vector<27x16x10xf32>
    %36 = vector.shape_cast %35 : vector<27x16x10xf32> to vector<432x10xf32>
    %c0_7 = arith.constant 0 : index
    %c0_8 = arith.constant 0 : index
    %37 = vector.load %arg4[%c0_7, %c0_8] : memref<10x128xf32, #tpu.memory_space<vmem>>, vector<10x128xf32>
    %cst_9 = arith.constant dense<0.000000e+00> : vector<432x128xf32>
    %38 = tpu.matmul %36, %37, %cst_9 {dimension_numbers = #tpu.dot_dimension_numbers<[1], [0], [0], [1], [0, 0, 1, 1], [], []>} : vector<432x10xf32>, vector<10x128xf32>, vector<432x128xf32> -> vector<432x128xf32>
    %39 = vector.extract_strided_slice %38 {offsets = [0, 0], sizes = [320, 10], strides = [1, 1]} : vector<432x128xf32> to vector<320x10xf32>
    %40 = vector.extract_strided_slice %38 {offsets = [16, 10], sizes = [320, 10], strides = [1, 1]} : vector<432x128xf32> to vector<320x10xf32>
    %41 = arith.addf %39, %40 : vector<320x10xf32>
    %42 = vector.extract_strided_slice %38 {offsets = [32, 20], sizes = [320, 10], strides = [1, 1]} : vector<432x128xf32> to vector<320x10xf32>
    %43 = arith.addf %41, %42 : vector<320x10xf32>
    %44 = vector.extract_strided_slice %38 {offsets = [48, 30], sizes = [320, 10], strides = [1, 1]} : vector<432x128xf32> to vector<320x10xf32>
    %45 = arith.addf %43, %44 : vector<320x10xf32>
    %46 = vector.extract_strided_slice %38 {offsets = [64, 40], sizes = [320, 10], strides = [1, 1]} : vector<432x128xf32> to vector<320x10xf32>
    %47 = arith.addf %45, %46 : vector<320x10xf32>
    %48 = vector.extract_strided_slice %38 {offsets = [80, 50], sizes = [320, 10], strides = [1, 1]} : vector<432x128xf32> to vector<320x10xf32>
    %49 = arith.addf %47, %48 : vector<320x10xf32>
    %50 = vector.extract_strided_slice %38 {offsets = [96, 60], sizes = [320, 10], strides = [1, 1]} : vector<432x128xf32> to vector<320x10xf32>
    %51 = arith.addf %49, %50 : vector<320x10xf32>
    %52 = vector.extract_strided_slice %38 {offsets = [112, 70], sizes = [320, 10], strides = [1, 1]} : vector<432x128xf32> to vector<320x10xf32>
    %53 = arith.addf %51, %52 : vector<320x10xf32>
    %c0_10 = arith.constant 0 : index
    %c0_11 = arith.constant 0 : index
    %54 = vector.load %arg5[%c0_10, %c0_11] : memref<1x10xf32, #tpu.memory_space<vmem>>, vector<1x10xf32>
    %55 = vector.broadcast %54 : vector<1x10xf32> to vector<320x10xf32>
    %56 = arith.addf %53, %55 : vector<320x10xf32>
    %cst_12 = arith.constant 0.000000e+00 : f32
    %57 = vector.broadcast %cst_12 : f32 to vector<320x10xf32>
    %58 = arith.maximumf %56, %57 : vector<320x10xf32>
    %59 = vector.shape_cast %58 : vector<320x10xf32> to vector<10x2x16x10xf32>
    %60 = vector.extract_strided_slice %59 {offsets = [0, 0, 0, 0], sizes = [10, 1, 16, 10], strides = [1, 1, 1, 1]} : vector<10x2x16x10xf32> to vector<10x1x16x10xf32>
    %61 = vector.shape_cast %60 : vector<10x1x16x10xf32> to vector<10x16x10xf32>
    %62 = vector.extract_strided_slice %59 {offsets = [0, 1, 0, 0], sizes = [10, 1, 16, 10], strides = [1, 1, 1, 1]} : vector<10x2x16x10xf32> to vector<10x1x16x10xf32>
    %63 = vector.shape_cast %62 : vector<10x1x16x10xf32> to vector<10x16x10xf32>
    %64 = arith.maximumf %61, %63 : vector<10x16x10xf32>
    %65 = vector.shape_cast %64 : vector<10x16x10xf32> to vector<160x10xf32>
    %c0_13 = arith.constant 0 : index
    %c0_14 = arith.constant 0 : index
    %66 = vector.load %arg6[%c0_13, %c0_14] : memref<10x128xf32, #tpu.memory_space<vmem>>, vector<10x128xf32>
    %cst_15 = arith.constant dense<0.000000e+00> : vector<160x128xf32>
    %67 = tpu.matmul %65, %66, %cst_15 {dimension_numbers = #tpu.dot_dimension_numbers<[1], [0], [0], [1], [0, 0, 1, 1], [], []>} : vector<160x10xf32>, vector<10x128xf32>, vector<160x128xf32> -> vector<160x128xf32>
    %68 = vector.extract_strided_slice %67 {offsets = [0, 0], sizes = [96, 10], strides = [1, 1]} : vector<160x128xf32> to vector<96x10xf32>
    %69 = vector.extract_strided_slice %67 {offsets = [16, 10], sizes = [96, 10], strides = [1, 1]} : vector<160x128xf32> to vector<96x10xf32>
    %70 = arith.addf %68, %69 : vector<96x10xf32>
    %71 = vector.extract_strided_slice %67 {offsets = [32, 20], sizes = [96, 10], strides = [1, 1]} : vector<160x128xf32> to vector<96x10xf32>
    %72 = arith.addf %70, %71 : vector<96x10xf32>
    %73 = vector.extract_strided_slice %67 {offsets = [48, 30], sizes = [96, 10], strides = [1, 1]} : vector<160x128xf32> to vector<96x10xf32>
    %74 = arith.addf %72, %73 : vector<96x10xf32>
    %75 = vector.extract_strided_slice %67 {offsets = [64, 40], sizes = [96, 10], strides = [1, 1]} : vector<160x128xf32> to vector<96x10xf32>
    %76 = arith.addf %74, %75 : vector<96x10xf32>
    %c0_16 = arith.constant 0 : index
    %c0_17 = arith.constant 0 : index
    %77 = vector.load %arg7[%c0_16, %c0_17] : memref<1x10xf32, #tpu.memory_space<vmem>>, vector<1x10xf32>
    %78 = vector.broadcast %77 : vector<1x10xf32> to vector<96x10xf32>
    %79 = arith.addf %76, %78 : vector<96x10xf32>
    %cst_18 = arith.constant 0.000000e+00 : f32
    %80 = vector.broadcast %cst_18 : f32 to vector<96x10xf32>
    %81 = arith.maximumf %79, %80 : vector<96x10xf32>
    %82 = vector.shape_cast %81 : vector<96x10xf32> to vector<3x2x16x10xf32>
    %83 = vector.extract_strided_slice %82 {offsets = [0, 0, 0, 0], sizes = [3, 1, 16, 10], strides = [1, 1, 1, 1]} : vector<3x2x16x10xf32> to vector<3x1x16x10xf32>
    %84 = vector.shape_cast %83 : vector<3x1x16x10xf32> to vector<3x16x10xf32>
    %85 = vector.extract_strided_slice %82 {offsets = [0, 1, 0, 0], sizes = [3, 1, 16, 10], strides = [1, 1, 1, 1]} : vector<3x2x16x10xf32> to vector<3x1x16x10xf32>
    %86 = vector.shape_cast %85 : vector<3x1x16x10xf32> to vector<3x16x10xf32>
    %87 = arith.maximumf %84, %86 : vector<3x16x10xf32>
    %88 = vector.shape_cast %87 : vector<3x16x10xf32> to vector<48x10xf32>
    %c0_19 = arith.constant 0 : index
    %c0_20 = arith.constant 0 : index
    %89 = vector.load %arg8[%c0_19, %c0_20] : memref<10x512xf32, #tpu.memory_space<vmem>>, vector<10x512xf32>
    %cst_21 = arith.constant dense<0.000000e+00> : vector<48x512xf32>
    %90 = tpu.matmul %88, %89, %cst_21 {dimension_numbers = #tpu.dot_dimension_numbers<[1], [0], [0], [1], [0, 0, 1, 1], [], []>} : vector<48x10xf32>, vector<10x512xf32>, vector<48x512xf32> -> vector<48x512xf32>
    %c0_22 = arith.constant 0 : index
    %c0_23 = arith.constant 0 : index
    %91 = vector.load %arg9[%c0_22, %c0_23] : memref<128x512xf32, #tpu.memory_space<vmem>>, vector<128x512xf32>
    %c0_24 = arith.constant 0 : index
    %c0_25 = arith.constant 0 : index
    %92 = vector.load %arg10[%c0_24, %c0_25] : memref<1x512xf32, #tpu.memory_space<vmem>>, vector<1x512xf32>
    %cst_26 = arith.constant 0.000000e+00 : f32
    %93 = vector.broadcast %cst_26 : f32 to vector<16x128xf32>
    %cst_27 = arith.constant 0.000000e+00 : f32
    %94 = vector.broadcast %cst_27 : f32 to vector<16x128xf32>
    %95 = vector.extract_strided_slice %90 {offsets = [0, 0], sizes = [16, 512], strides = [1, 1]} : vector<48x512xf32> to vector<16x512xf32>
    %cst_28 = arith.constant dense<0.000000e+00> : vector<16x512xf32>
    %96 = tpu.matmul %93, %91, %cst_28 {dimension_numbers = #tpu.dot_dimension_numbers<[1], [0], [0], [1], [0, 0, 1, 1], [], []>} : vector<16x128xf32>, vector<128x512xf32>, vector<16x512xf32> -> vector<16x512xf32>
    %97 = arith.addf %95, %96 : vector<16x512xf32>
    %98 = vector.broadcast %92 : vector<1x512xf32> to vector<16x512xf32>
    %99 = arith.addf %97, %98 : vector<16x512xf32>
    %100 = vector.extract_strided_slice %99 {offsets = [0, 0], sizes = [16, 128], strides = [1, 1]} : vector<16x512xf32> to vector<16x128xf32>
    %101 = arith.negf %100 : vector<16x128xf32>
    %102 = math.exp %101 : vector<16x128xf32>
    %cst_29 = arith.constant 1.000000e+00 : f32
    %103 = vector.broadcast %cst_29 : f32 to vector<16x128xf32>
    %104 = arith.addf %103, %102 : vector<16x128xf32>
    %105 = arith.divf %103, %104 : vector<16x128xf32>
    %106 = vector.extract_strided_slice %99 {offsets = [0, 128], sizes = [16, 128], strides = [1, 1]} : vector<16x512xf32> to vector<16x128xf32>
    %107 = arith.negf %106 : vector<16x128xf32>
    %108 = math.exp %107 : vector<16x128xf32>
    %cst_30 = arith.constant 1.000000e+00 : f32
    %109 = vector.broadcast %cst_30 : f32 to vector<16x128xf32>
    %110 = arith.addf %109, %108 : vector<16x128xf32>
    %111 = arith.divf %109, %110 : vector<16x128xf32>
    %112 = vector.extract_strided_slice %99 {offsets = [0, 256], sizes = [16, 128], strides = [1, 1]} : vector<16x512xf32> to vector<16x128xf32>
    %113 = math.tanh %112 : vector<16x128xf32>
    %114 = vector.extract_strided_slice %99 {offsets = [0, 384], sizes = [16, 128], strides = [1, 1]} : vector<16x512xf32> to vector<16x128xf32>
    %115 = arith.negf %114 : vector<16x128xf32>
    %116 = math.exp %115 : vector<16x128xf32>
    %cst_31 = arith.constant 1.000000e+00 : f32
    %117 = vector.broadcast %cst_31 : f32 to vector<16x128xf32>
    %118 = arith.addf %117, %116 : vector<16x128xf32>
    %119 = arith.divf %117, %118 : vector<16x128xf32>
    %120 = arith.mulf %111, %94 : vector<16x128xf32>
    %121 = arith.mulf %105, %113 : vector<16x128xf32>
    %122 = arith.addf %120, %121 : vector<16x128xf32>
    %123 = math.tanh %122 : vector<16x128xf32>
    %124 = arith.mulf %119, %123 : vector<16x128xf32>
    %125 = vector.extract_strided_slice %90 {offsets = [16, 0], sizes = [16, 512], strides = [1, 1]} : vector<48x512xf32> to vector<16x512xf32>
    %cst_32 = arith.constant dense<0.000000e+00> : vector<16x512xf32>
    %126 = tpu.matmul %124, %91, %cst_32 {dimension_numbers = #tpu.dot_dimension_numbers<[1], [0], [0], [1], [0, 0, 1, 1], [], []>} : vector<16x128xf32>, vector<128x512xf32>, vector<16x512xf32> -> vector<16x512xf32>
    %127 = arith.addf %125, %126 : vector<16x512xf32>
    %128 = vector.broadcast %92 : vector<1x512xf32> to vector<16x512xf32>
    %129 = arith.addf %127, %128 : vector<16x512xf32>
    %130 = vector.extract_strided_slice %129 {offsets = [0, 0], sizes = [16, 128], strides = [1, 1]} : vector<16x512xf32> to vector<16x128xf32>
    %131 = arith.negf %130 : vector<16x128xf32>
    %132 = math.exp %131 : vector<16x128xf32>
    %cst_33 = arith.constant 1.000000e+00 : f32
    %133 = vector.broadcast %cst_33 : f32 to vector<16x128xf32>
    %134 = arith.addf %133, %132 : vector<16x128xf32>
    %135 = arith.divf %133, %134 : vector<16x128xf32>
    %136 = vector.extract_strided_slice %129 {offsets = [0, 128], sizes = [16, 128], strides = [1, 1]} : vector<16x512xf32> to vector<16x128xf32>
    %137 = arith.negf %136 : vector<16x128xf32>
    %138 = math.exp %137 : vector<16x128xf32>
    %cst_34 = arith.constant 1.000000e+00 : f32
    %139 = vector.broadcast %cst_34 : f32 to vector<16x128xf32>
    %140 = arith.addf %139, %138 : vector<16x128xf32>
    %141 = arith.divf %139, %140 : vector<16x128xf32>
    %142 = vector.extract_strided_slice %129 {offsets = [0, 256], sizes = [16, 128], strides = [1, 1]} : vector<16x512xf32> to vector<16x128xf32>
    %143 = math.tanh %142 : vector<16x128xf32>
    %144 = vector.extract_strided_slice %129 {offsets = [0, 384], sizes = [16, 128], strides = [1, 1]} : vector<16x512xf32> to vector<16x128xf32>
    %145 = arith.negf %144 : vector<16x128xf32>
    %146 = math.exp %145 : vector<16x128xf32>
    %cst_35 = arith.constant 1.000000e+00 : f32
    %147 = vector.broadcast %cst_35 : f32 to vector<16x128xf32>
    %148 = arith.addf %147, %146 : vector<16x128xf32>
    %149 = arith.divf %147, %148 : vector<16x128xf32>
    %150 = arith.mulf %141, %122 : vector<16x128xf32>
    %151 = arith.mulf %135, %143 : vector<16x128xf32>
    %152 = arith.addf %150, %151 : vector<16x128xf32>
    %153 = math.tanh %152 : vector<16x128xf32>
    %154 = arith.mulf %149, %153 : vector<16x128xf32>
    %155 = vector.extract_strided_slice %90 {offsets = [32, 0], sizes = [16, 512], strides = [1, 1]} : vector<48x512xf32> to vector<16x512xf32>
    %cst_36 = arith.constant dense<0.000000e+00> : vector<16x512xf32>
    %156 = tpu.matmul %154, %91, %cst_36 {dimension_numbers = #tpu.dot_dimension_numbers<[1], [0], [0], [1], [0, 0, 1, 1], [], []>} : vector<16x128xf32>, vector<128x512xf32>, vector<16x512xf32> -> vector<16x512xf32>
    %157 = arith.addf %155, %156 : vector<16x512xf32>
    %158 = vector.broadcast %92 : vector<1x512xf32> to vector<16x512xf32>
    %159 = arith.addf %157, %158 : vector<16x512xf32>
    %160 = vector.extract_strided_slice %159 {offsets = [0, 0], sizes = [16, 128], strides = [1, 1]} : vector<16x512xf32> to vector<16x128xf32>
    %161 = arith.negf %160 : vector<16x128xf32>
    %162 = math.exp %161 : vector<16x128xf32>
    %cst_37 = arith.constant 1.000000e+00 : f32
    %163 = vector.broadcast %cst_37 : f32 to vector<16x128xf32>
    %164 = arith.addf %163, %162 : vector<16x128xf32>
    %165 = arith.divf %163, %164 : vector<16x128xf32>
    %166 = vector.extract_strided_slice %159 {offsets = [0, 128], sizes = [16, 128], strides = [1, 1]} : vector<16x512xf32> to vector<16x128xf32>
    %167 = arith.negf %166 : vector<16x128xf32>
    %168 = math.exp %167 : vector<16x128xf32>
    %cst_38 = arith.constant 1.000000e+00 : f32
    %169 = vector.broadcast %cst_38 : f32 to vector<16x128xf32>
    %170 = arith.addf %169, %168 : vector<16x128xf32>
    %171 = arith.divf %169, %170 : vector<16x128xf32>
    %172 = vector.extract_strided_slice %159 {offsets = [0, 256], sizes = [16, 128], strides = [1, 1]} : vector<16x512xf32> to vector<16x128xf32>
    %173 = math.tanh %172 : vector<16x128xf32>
    %174 = vector.extract_strided_slice %159 {offsets = [0, 384], sizes = [16, 128], strides = [1, 1]} : vector<16x512xf32> to vector<16x128xf32>
    %175 = arith.negf %174 : vector<16x128xf32>
    %176 = math.exp %175 : vector<16x128xf32>
    %cst_39 = arith.constant 1.000000e+00 : f32
    %177 = vector.broadcast %cst_39 : f32 to vector<16x128xf32>
    %178 = arith.addf %177, %176 : vector<16x128xf32>
    %179 = arith.divf %177, %178 : vector<16x128xf32>
    %180 = arith.mulf %171, %152 : vector<16x128xf32>
    %181 = arith.mulf %165, %173 : vector<16x128xf32>
    %182 = arith.addf %180, %181 : vector<16x128xf32>
    %183 = math.tanh %182 : vector<16x128xf32>
    %184 = arith.mulf %179, %183 : vector<16x128xf32>
    %c0_40 = arith.constant 0 : index
    %c0_41 = arith.constant 0 : index
    %185 = vector.load %arg11[%c0_40, %c0_41] : memref<1x128xf32, #tpu.memory_space<vmem>>, vector<1x128xf32>
    %cst_42 = arith.constant dense<0.000000e+00> : vector<1x16xf32>
    %186 = tpu.matmul %185, %184, %cst_42 {dimension_numbers = #tpu.dot_dimension_numbers<[1], [1], [0], [0], [0, 0, 1, 0], [], []>} : vector<1x128xf32>, vector<16x128xf32>, vector<1x16xf32> -> vector<1x16xf32>
    %c0_43 = arith.constant 0 : index
    %c0_44 = arith.constant 0 : index
    %187 = vector.load %arg12[%c0_43, %c0_44] : memref<1x128xf32, #tpu.memory_space<vmem>>, vector<1x128xf32>
    %cst_45 = arith.constant dense<0.000000e+00> : vector<1x16xf32>
    %188 = tpu.matmul %187, %184, %cst_45 {dimension_numbers = #tpu.dot_dimension_numbers<[1], [1], [0], [0], [0, 0, 1, 0], [], []>} : vector<1x128xf32>, vector<16x128xf32>, vector<1x16xf32> -> vector<1x16xf32>
    %189 = vector.extract_strided_slice %186 {offsets = [0, 0], sizes = [1, 8], strides = [1, 1]} : vector<1x16xf32> to vector<1x8xf32>
    %190 = vector.extract_strided_slice %188 {offsets = [0, 8], sizes = [1, 8], strides = [1, 1]} : vector<1x16xf32> to vector<1x8xf32>
    %191 = arith.addf %189, %190 : vector<1x8xf32>
    %c0_46 = arith.constant 0 : index
    %c0_47 = arith.constant 0 : index
    %192 = vector.load %arg13[%c0_46, %c0_47] : memref<1x1xf32, #tpu.memory_space<vmem>>, vector<1x1xf32>
    %193 = vector.broadcast %192 : vector<1x1xf32> to vector<1x8xf32>
    %194 = arith.addf %191, %193 : vector<1x8xf32>
    %195 = arith.negf %194 : vector<1x8xf32>
    %196 = math.exp %195 : vector<1x8xf32>
    %cst_48 = arith.constant 1.000000e+00 : f32
    %197 = vector.broadcast %cst_48 : f32 to vector<1x8xf32>
    %198 = arith.addf %197, %196 : vector<1x8xf32>
    %199 = arith.divf %197, %198 : vector<1x8xf32>
    %c0_49 = arith.constant 0 : index
    %c0_50 = arith.constant 0 : index
    %c0_51 = arith.constant 0 : index
    %200 = vector.load %arg14[%c0_49, %c0_50, %c0_51] : memref<1x1x8xf32, #tpu.memory_space<vmem>>, vector<1x1x8xf32>
    %201 = vector.shape_cast %200 : vector<1x1x8xf32> to vector<1x8xf32>
    %202 = vector.shape_cast %199 : vector<1x8xf32> to vector<1x1x8xf32>
    tpu.vector_store %arg14[%c0_49, %c0_50, %c0_51], %202 {strides = array<i32>} : memref<1x1x8xf32, #tpu.memory_space<vmem>>, vector<1x1x8xf32>,
    return
  }
  func.func @transform_0(%arg0: i32) -> (i32, i32, i32) {
    %c0_i32 = arith.constant 0 : i32
    %c0_i32_0 = arith.constant 0 : i32
    %c0_i32_1 = arith.constant 0 : i32
    return %arg0, %c0_i32, %c0_i32_0 : i32, i32, i32
  }
  func.func @transform_1(%arg0: i32) -> (i32, i32) {
    %c0_i32 = arith.constant 0 : i32
    %c0_i32_0 = arith.constant 0 : i32
    %c0_i32_1 = arith.constant 0 : i32
    return %c0_i32, %c0_i32_0 : i32, i32
  }
  func.func @transform_2(%arg0: i32) -> (i32, i32) {
    %c0_i32 = arith.constant 0 : i32
    %c0_i32_0 = arith.constant 0 : i32
    %c0_i32_1 = arith.constant 0 : i32
    return %c0_i32, %c0_i32_0 : i32, i32
  }
  func.func @transform_3(%arg0: i32) -> (i32, i32) {
    %c0_i32 = arith.constant 0 : i32
    %c0_i32_0 = arith.constant 0 : i32
    %c0_i32_1 = arith.constant 0 : i32
    return %c0_i32, %c0_i32_0 : i32, i32
  }
  func.func @transform_4(%arg0: i32) -> (i32, i32) {
    %c0_i32 = arith.constant 0 : i32
    %c0_i32_0 = arith.constant 0 : i32
    %c0_i32_1 = arith.constant 0 : i32
    return %c0_i32, %c0_i32_0 : i32, i32
  }
  func.func @transform_5(%arg0: i32) -> (i32, i32) {
    %c0_i32 = arith.constant 0 : i32
    %c0_i32_0 = arith.constant 0 : i32
    %c0_i32_1 = arith.constant 0 : i32
    return %c0_i32, %c0_i32_0 : i32, i32
  }
  func.func @transform_6(%arg0: i32) -> (i32, i32) {
    %c0_i32 = arith.constant 0 : i32
    %c0_i32_0 = arith.constant 0 : i32
    %c0_i32_1 = arith.constant 0 : i32
    return %c0_i32, %c0_i32_0 : i32, i32
  }
  func.func @transform_7(%arg0: i32) -> (i32, i32) {
    %c0_i32 = arith.constant 0 : i32
    %c0_i32_0 = arith.constant 0 : i32
    %c0_i32_1 = arith.constant 0 : i32
    return %c0_i32, %c0_i32_0 : i32, i32
  }
  func.func @transform_8(%arg0: i32) -> (i32, i32) {
    %c0_i32 = arith.constant 0 : i32
    %c0_i32_0 = arith.constant 0 : i32
    %c0_i32_1 = arith.constant 0 : i32
    return %c0_i32, %c0_i32_0 : i32, i32
  }
  func.func @transform_9(%arg0: i32) -> (i32, i32) {
    %c0_i32 = arith.constant 0 : i32
    %c0_i32_0 = arith.constant 0 : i32
    %c0_i32_1 = arith.constant 0 : i32
    return %c0_i32, %c0_i32_0 : i32, i32
  }
  func.func @transform_10(%arg0: i32) -> (i32, i32) {
    %c0_i32 = arith.constant 0 : i32
    %c0_i32_0 = arith.constant 0 : i32
    %c0_i32_1 = arith.constant 0 : i32
    return %c0_i32, %c0_i32_0 : i32, i32
  }
  func.func @transform_11(%arg0: i32) -> (i32, i32) {
    %c0_i32 = arith.constant 0 : i32
    %c0_i32_0 = arith.constant 0 : i32
    %c0_i32_1 = arith.constant 0 : i32
    return %c0_i32, %c0_i32_0 : i32, i32
  }
  func.func @transform_12(%arg0: i32) -> (i32, i32) {
    %c0_i32 = arith.constant 0 : i32
    %c0_i32_0 = arith.constant 0 : i32
    %c0_i32_1 = arith.constant 0 : i32
    return %c0_i32, %c0_i32_0 : i32, i32
  }
  func.func @transform_13(%arg0: i32) -> (i32, i32, i32) {
    %c0_i32 = arith.constant 0 : i32
    %c0_i32_0 = arith.constant 0 : i32
    %c0_i32_1 = arith.constant 0 : i32
    return %arg0, %c0_i32, %c0_i32_0 : i32, i32, i32
  }
}

</mosaic_0001>

<bundles_post_ra>
// kernel: dnn_forward.1
= control target key start
LH: loop header
LB: loop body
LE: loop exit
PB: predicated region body
PF: predicated region fallthrough
CT: control target
= control target key end

     0   :  { %vm306_vm0 = vcmask 261120   ;;  %s10580_s29 = smov 118   ;;  %s10581_s15 = smov 108   ;;  %vm5848_vm1 = vcmask 1041408   ;;  %vm10589_vm2 = vmmov 1   ;;  %vm5685_vm4 = vcmask 80896   ;;  %s17983_s1 = inlined_call_operand.vmem [shape: f32[32,128], index: 1, kind: input, shape index: {}]   ;;  %s17984_s0 = inlined_call_operand.vmem [shape: bf16[1,1024,32], index: 0, kind: input, shape index: {}]   ;;  %s17985_s3 = inlined_call_operand.vmem [shape: f32[10,128], index: 3, kind: input, shape index: {}]   ;;  %s17986_s2 = inlined_call_operand.vmem [shape: f32[1,10], index: 2, kind: input, shape index: {}]   ;;  %s17987_s5 = inlined_call_operand.vmem [shape: f32[10,128], index: 5, kind: input, shape index: {}]   ;;  %s17988_s4 = inlined_call_operand.vmem [shape: f32[1,10], index: 4, kind: input, shape index: {}]   ;;  %s17989_s7 = inlined_call_operand.vmem [shape: f32[10,512], index: 7, kind: input, shape index: {}]   ;;  %s17990_s6 = inlined_call_operand.vmem [shape: f32[1,10], index: 6, kind: input, shape index: {}]   ;;  %s17991_s8 = inlined_call_operand.vmem [shape: f32[128,512], index: 8, kind: input, shape index: {}]   ;;  %s17992_s9 = inlined_call_operand.vmem [shape: f32[1,512], index: 9, kind: input, shape index: {}]   ;;  %s17993_s12 = inlined_call_operand.<no memory space> [shape: f32[1,1], index: 12, kind: input, shape index: {}]   ;;  %s17994_s10 = inlined_call_operand.vmem [shape: f32[1,128], index: 10, kind: input, shape index: {}]   ;;  %s17995_s11 = inlined_call_operand.vmem [shape: f32[1,128], index: 11, kind: input, shape index: {}]   ;;  %s17996_s13 = inlined_call_operand.vmem [shape: f32[1,1,8], index: 13, kind: output, shape index: {}]  }
   0x1   :  { %v302_v0 = vld [vmem:[%s17983_s1] sm:$0xff]  ;;  %v303_v1 = vld [vmem:[%s17983_s1 + $0x8] sm:$0xff]  ;;  %v304_v2 = vld [vmem:[%s17983_s1 + $0x10] sm:$0xff]  ;;  %s10583_s27 = smov 88   ;;  %s10584_s28 = smov 78   ;;  %vm10592_vm5 = vmmov 0  }
   0x2   :  { %v10203_v3 = vpack.c.bf16 %v303_v1, %v302_v0  ;;  %v305_v4 = vld [vmem:[%s17983_s1 + $0x18] sm:$0xff]  ;;  %v9336_v5 = vld [vmem:[%s17984_s0] sm:$0xff]   ;;  %v9591_v8 = vld [vmem:[%s17984_s0 + $0x8] sm:$0xff]   ;;  %s10582_s1 = smov 98   ;;  %s10585_s30 = smov 68   ;;  %vm9087_vm6 = vcmask 57344  }
   0x3   :  { %v10207_v6 = vpack.c.bf16 %v305_v4, %v304_v2  ;;  %v9337_v7 = vunpack.c.l.bf16 %v9336_v5  ;;  %v9338_v9 = vunpack.c.h.bf16 %v9336_v5  ;;  %v9341_v10 = vunpack.c.l.bf16 %v9591_v8  ;;  %v9592_v11 = vld [vmem:[%s17984_s0 + $0x10] sm:$0xff]   ;;  %v9593_v14 = vld [vmem:[%s17984_s0 + $0x18] sm:$0xff]   ;;  %v9594_v17 = vld [vmem:[%s17984_s0 + $0x20] sm:$0xff]   ;;  %s10586_s14 = smov 58   ;;  %s10587_s22 = smov 48  }
   0x4   :  { %10204 = vmatprep.subr.bf16.mxu0 %v10203_v3  ;;  %v9342_v12 = vunpack.c.h.bf16 %v9591_v8  ;;  %v9345_v13 = vunpack.c.l.bf16 %v9592_v11  ;;  %v9346_v15 = vunpack.c.h.bf16 %v9592_v11  ;;  %v9349_v16 = vunpack.c.l.bf16 %v9593_v14  ;;  %v9595_v20 = vld [vmem:[%s17984_s0 + $0x28] sm:$0xff]   ;;  %v9596_v23 = vld [vmem:[%s17984_s0 + $0x30] sm:$0xff]   ;;  %v9597_v26 = vld [vmem:[%s17984_s0 + $0x38] sm:$0xff]  }
   0x5   :  { %10206 = vmatpush3.bf16.msra.mxu0 %v10203_v3  ;;  %9878 = vmatprep.mubr.msk.f32.mxu0 %vm306_vm0, %v9337_v7  ;;  %v9350_v18 = vunpack.c.h.bf16 %v9593_v14  ;;  %v9353_v19 = vunpack.c.l.bf16 %v9594_v17  ;;  %v9354_v21 = vunpack.c.h.bf16 %v9594_v17  ;;  %v9357_v22 = vunpack.c.l.bf16 %v9595_v20  ;;  %v9598_v29 = vld [vmem:[%s17984_s0 + $0x40] sm:$0xff]   ;;  %v9599_v32 = vld [vmem:[%s17984_s0 + $0x48] sm:$0xff]   ;;  %v9600_v35 = vld [vmem:[%s17984_s0 + $0x50] sm:$0xff]  }
   0x6   :  { %10208 = vmatprep.subr.bf16.mxu0 %v10207_v6  ;;  %v9358_v24 = vunpack.c.h.bf16 %v9595_v20  ;;  %v9361_v25 = vunpack.c.l.bf16 %v9596_v23  ;;  %v9362_v27 = vunpack.c.h.bf16 %v9596_v23  ;;  %v9365_v28 = vunpack.c.l.bf16 %v9597_v26  ;;  %v9601_v38 = vld [vmem:[%s17984_s0 + $0x58] sm:$0xff]   ;;  %v9602_v41 = vld [vmem:[%s17984_s0 + $0x60] sm:$0xff]   ;;  %v9603_v44 = vld [vmem:[%s17984_s0 + $0x68] sm:$0xff]  }
   0x7   :  { %v9366_v30 = vunpack.c.h.bf16 %v9597_v26  ;;  %v9369_v31 = vunpack.c.l.bf16 %v9598_v29  ;;  %v9370_v33 = vunpack.c.h.bf16 %v9598_v29  ;;  %v9373_v34 = vunpack.c.l.bf16 %v9599_v32  ;;  %v9604_v47 = vld [vmem:[%s17984_s0 + $0x70] sm:$0xff]   ;;  %v9605_v50 = vld [vmem:[%s17984_s0 + $0x78] sm:$0xff]   ;;  %v9606_v53 = vld [vmem:[%s17984_s0 + $0x80] sm:$0xff]  }
   0x8   :  { %v9374_v36 = vunpack.c.h.bf16 %v9599_v32  ;;  %v9377_v37 = vunpack.c.l.bf16 %v9600_v35  ;;  %v9378_v39 = vunpack.c.h.bf16 %v9600_v35  ;;  %v9381_v40 = vunpack.c.l.bf16 %v9601_v38  ;;  %v9607_v56 = vld [vmem:[%s17984_s0 + $0x88] sm:$0xff]   ;;  %v9608_v59 = vld [vmem:[%s17984_s0 + $0x90] sm:$0xff]   ;;  %v9609_v62 = vld [vmem:[%s17984_s0 + $0x98] sm:$0xff]  }
   0x9   :  { %10210 = vmatpush3.bf16.msra.mxu0 %v10207_v6  ;;  %v9382_v42 = vunpack.c.h.bf16 %v9601_v38  ;;  %v9385_v43 = vunpack.c.l.bf16 %v9602_v41  ;;  %v9386_v45 = vunpack.c.h.bf16 %v9602_v41  ;;  %v9389_v46 = vunpack.c.l.bf16 %v9603_v44  ;;  %v9610_v1 = vld [vmem:[%s17984_s0 + $0xa0] sm:$0xff]   ;;  %v9611_v4 = vld [vmem:[%s17984_s0 + $0xa8] sm:$0xff]   ;;  %v9612_v7 = vld [vmem:[%s17984_s0 + $0xb0] sm:$0xff]  }
   0xa   :  { %v9390_v48 = vunpack.c.h.bf16 %v9603_v44  ;;  %v9393_v49 = vunpack.c.l.bf16 %v9604_v47  ;;  %v9394_v51 = vunpack.c.h.bf16 %v9604_v47  ;;  %v9397_v52 = vunpack.c.l.bf16 %v9605_v50  ;;  %v9620_v32 = vld [vmem:[%s17984_s0 + $0xf0] sm:$0xff]   ;;  %v9621_v35 = vld [vmem:[%s17984_s0 + $0xf8] sm:$0xff]   ;;  %v9622_v38 = vld [vmem:[%s17984_s0 + $0x100] sm:$0xff]  }
   0xb   :  { %v9398_v54 = vunpack.c.h.bf16 %v9605_v50  ;;  %v9401_v55 = vunpack.c.l.bf16 %v9606_v53  ;;  %v9402_v57 = vunpack.c.h.bf16 %v9606_v53  ;;  %v9405_v58 = vunpack.c.l.bf16 %v9607_v56  ;;  %v9623_v41 = vld [vmem:[%s17984_s0 + $0x108] sm:$0xff]   ;;  %v9624_v44 = vld [vmem:[%s17984_s0 + $0x110] sm:$0xff]   ;;  %v9625_v47 = vld [vmem:[%s17984_s0 + $0x118] sm:$0xff]  }
   0xc   :  { %9879 = vmatmul.mubr.msk.f32.vlgmr.msra.gmra.mrb[0].mxu0 %vm306_vm0, %v9338_v9  ;;  %v9406_v60 = vunpack.c.h.bf16 %v9607_v56  ;;  %v9409_v61 = vunpack.c.l.bf16 %v9608_v59  ;;  %v9410_v63 = vunpack.c.h.bf16 %v9608_v59  ;;  %v9413_v0 = vunpack.c.l.bf16 %v9609_v62  ;;  %v9626_v50 = vld [vmem:[%s17984_s0 + $0x120] sm:$0xff]   ;;  %v9627_v53 = vld [vmem:[%s17984_s0 + $0x128] sm:$0xff]   ;;  %v9628_v56 = vld [vmem:[%s17984_s0 + $0x130] sm:$0xff]  }
   0xd   :  { %9881 = vmatprep.mubr.msk.f32.mxu0 %vm306_vm0, %v9341_v10  ;;  %v9414_v2 = vunpack.c.h.bf16 %v9609_v62  ;;  %v9417_v3 = vunpack.c.l.bf16 %v9610_v1  ;;  %v9418_v5 = vunpack.c.h.bf16 %v9610_v1  ;;  %v9421_v6 = vunpack.c.l.bf16 %v9611_v4  ;;  %v9613_v10 = vld [vmem:[%s17984_s0 + $0xb8] sm:$0xff]   ;;  %v9630_v62 = vld [vmem:[%s17984_s0 + $0x140] sm:$0xff]   ;;  %v9631_v1 = vld [vmem:[%s17984_s0 + $0x148] sm:$0xff]  }
   0xe   :  { %v9422_v8 = vunpack.c.h.bf16 %v9611_v4  ;;  %v9425_v9 = vunpack.c.l.bf16 %v9612_v7  ;;  %v9426_v11 = vunpack.c.h.bf16 %v9612_v7  ;;  %v9430_v14 = vunpack.c.h.bf16 %v9613_v10  ;;  %v9629_v59 = vld [vmem:[%s17984_s0 + $0x138] sm:$0xff]   ;;  %vm12675_vm3 = vmpackc.low %vm5848_vm1, %vm10589_vm2 }
  0x10   :  { %9882 = vmatmul.mubr.msk.f32.gmra.mrb[2].mxu0 %vm306_vm0, %v9342_v12  ;;  %v9429_v12 = vunpack.c.l.bf16 %v9613_v10 }
  0x11   :  { %9884 = vmatprep.mubr.msk.f32.mxu0 %vm306_vm0, %v9345_v13  ;;  %v9614_v13 = vld [vmem:[%s17984_s0 + $0xc0] sm:$0xff]  }
  0x12   :  { %v9434_v17 = vunpack.c.h.bf16 %v9614_v13 }
  0x14   :  { %9885 = vmatmul.mubr.msk.f32.gmra.mrb[4].mxu0 %vm306_vm0, %v9346_v15  ;;  %v9433_v15 = vunpack.c.l.bf16 %v9614_v13 }
  0x15   :  { %9887 = vmatprep.mubr.msk.f32.mxu0 %vm306_vm0, %v9349_v16  ;;  %v9615_v16 = vld [vmem:[%s17984_s0 + $0xc8] sm:$0xff]  }
  0x16   :  { %v9438_v20 = vunpack.c.h.bf16 %v9615_v16 }
  0x18   :  { %9888 = vmatmul.mubr.msk.f32.gmra.mrb[6].mxu0 %vm306_vm0, %v9350_v18  ;;  %v9437_v18 = vunpack.c.l.bf16 %v9615_v16 }
  0x19   :  { %9890 = vmatprep.mubr.msk.f32.mxu0 %vm306_vm0, %v9353_v19  ;;  %v9616_v19 = vld [vmem:[%s17984_s0 + $0xd0] sm:$0xff]  }
  0x1a   :  { %v9442_v23 = vunpack.c.h.bf16 %v9616_v19 }
  0x1c   :  { %9891 = vmatmul.mubr.msk.f32.gmra.mrb[8].mxu0 %vm306_vm0, %v9354_v21  ;;  %v9441_v21 = vunpack.c.l.bf16 %v9616_v19  ;;  %v9634_v19 = vld [vmem:[%s17984_s0 + $0x160] sm:$0xff]  }
  0x1d   :  { %9893 = vmatprep.mubr.msk.f32.mxu0 %vm306_vm0, %v9357_v22  ;;  %v9617_v22 = vld [vmem:[%s17984_s0 + $0xd8] sm:$0xff]  }
  0x1e   :  { %v9446_v26 = vunpack.c.h.bf16 %v9617_v22 }
  0x20   :  { %9894 = vmatmul.mubr.msk.f32.gmra.mrb[10].mxu0 %vm306_vm0, %v9358_v24  ;;  %v9445_v24 = vunpack.c.l.bf16 %v9617_v22  ;;  %v9514_v22 = vunpack.c.h.bf16 %v9634_v19 }
  0x21   :  { %9896 = vmatprep.mubr.msk.f32.mxu0 %vm306_vm0, %v9361_v25  ;;  %v9618_v25 = vld [vmem:[%s17984_s0 + $0xe0] sm:$0xff]  }
  0x22   :  { %v9450_v29 = vunpack.c.h.bf16 %v9618_v25 }
  0x24   :  { %9897 = vmatmul.mubr.msk.f32.gmra.mrb[12].mxu0 %vm306_vm0, %v9362_v27  ;;  %v9449_v27 = vunpack.c.l.bf16 %v9618_v25 }
  0x25   :  { %9899 = vmatprep.mubr.msk.f32.mxu0 %vm306_vm0, %v9365_v28  ;;  %v9619_v28 = vld [vmem:[%s17984_s0 + $0xe8] sm:$0xff]  }
  0x28   :  { %9900 = vmatmul.mubr.msk.f32.gmra.mrb[14].mxu0 %vm306_vm0, %v9366_v30  ;;  %v9453_v30 = vunpack.c.l.bf16 %v9619_v28 }
  0x29   :  { %9902 = vmatprep.mubr.msk.f32.mxu0 %vm306_vm0, %v9369_v31  ;;  %v9454_v31 = vunpack.c.h.bf16 %v9619_v28 }
  0x2c   :  { %9903 = vmatmul.mubr.msk.f32.gmra.mrb[16].mxu0 %vm306_vm0, %v9370_v33  ;;  %v9457_v33 = vunpack.c.l.bf16 %v9620_v32 }
  0x2d   :  { %9905 = vmatprep.mubr.msk.f32.mxu0 %vm306_vm0, %v9373_v34  ;;  %v9458_v34 = vunpack.c.h.bf16 %v9620_v32 }
  0x30   :  { %9906 = vmatmul.mubr.msk.f32.gmra.mrb[18].mxu0 %vm306_vm0, %v9374_v36  ;;  %v9461_v36 = vunpack.c.l.bf16 %v9621_v35 }
  0x31   :  { %9908 = vmatprep.mubr.msk.f32.mxu0 %vm306_vm0, %v9377_v37  ;;  %v9462_v37 = vunpack.c.h.bf16 %v9621_v35 }
  0x34   :  { %9909 = vmatmul.mubr.msk.f32.gmra.mrb[20].mxu0 %vm306_vm0, %v9378_v39  ;;  %v9465_v39 = vunpack.c.l.bf16 %v9622_v38 }
  0x35   :  { %9911 = vmatprep.mubr.msk.f32.mxu0 %vm306_vm0, %v9381_v40  ;;  %v9466_v40 = vunpack.c.h.bf16 %v9622_v38 }
  0x38   :  { %9912 = vmatmul.mubr.msk.f32.gmra.mrb[22].mxu0 %vm306_vm0, %v9382_v42  ;;  %v9469_v42 = vunpack.c.l.bf16 %v9623_v41 }
  0x39   :  { %9914 = vmatprep.mubr.msk.f32.mxu0 %vm306_vm0, %v9385_v43  ;;  %v9470_v43 = vunpack.c.h.bf16 %v9623_v41 }
  0x3c   :  { %9915 = vmatmul.mubr.msk.f32.gmra.mrb[24].mxu0 %vm306_vm0, %v9386_v45  ;;  %v9473_v45 = vunpack.c.l.bf16 %v9624_v44 }
  0x3d   :  { %9917 = vmatprep.mubr.msk.f32.mxu0 %vm306_vm0, %v9389_v46  ;;  %v9474_v46 = vunpack.c.h.bf16 %v9624_v44 }
  0x40   :  { %9918 = vmatmul.mubr.msk.f32.gmra.mrb[26].mxu0 %vm306_vm0, %v9390_v48  ;;  %v9477_v48 = vunpack.c.l.bf16 %v9625_v47 }
  0x41   :  { %9920 = vmatprep.mubr.msk.f32.mxu0 %vm306_vm0, %v9393_v49  ;;  %v9478_v49 = vunpack.c.h.bf16 %v9625_v47  ;;  %v9638_v47 = vld [vmem:[%s17984_s0 + $0x180] sm:$0xff]  }
  0x44   :  { %9921 = vmatmul.mubr.msk.f32.gmra.mrb[28].mxu0 %vm306_vm0, %v9394_v51  ;;  %v9481_v51 = vunpack.c.l.bf16 %v9626_v50 }
  0x45   :  { %9923 = vmatprep.mubr.msk.f32.mxu0 %vm306_vm0, %v9397_v52  ;;  %v9482_v52 = vunpack.c.h.bf16 %v9626_v50  ;;  %v9530_v50 = vunpack.c.h.bf16 %v9638_v47 }
  0x48   :  { %9924 = vmatmul.mubr.msk.f32.gmra.mrb[30].mxu0 %vm306_vm0, %v9398_v54  ;;  %v9485_v54 = vunpack.c.l.bf16 %v9627_v53 }
  0x49   :  { %9926 = vmatprep.mubr.msk.f32.mxu0 %vm306_vm0, %v9401_v55  ;;  %v9486_v55 = vunpack.c.h.bf16 %v9627_v53 }
  0x4c   :  { %9927 = vmatmul.mubr.msk.f32.gmra.mrb[32].mxu0 %vm306_vm0, %v9402_v57  ;;  %v9489_v57 = vunpack.c.l.bf16 %v9628_v56 }
  0x4d   :  { %9929 = vmatprep.mubr.msk.f32.mxu0 %vm306_vm0, %v9405_v58  ;;  %v9490_v58 = vunpack.c.h.bf16 %v9628_v56 }
  0x50   :  { %9930 = vmatmul.mubr.msk.f32.gmra.mrb[34].mxu0 %vm306_vm0, %v9406_v60  ;;  %v9493_v60 = vunpack.c.l.bf16 %v9629_v59 }
  0x51   :  { %9932 = vmatprep.mubr.msk.f32.mxu0 %vm306_vm0, %v9409_v61  ;;  %v9494_v61 = vunpack.c.h.bf16 %v9629_v59 }
  0x54   :  { %9933 = vmatmul.mubr.msk.f32.gmra.mrb[36].mxu0 %vm306_vm0, %v9410_v63  ;;  %v9497_v63 = vunpack.c.l.bf16 %v9630_v62 }
  0x55   :  { %9935 = vmatprep.mubr.msk.f32.mxu0 %vm306_vm0, %v9413_v0  ;;  %v9498_v0 = vunpack.c.h.bf16 %v9630_v62 }
  0x58   :  { %9936 = vmatmul.mubr.msk.f32.gmra.mrb[38].mxu0 %vm306_vm0, %v9414_v2  ;;  %v9501_v2 = vunpack.c.l.bf16 %v9631_v1 }
  0x59   :  { %9938 = vmatprep.mubr.msk.f32.mxu0 %vm306_vm0, %v9417_v3  ;;  %v9502_v3 = vunpack.c.h.bf16 %v9631_v1 }
  0x5c   :  { %9939 = vmatmul.mubr.msk.f32.gmra.mrb[40].mxu0 %vm306_vm0, %v9418_v5  ;;  %v9632_v5 = vld [vmem:[%s17984_s0 + $0x150] sm:$0xff]  }
  0x5d   :  { %9941 = vmatprep.mubr.msk.f32.mxu0 %vm306_vm0, %v9421_v6  ;;  %v9505_v7 = vunpack.c.l.bf16 %v9632_v5 }
  0x60   :  { %9942 = vmatmul.mubr.msk.f32.gmra.mrb[42].mxu0 %vm306_vm0, %v9422_v8  ;;  %v9506_v8 = vunpack.c.h.bf16 %v9632_v5  ;;  %v9641_v5 = vld [vmem:[%s17984_s0 + $0x198] sm:$0xff]  }
  0x61   :  { %9944 = vmatprep.mubr.msk.f32.mxu0 %vm306_vm0, %v9425_v9 }
  0x64   :  { %9945 = vmatmul.mubr.msk.f32.gmra.mrb[44].mxu0 %vm306_vm0, %v9426_v11 }
  0x65   :  { %9947 = vmatprep.mubr.msk.f32.mxu0 %vm306_vm0, %v9429_v12  ;;  %v9633_v12 = vld [vmem:[%s17984_s0 + $0x158] sm:$0xff]  }
  0x68   :  { %9948 = vmatmul.mubr.msk.f32.gmra.mrb[46].mxu0 %vm306_vm0, %v9430_v14  ;;  %v9509_v14 = vunpack.c.l.bf16 %v9633_v12 }
  0x69   :  { %9950 = vmatprep.mubr.msk.f32.mxu0 %vm306_vm0, %v9433_v15  ;;  %v9510_v15 = vunpack.c.h.bf16 %v9633_v12  ;;  %v9542_v12 = vunpack.c.h.bf16 %v9641_v5 }
  0x6c   :  { %9951 = vmatmul.mubr.msk.f32.gmra.mrb[48].mxu0 %vm306_vm0, %v9434_v17 }
  0x6d   :  { %9953 = vmatprep.mubr.msk.f32.mxu0 %vm306_vm0, %v9437_v18 }
  0x70   :  { %9954 = vmatmul.mubr.msk.f32.gmra.mrb[50].mxu0 %vm306_vm0, %v9438_v20 }
  0x71   :  { %9956 = vmatprep.mubr.msk.f32.mxu0 %vm306_vm0, %v9441_v21  ;;  %v9513_v21 = vunpack.c.l.bf16 %v9634_v19 }
  0x74   :  { %9957 = vmatmul.mubr.msk.f32.gmra.mrb[52].mxu0 %vm306_vm0, %v9442_v23 }
  0x75   :  { %9959 = vmatprep.mubr.msk.f32.mxu0 %vm306_vm0, %v9445_v24 }
  0x78   :  { %9960 = vmatmul.mubr.msk.f32.gmra.mrb[54].mxu0 %vm306_vm0, %v9446_v26  ;;  %v9635_v26 = vld [vmem:[%s17984_s0 + $0x168] sm:$0xff]  }
  0x79   :  { %9962 = vmatprep.mubr.msk.f32.mxu0 %vm306_vm0, %v9449_v27  ;;  %v9517_v28 = vunpack.c.l.bf16 %v9635_v26 }
  0x7c   :  { %9963 = vmatmul.mubr.msk.f32.gmra.mrb[56].mxu0 %vm306_vm0, %v9450_v29  ;;  %v9518_v29 = vunpack.c.h.bf16 %v9635_v26 }
  0x7d   :  { %9965 = vmatprep.mubr.msk.f32.mxu0 %vm306_vm0, %v9453_v30 }
  0x80   :  { %9966 = vmatmul.mubr.msk.f32.gmra.mrb[58].mxu0 %vm306_vm0, %v9454_v31 }
  0x81   :  { %9968 = vmatprep.mubr.msk.f32.mxu0 %vm306_vm0, %v9457_v33  ;;  %v9636_v33 = vld [vmem:[%s17984_s0 + $0x170] sm:$0xff]  }
  0x82   :  { %v9521_v35 = vunpack.c.l.bf16 %v9636_v33 }
  0x84   :  { %9969 = vmatmul.mubr.msk.f32.gmra.mrb[60].mxu0 %vm306_vm0, %v9458_v34 }
  0x85   :  { %9971 = vmatprep.mubr.msk.f32.mxu0 %vm306_vm0, %v9461_v36  ;;  %v9522_v36 = vunpack.c.h.bf16 %v9636_v33 }
  0x88   :  { %9972 = vmatmul.mubr.msk.f32.gmra.mrb[62].mxu0 %vm306_vm0, %v9462_v37 }
  0x89   :  { %9974 = vmatprep.mubr.msk.f32.mxu0 %vm306_vm0, %v9465_v39 }
  0x8c   :  { %9975 = vmatmul.mubr.msk.f32.gmra.mrb[64].mxu0 %vm306_vm0, %v9466_v40  ;;  %v9637_v40 = vld [vmem:[%s17984_s0 + $0x178] sm:$0xff]  }
  0x8d   :  { %9977 = vmatprep.mubr.msk.f32.mxu0 %vm306_vm0, %v9469_v42  ;;  %v9525_v42 = vunpack.c.l.bf16 %v9637_v40 }
  0x90   :  { %9978 = vmatmul.mubr.msk.f32.gmra.mrb[66].mxu0 %vm306_vm0, %v9470_v43  ;;  %v9526_v43 = vunpack.c.h.bf16 %v9637_v40 }
  0x91   :  { %9980 = vmatprep.mubr.msk.f32.mxu0 %vm306_vm0, %v9473_v45 }
  0x94   :  { %9981 = vmatmul.mubr.msk.f32.gmra.mrb[68].mxu0 %vm306_vm0, %v9474_v46 }
  0x95   :  { %9983 = vmatprep.mubr.msk.f32.mxu0 %vm306_vm0, %v9477_v48 }
  0x98   :  { %9984 = vmatmul.mubr.msk.f32.gmra.mrb[70].mxu0 %vm306_vm0, %v9478_v49  ;;  %v9529_v49 = vunpack.c.l.bf16 %v9638_v47 }
  0x99   :  { %9986 = vmatprep.mubr.msk.f32.mxu0 %vm306_vm0, %v9481_v51 }
  0x9c   :  { %9987 = vmatmul.mubr.msk.f32.gmra.mrb[72].mxu0 %vm306_vm0, %v9482_v52 }
  0x9d   :  { %9989 = vmatprep.mubr.msk.f32.mxu0 %vm306_vm0, %v9485_v54  ;;  %v9639_v54 = vld [vmem:[%s17984_s0 + $0x188] sm:$0xff]  }
  0x9e   :  { %v9533_v56 = vunpack.c.l.bf16 %v9639_v54 }
  0xa0   :  { %9990 = vmatmul.mubr.msk.f32.gmra.mrb[74].mxu0 %vm306_vm0, %v9486_v55 }
  0xa1   :  { %9992 = vmatprep.mubr.msk.f32.mxu0 %vm306_vm0, %v9489_v57  ;;  %v9534_v57 = vunpack.c.h.bf16 %v9639_v54  ;;  %v9644_v54 = vld [vmem:[%s17984_s0 + $0x1b0] sm:$0xff]  }
  0xa4   :  { %9993 = vmatmul.mubr.msk.f32.gmra.mrb[76].mxu0 %vm306_vm0, %v9490_v58 }
  0xa5   :  { %9995 = vmatprep.mubr.msk.f32.mxu0 %vm306_vm0, %v9493_v60 }
  0xa8   :  { %9996 = vmatmul.mubr.msk.f32.gmra.mrb[78].mxu0 %vm306_vm0, %v9494_v61  ;;  %v9640_v61 = vld [vmem:[%s17984_s0 + $0x190] sm:$0xff]  }
  0xa9   :  { %9998 = vmatprep.mubr.msk.f32.mxu0 %vm306_vm0, %v9497_v63  ;;  %v9537_v63 = vunpack.c.l.bf16 %v9640_v61 }
  0xac   :  { %9999 = vmatmul.mubr.msk.f32.gmra.mrb[80].mxu0 %vm306_vm0, %v9498_v0  ;;  %v9538_v0 = vunpack.c.h.bf16 %v9640_v61  ;;  %v9554_v61 = vunpack.c.h.bf16 %v9644_v54 }
  0xad   :  { %10001 = vmatprep.mubr.msk.f32.mxu0 %vm306_vm0, %v9501_v2 }
  0xb0   :  { %10002 = vmatmul.mubr.msk.f32.gmra.mrb[82].mxu0 %vm306_vm0, %v9502_v3 }
  0xb1   :  { %10004 = vmatprep.mubr.msk.f32.mxu0 %vm306_vm0, %v9505_v7 }
  0xb4   :  { %10005 = vmatmul.mubr.msk.f32.gmra.mrb[84].mxu0 %vm306_vm0, %v9506_v8  ;;  %v9541_v8 = vunpack.c.l.bf16 %v9641_v5 }
  0xb5   :  { %10007 = vmatprep.mubr.msk.f32.mxu0 %vm306_vm0, %v9509_v14 }
  0xb8   :  { %10008 = vmatmul.mubr.msk.f32.gmra.mrb[86].mxu0 %vm306_vm0, %v9510_v15 }
  0xb9   :  { %10010 = vmatprep.mubr.msk.f32.mxu0 %vm306_vm0, %v9513_v21  ;;  %v9642_v21 = vld [vmem:[%s17984_s0 + $0x1a0] sm:$0xff]  }
  0xba   :  { %v9545_v26 = vunpack.c.l.bf16 %v9642_v21 }
  0xbc   :  { %10011 = vmatmul.mubr.msk.f32.gmra.mrb[88].mxu0 %vm306_vm0, %v9514_v22 }
  0xbd   :  { %10013 = vmatprep.mubr.msk.f32.mxu0 %vm306_vm0, %v9517_v28  ;;  %v9546_v28 = vunpack.c.h.bf16 %v9642_v21 }
  0xc0   :  { %10014 = vmatmul.mubr.msk.f32.gmra.mrb[90].mxu0 %vm306_vm0, %v9518_v29 }
  0xc1   :  { %10016 = vmatprep.mubr.msk.f32.mxu0 %vm306_vm0, %v9521_v35 }
  0xc4   :  { %10017 = vmatmul.mubr.msk.f32.gmra.mrb[92].mxu0 %vm306_vm0, %v9522_v36  ;;  %v9643_v36 = vld [vmem:[%s17984_s0 + $0x1a8] sm:$0xff]  }
  0xc5   :  { %10019 = vmatprep.mubr.msk.f32.mxu0 %vm306_vm0, %v9525_v42  ;;  %v9549_v42 = vunpack.c.l.bf16 %v9643_v36 }
  0xc8   :  { %10020 = vmatmul.mubr.msk.f32.gmra.mrb[94].mxu0 %vm306_vm0, %v9526_v43  ;;  %v9550_v43 = vunpack.c.h.bf16 %v9643_v36 }
  0xc9   :  { %10022 = vmatprep.mubr.msk.f32.mxu0 %vm306_vm0, %v9529_v49 }
  0xcc   :  { %10023 = vmatmul.mubr.msk.f32.gmra.mrb[96].mxu0 %vm306_vm0, %v9530_v50 }
  0xcd   :  { %10025 = vmatprep.mubr.msk.f32.mxu0 %vm306_vm0, %v9533_v56 }
  0xd0   :  { %10026 = vmatmul.mubr.msk.f32.gmra.mrb[98].mxu0 %vm306_vm0, %v9534_v57  ;;  %v9553_v57 = vunpack.c.l.bf16 %v9644_v54 }
  0xd1   :  { %10028 = vmatprep.mubr.msk.f32.mxu0 %vm306_vm0, %v9537_v63 }
  0xd4   :  { %10029 = vmatmul.mubr.msk.f32.gmra.mrb[100].mxu0 %vm306_vm0, %v9538_v0 }
  0xd5   :  { %10031 = vmatprep.mubr.msk.f32.mxu0 %vm306_vm0, %v9541_v8  ;;  %v9645_v8 = vld [vmem:[%s17984_s0 + $0x1b8] sm:$0xff]  }
  0xd6   :  { %v9557_v21 = vunpack.c.l.bf16 %v9645_v8 }
  0xd8   :  { %10032 = vmatmul.mubr.msk.f32.gmra.mrb[102].mxu0 %vm306_vm0, %v9542_v12 }
  0xd9   :  { %10034 = vmatprep.mubr.msk.f32.mxu0 %vm306_vm0, %v9545_v26  ;;  %v9558_v26 = vunpack.c.h.bf16 %v9645_v8 }
  0xdc   :  { %10035 = vmatmul.mubr.msk.f32.gmra.mrb[104].mxu0 %vm306_vm0, %v9546_v28 }
  0xdd   :  { %10037 = vmatprep.mubr.msk.f32.mxu0 %vm306_vm0, %v9549_v42 }
  0xdf   :  { %v10887_v4 = vpop.f32.mrb[0].mxu0 }
  0xe0   :  { %18346 = vst [vmem:[#allocation3_spill] sm:$0xff] %v10887_v4  ;;  %v10892_v6 = vpop.f32.mrb[1].mxu0  ;;  %10038 = vmatmul.mubr.msk.f32.gmra.mrb[106].mxu0 %vm306_vm0, %v9550_v43 }
  0xe1   :  { %18347 = vst [vmem:[#allocation4_spill] sm:$0xff] %v10892_v6  ;;  %10040 = vmatprep.mubr.msk.f32.mxu0 %vm306_vm0, %v9553_v57 }
  0xe3   :  { %v10895_v9 = vpop.f32.mrb[2].mxu0 }
  0xe4   :  { %18348 = vst [vmem:[#allocation5_spill] sm:$0xff] %v10895_v9  ;;  %1504 = vrot.lane.b32.xlu0 %v10895_v9, %s10580_s29  ;;  %v10900_v10 = vpop.f32.mrb[3].mxu0  ;;  %10041 = vmatmul.mubr.msk.f32.gmra.mrb[108].mxu0 %vm306_vm0, %v9554_v61 }
  0xe5   :  { %18349 = vst [vmem:[#allocation6_spill] sm:$0xff] %v10900_v10  ;;  %10043 = vmatprep.mubr.msk.f32.mxu0 %vm306_vm0, %v9557_v21 }
  0xe7   :  { %v10902_v11 = vpop.f32.mrb[4].mxu0 }
  0xe8   :  { %18350 = vst [vmem:[#allocation7_spill] sm:$0xff] %v10902_v11  ;;  %1502 = vrot.lane.b32.xlu0 %v10900_v10, %s10580_s29  ;;  %1508 = vrot.lane.b32.xlu1 %v10902_v11, %s10580_s29  ;;  %v10911_v13 = vpop.f32.mrb[5].mxu0 }
  0xe9   :  { %18351 = vst [vmem:[#allocation8_spill] sm:$0xff] %v10911_v13  ;;  %10044 = vmatmul.mubr.msk.f32.gmra.mrb[110].mxu0 %vm306_vm0, %v9558_v26 }
  0xeb   :  { %v10914_v16 = vpop.f32.mrb[6].mxu0 }
  0xec   :  { %18352 = vst [vmem:[#allocation9_spill] sm:$0xff] %v10914_v16  ;;  %1938 = vrot.lane.b32.xlu1 %v10902_v11, %s10581_s15  ;;  %1936 = vrot.lane.b32.xlu0 %v10911_v13, %s10581_s15  ;;  %v10921_v17 = vpop.f32.mrb[7].mxu0 }
  0xed   :  { %18353 = vst [vmem:[#allocation10_spill] sm:$0xff] %v10921_v17 }
  0xef   :  { %v10923_v18 = vpop.f32.mrb[8].mxu0 }
  0xf0   :  { %18354 = vst [vmem:[#allocation11_spill] sm:$0xff] %v10923_v18  ;;  %1506 = vrot.lane.b32.xlu1 %v10911_v13, %s10580_s29  ;;  %1510 = vrot.lane.b32.xlu0 %v10921_v17, %s10580_s29  ;;  %v10932_v20 = vpop.f32.mrb[9].mxu0 }
  0xf1   :  { %18355 = vst [vmem:[#allocation12_spill] sm:$0xff] %v10932_v20 }
  0xf3   :  { %v10935_v23 = vpop.f32.mrb[10].mxu0 }
  0xf4   :  { %18356 = vst [vmem:[#allocation13_spill] sm:$0xff] %v10935_v23  ;;  %1512 = vrot.lane.b32.xlu1 %v10914_v16, %s10580_s29  ;;  %1940 = vrot.lane.b32.xlu0 %v10921_v17, %s10581_s15  ;;  %v10942_v24 = vpop.f32.mrb[11].mxu0 }
  0xf5   :  { %18357 = vst [vmem:[#allocation14_spill] sm:$0xff] %v10942_v24 }
  0xf7   :  { %v10944_v25 = vpop.f32.mrb[12].mxu0 }
  0xf8   :  { %18358 = vst [vmem:[#allocation15_spill] sm:$0xff] %v10944_v25  ;;  %1942 = vrot.lane.b32.xlu1 %v10914_v16, %s10581_s15  ;;  %2370 = vrot.lane.b32.xlu0 %v10921_v17, %s10582_s1  ;;  %v10953_v27 = vpop.f32.mrb[13].mxu0 }
  0xf9   :  { %18359 = vst [vmem:[#allocation16_spill] sm:$0xff] %v10953_v27 }
  0xfb   :  { %v10956_v30 = vpop.f32.mrb[14].mxu0 }
  0xfc   :  { %18360 = vst [vmem:[#allocation17_spill] sm:$0xff] %v10956_v30  ;;  %2372 = vrot.lane.b32.xlu1 %v10914_v16, %s10582_s1  ;;  %1514 = vrot.lane.b32.xlu0 %v10932_v20, %s10580_s29  ;;  %v10963_v31 = vpop.f32.mrb[15].mxu0 }
  0xfd   :  { %18361 = vst [vmem:[#allocation18_spill] sm:$0xff] %v10963_v31 }
  0xff   :  { %v10965_v32 = vpop.f32.mrb[16].mxu0 }
 0x100   :  { %18362 = vst [vmem:[#allocation19_spill] sm:$0xff] %v10965_v32  ;;  %1516 = vrot.lane.b32.xlu1 %v10923_v18, %s10580_s29  ;;  %1944 = vrot.lane.b32.xlu0 %v10932_v20, %s10581_s15  ;;  %v10974_v34 = vpop.f32.mrb[17].mxu0 }
 0x101   :  { %18363 = vst [vmem:[#allocation20_spill] sm:$0xff] %v10974_v34 }
 0x103   :  { %v10977_v37 = vpop.f32.mrb[18].mxu0 }
 0x104   :  { %18364 = vst [vmem:[#allocation21_spill] sm:$0xff] %v10977_v37  ;;  %1946 = vrot.lane.b32.xlu1 %v10923_v18, %s10581_s15  ;;  %2374 = vrot.lane.b32.xlu0 %v10932_v20, %s10582_s1  ;;  %v10984_v38 = vpop.f32.mrb[19].mxu0 }
 0x105   :  { %18365 = vst [vmem:[#allocation22_spill] sm:$0xff] %v10984_v38 }
 0x107   :  { %v10986_v39 = vpop.f32.mrb[20].mxu0 }
 0x108   :  { %18366 = vst [vmem:[#allocation23_spill] sm:$0xff] %v10986_v39  ;;  %2376 = vrot.lane.b32.xlu1 %v10923_v18, %s10582_s1  ;;  %1518 = vrot.lane.b32.xlu0 %v10942_v24, %s10580_s29  ;;  %v10995_v41 = vpop.f32.mrb[21].mxu0 }
 0x109   :  { %18367 = vst [vmem:[#allocation24_spill] sm:$0xff] %v10995_v41 }
 0x10b   :  { %v10998_v44 = vpop.f32.mrb[22].mxu0 }
 0x10c   :  { %18368 = vst [vmem:[#allocation25_spill] sm:$0xff] %v10998_v44  ;;  %1520 = vrot.lane.b32.xlu1 %v10935_v23, %s10580_s29  ;;  %1948 = vrot.lane.b32.xlu0 %v10942_v24, %s10581_s15  ;;  %v11005_v45 = vpop.f32.mrb[23].mxu0 }
 0x10d   :  { %18369 = vst [vmem:[#allocation26_spill] sm:$0xff] %v11005_v45 }
 0x10f   :  { %v11007_v46 = vpop.f32.mrb[24].mxu0 }
 0x110   :  { %18370 = vst [vmem:[#allocation27_spill] sm:$0xff] %v11007_v46  ;;  %1950 = vrot.lane.b32.xlu1 %v10935_v23, %s10581_s15  ;;  %2378 = vrot.lane.b32.xlu0 %v10942_v24, %s10582_s1  ;;  %v11016_v48 = vpop.f32.mrb[25].mxu0 }
 0x111   :  { %18371 = vst [vmem:[#allocation28_spill] sm:$0xff] %v11016_v48 }
 0x113   :  { %v11019_v51 = vpop.f32.mrb[26].mxu0 }
 0x114   :  { %18372 = vst [vmem:[#allocation29_spill] sm:$0xff] %v11019_v51  ;;  %2380 = vrot.lane.b32.xlu1 %v10935_v23, %s10582_s1  ;;  %1522 = vrot.lane.b32.xlu0 %v10953_v27, %s10580_s29  ;;  %v11026_v52 = vpop.f32.mrb[27].mxu0 }
 0x115   :  { %18373 = vst [vmem:[#allocation30_spill] sm:$0xff] %v11026_v52 }
 0x117   :  { %v11028_v53 = vpop.f32.mrb[28].mxu0 }
 0x118   :  { %18374 = vst [vmem:[#allocation31_spill] sm:$0xff] %v11028_v53  ;;  %1524 = vrot.lane.b32.xlu1 %v10944_v25, %s10580_s29  ;;  %1952 = vrot.lane.b32.xlu0 %v10953_v27, %s10581_s15  ;;  %v11037_v55 = vpop.f32.mrb[29].mxu0 }
 0x119   :  { %18375 = vst [vmem:[#allocation32_spill] sm:$0xff] %v11037_v55 }
 0x11b   :  { %v11040_v58 = vpop.f32.mrb[30].mxu0 }
 0x11c   :  { %18376 = vst [vmem:[#allocation33_spill] sm:$0xff] %v11040_v58  ;;  %1954 = vrot.lane.b32.xlu1 %v10944_v25, %s10581_s15  ;;  %2382 = vrot.lane.b32.xlu0 %v10953_v27, %s10582_s1  ;;  %v11047_v59 = vpop.f32.mrb[31].mxu0 }
 0x11d   :  { %18377 = vst [vmem:[#allocation34_spill] sm:$0xff] %v11047_v59 }
 0x11f   :  { %v11049_v60 = vpop.f32.mrb[32].mxu0 }
 0x120   :  { %18378 = vst [vmem:[#allocation35_spill] sm:$0xff] %v11049_v60  ;;  %2384 = vrot.lane.b32.xlu1 %v10944_v25, %s10582_s1  ;;  %1526 = vrot.lane.b32.xlu0 %v10963_v31, %s10580_s29  ;;  %v11058_v62 = vpop.f32.mrb[33].mxu0 }
 0x121   :  { %18379 = vst [vmem:[#allocation36_spill] sm:$0xff] %v11058_v62 }
 0x123   :  { %v11061_v1 = vpop.f32.mrb[34].mxu0 }
 0x124   :  { %18380 = vst [vmem:[#allocation37_spill] sm:$0xff] %v11061_v1  ;;  %1528 = vrot.lane.b32.xlu1 %v10956_v30, %s10580_s29  ;;  %1956 = vrot.lane.b32.xlu0 %v10963_v31, %s10581_s15  ;;  %v11068_v2 = vpop.f32.mrb[35].mxu0 }
 0x125   :  { %18381 = vst [vmem:[#allocation38_spill] sm:$0xff] %v11068_v2 }
 0x127   :  { %v11070_v3 = vpop.f32.mrb[36].mxu0 }
 0x128   :  { %18382 = vst [vmem:[#allocation39_spill] sm:$0xff] %v11070_v3  ;;  %1958 = vrot.lane.b32.xlu1 %v10956_v30, %s10581_s15  ;;  %1530 = vrot.lane.b32.xlu0 %v10974_v34, %s10580_s29  ;;  %v11079_v7 = vpop.f32.mrb[37].mxu0 }
 0x129   :  { %18383 = vst [vmem:[#allocation40_spill] sm:$0xff] %v11079_v7 }
 0x12b   :  { %v11082_v14 = vpop.f32.mrb[38].mxu0 }
 0x12c   :  { %18384 = vst [vmem:[#allocation41_spill] sm:$0xff] %v11082_v14  ;;  %1532 = vrot.lane.b32.xlu1 %v10965_v32, %s10580_s29  ;;  %1960 = vrot.lane.b32.xlu0 %v10974_v34, %s10581_s15  ;;  %v11089_v15 = vpop.f32.mrb[39].mxu0 }
 0x12d   :  { %18385 = vst [vmem:[#allocation42_spill] sm:$0xff] %v11089_v15 }
 0x12f   :  { %v11091_v19 = vpop.f32.mrb[40].mxu0 }
 0x130   :  { %18386 = vst [vmem:[#allocation43_spill] sm:$0xff] %v11091_v19  ;;  %1962 = vrot.lane.b32.xlu1 %v10965_v32, %s10581_s15  ;;  %1534 = vrot.lane.b32.xlu0 %v10984_v38, %s10580_s29  ;;  %v11100_v22 = vpop.f32.mrb[41].mxu0 }
 0x131   :  { %18387 = vst [vmem:[#allocation44_spill] sm:$0xff] %v11100_v22 }
 0x133   :  { %v11103_v29 = vpop.f32.mrb[42].mxu0 }
 0x134   :  { %18388 = vst [vmem:[#allocation45_spill] sm:$0xff] %v11103_v29  ;;  %1536 = vrot.lane.b32.xlu1 %v10977_v37, %s10580_s29  ;;  %1964 = vrot.lane.b32.xlu0 %v10984_v38, %s10581_s15  ;;  %v11110_v33 = vpop.f32.mrb[43].mxu0 }
 0x135   :  { %18389 = vst [vmem:[#allocation46_spill] sm:$0xff] %v11110_v33 }
 0x137   :  { %v11112_v35 = vpop.f32.mrb[44].mxu0 }
 0x138   :  { %18390 = vst [vmem:[#allocation47_spill] sm:$0xff] %v11112_v35  ;;  %1966 = vrot.lane.b32.xlu1 %v10977_v37, %s10581_s15  ;;  %1538 = vrot.lane.b32.xlu0 %v10995_v41, %s10580_s29  ;;  %v11121_v40 = vpop.f32.mrb[45].mxu0 }
 0x139   :  { %18391 = vst [vmem:[#allocation48_spill] sm:$0xff] %v11121_v40 }
 0x13b   :  { %v11124_v47 = vpop.f32.mrb[46].mxu0 }
 0x13c   :  { %18392 = vst [vmem:[#allocation49_spill] sm:$0xff] %v11124_v47  ;;  %1540 = vrot.lane.b32.xlu1 %v10986_v39, %s10580_s29  ;;  %1968 = vrot.lane.b32.xlu0 %v10995_v41, %s10581_s15  ;;  %v11131_v49 = vpop.f32.mrb[47].mxu0 }
 0x13d   :  { %18393 = vst [vmem:[#allocation50_spill] sm:$0xff] %v11131_v49 }
 0x13f   :  { %v11133_v50 = vpop.f32.mrb[48].mxu0 }
 0x140   :  { %18394 = vst [vmem:[#allocation51_spill] sm:$0xff] %v11133_v50  ;;  %1970 = vrot.lane.b32.xlu1 %v10986_v39, %s10581_s15  ;;  %1542 = vrot.lane.b32.xlu0 %v11005_v45, %s10580_s29  ;;  %v11142_v56 = vpop.f32.mrb[49].mxu0 }
 0x141   :  { %18395 = vst [vmem:[#allocation52_spill] sm:$0xff] %v11142_v56 }
 0x143   :  { %v11145_v63 = vpop.f32.mrb[50].mxu0 }
 0x144   :  { %18396 = vst [vmem:[#allocation53_spill] sm:$0xff] %v11145_v63  ;;  %1544 = vrot.lane.b32.xlu1 %v10998_v44, %s10580_s29  ;;  %1972 = vrot.lane.b32.xlu0 %v11005_v45, %s10581_s15  ;;  %v11152_v0 = vpop.f32.mrb[51].mxu0 }
 0x145   :  { %18397 = vst [vmem:[#allocation54_spill] sm:$0xff] %v11152_v0 }
 0x147   :  { %v11154_v5 = vpop.f32.mrb[52].mxu0 }
 0x148   :  { %18398 = vst [vmem:[#allocation55_spill] sm:$0xff] %v11154_v5  ;;  %1974 = vrot.lane.b32.xlu1 %v10998_v44, %s10581_s15  ;;  %1546 = vrot.lane.b32.xlu0 %v11016_v48, %s10580_s29  ;;  %v11163_v12 = vpop.f32.mrb[53].mxu0 }
 0x149   :  { %18399 = vst [vmem:[#allocation56_spill] sm:$0xff] %v11163_v12 }
 0x14b   :  { %v11166_v28 = vpop.f32.mrb[54].mxu0 }
 0x14c   :  { %18400 = vst [vmem:[#allocation57_spill] sm:$0xff] %v11166_v28  ;;  %1548 = vrot.lane.b32.xlu1 %v11007_v46, %s10580_s29  ;;  %1976 = vrot.lane.b32.xlu0 %v11016_v48, %s10581_s15  ;;  %v11173_v36 = vpop.f32.mrb[55].mxu0 }
 0x14d   :  { %18401 = vst [vmem:[#allocation58_spill] sm:$0xff] %v11173_v36 }
 0x14f   :  { %v11175_v42 = vpop.f32.mrb[56].mxu0 }
 0x150   :  { %18402 = vst [vmem:[#allocation59_spill] sm:$0xff] %v11175_v42  ;;  %1978 = vrot.lane.b32.xlu1 %v11007_v46, %s10581_s15  ;;  %1550 = vrot.lane.b32.xlu0 %v11026_v52, %s10580_s29  ;;  %v11181_v43 = vpop.f32.mrb[57].mxu0 }
 0x151   :  { %18403 = vst [vmem:[#allocation60_spill] sm:$0xff] %v11181_v43 }
 0x153   :  { %v11183_v54 = vpop.f32.mrb[58].mxu0 }
 0x154   :  { %18404 = vst [vmem:[#allocation61_spill] sm:$0xff] %v11183_v54  ;;  %1552 = vrot.lane.b32.xlu1 %v11019_v51, %s10580_s29  ;;  %1980 = vrot.lane.b32.xlu0 %v11026_v52, %s10581_s15  ;;  %v11189_v57 = vpop.f32.mrb[59].mxu0 }
 0x155   :  { %18405 = vst [vmem:[#allocation62_spill] sm:$0xff] %v11189_v57 }
 0x156   :  { %v11191_v61 = vpop.permute.xlu0 %1504 }
 0x157   :  { %18406 = vst [vmem:[#allocation63_spill] sm:$0xff] %v11191_v61  ;;  %v11193_v8 = vpop.f32.mrb[60].mxu0 }
 0x158   :  { %18407 = vst [vmem:[#allocation64_spill] sm:$0xff] %v11193_v8  ;;  %1982 = vrot.lane.b32.xlu1 %v11019_v51, %s10581_s15  ;;  %1554 = vrot.lane.b32.xlu0 %v11037_v55, %s10580_s29  ;;  %v11199_v21 = vpop.f32.mrb[61].mxu0 }
 0x159   :  { %18408 = vst [vmem:[#allocation65_spill] sm:$0xff] %v11199_v21 }
 0x15a   :  { %v11201_v26 = vpop.permute.xlu0 %1502  ;;  %v11203_v16 = vpop.permute.xlu1 %1508 }
 0x15b   :  { %18409 = vst [vmem:[#allocation66_spill] sm:$0xff] %v11201_v26  ;;  %18410 = vst [vmem:[#allocation67_spill] sm:$0xff] %v11203_v16  ;;  %v11213_v13 = vpop.f32.mrb[62].mxu0 }
 0x15c   :  { %1556 = vrot.lane.b32.xlu1 %v11028_v53, %s10580_s29  ;;  %1984 = vrot.lane.b32.xlu0 %v11037_v55, %s10581_s15  ;;  %18413 = vst [vmem:[#allocation70_spill] sm:$0xff] %v11213_v13  ;;  %v11219_v9 = vpop.f32.mrb[63].mxu0 }
 0x15d   :  { %18414 = vst [vmem:[#allocation71_spill] sm:$0xff] %v11219_v9 }
 0x15e   :  { %v11209_v11 = vpop.permute.xlu1 %1938  ;;  %v11211_v17 = vpop.permute.xlu0 %1936 }
 0x15f   :  { %18411 = vst [vmem:[#allocation68_spill] sm:$0xff] %v11209_v11  ;;  %18412 = vst [vmem:[#allocation69_spill] sm:$0xff] %v11211_v17  ;;  %v11233_v10 = vpop.f32.mrb[64].mxu0 }
 0x160   :  { %1986 = vrot.lane.b32.xlu1 %v11028_v53, %s10581_s15  ;;  %1558 = vrot.lane.b32.xlu0 %v11047_v59, %s10580_s29  ;;  %18419 = vst [vmem:[#allocation76_spill] sm:$0xff] %v11233_v10 }
 0x162   :  { %v11221_v16 = vpop.permute.xlu1 %1506  ;;  %v11223_v4 = vpop.permute.xlu0 %1510 }
 0x163   :  { %18415 = vst [vmem:[#allocation72_spill] sm:$0xff] %v11221_v16  ;;  %18416 = vst [vmem:[#allocation73_spill] sm:$0xff] %v11223_v4  ;;  %v11239_v16 = vpop.f32.mrb[65].mxu0 }
 0x164   :  { %1560 = vrot.lane.b32.xlu1 %v11040_v58, %s10580_s29  ;;  %1988 = vrot.lane.b32.xlu0 %v11047_v59, %s10581_s15  ;;  %18420 = vst [vmem:[#allocation77_spill] sm:$0xff] %v11239_v16  ;;  %v11253_v26 = vpop.f32.mrb[66].mxu0 }
 0x165   :  { %18425 = vst [vmem:[#allocation82_spill] sm:$0xff] %v11253_v26 }
 0x166   :  { %v11229_v11 = vpop.permute.xlu1 %1512  ;;  %v11231_v61 = vpop.permute.xlu0 %1940 }
 0x167   :  { %18417 = vst [vmem:[#allocation74_spill] sm:$0xff] %v11229_v11  ;;  %18418 = vst [vmem:[#allocation75_spill] sm:$0xff] %v11231_v61 }
 0x168   :  { %1990 = vrot.lane.b32.xlu1 %v11040_v58, %s10581_s15  ;;  %1562 = vrot.lane.b32.xlu0 %v11058_v62, %s10580_s29 }
 0x16a   :  { %v11241_v4 = vpop.permute.xlu1 %1942  ;;  %v11243_v17 = vpop.permute.xlu0 %2370 }
 0x16b   :  { %18421 = vst [vmem:[#allocation78_spill] sm:$0xff] %v11241_v4  ;;  %18422 = vst [vmem:[#allocation79_spill] sm:$0xff] %v11243_v17  ;;  %v11259_v4 = vpop.f32.mrb[67].mxu0 }
 0x16c   :  { %1564 = vrot.lane.b32.xlu1 %v11049_v60, %s10580_s29  ;;  %1992 = vrot.lane.b32.xlu0 %v11058_v62, %s10581_s15  ;;  %18426 = vst [vmem:[#allocation83_spill] sm:$0xff] %v11259_v4  ;;  %v11273_v25 = vpop.f32.mrb[68].mxu0 }
 0x16d   :  { %18431 = vst [vmem:[#allocation88_spill] sm:$0xff] %v11273_v25 }
 0x16e   :  { %v11249_v11 = vpop.permute.xlu1 %2372  ;;  %v11251_v61 = vpop.permute.xlu0 %1514 }
 0x16f   :  { %18423 = vst [vmem:[#allocation80_spill] sm:$0xff] %v11249_v11  ;;  %18424 = vst [vmem:[#allocation81_spill] sm:$0xff] %v11251_v61 }
 0x170   :  { %1994 = vrot.lane.b32.xlu1 %v11049_v60, %s10581_s15  ;;  %1566 = vrot.lane.b32.xlu0 %v11068_v2, %s10580_s29 }
 0x172   :  { %v11261_v17 = vpop.permute.xlu1 %1516  ;;  %v11263_v6 = vpop.permute.xlu0 %1944 }
 0x173   :  { %18427 = vst [vmem:[#allocation84_spill] sm:$0xff] %v11261_v17  ;;  %18428 = vst [vmem:[#allocation85_spill] sm:$0xff] %v11263_v6  ;;  %v11279_v17 = vpop.f32.mrb[69].mxu0 }
 0x174   :  { %1568 = vrot.lane.b32.xlu1 %v11061_v1, %s10580_s29  ;;  %1996 = vrot.lane.b32.xlu0 %v11068_v2, %s10581_s15  ;;  %18432 = vst [vmem:[#allocation89_spill] sm:$0xff] %v11279_v17  ;;  %v11293_v23 = vpop.f32.mrb[70].mxu0 }
 0x175   :  { %18437 = vst [vmem:[#allocation94_spill] sm:$0xff] %v11293_v23 }
 0x176   :  { %v11269_v61 = vpop.permute.xlu1 %1946  ;;  %v11271_v11 = vpop.permute.xlu0 %2374 }
 0x177   :  { %18429 = vst [vmem:[#allocation86_spill] sm:$0xff] %v11269_v61  ;;  %18430 = vst [vmem:[#allocation87_spill] sm:$0xff] %v11271_v11 }
 0x178   :  { %1998 = vrot.lane.b32.xlu1 %v11061_v1, %s10581_s15  ;;  %1570 = vrot.lane.b32.xlu0 %v11079_v7, %s10580_s29 }
 0x17a   :  { %v11281_v6 = vpop.permute.xlu1 %2376  ;;  %v11283_v27 = vpop.permute.xlu0 %1518 }
 0x17b   :  { %18433 = vst [vmem:[#allocation90_spill] sm:$0xff] %v11281_v6  ;;  %18434 = vst [vmem:[#allocation91_spill] sm:$0xff] %v11283_v27  ;;  %v11299_v6 = vpop.f32.mrb[71].mxu0 }
 0x17c   :  { %1572 = vrot.lane.b32.xlu1 %v11070_v3, %s10580_s29  ;;  %2000 = vrot.lane.b32.xlu0 %v11079_v7, %s10581_s15  ;;  %18438 = vst [vmem:[#allocation95_spill] sm:$0xff] %v11299_v6  ;;  %v11313_v18 = vpop.f32.mrb[72].mxu0 }
 0x17d   :  { %18443 = vst [vmem:[#allocation100_spill] sm:$0xff] %v11313_v18 }
 0x17e   :  { %v11289_v61 = vpop.permute.xlu1 %1520  ;;  %v11291_v11 = vpop.permute.xlu0 %1948 }
 0x17f   :  { %18435 = vst [vmem:[#allocation92_spill] sm:$0xff] %v11289_v61  ;;  %18436 = vst [vmem:[#allocation93_spill] sm:$0xff] %v11291_v11 }
 0x180   :  { %2002 = vrot.lane.b32.xlu1 %v11070_v3, %s10581_s15  ;;  %1574 = vrot.lane.b32.xlu0 %v11089_v15, %s10580_s29 }
 0x182   :  { %v11301_v27 = vpop.permute.xlu1 %1950  ;;  %v11303_v24 = vpop.permute.xlu0 %2378 }
 0x183   :  { %18439 = vst [vmem:[#allocation96_spill] sm:$0xff] %v11301_v27  ;;  %18440 = vst [vmem:[#allocation97_spill] sm:$0xff] %v11303_v24  ;;  %v11319_v27 = vpop.f32.mrb[73].mxu0 }
 0x184   :  { %1576 = vrot.lane.b32.xlu1 %v11082_v14, %s10580_s29  ;;  %2004 = vrot.lane.b32.xlu0 %v11089_v15, %s10581_s15  ;;  %18444 = vst [vmem:[#allocation101_spill] sm:$0xff] %v11319_v27 }
 0x186   :  { %v11309_v61 = vpop.permute.xlu1 %2380  ;;  %v11311_v11 = vpop.permute.xlu0 %1522 }
 0x187   :  { %18441 = vst [vmem:[#allocation98_spill] sm:$0xff] %v11309_v61  ;;  %18442 = vst [vmem:[#allocation99_spill] sm:$0xff] %v11311_v11 }
 0x188   :  { %2006 = vrot.lane.b32.xlu1 %v11082_v14, %s10581_s15  ;;  %1578 = vrot.lane.b32.xlu0 %v11100_v22, %s10580_s29  ;;  %v11333_v14 = vpop.f32.mrb[74].mxu0 }
 0x189   :  { %18449 = vst [vmem:[#allocation106_spill] sm:$0xff] %v11333_v14 }
 0x18a   :  { %v11321_v24 = vpop.permute.xlu1 %1524  ;;  %v11323_v20 = vpop.permute.xlu0 %1952 }
 0x18b   :  { %18445 = vst [vmem:[#allocation102_spill] sm:$0xff] %v11321_v24  ;;  %18446 = vst [vmem:[#allocation103_spill] sm:$0xff] %v11323_v20  ;;  %v11339_v24 = vpop.f32.mrb[75].mxu0 }
 0x18c   :  { %1580 = vrot.lane.b32.xlu1 %v11091_v19, %s10580_s29  ;;  %2008 = vrot.lane.b32.xlu0 %v11100_v22, %s10581_s15  ;;  %18450 = vst [vmem:[#allocation107_spill] sm:$0xff] %v11339_v24 }
 0x18e   :  { %v11329_v11 = vpop.permute.xlu1 %1954  ;;  %v11331_v61 = vpop.permute.xlu0 %2382 }
 0x18f   :  { %18447 = vst [vmem:[#allocation104_spill] sm:$0xff] %v11329_v11  ;;  %18448 = vst [vmem:[#allocation105_spill] sm:$0xff] %v11331_v61 }
 0x190   :  { %2010 = vrot.lane.b32.xlu1 %v11091_v19, %s10581_s15  ;;  %1582 = vrot.lane.b32.xlu0 %v11110_v33, %s10580_s29  ;;  %v11353_v19 = vpop.f32.mrb[76].mxu0 }
 0x191   :  { %18455 = vst [vmem:[#allocation112_spill] sm:$0xff] %v11353_v19 }
 0x192   :  { %v11341_v20 = vpop.permute.xlu1 %2384  ;;  %v11343_v15 = vpop.permute.xlu0 %1526 }
 0x193   :  { %18451 = vst [vmem:[#allocation108_spill] sm:$0xff] %v11341_v20  ;;  %18452 = vst [vmem:[#allocation109_spill] sm:$0xff] %v11343_v15  ;;  %v11359_v20 = vpop.f32.mrb[77].mxu0 }
 0x194   :  { %1584 = vrot.lane.b32.xlu1 %v11103_v29, %s10580_s29  ;;  %2012 = vrot.lane.b32.xlu0 %v11110_v33, %s10581_s15  ;;  %18456 = vst [vmem:[#allocation113_spill] sm:$0xff] %v11359_v20 }
 0x196   :  { %v11349_v11 = vpop.permute.xlu1 %1528  ;;  %v11351_v61 = vpop.permute.xlu0 %1956 }
 0x197   :  { %18453 = vst [vmem:[#allocation110_spill] sm:$0xff] %v11349_v11  ;;  %18454 = vst [vmem:[#allocation111_spill] sm:$0xff] %v11351_v61 }
 0x198   :  { %2014 = vrot.lane.b32.xlu1 %v11103_v29, %s10581_s15  ;;  %1586 = vrot.lane.b32.xlu0 %v11121_v40, %s10580_s29  ;;  %v11373_v29 = vpop.f32.mrb[78].mxu0 }
 0x199   :  { %18461 = vst [vmem:[#allocation118_spill] sm:$0xff] %v11373_v29 }
 0x19a   :  { %v11361_v15 = vpop.permute.xlu1 %1958  ;;  %v11363_v22 = vpop.permute.xlu0 %1530 }
 0x19b   :  { %18457 = vst [vmem:[#allocation114_spill] sm:$0xff] %v11361_v15  ;;  %18458 = vst [vmem:[#allocation115_spill] sm:$0xff] %v11363_v22  ;;  %v11379_v15 = vpop.f32.mrb[79].mxu0 }
 0x19c   :  { %1588 = vrot.lane.b32.xlu1 %v11112_v35, %s10580_s29  ;;  %2016 = vrot.lane.b32.xlu0 %v11121_v40, %s10581_s15  ;;  %18462 = vst [vmem:[#allocation119_spill] sm:$0xff] %v11379_v15 }
 0x19e   :  { %v11369_v11 = vpop.permute.xlu1 %1532  ;;  %v11371_v61 = vpop.permute.xlu0 %1960 }
 0x19f   :  { %18459 = vst [vmem:[#allocation116_spill] sm:$0xff] %v11369_v11  ;;  %18460 = vst [vmem:[#allocation117_spill] sm:$0xff] %v11371_v61 }
 0x1a0   :  { %2018 = vrot.lane.b32.xlu1 %v11112_v35, %s10581_s15  ;;  %1590 = vrot.lane.b32.xlu0 %v11131_v49, %s10580_s29  ;;  %v11393_v35 = vpop.f32.mrb[80].mxu0 }
 0x1a1   :  { %18467 = vst [vmem:[#allocation124_spill] sm:$0xff] %v11393_v35 }
 0x1a2   :  { %v11381_v22 = vpop.permute.xlu1 %1962  ;;  %v11383_v33 = vpop.permute.xlu0 %1534 }
 0x1a3   :  { %18463 = vst [vmem:[#allocation120_spill] sm:$0xff] %v11381_v22  ;;  %18464 = vst [vmem:[#allocation121_spill] sm:$0xff] %v11383_v33  ;;  %v11399_v22 = vpop.f32.mrb[81].mxu0 }
 0x1a4   :  { %1592 = vrot.lane.b32.xlu1 %v11124_v47, %s10580_s29  ;;  %2020 = vrot.lane.b32.xlu0 %v11131_v49, %s10581_s15  ;;  %18468 = vst [vmem:[#allocation125_spill] sm:$0xff] %v11399_v22 }
 0x1a6   :  { %v11389_v11 = vpop.permute.xlu1 %1536  ;;  %v11391_v61 = vpop.permute.xlu0 %1964 }
 0x1a7   :  { %18465 = vst [vmem:[#allocation122_spill] sm:$0xff] %v11389_v11  ;;  %18466 = vst [vmem:[#allocation123_spill] sm:$0xff] %v11391_v61 }
 0x1a8   :  { %2022 = vrot.lane.b32.xlu1 %v11124_v47, %s10581_s15  ;;  %1594 = vrot.lane.b32.xlu0 %v11142_v56, %s10580_s29  ;;  %v11413_v47 = vpop.f32.mrb[82].mxu0 }
 0x1a9   :  { %18473 = vst [vmem:[#allocation130_spill] sm:$0xff] %v11413_v47 }
 0x1aa   :  { %v11401_v33 = vpop.permute.xlu1 %1966  ;;  %v11403_v40 = vpop.permute.xlu0 %1538 }
 0x1ab   :  { %18469 = vst [vmem:[#allocation126_spill] sm:$0xff] %v11401_v33  ;;  %18470 = vst [vmem:[#allocation127_spill] sm:$0xff] %v11403_v40  ;;  %v11419_v33 = vpop.f32.mrb[83].mxu0 }
 0x1ac   :  { %1596 = vrot.lane.b32.xlu1 %v11133_v50, %s10580_s29  ;;  %2024 = vrot.lane.b32.xlu0 %v11142_v56, %s10581_s15  ;;  %18474 = vst [vmem:[#allocation131_spill] sm:$0xff] %v11419_v33 }
 0x1ae   :  { %v11409_v11 = vpop.permute.xlu1 %1540  ;;  %v11411_v61 = vpop.permute.xlu0 %1968 }
 0x1af   :  { %18471 = vst [vmem:[#allocation128_spill] sm:$0xff] %v11409_v11  ;;  %18472 = vst [vmem:[#allocation129_spill] sm:$0xff] %v11411_v61 }
 0x1b0   :  { %2026 = vrot.lane.b32.xlu1 %v11133_v50, %s10581_s15  ;;  %1598 = vrot.lane.b32.xlu0 %v11152_v0, %s10580_s29  ;;  %v11433_v50 = vpop.f32.mrb[84].mxu0 }
 0x1b1   :  { %18479 = vst [vmem:[#allocation136_spill] sm:$0xff] %v11433_v50 }
 0x1b2   :  { %v11421_v40 = vpop.permute.xlu1 %1970  ;;  %v11423_v49 = vpop.permute.xlu0 %1542 }
 0x1b3   :  { %18475 = vst [vmem:[#allocation132_spill] sm:$0xff] %v11421_v40  ;;  %18476 = vst [vmem:[#allocation133_spill] sm:$0xff] %v11423_v49  ;;  %v11439_v40 = vpop.f32.mrb[85].mxu0 }
 0x1b4   :  { %1600 = vrot.lane.b32.xlu1 %v11145_v63, %s10580_s29  ;;  %2028 = vrot.lane.b32.xlu0 %v11152_v0, %s10581_s15  ;;  %18480 = vst [vmem:[#allocation137_spill] sm:$0xff] %v11439_v40 }
 0x1b6   :  { %v11429_v11 = vpop.permute.xlu1 %1544  ;;  %v11431_v61 = vpop.permute.xlu0 %1972 }
 0x1b7   :  { %18477 = vst [vmem:[#allocation134_spill] sm:$0xff] %v11429_v11  ;;  %18478 = vst [vmem:[#allocation135_spill] sm:$0xff] %v11431_v61 }
 0x1b8   :  { %2030 = vrot.lane.b32.xlu1 %v11145_v63, %s10581_s15  ;;  %1602 = vrot.lane.b32.xlu0 %v11163_v12, %s10580_s29  ;;  %v11453_v63 = vpop.f32.mrb[86].mxu0 }
 0x1b9   :  { %18485 = vst [vmem:[#allocation142_spill] sm:$0xff] %v11453_v63 }
 0x1ba   :  { %v11441_v49 = vpop.permute.xlu1 %1974  ;;  %v11443_v56 = vpop.permute.xlu0 %1546 }
 0x1bb   :  { %18481 = vst [vmem:[#allocation138_spill] sm:$0xff] %v11441_v49  ;;  %18482 = vst [vmem:[#allocation139_spill] sm:$0xff] %v11443_v56  ;;  %v11459_v49 = vpop.f32.mrb[87].mxu0 }
 0x1bc   :  { %1604 = vrot.lane.b32.xlu1 %v11154_v5, %s10580_s29  ;;  %2032 = vrot.lane.b32.xlu0 %v11163_v12, %s10581_s15  ;;  %18486 = vst [vmem:[#allocation143_spill] sm:$0xff] %v11459_v49 }
 0x1be   :  { %v11449_v11 = vpop.permute.xlu1 %1548  ;;  %v11451_v61 = vpop.permute.xlu0 %1976 }
 0x1bf   :  { %18483 = vst [vmem:[#allocation140_spill] sm:$0xff] %v11449_v11  ;;  %18484 = vst [vmem:[#allocation141_spill] sm:$0xff] %v11451_v61 }
 0x1c0   :  { %2034 = vrot.lane.b32.xlu1 %v11154_v5, %s10581_s15  ;;  %1606 = vrot.lane.b32.xlu0 %v11173_v36, %s10580_s29  ;;  %v11473_v5 = vpop.f32.mrb[88].mxu0 }
 0x1c1   :  { %18491 = vst [vmem:[#allocation148_spill] sm:$0xff] %v11473_v5 }
 0x1c2   :  { %v11461_v56 = vpop.permute.xlu1 %1978  ;;  %v11463_v0 = vpop.permute.xlu0 %1550 }
 0x1c3   :  { %18487 = vst [vmem:[#allocation144_spill] sm:$0xff] %v11461_v56  ;;  %18488 = vst [vmem:[#allocation145_spill] sm:$0xff] %v11463_v0  ;;  %v11479_v56 = vpop.f32.mrb[89].mxu0 }
 0x1c4   :  { %1608 = vrot.lane.b32.xlu1 %v11166_v28, %s10580_s29  ;;  %2036 = vrot.lane.b32.xlu0 %v11173_v36, %s10581_s15  ;;  %18492 = vst [vmem:[#allocation149_spill] sm:$0xff] %v11479_v56 }
 0x1c6   :  { %v11469_v11 = vpop.permute.xlu1 %1552  ;;  %v11471_v61 = vpop.permute.xlu0 %1980 }
 0x1c7   :  { %18489 = vst [vmem:[#allocation146_spill] sm:$0xff] %v11469_v11  ;;  %18490 = vst [vmem:[#allocation147_spill] sm:$0xff] %v11471_v61 }
 0x1c8   :  { %2038 = vrot.lane.b32.xlu1 %v11166_v28, %s10581_s15  ;;  %1610 = vrot.lane.b32.xlu0 %v11181_v43, %s10580_s29  ;;  %v11493_v28 = vpop.f32.mrb[90].mxu0 }
 0x1c9   :  { %18497 = vst [vmem:[#allocation154_spill] sm:$0xff] %v11493_v28 }
 0x1ca   :  { %v11481_v0 = vpop.permute.xlu1 %1982  ;;  %v11483_v12 = vpop.permute.xlu0 %1554 }
 0x1cb   :  { %18493 = vst [vmem:[#allocation150_spill] sm:$0xff] %v11481_v0  ;;  %18494 = vst [vmem:[#allocation151_spill] sm:$0xff] %v11483_v12  ;;  %v11499_v0 = vpop.f32.mrb[91].mxu0 }
 0x1cc   :  { %1612 = vrot.lane.b32.xlu1 %v11175_v42, %s10580_s29  ;;  %2040 = vrot.lane.b32.xlu0 %v11181_v43, %s10581_s15  ;;  %18498 = vst [vmem:[#allocation155_spill] sm:$0xff] %v11499_v0 }
 0x1ce   :  { %v11489_v11 = vpop.permute.xlu1 %1556  ;;  %v11491_v61 = vpop.permute.xlu0 %1984 }
 0x1cf   :  { %18495 = vst [vmem:[#allocation152_spill] sm:$0xff] %v11489_v11  ;;  %18496 = vst [vmem:[#allocation153_spill] sm:$0xff] %v11491_v61 }
 0x1d0   :  { %2042 = vrot.lane.b32.xlu1 %v11175_v42, %s10581_s15  ;;  %1614 = vrot.lane.b32.xlu0 %v11189_v57, %s10580_s29  ;;  %v11513_v42 = vpop.f32.mrb[92].mxu0 }
 0x1d1   :  { %18503 = vst [vmem:[#allocation160_spill] sm:$0xff] %v11513_v42 }
 0x1d2   :  { %v11501_v12 = vpop.permute.xlu1 %1986  ;;  %v11503_v36 = vpop.permute.xlu0 %1558 }
 0x1d3   :  { %18499 = vst [vmem:[#allocation156_spill] sm:$0xff] %v11501_v12  ;;  %18500 = vst [vmem:[#allocation157_spill] sm:$0xff] %v11503_v36  ;;  %v11519_v12 = vpop.f32.mrb[93].mxu0 }
 0x1d4   :  { %1616 = vrot.lane.b32.xlu1 %v11183_v54, %s10580_s29  ;;  %2044 = vrot.lane.b32.xlu0 %v11189_v57, %s10581_s15  ;;  %18504 = vst [vmem:[#allocation161_spill] sm:$0xff] %v11519_v12 }
 0x1d6   :  { %v11509_v11 = vpop.permute.xlu1 %1560  ;;  %v11511_v61 = vpop.permute.xlu0 %1988 }
 0x1d7   :  { %18501 = vst [vmem:[#allocation158_spill] sm:$0xff] %v11509_v11  ;;  %18502 = vst [vmem:[#allocation159_spill] sm:$0xff] %v11511_v61 }
 0x1d8   :  { %2046 = vrot.lane.b32.xlu1 %v11183_v54, %s10581_s15  ;;  %1618 = vrot.lane.b32.xlu0 %v11199_v21, %s10580_s29  ;;  %v11533_v54 = vpop.f32.mrb[94].mxu0 }
 0x1d9   :  { %18509 = vst [vmem:[#allocation166_spill] sm:$0xff] %v11533_v54 }
 0x1da   :  { %v11521_v36 = vpop.permute.xlu1 %1990  ;;  %v11523_v43 = vpop.permute.xlu0 %1562 }
 0x1db   :  { %18505 = vst [vmem:[#allocation162_spill] sm:$0xff] %v11521_v36  ;;  %18506 = vst [vmem:[#allocation163_spill] sm:$0xff] %v11523_v43  ;;  %v11539_v36 = vpop.f32.mrb[95].mxu0 }
 0x1dc   :  { %1620 = vrot.lane.b32.xlu1 %v11193_v8, %s10580_s29  ;;  %2048 = vrot.lane.b32.xlu0 %v11199_v21, %s10581_s15  ;;  %18510 = vst [vmem:[#allocation167_spill] sm:$0xff] %v11539_v36 }
 0x1de   :  { %v11529_v11 = vpop.permute.xlu1 %1564  ;;  %v11531_v61 = vpop.permute.xlu0 %1992 }
 0x1df   :  { %18507 = vst [vmem:[#allocation164_spill] sm:$0xff] %v11529_v11  ;;  %18508 = vst [vmem:[#allocation165_spill] sm:$0xff] %v11531_v61 }
 0x1e0   :  { %2050 = vrot.lane.b32.xlu1 %v11193_v8, %s10581_s15  ;;  %1622 = vrot.lane.b32.xlu0 %v11219_v9, %s10580_s29  ;;  %v11553_v8 = vpop.f32.mrb[96].mxu0 }
 0x1e1   :  { %18515 = vst [vmem:[#allocation172_spill] sm:$0xff] %v11553_v8 }
 0x1e2   :  { %v11541_v43 = vpop.permute.xlu1 %1994  ;;  %v11543_v57 = vpop.permute.xlu0 %1566 }
 0x1e3   :  { %18511 = vst [vmem:[#allocation168_spill] sm:$0xff] %v11541_v43  ;;  %18512 = vst [vmem:[#allocation169_spill] sm:$0xff] %v11543_v57  ;;  %v11559_v43 = vpop.f32.mrb[97].mxu0 }
 0x1e4   :  { %1624 = vrot.lane.b32.xlu1 %v11213_v13, %s10580_s29  ;;  %2052 = vrot.lane.b32.xlu0 %v11219_v9, %s10581_s15  ;;  %18516 = vst [vmem:[#allocation173_spill] sm:$0xff] %v11559_v43 }
 0x1e6   :  { %v11549_v11 = vpop.permute.xlu1 %1568  ;;  %v11551_v61 = vpop.permute.xlu0 %1996 }
 0x1e7   :  { %18513 = vst [vmem:[#allocation170_spill] sm:$0xff] %v11549_v11  ;;  %18514 = vst [vmem:[#allocation171_spill] sm:$0xff] %v11551_v61 }
 0x1e8   :  { %2054 = vrot.lane.b32.xlu1 %v11213_v13, %s10581_s15  ;;  %1626 = vrot.lane.b32.xlu0 %v11239_v16, %s10580_s29  ;;  %v11573_v13 = vpop.f32.mrb[98].mxu0 }
 0x1e9   :  { %18521 = vst [vmem:[#allocation178_spill] sm:$0xff] %v11573_v13 }
 0x1ea   :  { %v11561_v57 = vpop.permute.xlu1 %1998  ;;  %v11563_v21 = vpop.permute.xlu0 %1570 }
 0x1eb   :  { %18517 = vst [vmem:[#allocation174_spill] sm:$0xff] %v11561_v57  ;;  %18518 = vst [vmem:[#allocation175_spill] sm:$0xff] %v11563_v21  ;;  %v11579_v57 = vpop.f32.mrb[99].mxu0 }
 0x1ec   :  { %1628 = vrot.lane.b32.xlu1 %v11233_v10, %s10580_s29  ;;  %2056 = vrot.lane.b32.xlu0 %v11239_v16, %s10581_s15  ;;  %18522 = vst [vmem:[#allocation179_spill] sm:$0xff] %v11579_v57 }
 0x1ee   :  { %v11569_v11 = vpop.permute.xlu1 %1572  ;;  %v11571_v61 = vpop.permute.xlu0 %2000 }
 0x1ef   :  { %18519 = vst [vmem:[#allocation176_spill] sm:$0xff] %v11569_v11  ;;  %18520 = vst [vmem:[#allocation177_spill] sm:$0xff] %v11571_v61 }
 0x1f0   :  { %2058 = vrot.lane.b32.xlu1 %v11233_v10, %s10581_s15  ;;  %1630 = vrot.lane.b32.xlu0 %v11259_v4, %s10580_s29  ;;  %v11593_v10 = vpop.f32.mrb[100].mxu0 }
 0x1f1   :  { %18527 = vst [vmem:[#allocation184_spill] sm:$0xff] %v11593_v10 }
 0x1f2   :  { %v11581_v21 = vpop.permute.xlu1 %2002  ;;  %v11583_v9 = vpop.permute.xlu0 %1574 }
 0x1f3   :  { %18523 = vst [vmem:[#allocation180_spill] sm:$0xff] %v11581_v21  ;;  %18524 = vst [vmem:[#allocation181_spill] sm:$0xff] %v11583_v9  ;;  %v11599_v21 = vpop.f32.mrb[101].mxu0 }
 0x1f4   :  { %1632 = vrot.lane.b32.xlu1 %v11253_v26, %s10580_s29  ;;  %2060 = vrot.lane.b32.xlu0 %v11259_v4, %s10581_s15  ;;  %18528 = vst [vmem:[#allocation185_spill] sm:$0xff] %v11599_v21 }
 0x1f6   :  { %v11589_v11 = vpop.permute.xlu1 %1576  ;;  %v11591_v61 = vpop.permute.xlu0 %2004 }
 0x1f7   :  { %18525 = vst [vmem:[#allocation182_spill] sm:$0xff] %v11589_v11  ;;  %18526 = vst [vmem:[#allocation183_spill] sm:$0xff] %v11591_v61 }
 0x1f8   :  { %2062 = vrot.lane.b32.xlu1 %v11253_v26, %s10581_s15  ;;  %1634 = vrot.lane.b32.xlu0 %v11279_v17, %s10580_s29  ;;  %v11613_v26 = vpop.f32.mrb[102].mxu0 }
 0x1f9   :  { %18533 = vst [vmem:[#allocation190_spill] sm:$0xff] %v11613_v26 }
 0x1fa   :  { %v11601_v9 = vpop.permute.xlu1 %2006  ;;  %v11603_v16 = vpop.permute.xlu0 %1578 }
 0x1fb   :  { %18529 = vst [vmem:[#allocation186_spill] sm:$0xff] %v11601_v9  ;;  %18530 = vst [vmem:[#allocation187_spill] sm:$0xff] %v11603_v16  ;;  %v11619_v9 = vpop.f32.mrb[103].mxu0 }
 0x1fc   :  { %1636 = vrot.lane.b32.xlu1 %v11273_v25, %s10580_s29  ;;  %2064 = vrot.lane.b32.xlu0 %v11279_v17, %s10581_s15  ;;  %18534 = vst [vmem:[#allocation191_spill] sm:$0xff] %v11619_v9 }
 0x1fe   :  { %v11609_v11 = vpop.permute.xlu1 %1580  ;;  %v11611_v61 = vpop.permute.xlu0 %2008 }
 0x1ff   :  { %18531 = vst [vmem:[#allocation188_spill] sm:$0xff] %v11609_v11  ;;  %18532 = vst [vmem:[#allocation189_spill] sm:$0xff] %v11611_v61 }
 0x200   :  { %2066 = vrot.lane.b32.xlu1 %v11273_v25, %s10581_s15  ;;  %1638 = vrot.lane.b32.xlu0 %v11299_v6, %s10580_s29  ;;  %v11633_v25 = vpop.f32.mrb[104].mxu0 }
 0x201   :  { %18539 = vst [vmem:[#allocation196_spill] sm:$0xff] %v11633_v25 }
 0x202   :  { %v11621_v16 = vpop.permute.xlu1 %2010  ;;  %v11623_v4 = vpop.permute.xlu0 %1582 }
 0x203   :  { %18535 = vst [vmem:[#allocation192_spill] sm:$0xff] %v11621_v16  ;;  %18536 = vst [vmem:[#allocation193_spill] sm:$0xff] %v11623_v4  ;;  %v11639_v16 = vpop.f32.mrb[105].mxu0 }
 0x204   :  { %1640 = vrot.lane.b32.xlu1 %v11293_v23, %s10580_s29  ;;  %2068 = vrot.lane.b32.xlu0 %v11299_v6, %s10581_s15  ;;  %18540 = vst [vmem:[#allocation197_spill] sm:$0xff] %v11639_v16  ;;  %v9646_v6 = vld [vmem:[%s17984_s0 + $0x1c0] sm:$0xff]  }
 0x206   :  { %v11629_v11 = vpop.permute.xlu1 %1584  ;;  %v11631_v61 = vpop.permute.xlu0 %2012 }
 0x207   :  { %18537 = vst [vmem:[#allocation194_spill] sm:$0xff] %v11629_v11  ;;  %18538 = vst [vmem:[#allocation195_spill] sm:$0xff] %v11631_v61 }
 0x208   :  { %2070 = vrot.lane.b32.xlu1 %v11293_v23, %s10581_s15  ;;  %1642 = vrot.lane.b32.xlu0 %v11319_v27, %s10580_s29  ;;  %v11653_v23 = vpop.f32.mrb[106].mxu0 }
 0x209   :  { %18545 = vst [vmem:[#allocation202_spill] sm:$0xff] %v11653_v23 }
 0x20a   :  { %v11641_v4 = vpop.permute.xlu1 %2014  ;;  %v11643_v17 = vpop.permute.xlu0 %1586 }
 0x20b   :  { %18541 = vst [vmem:[#allocation198_spill] sm:$0xff] %v11641_v4  ;;  %18542 = vst [vmem:[#allocation199_spill] sm:$0xff] %v11643_v17  ;;  %v11662_v17 = vpop.f32.mrb[107].mxu0  ;;  %v9561_v4 = vunpack.c.l.bf16 %v9646_v6 }
 0x20c   :  { %1644 = vrot.lane.b32.xlu1 %v11313_v18, %s10580_s29  ;;  %2072 = vrot.lane.b32.xlu0 %v11319_v27, %s10581_s15  ;;  %18546 = vst [vmem:[#allocation203_spill] sm:$0xff] %v11662_v17  ;;  %v9562_v27 = vunpack.c.h.bf16 %v9646_v6  ;;  %v11678_v7 = vpop.f32.mrb[108].mxu0 }
 0x20d   :  { %10046 = vmatprep.mubr.msk.f32.mxu0 %vm306_vm0, %v9561_v4  ;;  %18551 = vst [vmem:[#allocation208_spill] sm:$0xff] %v11678_v7  ;;  %v11684_v4 = vpop.f32.mrb[109].mxu0 }
 0x20e   :  { %v11649_v11 = vpop.permute.xlu1 %1588  ;;  %v11651_v61 = vpop.permute.xlu0 %2016  ;;  %10047 = vmatmul.mubr.msk.f32.gmra.mrb[112].mxu0 %vm306_vm0, %v9562_v27  ;;  %18552 = vst [vmem:[#allocation209_spill] sm:$0xff] %v11684_v4 }
 0x20f   :  { %18543 = vst [vmem:[#allocation200_spill] sm:$0xff] %v11649_v11  ;;  %18544 = vst [vmem:[#allocation201_spill] sm:$0xff] %v11651_v61 }
 0x210   :  { %2074 = vrot.lane.b32.xlu1 %v11313_v18, %s10581_s15  ;;  %1646 = vrot.lane.b32.xlu0 %v11339_v24, %s10580_s29 }
 0x212   :  { %v11664_v3 = vpop.permute.xlu1 %2018  ;;  %v11666_v11 = vpop.permute.xlu0 %1590 }
 0x213   :  { %18547 = vst [vmem:[#allocation204_spill] sm:$0xff] %v11664_v3  ;;  %18548 = vst [vmem:[#allocation205_spill] sm:$0xff] %v11666_v11  ;;  %v11698_v3 = vpop.f32.mrb[110].mxu0 }
 0x214   :  { %1648 = vrot.lane.b32.xlu1 %v11333_v14, %s10580_s29  ;;  %2076 = vrot.lane.b32.xlu0 %v11339_v24, %s10581_s15  ;;  %18557 = vst [vmem:[#allocation214_spill] sm:$0xff] %v11698_v3 }
 0x216   :  { %v11674_v61 = vpop.permute.xlu1 %1592  ;;  %v11676_v18 = vpop.permute.xlu0 %2020 }
 0x217   :  { %18549 = vst [vmem:[#allocation206_spill] sm:$0xff] %v11674_v61  ;;  %18550 = vst [vmem:[#allocation207_spill] sm:$0xff] %v11676_v18 }
 0x218   :  { %2078 = vrot.lane.b32.xlu1 %v11333_v14, %s10581_s15  ;;  %1650 = vrot.lane.b32.xlu0 %v11359_v20, %s10580_s29 }
 0x21a   :  { %v11686_v6 = vpop.permute.xlu1 %2022  ;;  %v11688_v27 = vpop.permute.xlu0 %1594 }
 0x21b   :  { %18553 = vst [vmem:[#allocation210_spill] sm:$0xff] %v11686_v6  ;;  %18554 = vst [vmem:[#allocation211_spill] sm:$0xff] %v11688_v27  ;;  %v11704_v6 = vpop.f32.mrb[111].mxu0 }
 0x21c   :  { %1652 = vrot.lane.b32.xlu1 %v11353_v19, %s10580_s29  ;;  %2080 = vrot.lane.b32.xlu0 %v11359_v20, %s10581_s15  ;;  %18558 = vst [vmem:[#allocation215_spill] sm:$0xff] %v11704_v6 }
 0x21e   :  { %v11694_v61 = vpop.permute.xlu1 %1596  ;;  %v11696_v11 = vpop.permute.xlu0 %2024 }
 0x21f   :  { %18555 = vst [vmem:[#allocation212_spill] sm:$0xff] %v11694_v61  ;;  %18556 = vst [vmem:[#allocation213_spill] sm:$0xff] %v11696_v11 }
 0x220   :  { %2082 = vrot.lane.b32.xlu1 %v11353_v19, %s10581_s15  ;;  %1654 = vrot.lane.b32.xlu0 %v11379_v15, %s10580_s29 }
 0x222   :  { %v11706_v27 = vpop.permute.xlu1 %2026  ;;  %v11708_v18 = vpop.permute.xlu0 %1598 }
 0x223   :  { %18559 = vst [vmem:[#allocation216_spill] sm:$0xff] %v11706_v27  ;;  %18560 = vst [vmem:[#allocation217_spill] sm:$0xff] %v11708_v18 }
 0x224   :  { %1656 = vrot.lane.b32.xlu1 %v11373_v29, %s10580_s29  ;;  %2084 = vrot.lane.b32.xlu0 %v11379_v15, %s10581_s15 }
 0x226   :  { %v11714_v61 = vpop.permute.xlu1 %1600  ;;  %v11716_v11 = vpop.permute.xlu0 %2028 }
 0x227   :  { %18561 = vst [vmem:[#allocation218_spill] sm:$0xff] %v11714_v61  ;;  %18562 = vst [vmem:[#allocation219_spill] sm:$0xff] %v11716_v11 }
 0x228   :  { %2086 = vrot.lane.b32.xlu1 %v11373_v29, %s10581_s15  ;;  %1658 = vrot.lane.b32.xlu0 %v11399_v22, %s10580_s29 }
 0x22a   :  { %v11722_v19 = vpop.permute.xlu1 %2030  ;;  %v11724_v27 = vpop.permute.xlu0 %1602 }
 0x22b   :  { %18563 = vst [vmem:[#allocation220_spill] sm:$0xff] %v11722_v19  ;;  %18564 = vst [vmem:[#allocation221_spill] sm:$0xff] %v11724_v27 }
 0x22c   :  { %1660 = vrot.lane.b32.xlu1 %v11393_v35, %s10580_s29  ;;  %2088 = vrot.lane.b32.xlu0 %v11399_v22, %s10581_s15 }
 0x22e   :  { %v11730_v18 = vpop.permute.xlu1 %1604  ;;  %v11732_v61 = vpop.permute.xlu0 %2032 }
 0x22f   :  { %18565 = vst [vmem:[#allocation222_spill] sm:$0xff] %v11730_v18  ;;  %18566 = vst [vmem:[#allocation223_spill] sm:$0xff] %v11732_v61 }
 0x230   :  { %2090 = vrot.lane.b32.xlu1 %v11393_v35, %s10581_s15  ;;  %1662 = vrot.lane.b32.xlu0 %v11419_v33, %s10580_s29 }
 0x232   :  { %v11738_v11 = vpop.permute.xlu1 %2034  ;;  %v11740_v19 = vpop.permute.xlu0 %1606 }
 0x233   :  { %18567 = vst [vmem:[#allocation224_spill] sm:$0xff] %v11738_v11  ;;  %18568 = vst [vmem:[#allocation225_spill] sm:$0xff] %v11740_v19 }
 0x234   :  { %1664 = vrot.lane.b32.xlu1 %v11413_v47, %s10580_s29  ;;  %2092 = vrot.lane.b32.xlu0 %v11419_v33, %s10581_s15 }
 0x236   :  { %v11746_v27 = vpop.permute.xlu1 %1608  ;;  %v11748_v18 = vpop.permute.xlu0 %2036 }
 0x237   :  { %18569 = vst [vmem:[#allocation226_spill] sm:$0xff] %v11746_v27  ;;  %18570 = vst [vmem:[#allocation227_spill] sm:$0xff] %v11748_v18 }
 0x238   :  { %2094 = vrot.lane.b32.xlu1 %v11413_v47, %s10581_s15  ;;  %1666 = vrot.lane.b32.xlu0 %v11439_v40, %s10580_s29 }
 0x23a   :  { %v11754_v61 = vpop.permute.xlu1 %2038  ;;  %v11756_v11 = vpop.permute.xlu0 %1610 }
 0x23b   :  { %18571 = vst [vmem:[#allocation228_spill] sm:$0xff] %v11754_v61  ;;  %18572 = vst [vmem:[#allocation229_spill] sm:$0xff] %v11756_v11 }
 0x23c   :  { %1668 = vrot.lane.b32.xlu1 %v11433_v50, %s10580_s29  ;;  %2096 = vrot.lane.b32.xlu0 %v11439_v40, %s10581_s15 }
 0x23e   :  { %v11762_v19 = vpop.permute.xlu1 %1612  ;;  %v11764_v27 = vpop.permute.xlu0 %2040 }
 0x23f   :  { %18573 = vst [vmem:[#allocation230_spill] sm:$0xff] %v11762_v19  ;;  %18574 = vst [vmem:[#allocation231_spill] sm:$0xff] %v11764_v27 }
 0x240   :  { %2098 = vrot.lane.b32.xlu1 %v11433_v50, %s10581_s15  ;;  %1670 = vrot.lane.b32.xlu0 %v11459_v49, %s10580_s29 }
 0x242   :  { %v11770_v18 = vpop.permute.xlu1 %2042  ;;  %v11772_v61 = vpop.permute.xlu0 %1614 }
 0x243   :  { %18575 = vst [vmem:[#allocation232_spill] sm:$0xff] %v11770_v18  ;;  %18576 = vst [vmem:[#allocation233_spill] sm:$0xff] %v11772_v61 }
 0x244   :  { %1672 = vrot.lane.b32.xlu1 %v11453_v63, %s10580_s29  ;;  %2100 = vrot.lane.b32.xlu0 %v11459_v49, %s10581_s15 }
 0x246   :  { %v11778_v11 = vpop.permute.xlu1 %1616  ;;  %v11780_v19 = vpop.permute.xlu0 %2044 }
 0x247   :  { %18577 = vst [vmem:[#allocation234_spill] sm:$0xff] %v11778_v11  ;;  %18578 = vst [vmem:[#allocation235_spill] sm:$0xff] %v11780_v19 }
 0x248   :  { %2102 = vrot.lane.b32.xlu1 %v11453_v63, %s10581_s15  ;;  %1674 = vrot.lane.b32.xlu0 %v11479_v56, %s10580_s29 }
 0x24a   :  { %v11786_v27 = vpop.permute.xlu1 %2046  ;;  %v11788_v18 = vpop.permute.xlu0 %1618 }
 0x24b   :  { %18579 = vst [vmem:[#allocation236_spill] sm:$0xff] %v11786_v27  ;;  %18580 = vst [vmem:[#allocation237_spill] sm:$0xff] %v11788_v18 }
 0x24c   :  { %1676 = vrot.lane.b32.xlu1 %v11473_v5, %s10580_s29  ;;  %2104 = vrot.lane.b32.xlu0 %v11479_v56, %s10581_s15 }
 0x24e   :  { %v11794_v61 = vpop.permute.xlu1 %1620  ;;  %v11796_v11 = vpop.permute.xlu0 %2048 }
 0x24f   :  { %18581 = vst [vmem:[#allocation238_spill] sm:$0xff] %v11794_v61  ;;  %18582 = vst [vmem:[#allocation239_spill] sm:$0xff] %v11796_v11 }
 0x250   :  { %2106 = vrot.lane.b32.xlu1 %v11473_v5, %s10581_s15  ;;  %1678 = vrot.lane.b32.xlu0 %v11499_v0, %s10580_s29 }
 0x252   :  { %v11802_v19 = vpop.permute.xlu1 %2050  ;;  %v11804_v27 = vpop.permute.xlu0 %1622 }
 0x253   :  { %18583 = vst [vmem:[#allocation240_spill] sm:$0xff] %v11802_v19  ;;  %18584 = vst [vmem:[#allocation241_spill] sm:$0xff] %v11804_v27 }
 0x254   :  { %1680 = vrot.lane.b32.xlu1 %v11493_v28, %s10580_s29  ;;  %2108 = vrot.lane.b32.xlu0 %v11499_v0, %s10581_s15 }
 0x256   :  { %v11810_v18 = vpop.permute.xlu1 %1624  ;;  %v11812_v61 = vpop.permute.xlu0 %2052 }
 0x257   :  { %18585 = vst [vmem:[#allocation242_spill] sm:$0xff] %v11810_v18  ;;  %18586 = vst [vmem:[#allocation243_spill] sm:$0xff] %v11812_v61 }
 0x258   :  { %2110 = vrot.lane.b32.xlu1 %v11493_v28, %s10581_s15  ;;  %1682 = vrot.lane.b32.xlu0 %v11519_v12, %s10580_s29 }
 0x25a   :  { %v11818_v11 = vpop.permute.xlu1 %2054  ;;  %v11820_v19 = vpop.permute.xlu0 %1626 }
 0x25b   :  { %18587 = vst [vmem:[#allocation244_spill] sm:$0xff] %v11818_v11  ;;  %18588 = vst [vmem:[#allocation245_spill] sm:$0xff] %v11820_v19 }
 0x25c   :  { %1684 = vrot.lane.b32.xlu1 %v11513_v42, %s10580_s29  ;;  %2112 = vrot.lane.b32.xlu0 %v11519_v12, %s10581_s15 }
 0x25e   :  { %v11826_v27 = vpop.permute.xlu1 %1628  ;;  %v11828_v18 = vpop.permute.xlu0 %2056 }
 0x25f   :  { %18589 = vst [vmem:[#allocation246_spill] sm:$0xff] %v11826_v27  ;;  %18590 = vst [vmem:[#allocation247_spill] sm:$0xff] %v11828_v18 }
 0x260   :  { %2114 = vrot.lane.b32.xlu1 %v11513_v42, %s10581_s15  ;;  %1686 = vrot.lane.b32.xlu0 %v11539_v36, %s10580_s29 }
 0x262   :  { %v11834_v61 = vpop.permute.xlu1 %2058  ;;  %v11836_v11 = vpop.permute.xlu0 %1630 }
 0x263   :  { %18591 = vst [vmem:[#allocation248_spill] sm:$0xff] %v11834_v61  ;;  %18592 = vst [vmem:[#allocation249_spill] sm:$0xff] %v11836_v11 }
 0x264   :  { %1688 = vrot.lane.b32.xlu1 %v11533_v54, %s10580_s29  ;;  %2116 = vrot.lane.b32.xlu0 %v11539_v36, %s10581_s15 }
 0x266   :  { %v11842_v19 = vpop.permute.xlu1 %1632  ;;  %v11844_v27 = vpop.permute.xlu0 %2060 }
 0x267   :  { %18593 = vst [vmem:[#allocation250_spill] sm:$0xff] %v11842_v19  ;;  %18594 = vst [vmem:[#allocation251_spill] sm:$0xff] %v11844_v27 }
 0x268   :  { %2118 = vrot.lane.b32.xlu1 %v11533_v54, %s10581_s15  ;;  %1690 = vrot.lane.b32.xlu0 %v11559_v43, %s10580_s29 }
 0x26a   :  { %v11850_v18 = vpop.permute.xlu1 %2062  ;;  %v11852_v61 = vpop.permute.xlu0 %1634 }
 0x26b   :  { %18595 = vst [vmem:[#allocation252_spill] sm:$0xff] %v11850_v18  ;;  %18596 = vst [vmem:[#allocation253_spill] sm:$0xff] %v11852_v61 }
 0x26c   :  { %1692 = vrot.lane.b32.xlu1 %v11553_v8, %s10580_s29  ;;  %2120 = vrot.lane.b32.xlu0 %v11559_v43, %s10581_s15 }
 0x26e   :  { %v11858_v11 = vpop.permute.xlu1 %1636  ;;  %v11860_v19 = vpop.permute.xlu0 %2064 }
 0x26f   :  { %18597 = vst [vmem:[#allocation254_spill] sm:$0xff] %v11858_v11  ;;  %18598 = vst [vmem:[#allocation255_spill] sm:$0xff] %v11860_v19 }
 0x270   :  { %2122 = vrot.lane.b32.xlu1 %v11553_v8, %s10581_s15  ;;  %1694 = vrot.lane.b32.xlu0 %v11579_v57, %s10580_s29 }
 0x272   :  { %v11866_v27 = vpop.permute.xlu1 %2066  ;;  %v11868_v18 = vpop.permute.xlu0 %1638 }
 0x273   :  { %18599 = vst [vmem:[#allocation256_spill] sm:$0xff] %v11866_v27  ;;  %18600 = vst [vmem:[#allocation257_spill] sm:$0xff] %v11868_v18 }
 0x274   :  { %1696 = vrot.lane.b32.xlu1 %v11573_v13, %s10580_s29  ;;  %2124 = vrot.lane.b32.xlu0 %v11579_v57, %s10581_s15 }
 0x276   :  { %v11874_v61 = vpop.permute.xlu1 %1640  ;;  %v11876_v11 = vpop.permute.xlu0 %2068 }
 0x277   :  { %18601 = vst [vmem:[#allocation258_spill] sm:$0xff] %v11874_v61  ;;  %18602 = vst [vmem:[#allocation259_spill] sm:$0xff] %v11876_v11 }
 0x278   :  { %2126 = vrot.lane.b32.xlu1 %v11573_v13, %s10581_s15  ;;  %1698 = vrot.lane.b32.xlu0 %v11599_v21, %s10580_s29 }
 0x27a   :  { %v11882_v19 = vpop.permute.xlu1 %2070  ;;  %v11884_v27 = vpop.permute.xlu0 %1642 }
 0x27b   :  { %18603 = vst [vmem:[#allocation260_spill] sm:$0xff] %v11882_v19  ;;  %18604 = vst [vmem:[#allocation261_spill] sm:$0xff] %v11884_v27 }
 0x27c   :  { %1700 = vrot.lane.b32.xlu1 %v11593_v10, %s10580_s29  ;;  %2128 = vrot.lane.b32.xlu0 %v11599_v21, %s10581_s15 }
 0x27e   :  { %v11890_v18 = vpop.permute.xlu1 %1644  ;;  %v11892_v61 = vpop.permute.xlu0 %2072 }
 0x27f   :  { %18605 = vst [vmem:[#allocation262_spill] sm:$0xff] %v11890_v18  ;;  %18606 = vst [vmem:[#allocation263_spill] sm:$0xff] %v11892_v61 }
 0x280   :  { %2130 = vrot.lane.b32.xlu1 %v11593_v10, %s10581_s15  ;;  %1702 = vrot.lane.b32.xlu0 %v11619_v9, %s10580_s29 }
 0x282   :  { %v11898_v11 = vpop.permute.xlu1 %2074  ;;  %v11900_v19 = vpop.permute.xlu0 %1646 }
 0x283   :  { %18607 = vst [vmem:[#allocation264_spill] sm:$0xff] %v11898_v11  ;;  %18608 = vst [vmem:[#allocation265_spill] sm:$0xff] %v11900_v19 }
 0x284   :  { %1704 = vrot.lane.b32.xlu1 %v11613_v26, %s10580_s29  ;;  %2132 = vrot.lane.b32.xlu0 %v11619_v9, %s10581_s15 }
 0x286   :  { %v11906_v27 = vpop.permute.xlu1 %1648  ;;  %v11908_v18 = vpop.permute.xlu0 %2076 }
 0x287   :  { %18609 = vst [vmem:[#allocation266_spill] sm:$0xff] %v11906_v27  ;;  %18610 = vst [vmem:[#allocation267_spill] sm:$0xff] %v11908_v18 }
 0x288   :  { %2134 = vrot.lane.b32.xlu1 %v11613_v26, %s10581_s15  ;;  %1706 = vrot.lane.b32.xlu0 %v11639_v16, %s10580_s29 }
 0x28a   :  { %v11914_v61 = vpop.permute.xlu1 %2078  ;;  %v11916_v11 = vpop.permute.xlu0 %1650 }
 0x28b   :  { %18611 = vst [vmem:[#allocation268_spill] sm:$0xff] %v11914_v61  ;;  %18612 = vst [vmem:[#allocation269_spill] sm:$0xff] %v11916_v11 }
 0x28c   :  { %1708 = vrot.lane.b32.xlu1 %v11633_v25, %s10580_s29  ;;  %2136 = vrot.lane.b32.xlu0 %v11639_v16, %s10581_s15 }
 0x28e   :  { %v11922_v19 = vpop.permute.xlu1 %1652  ;;  %v11924_v27 = vpop.permute.xlu0 %2080 }
 0x28f   :  { %18613 = vst [vmem:[#allocation270_spill] sm:$0xff] %v11922_v19  ;;  %18614 = vst [vmem:[#allocation271_spill] sm:$0xff] %v11924_v27 }
 0x290   :  { %2138 = vrot.lane.b32.xlu1 %v11633_v25, %s10581_s15  ;;  %1710 = vrot.lane.b32.xlu0 %v11662_v17, %s10580_s29 }
 0x292   :  { %v11930_v18 = vpop.permute.xlu1 %2082  ;;  %v11932_v61 = vpop.permute.xlu0 %1654 }
 0x293   :  { %18615 = vst [vmem:[#allocation272_spill] sm:$0xff] %v11930_v18  ;;  %18616 = vst [vmem:[#allocation273_spill] sm:$0xff] %v11932_v61 }
 0x294   :  { %1712 = vrot.lane.b32.xlu1 %v11653_v23, %s10580_s29  ;;  %2140 = vrot.lane.b32.xlu0 %v11662_v17, %s10581_s15 }
 0x296   :  { %v11938_v11 = vpop.permute.xlu1 %1656  ;;  %v11940_v19 = vpop.permute.xlu0 %2084 }
 0x297   :  { %18617 = vst [vmem:[#allocation274_spill] sm:$0xff] %v11938_v11  ;;  %18618 = vst [vmem:[#allocation275_spill] sm:$0xff] %v11940_v19 }
 0x298   :  { %2142 = vrot.lane.b32.xlu1 %v11653_v23, %s10581_s15  ;;  %1714 = vrot.lane.b32.xlu0 %v11684_v4, %s10580_s29 }
 0x29a   :  { %v11946_v27 = vpop.permute.xlu1 %2086  ;;  %v11948_v18 = vpop.permute.xlu0 %1658 }
 0x29b   :  { %18619 = vst [vmem:[#allocation276_spill] sm:$0xff] %v11946_v27  ;;  %18620 = vst [vmem:[#allocation277_spill] sm:$0xff] %v11948_v18 }
 0x29c   :  { %1716 = vrot.lane.b32.xlu1 %v11678_v7, %s10580_s29  ;;  %2144 = vrot.lane.b32.xlu0 %v11684_v4, %s10581_s15 }
 0x29e   :  { %v11954_v61 = vpop.permute.xlu1 %1660  ;;  %v11956_v11 = vpop.permute.xlu0 %2088 }
 0x29f   :  { %18621 = vst [vmem:[#allocation278_spill] sm:$0xff] %v11954_v61  ;;  %18622 = vst [vmem:[#allocation279_spill] sm:$0xff] %v11956_v11 }
 0x2a0   :  { %2146 = vrot.lane.b32.xlu1 %v11678_v7, %s10581_s15  ;;  %2148 = vrot.lane.b32.xlu0 %v11704_v6, %s10581_s15 }
 0x2a2   :  { %v11962_v19 = vpop.permute.xlu1 %2090  ;;  %v11964_v27 = vpop.permute.xlu0 %1662 }
 0x2a3   :  { %18623 = vst [vmem:[#allocation280_spill] sm:$0xff] %v11962_v19  ;;  %18624 = vst [vmem:[#allocation281_spill] sm:$0xff] %v11964_v27 }
 0x2a4   :  { %2150 = vrot.lane.b32.xlu1 %v11698_v3, %s10581_s15  ;;  %2386 = vrot.lane.b32.xlu0 %v10963_v31, %s10582_s1 }
 0x2a6   :  { %v11970_v18 = vpop.permute.xlu1 %1664  ;;  %v11972_v61 = vpop.permute.xlu0 %2092 }
 0x2a7   :  { %18625 = vst [vmem:[#allocation282_spill] sm:$0xff] %v11970_v18  ;;  %18626 = vst [vmem:[#allocation283_spill] sm:$0xff] %v11972_v61 }
 0x2a8   :  { %2388 = vrot.lane.b32.xlu1 %v10956_v30, %s10582_s1  ;;  %2390 = vrot.lane.b32.xlu0 %v10974_v34, %s10582_s1 }
 0x2aa   :  { %v11978_v11 = vpop.permute.xlu1 %2094  ;;  %v11980_v19 = vpop.permute.xlu0 %1666 }
 0x2ab   :  { %18627 = vst [vmem:[#allocation284_spill] sm:$0xff] %v11978_v11  ;;  %18628 = vst [vmem:[#allocation285_spill] sm:$0xff] %v11980_v19 }
 0x2ac   :  { %2392 = vrot.lane.b32.xlu1 %v10965_v32, %s10582_s1  ;;  %2394 = vrot.lane.b32.xlu0 %v10984_v38, %s10582_s1 }
 0x2ae   :  { %v11986_v27 = vpop.permute.xlu1 %1668  ;;  %v11988_v18 = vpop.permute.xlu0 %2096 }
 0x2af   :  { %18629 = vst [vmem:[#allocation286_spill] sm:$0xff] %v11986_v27  ;;  %18630 = vst [vmem:[#allocation287_spill] sm:$0xff] %v11988_v18 }
 0x2b0   :  { %2396 = vrot.lane.b32.xlu1 %v10977_v37, %s10582_s1  ;;  %2398 = vrot.lane.b32.xlu0 %v10995_v41, %s10582_s1 }
 0x2b2   :  { %v11994_v61 = vpop.permute.xlu1 %2098  ;;  %v11996_v11 = vpop.permute.xlu0 %1670 }
 0x2b3   :  { %18631 = vst [vmem:[#allocation288_spill] sm:$0xff] %v11994_v61  ;;  %18632 = vst [vmem:[#allocation289_spill] sm:$0xff] %v11996_v11 }
 0x2b4   :  { %2400 = vrot.lane.b32.xlu1 %v10986_v39, %s10582_s1  ;;  %2402 = vrot.lane.b32.xlu0 %v11005_v45, %s10582_s1 }
 0x2b6   :  { %v12002_v19 = vpop.permute.xlu1 %1672  ;;  %v12004_v27 = vpop.permute.xlu0 %2100 }
 0x2b7   :  { %18633 = vst [vmem:[#allocation290_spill] sm:$0xff] %v12002_v19  ;;  %18634 = vst [vmem:[#allocation291_spill] sm:$0xff] %v12004_v27 }
 0x2b8   :  { %2404 = vrot.lane.b32.xlu1 %v10998_v44, %s10582_s1  ;;  %2406 = vrot.lane.b32.xlu0 %v11016_v48, %s10582_s1 }
 0x2ba   :  { %v12010_v18 = vpop.permute.xlu1 %2102  ;;  %v12012_v61 = vpop.permute.xlu0 %1674 }
 0x2bb   :  { %18635 = vst [vmem:[#allocation292_spill] sm:$0xff] %v12010_v18  ;;  %18636 = vst [vmem:[#allocation293_spill] sm:$0xff] %v12012_v61 }
 0x2bc   :  { %2408 = vrot.lane.b32.xlu1 %v11007_v46, %s10582_s1  ;;  %2410 = vrot.lane.b32.xlu0 %v11026_v52, %s10582_s1 }
 0x2be   :  { %v12018_v11 = vpop.permute.xlu1 %1676  ;;  %v12020_v19 = vpop.permute.xlu0 %2104 }
 0x2bf   :  { %18637 = vst [vmem:[#allocation294_spill] sm:$0xff] %v12018_v11  ;;  %18638 = vst [vmem:[#allocation295_spill] sm:$0xff] %v12020_v19 }
 0x2c0   :  { %2412 = vrot.lane.b32.xlu1 %v11019_v51, %s10582_s1  ;;  %2414 = vrot.lane.b32.xlu0 %v11037_v55, %s10582_s1 }
 0x2c2   :  { %v12026_v27 = vpop.permute.xlu1 %2106  ;;  %v12028_v18 = vpop.permute.xlu0 %1678 }
 0x2c3   :  { %18639 = vst [vmem:[#allocation296_spill] sm:$0xff] %v12026_v27  ;;  %18640 = vst [vmem:[#allocation297_spill] sm:$0xff] %v12028_v18 }
 0x2c4   :  { %2416 = vrot.lane.b32.xlu1 %v11028_v53, %s10582_s1  ;;  %2418 = vrot.lane.b32.xlu0 %v11047_v59, %s10582_s1 }
 0x2c6   :  { %v12034_v61 = vpop.permute.xlu1 %1680  ;;  %v12036_v11 = vpop.permute.xlu0 %2108 }
 0x2c7   :  { %18641 = vst [vmem:[#allocation298_spill] sm:$0xff] %v12034_v61  ;;  %18642 = vst [vmem:[#allocation299_spill] sm:$0xff] %v12036_v11  ;;  %v18647_v11 = vld [vmem:[#allocation40_spill] sm:$0xff] }
 0x2c8   :  { %2420 = vrot.lane.b32.xlu1 %v11040_v58, %s10582_s1  ;;  %2422 = vrot.lane.b32.xlu0 %v11058_v62, %s10582_s1 }
 0x2ca   :  { %v12042_v19 = vpop.permute.xlu1 %2110  ;;  %v12044_v27 = vpop.permute.xlu0 %1682 }
 0x2cb   :  { %18643 = vst [vmem:[#allocation300_spill] sm:$0xff] %v12042_v19  ;;  %18644 = vst [vmem:[#allocation301_spill] sm:$0xff] %v12044_v27  ;;  %v18650_v27 = vld [vmem:[#allocation39_spill] sm:$0xff] }
 0x2cc   :  { %2424 = vrot.lane.b32.xlu1 %v11049_v60, %s10582_s1  ;;  %2426 = vrot.lane.b32.xlu0 %v11068_v2, %s10582_s1  ;;  %v18651_v60 = vld [vmem:[#allocation42_spill] sm:$0xff] }
 0x2ce   :  { %v12050_v18 = vpop.permute.xlu1 %1684  ;;  %v12052_v61 = vpop.permute.xlu0 %2112 }
 0x2cf   :  { %18645 = vst [vmem:[#allocation302_spill] sm:$0xff] %v12050_v18  ;;  %18646 = vst [vmem:[#allocation303_spill] sm:$0xff] %v12052_v61  ;;  %v18654_v61 = vld [vmem:[#allocation41_spill] sm:$0xff] }
 0x2d0   :  { %2428 = vrot.lane.b32.xlu1 %v11061_v1, %s10582_s1  ;;  %2430 = vrot.lane.b32.xlu0 %v18647_v11, %s10582_s1  ;;  %v18655_v1 = vld [vmem:[#allocation44_spill] sm:$0xff] }
 0x2d2   :  { %v12058_v62 = vpop.permute.xlu1 %2114  ;;  %v12060_v19 = vpop.permute.xlu0 %1686 }
 0x2d3   :  { %18648 = vst [vmem:[#allocation304_spill] sm:$0xff] %v12058_v62  ;;  %18649 = vst [vmem:[#allocation305_spill] sm:$0xff] %v12060_v19  ;;  %v18658_v19 = vld [vmem:[#allocation43_spill] sm:$0xff] }
 0x2d4   :  { %2432 = vrot.lane.b32.xlu1 %v18650_v27, %s10582_s1  ;;  %2434 = vrot.lane.b32.xlu0 %v18651_v60, %s10582_s1  ;;  %v18659_v27 = vld [vmem:[#allocation46_spill] sm:$0xff] }
 0x2d6   :  { %v12066_v2 = vpop.permute.xlu1 %1688  ;;  %v12068_v18 = vpop.permute.xlu0 %2116 }
 0x2d7   :  { %18652 = vst [vmem:[#allocation306_spill] sm:$0xff] %v12066_v2  ;;  %18653 = vst [vmem:[#allocation307_spill] sm:$0xff] %v12068_v18  ;;  %v18662_v18 = vld [vmem:[#allocation45_spill] sm:$0xff] }
 0x2d8   :  { %2436 = vrot.lane.b32.xlu1 %v18654_v61, %s10582_s1  ;;  %2438 = vrot.lane.b32.xlu0 %v18655_v1, %s10582_s1  ;;  %v18663_v61 = vld [vmem:[#allocation48_spill] sm:$0xff] }
 0x2da   :  { %v12074_v11 = vpop.permute.xlu1 %2118  ;;  %v12076_v62 = vpop.permute.xlu0 %1690 }
 0x2db   :  { %18656 = vst [vmem:[#allocation308_spill] sm:$0xff] %v12074_v11  ;;  %18657 = vst [vmem:[#allocation309_spill] sm:$0xff] %v12076_v62  ;;  %v18666_v62 = vld [vmem:[#allocation47_spill] sm:$0xff] }
 0x2dc   :  { %2440 = vrot.lane.b32.xlu1 %v18658_v19, %s10582_s1  ;;  %2442 = vrot.lane.b32.xlu0 %v18659_v27, %s10582_s1  ;;  %v18667_v19 = vld [vmem:[#allocation50_spill] sm:$0xff] }
 0x2de   :  { %v12082_v60 = vpop.permute.xlu1 %1692  ;;  %v12084_v2 = vpop.permute.xlu0 %2120 }
 0x2df   :  { %18660 = vst [vmem:[#allocation310_spill] sm:$0xff] %v12082_v60  ;;  %18661 = vst [vmem:[#allocation311_spill] sm:$0xff] %v12084_v2 }
 0x2e0   :  { %2444 = vrot.lane.b32.xlu1 %v18662_v18, %s10582_s1  ;;  %2446 = vrot.lane.b32.xlu0 %v18663_v61, %s10582_s1  ;;  %v18671_v18 = vld [vmem:[#allocation49_spill] sm:$0xff]  ;;  %v18672_v61 = vld [vmem:[#allocation52_spill] sm:$0xff] }
 0x2e1   :  { %v12102_v2 = vpop.f32.mrb[112].mxu0 }
 0x2e2   :  { %v12090_v1 = vpop.permute.xlu1 %2122  ;;  %v12092_v11 = vpop.permute.xlu0 %1694  ;;  %18670 = vst [vmem:[#allocation316_spill] sm:$0xff] %v12102_v2 }
 0x2e3   :  { %18664 = vst [vmem:[#allocation312_spill] sm:$0xff] %v12090_v1  ;;  %18665 = vst [vmem:[#allocation313_spill] sm:$0xff] %v12092_v11  ;;  %v12108_v1 = vpop.f32.mrb[113].mxu0 }
 0x2e4   :  { %2448 = vrot.lane.b32.xlu1 %v18666_v62, %s10582_s1  ;;  %2450 = vrot.lane.b32.xlu0 %v18667_v19, %s10582_s1  ;;  %18673 = vst [vmem:[#allocation317_spill] sm:$0xff] %v12108_v1  ;;  %v18676_v19 = vld [vmem:[#allocation51_spill] sm:$0xff] }
 0x2e6   :  { %v12098_v27 = vpop.permute.xlu1 %1696  ;;  %v12100_v60 = vpop.permute.xlu0 %2124 }
 0x2e7   :  { %18668 = vst [vmem:[#allocation314_spill] sm:$0xff] %v12098_v27  ;;  %18669 = vst [vmem:[#allocation315_spill] sm:$0xff] %v12100_v60  ;;  %v18677_v27 = vld [vmem:[#allocation54_spill] sm:$0xff] }
 0x2e8   :  { %2452 = vrot.lane.b32.xlu1 %v18671_v18, %s10582_s1  ;;  %2454 = vrot.lane.b32.xlu0 %v18672_v61, %s10582_s1  ;;  %v18680_v18 = vld [vmem:[#allocation53_spill] sm:$0xff]  ;;  %v18681_v61 = vld [vmem:[#allocation56_spill] sm:$0xff] }
 0x2ea   :  { %v12110_v11 = vpop.permute.xlu1 %2126  ;;  %v12112_v62 = vpop.permute.xlu0 %1698 }
 0x2eb   :  { %18674 = vst [vmem:[#allocation318_spill] sm:$0xff] %v12110_v11  ;;  %18675 = vst [vmem:[#allocation319_spill] sm:$0xff] %v12112_v62  ;;  %v18684_v62 = vld [vmem:[#allocation55_spill] sm:$0xff] }
 0x2ec   :  { %2456 = vrot.lane.b32.xlu1 %v18676_v19, %s10582_s1  ;;  %2458 = vrot.lane.b32.xlu0 %v18677_v27, %s10582_s1  ;;  %v18685_v19 = vld [vmem:[#allocation58_spill] sm:$0xff] }
 0x2ee   :  { %v12118_v60 = vpop.permute.xlu1 %1700  ;;  %v12120_v58 = vpop.permute.xlu0 %2128 }
 0x2ef   :  { %18678 = vst [vmem:[#allocation320_spill] sm:$0xff] %v12118_v60  ;;  %18679 = vst [vmem:[#allocation321_spill] sm:$0xff] %v12120_v58  ;;  %v18688_v58 = vld [vmem:[#allocation57_spill] sm:$0xff] }
 0x2f0   :  { %2460 = vrot.lane.b32.xlu1 %v18680_v18, %s10582_s1  ;;  %2462 = vrot.lane.b32.xlu0 %v18681_v61, %s10582_s1  ;;  %v18689_v18 = vld [vmem:[#allocation60_spill] sm:$0xff] }
 0x2f2   :  { %v12126_v59 = vpop.permute.xlu1 %2130  ;;  %v12128_v11 = vpop.permute.xlu0 %1702 }
 0x2f3   :  { %18682 = vst [vmem:[#allocation322_spill] sm:$0xff] %v12126_v59  ;;  %18683 = vst [vmem:[#allocation323_spill] sm:$0xff] %v12128_v11  ;;  %v18692_v11 = vld [vmem:[#allocation59_spill] sm:$0xff] }
 0x2f4   :  { %2464 = vrot.lane.b32.xlu1 %v18684_v62, %s10582_s1  ;;  %2466 = vrot.lane.b32.xlu0 %v18685_v19, %s10582_s1  ;;  %v18693_v62 = vld [vmem:[#allocation62_spill] sm:$0xff] }
 0x2f6   :  { %v12134_v27 = vpop.permute.xlu1 %1704  ;;  %v12136_v60 = vpop.permute.xlu0 %2132 }
 0x2f7   :  { %18686 = vst [vmem:[#allocation324_spill] sm:$0xff] %v12134_v27  ;;  %18687 = vst [vmem:[#allocation325_spill] sm:$0xff] %v12136_v60  ;;  %v18696_v60 = vld [vmem:[#allocation61_spill] sm:$0xff] }
 0x2f8   :  { %2468 = vrot.lane.b32.xlu1 %v18688_v58, %s10582_s1  ;;  %2470 = vrot.lane.b32.xlu0 %v18689_v18, %s10582_s1  ;;  %v18697_v58 = vld [vmem:[#allocation65_spill] sm:$0xff] }
 0x2fa   :  { %v12142_v61 = vpop.permute.xlu1 %2134  ;;  %v12144_v59 = vpop.permute.xlu0 %1706 }
 0x2fb   :  { %18690 = vst [vmem:[#allocation326_spill] sm:$0xff] %v12142_v61  ;;  %18691 = vst [vmem:[#allocation327_spill] sm:$0xff] %v12144_v59  ;;  %v18700_v59 = vld [vmem:[#allocation64_spill] sm:$0xff] }
 0x2fc   :  { %2472 = vrot.lane.b32.xlu1 %v18692_v11, %s10582_s1  ;;  %2474 = vrot.lane.b32.xlu0 %v18693_v62, %s10582_s1  ;;  %v18701_v11 = vld [vmem:[#allocation71_spill] sm:$0xff] }
 0x2fe   :  { %v12150_v19 = vpop.permute.xlu1 %1708  ;;  %v12152_v27 = vpop.permute.xlu0 %2136 }
 0x2ff   :  { %18694 = vst [vmem:[#allocation328_spill] sm:$0xff] %v12150_v19  ;;  %18695 = vst [vmem:[#allocation329_spill] sm:$0xff] %v12152_v27  ;;  %v18704_v27 = vld [vmem:[#allocation70_spill] sm:$0xff] }
 0x300   :  { %2476 = vrot.lane.b32.xlu1 %v18696_v60, %s10582_s1  ;;  %2478 = vrot.lane.b32.xlu0 %v18697_v58, %s10582_s1  ;;  %v18705_v60 = vld [vmem:[#allocation77_spill] sm:$0xff] }
 0x302   :  { %v12158_v18 = vpop.permute.xlu1 %2138  ;;  %v12160_v61 = vpop.permute.xlu0 %1710 }
 0x303   :  { %18698 = vst [vmem:[#allocation330_spill] sm:$0xff] %v12158_v18  ;;  %18699 = vst [vmem:[#allocation331_spill] sm:$0xff] %v12160_v61  ;;  %v18708_v61 = vld [vmem:[#allocation76_spill] sm:$0xff] }
 0x304   :  { %2480 = vrot.lane.b32.xlu1 %v18700_v59, %s10582_s1  ;;  %2482 = vrot.lane.b32.xlu0 %v18701_v11, %s10582_s1  ;;  %v18709_v59 = vld [vmem:[#allocation83_spill] sm:$0xff] }
 0x306   :  { %v12166_v62 = vpop.permute.xlu1 %1712  ;;  %v12168_v19 = vpop.permute.xlu0 %2140 }
 0x307   :  { %18702 = vst [vmem:[#allocation332_spill] sm:$0xff] %v12166_v62  ;;  %18703 = vst [vmem:[#allocation333_spill] sm:$0xff] %v12168_v19  ;;  %v18712_v19 = vld [vmem:[#allocation82_spill] sm:$0xff] }
 0x308   :  { %2484 = vrot.lane.b32.xlu1 %v18704_v27, %s10582_s1  ;;  %2486 = vrot.lane.b32.xlu0 %v18705_v60, %s10582_s1  ;;  %v18713_v27 = vld [vmem:[#allocation89_spill] sm:$0xff] }
 0x30a   :  { %v12174_v58 = vpop.permute.xlu1 %2142  ;;  %v12176_v18 = vpop.permute.xlu0 %1714 }
 0x30b   :  { %18706 = vst [vmem:[#allocation334_spill] sm:$0xff] %v12174_v58  ;;  %18707 = vst [vmem:[#allocation335_spill] sm:$0xff] %v12176_v18  ;;  %v18716_v18 = vld [vmem:[#allocation88_spill] sm:$0xff] }
 0x30c   :  { %2488 = vrot.lane.b32.xlu1 %v18708_v61, %s10582_s1  ;;  %2490 = vrot.lane.b32.xlu0 %v18709_v59, %s10582_s1  ;;  %v18717_v61 = vld [vmem:[#allocation95_spill] sm:$0xff] }
 0x30e   :  { %v12182_v11 = vpop.permute.xlu1 %1716  ;;  %v12184_v62 = vpop.permute.xlu0 %2144 }
 0x30f   :  { %18710 = vst [vmem:[#allocation336_spill] sm:$0xff] %v12182_v11  ;;  %18711 = vst [vmem:[#allocation337_spill] sm:$0xff] %v12184_v62  ;;  %v18719_v62 = vld [vmem:[#allocation94_spill] sm:$0xff] }
 0x310   :  { %2492 = vrot.lane.b32.xlu1 %v18712_v19, %s10582_s1  ;;  %2494 = vrot.lane.b32.xlu0 %v18713_v27, %s10582_s1  ;;  %v18720_v19 = vld [vmem:[#allocation101_spill] sm:$0xff] }
 0x312   :  { %v12190_v60 = vpop.permute.xlu1 %2146  ;;  %v12192_v58 = vpop.permute.xlu0 %2148 }
 0x313   :  { %18714 = vst [vmem:[#allocation338_spill] sm:$0xff] %v12190_v60  ;;  %18715 = vst [vmem:[#allocation339_spill] sm:$0xff] %v12192_v58  ;;  %v18722_v58 = vld [vmem:[#allocation100_spill] sm:$0xff] }
 0x314   :  { %2496 = vrot.lane.b32.xlu1 %v18716_v18, %s10582_s1  ;;  %2498 = vrot.lane.b32.xlu0 %v18717_v61, %s10582_s1  ;;  %v18727_v18 = vld [vmem:[#allocation112_spill] sm:$0xff] }
 0x316   :  { %v12198_v59 = vpop.permute.xlu1 %2150  ;;  %v12200_v11 = vpop.permute.xlu0 %2386 }
 0x317   :  { %18718 = vst [vmem:[#allocation340_spill] sm:$0xff] %v12198_v59 }
 0x318   :  { %2500 = vrot.lane.b32.xlu1 %v18719_v62, %s10582_s1  ;;  %2502 = vrot.lane.b32.xlu0 %v18720_v19, %s10582_s1 }
 0x31a   :  { %v12206_v27 = vpop.permute.xlu1 %2388  ;;  %v12208_v60 = vpop.permute.xlu0 %2390 }
 0x31b   :  { %18721 = vst [vmem:[#allocation341_spill] sm:$0xff] %v12206_v27 }
 0x31c   :  { %2504 = vrot.lane.b32.xlu1 %v18722_v58, %s10582_s1  ;;  %2506 = vrot.lane.b32.xlu0 %v11339_v24, %s10582_s1 }
 0x31e   :  { %v12214_v61 = vpop.permute.xlu1 %2392  ;;  %v12216_v59 = vpop.permute.xlu0 %2394 }
 0x31f   :  { %18723 = vst [vmem:[#allocation342_spill] sm:$0xff] %v12214_v61  ;;  %18724 = vst [vmem:[#allocation343_spill] sm:$0xff] %v12216_v59  ;;  %v18873_v59 = vld [vmem:[#allocation6_spill] sm:$0xff] }
 0x320   :  { %2508 = vrot.lane.b32.xlu1 %v11333_v14, %s10582_s1  ;;  %2510 = vrot.lane.b32.xlu0 %v11359_v20, %s10582_s1 }
 0x322   :  { %v12222_v19 = vpop.permute.xlu1 %2396  ;;  %v12224_v62 = vpop.permute.xlu0 %2398 }
 0x323   :  { %18725 = vst [vmem:[#allocation344_spill] sm:$0xff] %v12222_v19  ;;  %18726 = vst [vmem:[#allocation345_spill] sm:$0xff] %v12224_v62  ;;  %v18870_v19 = vld [vmem:[#allocation4_spill] sm:$0xff] }
 0x324   :  { %2512 = vrot.lane.b32.xlu1 %v18727_v18, %s10582_s1  ;;  %2514 = vrot.lane.b32.xlu0 %v11379_v15, %s10582_s1 }
 0x326   :  { %v12230_v24 = vpop.permute.xlu1 %2400  ;;  %v12232_v58 = vpop.permute.xlu0 %2402 }
 0x327   :  { %18728 = vst [vmem:[#allocation346_spill] sm:$0xff] %v12230_v24  ;;  %18729 = vst [vmem:[#allocation347_spill] sm:$0xff] %v12232_v58 }
 0x328   :  { %2516 = vrot.lane.b32.xlu1 %v11373_v29, %s10582_s1  ;;  %2518 = vrot.lane.b32.xlu0 %v11399_v22, %s10582_s1 }
 0x32a   :  { %v12238_v20 = vpop.permute.xlu1 %2404  ;;  %v12240_v14 = vpop.permute.xlu0 %2406 }
 0x32b   :  { %18730 = vst [vmem:[#allocation348_spill] sm:$0xff] %v12238_v20  ;;  %18731 = vst [vmem:[#allocation349_spill] sm:$0xff] %v12240_v14  ;;  %v18867_v14 = vld [vmem:[#allocation62_spill] sm:$0xff] }
 0x32c   :  { %2520 = vrot.lane.b32.xlu1 %v11393_v35, %s10582_s1  ;;  %2522 = vrot.lane.b32.xlu0 %v11419_v33, %s10582_s1 }
 0x32e   :  { %v12246_v15 = vpop.permute.xlu1 %2408  ;;  %v12248_v18 = vpop.permute.xlu0 %2410 }
 0x32f   :  { %18732 = vst [vmem:[#allocation350_spill] sm:$0xff] %v12246_v15  ;;  %18733 = vst [vmem:[#allocation351_spill] sm:$0xff] %v12248_v18 }
 0x330   :  { %2524 = vrot.lane.b32.xlu1 %v11413_v47, %s10582_s1  ;;  %2526 = vrot.lane.b32.xlu0 %v11439_v40, %s10582_s1 }
 0x332   :  { %v12254_v22 = vpop.permute.xlu1 %2412  ;;  %v12256_v29 = vpop.permute.xlu0 %2414 }
 0x333   :  { %18734 = vst [vmem:[#allocation352_spill] sm:$0xff] %v12254_v22  ;;  %18735 = vst [vmem:[#allocation353_spill] sm:$0xff] %v12256_v29  ;;  %v18839_v29 = vmov 0 }
 0x334   :  { %2528 = vrot.lane.b32.xlu1 %v11433_v50, %s10582_s1  ;;  %2530 = vrot.lane.b32.xlu0 %v11459_v49, %s10582_s1  ;;  %v18840_v29 = vsel %vm12675_vm3, 4294967295, %v18839_v29 }
 0x335   :  { %18841 = vst [vmem:[#allocation437_spill] sm:$0xff] %v18840_v29 }
 0x336   :  { %v12262_v33 = vpop.permute.xlu1 %2416  ;;  %v12264_v35 = vpop.permute.xlu0 %2418 }
 0x337   :  { %18736 = vst [vmem:[#allocation354_spill] sm:$0xff] %v12262_v33  ;;  %18737 = vst [vmem:[#allocation355_spill] sm:$0xff] %v12264_v35 }
 0x338   :  { %2532 = vrot.lane.b32.xlu1 %v11453_v63, %s10582_s1  ;;  %2534 = vrot.lane.b32.xlu0 %v11479_v56, %s10582_s1 }
 0x33a   :  { %v12270_v40 = vpop.permute.xlu1 %2420  ;;  %v12272_v47 = vpop.permute.xlu0 %2422 }
 0x33b   :  { %18738 = vst [vmem:[#allocation356_spill] sm:$0xff] %v12270_v40  ;;  %18739 = vst [vmem:[#allocation357_spill] sm:$0xff] %v12272_v47 }
 0x33c   :  { %2536 = vrot.lane.b32.xlu1 %v11473_v5, %s10582_s1  ;;  %2538 = vrot.lane.b32.xlu0 %v11499_v0, %s10582_s1 }
 0x33e   :  { %v12278_v49 = vpop.permute.xlu1 %2424  ;;  %v12280_v50 = vpop.permute.xlu0 %2426 }
 0x33f   :  { %18740 = vst [vmem:[#allocation358_spill] sm:$0xff] %v12278_v49  ;;  %18741 = vst [vmem:[#allocation359_spill] sm:$0xff] %v12280_v50  ;;  %v18812_v49 = vld [vmem:[#allocation44_spill] sm:$0xff] }
 0x340   :  { %2540 = vrot.lane.b32.xlu1 %v11493_v28, %s10582_s1  ;;  %2542 = vrot.lane.b32.xlu0 %v11519_v12, %s10582_s1 }
 0x342   :  { %v12286_v56 = vpop.permute.xlu1 %2428  ;;  %v12288_v63 = vpop.permute.xlu0 %2430 }
 0x343   :  { %18742 = vst [vmem:[#allocation360_spill] sm:$0xff] %v12286_v56  ;;  %18743 = vst [vmem:[#allocation361_spill] sm:$0xff] %v12288_v63  ;;  %v18800_v63 = vld [vmem:[#allocation38_spill] sm:$0xff] }
 0x344   :  { %2544 = vrot.lane.b32.xlu1 %v11513_v42, %s10582_s1  ;;  %2546 = vrot.lane.b32.xlu0 %v11539_v36, %s10582_s1 }
 0x346   :  { %v12294_v0 = vpop.permute.xlu1 %2432  ;;  %v12296_v5 = vpop.permute.xlu0 %2434 }
 0x347   :  { %18744 = vst [vmem:[#allocation362_spill] sm:$0xff] %v12294_v0  ;;  %18745 = vst [vmem:[#allocation363_spill] sm:$0xff] %v12296_v5  ;;  %v18796_v0 = vld [vmem:[#allocation36_spill] sm:$0xff] }
 0x348   :  { %2548 = vrot.lane.b32.xlu1 %v11533_v54, %s10582_s1  ;;  %2550 = vrot.lane.b32.xlu0 %v11559_v43, %s10582_s1 }
 0x34a   :  { %v12302_v12 = vpop.permute.xlu1 %2436  ;;  %v12304_v28 = vpop.permute.xlu0 %2438 }
 0x34b   :  { %18746 = vst [vmem:[#allocation364_spill] sm:$0xff] %v12302_v12  ;;  %18747 = vst [vmem:[#allocation365_spill] sm:$0xff] %v12304_v28 }
 0x34c   :  { %2552 = vrot.lane.b32.xlu1 %v11553_v8, %s10582_s1  ;;  %2554 = vrot.lane.b32.xlu0 %v11579_v57, %s10582_s1 }
 0x34e   :  { %v12310_v36 = vpop.permute.xlu1 %2440  ;;  %v12312_v42 = vpop.permute.xlu0 %2442 }
 0x34f   :  { %18748 = vst [vmem:[#allocation366_spill] sm:$0xff] %v12310_v36  ;;  %18749 = vst [vmem:[#allocation367_spill] sm:$0xff] %v12312_v42 }
 0x350   :  { %2556 = vrot.lane.b32.xlu1 %v11573_v13, %s10582_s1  ;;  %2558 = vrot.lane.b32.xlu0 %v11599_v21, %s10582_s1 }
 0x352   :  { %v12318_v43 = vpop.permute.xlu1 %2444  ;;  %v12320_v54 = vpop.permute.xlu0 %2446 }
 0x353   :  { %18750 = vst [vmem:[#allocation368_spill] sm:$0xff] %v12318_v43  ;;  %18751 = vst [vmem:[#allocation369_spill] sm:$0xff] %v12320_v54 }
 0x354   :  { %2560 = vrot.lane.b32.xlu1 %v11593_v10, %s10582_s1  ;;  %2562 = vrot.lane.b32.xlu0 %v11619_v9, %s10582_s1 }
 0x356   :  { %v12326_v57 = vpop.permute.xlu1 %2448  ;;  %v12328_v8 = vpop.permute.xlu0 %2450 }
 0x357   :  { %18752 = vst [vmem:[#allocation370_spill] sm:$0xff] %v12326_v57  ;;  %18753 = vst [vmem:[#allocation371_spill] sm:$0xff] %v12328_v8 }
 0x358   :  { %2564 = vrot.lane.b32.xlu1 %v11613_v26, %s10582_s1  ;;  %2566 = vrot.lane.b32.xlu0 %v11639_v16, %s10582_s1 }
 0x35a   :  { %v12334_v21 = vpop.permute.xlu1 %2452  ;;  %v12336_v13 = vpop.permute.xlu0 %2454 }
 0x35b   :  { %18754 = vst [vmem:[#allocation372_spill] sm:$0xff] %v12334_v21  ;;  %18755 = vst [vmem:[#allocation373_spill] sm:$0xff] %v12336_v13  ;;  %v18775_v13 = vld [vmem:[#allocation15_spill] sm:$0xff] }
 0x35c   :  { %2568 = vrot.lane.b32.xlu1 %v11633_v25, %s10582_s1  ;;  %2570 = vrot.lane.b32.xlu0 %v11662_v17, %s10582_s1 }
 0x35e   :  { %v12342_v9 = vpop.permute.xlu1 %2456  ;;  %v12344_v10 = vpop.permute.xlu0 %2458 }
 0x35f   :  { %18756 = vst [vmem:[#allocation374_spill] sm:$0xff] %v12342_v9  ;;  %18757 = vst [vmem:[#allocation375_spill] sm:$0xff] %v12344_v10  ;;  %v18772_v10 = vld [vmem:[#allocation16_spill] sm:$0xff] }
 0x360   :  { %2572 = vrot.lane.b32.xlu1 %v11653_v23, %s10582_s1  ;;  %2574 = vrot.lane.b32.xlu0 %v11684_v4, %s10582_s1 }
 0x362   :  { %v12350_v16 = vpop.permute.xlu1 %2460  ;;  %v12352_v26 = vpop.permute.xlu0 %2462 }
 0x363   :  { %18758 = vst [vmem:[#allocation376_spill] sm:$0xff] %v12350_v16  ;;  %18759 = vst [vmem:[#allocation377_spill] sm:$0xff] %v12352_v26 }
 0x364   :  { %2576 = vrot.lane.b32.xlu1 %v11678_v7, %s10582_s1  ;;  %2578 = vrot.lane.b32.xlu0 %v11704_v6, %s10582_s1  ;;  %v18764_v6 = vld [vmem:[#allocation12_spill] sm:$0xff] }
 0x366   :  { %v12358_v17 = vpop.permute.xlu1 %2464  ;;  %v12360_v25 = vpop.permute.xlu0 %2466 }
 0x367   :  { %18760 = vst [vmem:[#allocation378_spill] sm:$0xff] %v12358_v17  ;;  %18761 = vst [vmem:[#allocation379_spill] sm:$0xff] %v12360_v25 }
 0x368   :  { %2580 = vrot.lane.b32.xlu1 %v11698_v3, %s10582_s1  ;;  %2582 = vrot.lane.b32.xlu0 %v12108_v1, %s10582_s1  ;;  %v18767_v3 = vld [vmem:[#allocation11_spill] sm:$0xff]  ;;  %v18768_v1 = vld [vmem:[#allocation14_spill] sm:$0xff] }
 0x36a   :  { %v12366_v4 = vpop.permute.xlu1 %2468  ;;  %v12368_v23 = vpop.permute.xlu0 %2470 }
 0x36b   :  { %18762 = vst [vmem:[#allocation380_spill] sm:$0xff] %v12366_v4  ;;  %18763 = vst [vmem:[#allocation381_spill] sm:$0xff] %v12368_v23 }
 0x36c   :  { %2584 = vrot.lane.b32.xlu1 %v12102_v2, %s10582_s1  ;;  %2804 = vrot.lane.b32.xlu0 %v18764_v6, %s10583_s27  ;;  %v18771_v2 = vld [vmem:[#allocation13_spill] sm:$0xff] }
 0x36e   :  { %v12374_v7 = vpop.permute.xlu1 %2472  ;;  %v12376_v17 = vpop.permute.xlu0 %2474 }
 0x36f   :  { %18765 = vst [vmem:[#allocation12_spill] sm:$0xff] %v12374_v7  ;;  %18766 = vst [vmem:[#allocation382_spill] sm:$0xff] %v12376_v17 }
 0x370   :  { %2806 = vrot.lane.b32.xlu1 %v18767_v3, %s10583_s27  ;;  %2808 = vrot.lane.b32.xlu0 %v18768_v1, %s10583_s27  ;;  %v18884_v3 = vld [vmem:[#allocation80_spill] sm:$0xff] }
 0x372   :  { %v12382_v16 = vpop.permute.xlu1 %2476  ;;  %v12384_v26 = vpop.permute.xlu0 %2478 }
 0x373   :  { %18769 = vst [vmem:[#allocation14_spill] sm:$0xff] %v12382_v16  ;;  %18770 = vst [vmem:[#allocation383_spill] sm:$0xff] %v12384_v26 }
 0x374   :  { %2810 = vrot.lane.b32.xlu1 %v18771_v2, %s10583_s27  ;;  %2812 = vrot.lane.b32.xlu0 %v18772_v10, %s10583_s27 }
 0x376   :  { %v12390_v9 = vpop.permute.xlu1 %2480  ;;  %v12392_v21 = vpop.permute.xlu0 %2482 }
 0x377   :  { %18773 = vst [vmem:[#allocation384_spill] sm:$0xff] %v12390_v9  ;;  %18774 = vst [vmem:[#allocation385_spill] sm:$0xff] %v12392_v21 }
 0x378   :  { %2814 = vrot.lane.b32.xlu1 %v18775_v13, %s10583_s27  ;;  %2816 = vrot.lane.b32.xlu0 %v10963_v31, %s10583_s27 }
 0x37a   :  { %v12398_v8 = vpop.permute.xlu1 %2484  ;;  %v12400_v57 = vpop.permute.xlu0 %2486 }
 0x37b   :  { %18776 = vst [vmem:[#allocation386_spill] sm:$0xff] %v12398_v8  ;;  %18777 = vst [vmem:[#allocation387_spill] sm:$0xff] %v12400_v57  ;;  %v18808_v57 = vld [vmem:[#allocation42_spill] sm:$0xff] }
 0x37c   :  { %2818 = vrot.lane.b32.xlu1 %v10956_v30, %s10583_s27  ;;  %2820 = vrot.lane.b32.xlu0 %v10974_v34, %s10583_s27 }
 0x37e   :  { %v12406_v43 = vpop.permute.xlu1 %2488  ;;  %v12408_v54 = vpop.permute.xlu0 %2490 }
 0x37f   :  { %18778 = vst [vmem:[#allocation388_spill] sm:$0xff] %v12406_v43  ;;  %18779 = vst [vmem:[#allocation389_spill] sm:$0xff] %v12408_v54  ;;  %v18804_v43 = vld [vmem:[#allocation40_spill] sm:$0xff] }
 0x380   :  { %2822 = vrot.lane.b32.xlu1 %v10965_v32, %s10583_s27  ;;  %2824 = vrot.lane.b32.xlu0 %v10984_v38, %s10583_s27 }
 0x382   :  { %v12414_v42 = vpop.permute.xlu1 %2492  ;;  %v12416_v36 = vpop.permute.xlu0 %2494 }
 0x383   :  { %18780 = vst [vmem:[#allocation390_spill] sm:$0xff] %v12414_v42  ;;  %18781 = vst [vmem:[#allocation391_spill] sm:$0xff] %v12416_v36 }
 0x384   :  { %2826 = vrot.lane.b32.xlu1 %v10977_v37, %s10583_s27  ;;  %2828 = vrot.lane.b32.xlu0 %v10995_v41, %s10583_s27 }
 0x386   :  { %v12422_v12 = vpop.permute.xlu1 %2496  ;;  %v12424_v28 = vpop.permute.xlu0 %2498 }
 0x387   :  { %18782 = vst [vmem:[#allocation392_spill] sm:$0xff] %v12422_v12  ;;  %18783 = vst [vmem:[#allocation393_spill] sm:$0xff] %v12424_v28 }
 0x388   :  { %2830 = vrot.lane.b32.xlu1 %v10986_v39, %s10583_s27  ;;  %2832 = vrot.lane.b32.xlu0 %v11005_v45, %s10583_s27 }
 0x38a   :  { %v12430_v5 = vpop.permute.xlu1 %2500  ;;  %v12432_v42 = vpop.permute.xlu0 %2502 }
 0x38b   :  { %18784 = vst [vmem:[#allocation394_spill] sm:$0xff] %v12430_v5  ;;  %18785 = vst [vmem:[#allocation395_spill] sm:$0xff] %v12432_v42 }
 0x38c   :  { %2834 = vrot.lane.b32.xlu1 %v10998_v44, %s10583_s27  ;;  %2836 = vrot.lane.b32.xlu0 %v11016_v48, %s10583_s27 }
 0x38e   :  { %v12438_v36 = vpop.permute.xlu1 %2504  ;;  %v12440_v12 = vpop.permute.xlu0 %2506 }
 0x38f   :  { %18786 = vst [vmem:[#allocation396_spill] sm:$0xff] %v12438_v36  ;;  %18787 = vst [vmem:[#allocation397_spill] sm:$0xff] %v12440_v12  ;;  %v18792_v12 = vld [vmem:[#allocation34_spill] sm:$0xff] }
 0x390   :  { %2838 = vrot.lane.b32.xlu1 %v11007_v46, %s10583_s27  ;;  %2840 = vrot.lane.b32.xlu0 %v11026_v52, %s10583_s27 }
 0x392   :  { %v12446_v28 = vpop.permute.xlu1 %2508  ;;  %v12448_v5 = vpop.permute.xlu0 %2510 }
 0x393   :  { %18788 = vst [vmem:[#allocation398_spill] sm:$0xff] %v12446_v28  ;;  %18789 = vst [vmem:[#allocation399_spill] sm:$0xff] %v12448_v5  ;;  %v18795_v5 = vld [vmem:[#allocation33_spill] sm:$0xff] }
 0x394   :  { %2842 = vrot.lane.b32.xlu1 %v11019_v51, %s10583_s27  ;;  %2844 = vrot.lane.b32.xlu0 %v11037_v55, %s10583_s27 }
 0x396   :  { %v12454_v42 = vpop.permute.xlu1 %2512  ;;  %v12456_v36 = vpop.permute.xlu0 %2514 }
 0x397   :  { %18790 = vst [vmem:[#allocation400_spill] sm:$0xff] %v12454_v42  ;;  %18791 = vst [vmem:[#allocation401_spill] sm:$0xff] %v12456_v36  ;;  %v18799_v36 = vld [vmem:[#allocation35_spill] sm:$0xff] }
 0x398   :  { %2846 = vrot.lane.b32.xlu1 %v11028_v53, %s10583_s27  ;;  %2848 = vrot.lane.b32.xlu0 %v18792_v12, %s10583_s27 }
 0x39a   :  { %v12462_v54 = vpop.permute.xlu1 %2516  ;;  %v12464_v28 = vpop.permute.xlu0 %2518 }
 0x39b   :  { %18793 = vst [vmem:[#allocation402_spill] sm:$0xff] %v12462_v54  ;;  %18794 = vst [vmem:[#allocation403_spill] sm:$0xff] %v12464_v28  ;;  %v18803_v28 = vld [vmem:[#allocation37_spill] sm:$0xff] }
 0x39c   :  { %2850 = vrot.lane.b32.xlu1 %v18795_v5, %s10583_s27  ;;  %2852 = vrot.lane.b32.xlu0 %v18796_v0, %s10583_s27 }
 0x39e   :  { %v12470_v56 = vpop.permute.xlu1 %2520  ;;  %v12472_v42 = vpop.permute.xlu0 %2522 }
 0x39f   :  { %18797 = vst [vmem:[#allocation404_spill] sm:$0xff] %v12470_v56  ;;  %18798 = vst [vmem:[#allocation405_spill] sm:$0xff] %v12472_v42  ;;  %v18807_v42 = vld [vmem:[#allocation39_spill] sm:$0xff] }
 0x3a0   :  { %2854 = vrot.lane.b32.xlu1 %v18799_v36, %s10583_s27  ;;  %2856 = vrot.lane.b32.xlu0 %v18800_v63, %s10583_s27 }
 0x3a2   :  { %v12478_v50 = vpop.permute.xlu1 %2524  ;;  %v12480_v54 = vpop.permute.xlu0 %2526 }
 0x3a3   :  { %18801 = vst [vmem:[#allocation406_spill] sm:$0xff] %v12478_v50  ;;  %18802 = vst [vmem:[#allocation407_spill] sm:$0xff] %v12480_v54  ;;  %v18811_v54 = vld [vmem:[#allocation41_spill] sm:$0xff] }
 0x3a4   :  { %2858 = vrot.lane.b32.xlu1 %v18803_v28, %s10583_s27  ;;  %2860 = vrot.lane.b32.xlu0 %v18804_v43, %s10583_s27 }
 0x3a6   :  { %v12486_v8 = vpop.permute.xlu1 %2528  ;;  %v12488_v56 = vpop.permute.xlu0 %2530 }
 0x3a7   :  { %18805 = vst [vmem:[#allocation408_spill] sm:$0xff] %v12486_v8  ;;  %18806 = vst [vmem:[#allocation409_spill] sm:$0xff] %v12488_v56  ;;  %v18815_v56 = vld [vmem:[#allocation43_spill] sm:$0xff] }
 0x3a8   :  { %2862 = vrot.lane.b32.xlu1 %v18807_v42, %s10583_s27  ;;  %2864 = vrot.lane.b32.xlu0 %v18808_v57, %s10583_s27  ;;  %v18872_v57 = vld [vmem:[#allocation69_spill] sm:$0xff]  ;;  %v18875_v42 = vld [vmem:[#allocation79_spill] sm:$0xff] }
 0x3aa   :  { %v12494_v21 = vpop.permute.xlu1 %2532  ;;  %v12496_v50 = vpop.permute.xlu0 %2534 }
 0x3ab   :  { %18809 = vst [vmem:[#allocation410_spill] sm:$0xff] %v12494_v21  ;;  %18810 = vst [vmem:[#allocation411_spill] sm:$0xff] %v12496_v50 }
 0x3ac   :  { %2866 = vrot.lane.b32.xlu1 %v18811_v54, %s10583_s27  ;;  %2868 = vrot.lane.b32.xlu0 %v18812_v49, %s10583_s27 }
 0x3ae   :  { %v12502_v40 = vpop.permute.xlu1 %2536  ;;  %v12504_v8 = vpop.permute.xlu0 %2538 }
 0x3af   :  { %18813 = vst [vmem:[#allocation412_spill] sm:$0xff] %v12502_v40  ;;  %18814 = vst [vmem:[#allocation413_spill] sm:$0xff] %v12504_v8 }
 0x3b0   :  { %2870 = vrot.lane.b32.xlu1 %v18815_v56, %s10583_s27  ;;  %3238 = vrot.lane.b32.xlu0 %v18768_v1, %s10584_s28 }
 0x3b2   :  { %v12510_v21 = vpop.permute.xlu1 %2540  ;;  %v12512_v50 = vpop.permute.xlu0 %2542 }
 0x3b3   :  { %18816 = vst [vmem:[#allocation414_spill] sm:$0xff] %v12510_v21  ;;  %18817 = vst [vmem:[#allocation415_spill] sm:$0xff] %v12512_v50 }
 0x3b4   :  { %3242 = vrot.lane.b32.xlu1 %v18772_v10, %s10584_s28  ;;  %3240 = vrot.lane.b32.xlu0 %v18771_v2, %s10584_s28 }
 0x3b6   :  { %v12518_v40 = vpop.permute.xlu1 %2544  ;;  %v12520_v8 = vpop.permute.xlu0 %2546 }
 0x3b7   :  { %18818 = vst [vmem:[#allocation416_spill] sm:$0xff] %v12518_v40  ;;  %18819 = vst [vmem:[#allocation417_spill] sm:$0xff] %v12520_v8 }
 0x3b8   :  { %3244 = vrot.lane.b32.xlu1 %v18775_v13, %s10584_s28  ;;  %3672 = vrot.lane.b32.xlu0 %v18772_v10, %s10585_s30 }
 0x3ba   :  { %v12526_v21 = vpop.permute.xlu1 %2548  ;;  %v12528_v50 = vpop.permute.xlu0 %2550 }
 0x3bb   :  { %18820 = vst [vmem:[#allocation418_spill] sm:$0xff] %v12526_v21  ;;  %18821 = vst [vmem:[#allocation419_spill] sm:$0xff] %v12528_v50  ;;  %v9647_v50 = vld [vmem:[%s17984_s0 + $0x1c8] sm:$0xff]  }
 0x3bc   :  { %3676 = vrot.lane.b32.xlu1 %v10963_v31, %s10585_s30  ;;  %3674 = vrot.lane.b32.xlu0 %v18775_v13, %s10585_s30  ;;  %v9565_v35 = vunpack.c.l.bf16 %v9647_v50 }
 0x3be   :  { %v12534_v40 = vpop.permute.xlu1 %2552  ;;  %v12536_v8 = vpop.permute.xlu0 %2554  ;;  %10049 = vmatprep.mubr.msk.f32.mxu0 %vm306_vm0, %v9565_v35 }
 0x3bf   :  { %18822 = vst [vmem:[#allocation420_spill] sm:$0xff] %v12534_v40  ;;  %18823 = vst [vmem:[#allocation421_spill] sm:$0xff] %v12536_v8 }
 0x3c0   :  { %3678 = vrot.lane.b32.xlu1 %v10956_v30, %s10585_s30  ;;  %3246 = vrot.lane.b32.xlu0 %v10963_v31, %s10584_s28 }
 0x3c2   :  { %v12542_v47 = vpop.permute.xlu1 %2556  ;;  %v12544_v21 = vpop.permute.xlu0 %2558 }
 0x3c3   :  { %18824 = vst [vmem:[#allocation422_spill] sm:$0xff] %v12542_v47  ;;  %18825 = vst [vmem:[#allocation423_spill] sm:$0xff] %v12544_v21 }
 0x3c4   :  { %3250 = vrot.lane.b32.xlu1 %v10974_v34, %s10584_s28  ;;  %4106 = vrot.lane.b32.xlu0 %v10963_v31, %s10586_s14  ;;  %v18874_v31 = vld [vmem:[#allocation72_spill] sm:$0xff] }
 0x3c5   :  { %v1828_v10 = vadd.f32 %v18874_v31, %v18873_v59  ;;  %v18878_v31 = vld [vmem:[#allocation65_spill] sm:$0xff] }
 0x3c6   :  { %v12550_v40 = vpop.permute.xlu1 %2560  ;;  %v12552_v8 = vpop.permute.xlu0 %2562 }
 0x3c7   :  { %18826 = vst [vmem:[#allocation424_spill] sm:$0xff] %v12550_v40  ;;  %18827 = vst [vmem:[#allocation425_spill] sm:$0xff] %v12552_v8  ;;  %v9566_v8 = vunpack.c.h.bf16 %v9647_v50 }
 0x3c8   :  { %4110 = vrot.lane.b32.xlu1 %v10974_v34, %s10586_s14  ;;  %3248 = vrot.lane.b32.xlu0 %v10956_v30, %s10584_s28 }
 0x3c9   :  { %10050 = vmatmul.mubr.msk.f32.gmra.mrb[114].mxu0 %vm306_vm0, %v9566_v8  ;;  %v9649_v8 = vld [vmem:[%s17984_s0 + $0x1d8] sm:$0xff]  }
 0x3ca   :  { %v12558_v47 = vpop.permute.xlu1 %2564  ;;  %v12560_v21 = vpop.permute.xlu0 %2566 }
 0x3cb   :  { %18828 = vst [vmem:[#allocation426_spill] sm:$0xff] %v12558_v47  ;;  %18829 = vst [vmem:[#allocation427_spill] sm:$0xff] %v12560_v21  ;;  %v9648_v47 = vld [vmem:[%s17984_s0 + $0x1d0] sm:$0xff]  }
 0x3cc   :  { %3252 = vrot.lane.b32.xlu1 %v10965_v32, %s10584_s28  ;;  %4108 = vrot.lane.b32.xlu0 %v10956_v30, %s10586_s14  ;;  %v9569_v21 = vunpack.c.l.bf16 %v9648_v47  ;;  %v9570_v50 = vunpack.c.h.bf16 %v9648_v47  ;;  %v9574_v47 = vunpack.c.h.bf16 %v9649_v8  ;;  %v18871_v30 = vld [vmem:[#allocation66_spill] sm:$0xff] }
 0x3cd   :  { %v1826_v13 = vadd.f32 %v18871_v30, %v18870_v19  ;;  %v18876_v30 = vld [vmem:[#allocation75_spill] sm:$0xff] }
 0x3ce   :  { %v12570_v40 = vpop.permute.xlu1 %2568  ;;  %v12572_v9 = vpop.permute.xlu0 %2570  ;;  %10052 = vmatprep.mubr.msk.f32.mxu0 %vm306_vm0, %v9569_v21  ;;  %v2262_v19 = vadd.f32 %v18876_v30, %v1828_v10 }
 0x3cf   :  { %18830 = vst [vmem:[#allocation428_spill] sm:$0xff] %v12570_v40  ;;  %18831 = vst [vmem:[#allocation429_spill] sm:$0xff] %v12572_v9  ;;  %10053 = vmatmul.mubr.msk.f32.gmra.mrb[116].mxu0 %vm306_vm0, %v9570_v50  ;;  %v9573_v9 = vunpack.c.l.bf16 %v9649_v8  ;;  %v9650_v50 = vld [vmem:[%s17984_s0 + $0x1e0] sm:$0xff]  }
 0x3d0   :  { %4112 = vrot.lane.b32.xlu1 %v10965_v32, %s10586_s14  ;;  %3680 = vrot.lane.b32.xlu0 %v10974_v34, %s10585_s30  ;;  %v9578_v8 = vunpack.c.h.bf16 %v9650_v50 }
 0x3d1   :  { %10055 = vmatprep.mubr.msk.f32.mxu0 %vm306_vm0, %v9573_v9 }
 0x3d2   :  { %v12583_v35 = vpop.permute.xlu1 %2572  ;;  %v12585_v40 = vpop.permute.xlu0 %2574 }
 0x3d3   :  { %18832 = vst [vmem:[#allocation430_spill] sm:$0xff] %v12583_v35  ;;  %18833 = vst [vmem:[#allocation431_spill] sm:$0xff] %v12585_v40  ;;  %10056 = vmatmul.mubr.msk.f32.gmra.mrb[118].mxu0 %vm306_vm0, %v9574_v47  ;;  %v9577_v40 = vunpack.c.l.bf16 %v9650_v50  ;;  %v9651_v47 = vld [vmem:[%s17984_s0 + $0x1e8] sm:$0xff]  }
 0x3d4   :  { %3684 = vrot.lane.b32.xlu1 %v10984_v38, %s10585_s30  ;;  %4540 = vrot.lane.b32.xlu0 %v10974_v34, %s10587_s22  ;;  %v9582_v50 = vunpack.c.h.bf16 %v9651_v47  ;;  %v18868_v34 = vld [vmem:[#allocation59_spill] sm:$0xff] }
 0x3d5   :  { %10058 = vmatprep.mubr.msk.f32.mxu0 %vm306_vm0, %v9577_v40 }
 0x3d6   :  { %v12596_v21 = vpop.permute.xlu1 %2576  ;;  %v12598_v35 = vpop.permute.xlu0 %2578 }
 0x3d7   :  { %18834 = vst [vmem:[#allocation432_spill] sm:$0xff] %v12596_v21  ;;  %18835 = vst [vmem:[#allocation433_spill] sm:$0xff] %v12598_v35  ;;  %10059 = vmatmul.mubr.msk.f32.gmra.mrb[120].mxu0 %vm306_vm0, %v9578_v8  ;;  %v9581_v35 = vunpack.c.l.bf16 %v9651_v47  ;;  %v9652_v8 = vld [vmem:[%s17984_s0 + $0x1f0] sm:$0xff]  }
 0x3d8   :  { %4544 = vrot.lane.b32.xlu1 %v10984_v38, %s10587_s22  ;;  %3682 = vrot.lane.b32.xlu0 %v10965_v32, %s10585_s30  ;;  %v9586_v47 = vunpack.c.h.bf16 %v9652_v8 }
 0x3d9   :  { %10061 = vmatprep.mubr.msk.f32.mxu0 %vm306_vm0, %v9581_v35 }
 0x3da   :  { %v12609_v9 = vpop.permute.xlu1 %2580  ;;  %v12611_v21 = vpop.permute.xlu0 %2582 }
 0x3db   :  { %18836 = vst [vmem:[#allocation434_spill] sm:$0xff] %v12609_v9  ;;  %18837 = vst [vmem:[#allocation435_spill] sm:$0xff] %v12611_v21  ;;  %10062 = vmatmul.mubr.msk.f32.gmra.mrb[122].mxu0 %vm306_vm0, %v9582_v50  ;;  %v9585_v21 = vunpack.c.l.bf16 %v9652_v8  ;;  %v9653_v50 = vld [vmem:[%s17984_s0 + $0x1f8] sm:$0xff]   ;;  %s10588_s0 = smov 38  }
 0x3dc   :  { %3686 = vrot.lane.b32.xlu1 %v10977_v37, %s10585_s30  ;;  %4542 = vrot.lane.b32.xlu0 %v10965_v32, %s10587_s22  ;;  %v9589_v16 = vunpack.c.l.bf16 %v9653_v50  ;;  %v9590_v8 = vunpack.c.h.bf16 %v9653_v50  ;;  %v5684_v50 = vld [vmem:[%s17985_s3 + $0x8] sm:$0x3] }
 0x3dd   :  { %10064 = vmatprep.mubr.msk.f32.mxu0 %vm306_vm0, %v9585_v21 }
 0x3de   :  { %v12622_v40 = vpop.permute.xlu1 %2584  ;;  %v12624_v9 = vpop.permute.xlu0 %2804 }
 0x3df   :  { %18838 = vst [vmem:[#allocation436_spill] sm:$0xff] %v12622_v40  ;;  %10065 = vmatmul.mubr.msk.f32.gmra.mrb[124].mxu0 %vm306_vm0, %v9586_v47 }
 0x3e0   :  { %4546 = vrot.lane.b32.xlu1 %v10977_v37, %s10587_s22  ;;  %3254 = vrot.lane.b32.xlu0 %v10984_v38, %s10584_s28 }
 0x3e1   :  { %10067 = vmatprep.mubr.msk.f32.mxu0 %vm306_vm0, %v9589_v16  ;;  %v5683_v16 = vld [vmem:[%s17985_s3] sm:$0xff] }
 0x3e2   :  { %v12635_v35 = vpop.permute.xlu1 %2806  ;;  %v12637_v40 = vpop.permute.xlu0 %2808 }
 0x3e3   :  { %10068 = vmatmul.mubr.msk.f32.gmra.mrb[126].mxu0 %vm306_vm0, %v9590_v8  ;;  %v10211_v8 = vpack.c.bf16 %v5684_v50, %v5683_v16 }
 0x3e4   :  { %3258 = vrot.lane.b32.xlu1 %v10995_v41, %s10584_s28  ;;  %4114 = vrot.lane.b32.xlu0 %v10984_v38, %s10586_s14 }
 0x3e5   :  { %10213 = vmatprep.subr.msk.bf16.mxu0 %vm12675_vm3, %v10211_v8  ;;  %10433 = vmatprep.subr.msk.bf16.mxu1 %vm12675_vm3, %v10211_v8 }
 0x3e6   :  { %v12648_v21 = vpop.permute.xlu1 %2810  ;;  %v12650_v26 = vpop.permute.xlu0 %2812  ;;  %10216 = vmatpush3.bf16.msk.msra.mxu0 %vm12675_vm3, %v10211_v8  ;;  %10434 = vmatpush3.bf16.msk.msra.mxu1 %vm12675_vm3, %v10211_v8 }
 0x3e8   :  { %4118 = vrot.lane.b32.xlu1 %v10995_v41, %s10586_s14  ;;  %4974 = vrot.lane.b32.xlu0 %v10984_v38, %s10588_s0 }
 0x3ea   :  { %v12657_v47 = vpop.permute.xlu1 %2814  ;;  %v12659_v17 = vpop.permute.xlu0 %2816 }
 0x3ec   :  { %4978 = vrot.lane.b32.xlu1 %v10995_v41, %s10588_s0  ;;  %3256 = vrot.lane.b32.xlu0 %v10977_v37, %s10584_s28 }
 0x3ee   :  { %v12671_v33 = vpop.permute.xlu1 %2818  ;;  %v12673_v22 = vpop.permute.xlu0 %2820 }
 0x3f0   :  { %3260 = vrot.lane.b32.xlu1 %v10986_v39, %s10584_s28  ;;  %4116 = vrot.lane.b32.xlu0 %v10977_v37, %s10586_s14 }
 0x3f2   :  { %v12691_v16 = vpop.permute.xlu1 %2822  ;;  %v12693_v50 = vpop.permute.xlu0 %2824 }
 0x3f3   :  { %18842 = vst [vmem:[#allocation438_spill] sm:$0xff] %v12691_v16 }
 0x3f4   :  { %4120 = vrot.lane.b32.xlu1 %v10986_v39, %s10586_s14  ;;  %4976 = vrot.lane.b32.xlu0 %v10977_v37, %s10588_s0 }
 0x3f6   :  { %v12699_v18 = vpop.permute.xlu1 %2826  ;;  %v12701_v7 = vpop.permute.xlu0 %2828 }
 0x3f7   :  { %18843 = vst [vmem:[#allocation439_spill] sm:$0xff] %v12699_v18  ;;  %18844 = vst [vmem:[#allocation440_spill] sm:$0xff] %v12701_v7 }
 0x3f8   :  { %4980 = vrot.lane.b32.xlu1 %v10986_v39, %s10588_s0  ;;  %3688 = vrot.lane.b32.xlu0 %v10995_v41, %s10585_s30 }
 0x3fa   :  { %v12707_v8 = vpop.permute.xlu1 %2830  ;;  %v12709_v29 = vpop.permute.xlu0 %2832 }
 0x3fb   :  { %18845 = vst [vmem:[#allocation441_spill] sm:$0xff] %v12707_v8  ;;  %18846 = vst [vmem:[#allocation442_spill] sm:$0xff] %v12709_v29  ;;  %v2260_v29 = vadd.f32 %v18872_v57, %v1826_v13  ;;  %v18877_v57 = vld [vmem:[#allocation87_spill] sm:$0xff] }
 0x3fc   :  { %3692 = vrot.lane.b32.xlu1 %v11005_v45, %s10585_s30  ;;  %4548 = vrot.lane.b32.xlu0 %v10995_v41, %s10587_s22  ;;  %v2696_v61 = vadd.f32 %v18877_v57, %v2262_v19  ;;  %v18883_v57 = vld [vmem:[#allocation5_spill] sm:$0xff] }
 0x3fd   :  { %v2694_v18 = vadd.f32 %v18875_v42, %v2260_v29 }
 0x3fe   :  { %v12715_v4 = vpop.permute.xlu1 %2834  ;;  %v12717_v23 = vpop.permute.xlu0 %2836  ;;  %v3130_v59 = vadd.f32 %v12637_v40, %v2696_v61 }
 0x3ff   :  { %18847 = vst [vmem:[#allocation443_spill] sm:$0xff] %v12715_v4  ;;  %18848 = vst [vmem:[#allocation444_spill] sm:$0xff] %v12717_v23  ;;  %v18869_v4 = vld [vmem:[#allocation61_spill] sm:$0xff] }
 0x400   :  { %4552 = vrot.lane.b32.xlu1 %v11005_v45, %s10587_s22  ;;  %3690 = vrot.lane.b32.xlu0 %v10986_v39, %s10585_s30 }
 0x402   :  { %v12723_v25 = vpop.permute.xlu1 %2838  ;;  %v12725_v15 = vpop.permute.xlu0 %2840 }
 0x403   :  { %18849 = vst [vmem:[#allocation445_spill] sm:$0xff] %v12723_v25  ;;  %18850 = vst [vmem:[#allocation446_spill] sm:$0xff] %v12725_v15 }
 0x404   :  { %3694 = vrot.lane.b32.xlu1 %v10998_v44, %s10585_s30  ;;  %4550 = vrot.lane.b32.xlu0 %v10986_v39, %s10587_s22 }
 0x406   :  { %v12731_v41 = vpop.permute.xlu1 %2842  ;;  %v12733_v20 = vpop.permute.xlu0 %2844 }
 0x407   :  { %18851 = vst [vmem:[#allocation447_spill] sm:$0xff] %v12731_v41  ;;  %18852 = vst [vmem:[#allocation448_spill] sm:$0xff] %v12733_v20 }
 0x408   :  { %4554 = vrot.lane.b32.xlu1 %v10998_v44, %s10587_s22  ;;  %3262 = vrot.lane.b32.xlu0 %v11005_v45, %s10584_s28 }
 0x40a   :  { %v12739_v37 = vpop.permute.xlu1 %2846  ;;  %v12741_v25 = vpop.permute.xlu0 %2848 }
 0x40b   :  { %18853 = vst [vmem:[#allocation449_spill] sm:$0xff] %v12739_v37  ;;  %18854 = vst [vmem:[#allocation450_spill] sm:$0xff] %v12741_v25 }
 0x40c   :  { %3266 = vrot.lane.b32.xlu1 %v11016_v48, %s10584_s28  ;;  %4122 = vrot.lane.b32.xlu0 %v11005_v45, %s10586_s14 }
 0x40e   :  { %v12747_v39 = vpop.permute.xlu1 %2850  ;;  %v12749_v41 = vpop.permute.xlu0 %2852 }
 0x40f   :  { %18855 = vst [vmem:[#allocation451_spill] sm:$0xff] %v12747_v39  ;;  %18856 = vst [vmem:[#allocation452_spill] sm:$0xff] %v12749_v41 }
 0x410   :  { %4126 = vrot.lane.b32.xlu1 %v11016_v48, %s10586_s14  ;;  %4982 = vrot.lane.b32.xlu0 %v11005_v45, %s10588_s0  ;;  %v18866_v45 = vld [vmem:[#allocation60_spill] sm:$0xff] }
 0x412   :  { %v12755_v20 = vpop.permute.xlu1 %2854  ;;  %v12757_v37 = vpop.permute.xlu0 %2856 }
 0x413   :  { %18857 = vst [vmem:[#allocation453_spill] sm:$0xff] %v12755_v20  ;;  %18858 = vst [vmem:[#allocation454_spill] sm:$0xff] %v12757_v37 }
 0x414   :  { %4986 = vrot.lane.b32.xlu1 %v11016_v48, %s10588_s0  ;;  %3264 = vrot.lane.b32.xlu0 %v10998_v44, %s10584_s28 }
 0x416   :  { %v12763_v25 = vpop.permute.xlu1 %2858  ;;  %v12765_v39 = vpop.permute.xlu0 %2860 }
 0x417   :  { %18859 = vst [vmem:[#allocation455_spill] sm:$0xff] %v12763_v25  ;;  %18860 = vst [vmem:[#allocation456_spill] sm:$0xff] %v12765_v39 }
 0x418   :  { %3268 = vrot.lane.b32.xlu1 %v11007_v46, %s10584_s28  ;;  %4124 = vrot.lane.b32.xlu0 %v10998_v44, %s10586_s14 }
 0x41a   :  { %v12771_v41 = vpop.permute.xlu1 %2862  ;;  %v12773_v20 = vpop.permute.xlu0 %2864 }
 0x41b   :  { %18861 = vst [vmem:[#allocation457_spill] sm:$0xff] %v12771_v41  ;;  %18862 = vst [vmem:[#allocation458_spill] sm:$0xff] %v12773_v20 }
 0x41c   :  { %4128 = vrot.lane.b32.xlu1 %v11007_v46, %s10586_s14  ;;  %4984 = vrot.lane.b32.xlu0 %v10998_v44, %s10588_s0 }
 0x41e   :  { %v12779_v37 = vpop.permute.xlu1 %2866  ;;  %v12781_v25 = vpop.permute.xlu0 %2868 }
 0x41f   :  { %18863 = vst [vmem:[#allocation459_spill] sm:$0xff] %v12779_v37  ;;  %18864 = vst [vmem:[#allocation460_spill] sm:$0xff] %v12781_v25 }
 0x420   :  { %4988 = vrot.lane.b32.xlu1 %v11007_v46, %s10588_s0  ;;  %3696 = vrot.lane.b32.xlu0 %v11016_v48, %s10585_s30 }
 0x422   :  { %v12787_v39 = vpop.permute.xlu1 %2870  ;;  %v3239_v41 = vpop.permute.xlu0 %3238 }
 0x423   :  { %18865 = vst [vmem:[#allocation461_spill] sm:$0xff] %v12787_v39 }
 0x424   :  { %3700 = vrot.lane.b32.xlu1 %v11026_v52, %s10585_s30  ;;  %4556 = vrot.lane.b32.xlu0 %v11016_v48, %s10587_s22 }
 0x426   :  { %v3243_v20 = vpop.permute.xlu1 %3242  ;;  %v12793_v44 = vpop.permute.xlu0 %3240 }
 0x428   :  { %4560 = vrot.lane.b32.xlu1 %v11026_v52, %s10587_s22  ;;  %3698 = vrot.lane.b32.xlu0 %v11007_v46, %s10585_s30 }
 0x42a   :  { %v12799_v25 = vpop.permute.xlu1 %3244  ;;  %v3673_v37 = vpop.permute.xlu0 %3672 }
 0x42c   :  { %3702 = vrot.lane.b32.xlu1 %v11019_v51, %s10585_s30  ;;  %4558 = vrot.lane.b32.xlu0 %v11007_v46, %s10587_s22 }
 0x42e   :  { %v3677_v39 = vpop.permute.xlu1 %3676  ;;  %v12805_v48 = vpop.permute.xlu0 %3674 }
 0x430   :  { %4562 = vrot.lane.b32.xlu1 %v11019_v51, %s10587_s22  ;;  %2900 = vrot.lane.b32.xlu0 %v18866_v45, %s10583_s27 }
 0x432   :  { %v12811_v32 = vpop.permute.xlu1 %3678  ;;  %v12813_v15 = vpop.permute.xlu0 %3246 }
 0x434   :  { %2904 = vrot.lane.b32.xlu1 %v18867_v14, %s10583_s27  ;;  %3270 = vrot.lane.b32.xlu0 %v11026_v52, %s10584_s28 }
 0x436   :  { %v12819_v46 = vpop.permute.xlu1 %3250  ;;  %v4107_v23 = vpop.permute.xlu0 %4106 }
 0x438   :  { %3274 = vrot.lane.b32.xlu1 %v11037_v55, %s10584_s28  ;;  %4130 = vrot.lane.b32.xlu0 %v11026_v52, %s10586_s14 }
 0x43a   :  { %v4111_v45 = vpop.permute.xlu1 %4110  ;;  %v12825_v58 = vpop.permute.xlu0 %3248 }
 0x43c   :  { %4134 = vrot.lane.b32.xlu1 %v11037_v55, %s10586_s14  ;;  %4990 = vrot.lane.b32.xlu0 %v11026_v52, %s10588_s0 }
 0x43e   :  { %v12831_v38 = vpop.permute.xlu1 %3252  ;;  %v12833_v56 = vpop.permute.xlu0 %4108 }
 0x440   :  { %4994 = vrot.lane.b32.xlu1 %v11037_v55, %s10588_s0  ;;  %2902 = vrot.lane.b32.xlu0 %v18868_v34, %s10583_s27 }
 0x442   :  { %v12839_v49 = vpop.permute.xlu1 %4112  ;;  %v12841_v54 = vpop.permute.xlu0 %3680 }
 0x444   :  { %2906 = vrot.lane.b32.xlu1 %v18869_v4, %s10583_s27  ;;  %3272 = vrot.lane.b32.xlu0 %v11019_v51, %s10584_s28 }
 0x446   :  { %v12847_v52 = vpop.permute.xlu1 %3684  ;;  %v4541_v24 = vpop.permute.xlu0 %4540 }
 0x448   :  { %3276 = vrot.lane.b32.xlu1 %v11028_v53, %s10584_s28  ;;  %4132 = vrot.lane.b32.xlu0 %v11019_v51, %s10586_s14 }
 0x44a   :  { %v4545_v34 = vpop.permute.xlu1 %4544  ;;  %v12853_v8 = vpop.permute.xlu0 %3682 }
 0x44c   :  { %4136 = vrot.lane.b32.xlu1 %v11028_v53, %s10586_s14  ;;  %4992 = vrot.lane.b32.xlu0 %v11019_v51, %s10588_s0  ;;  %v3128_v51 = vadd.f32 %v12624_v9, %v2694_v18  ;;  %v18879_v18 = vld [vmem:[#allocation63_spill] sm:$0xff] }
 0x44d   :  { %v18880_v9 = vld [vmem:[#allocation3_spill] sm:$0xff] }
 0x44e   :  { %v12862_v62 = vpop.permute.xlu1 %3686  ;;  %v4543_v7 = vpop.permute.xlu0 %4542  ;;  %v3562_v16 = vadd.f32 %v3239_v41, %v3128_v51  ;;  %v1827_v30 = vadd.f32 %v18880_v9, %v18879_v18  ;;  %v18881_v41 = vld [vmem:[#allocation68_spill] sm:$0xff] }
 0x450   :  { %4996 = vrot.lane.b32.xlu1 %v11028_v53, %s10588_s0  ;;  %3334 = vrot.lane.b32.xlu0 %v18867_v14, %s10584_s28  ;;  %v3996_v29 = vadd.f32 %v3673_v37, %v3562_v16  ;;  %v3564_v14 = vadd.f32 %v3243_v20, %v3130_v59  ;;  %v2261_v51 = vadd.f32 %v18881_v41, %v1827_v30  ;;  %v18882_v16 = vld [vmem:[#allocation67_spill] sm:$0xff]  ;;  %v12900_v59 = vld [vmem:[%s17986_s2] ss:$0 sm:$0xff] }
 0x451   :  { %v1829_v2 = vadd.f32 %v18883_v57, %v18882_v16 }
 0x452   :  { %v4547_v43 = vpop.permute.xlu1 %4546  ;;  %v12873_v13 = vpop.permute.xlu0 %3254  ;;  %v4430_v27 = vadd.f32 %v4107_v23, %v3996_v29  ;;  %v3998_v19 = vadd.f32 %v3677_v39, %v3564_v14  ;;  %v2695_v18 = vadd.f32 %v18884_v3, %v2261_v51 }
 0x454   :  { %3338 = vrot.lane.b32.xlu1 %v18878_v31, %s10584_s28  ;;  %3704 = vrot.lane.b32.xlu0 %v11037_v55, %s10585_s30  ;;  %v4864_v61 = vadd.f32 %v4541_v24, %v4430_v27  ;;  %v4432_v20 = vadd.f32 %v4111_v45, %v3998_v19  ;;  %v18885_v24 = vld [vmem:[#allocation78_spill] sm:$0xff]  ;;  %v3129_v14 = vadd.f32 %v12635_v35, %v2695_v18  ;;  %v18887_v19 = vld [vmem:[#allocation64_spill] sm:$0xff] }
 0x455   :  { %v2263_v39 = vadd.f32 %v18885_v24, %v1829_v2  ;;  %v18886_v45 = vld [vmem:[#allocation90_spill] sm:$0xff] }
 0x456   :  { %v12881_v42 = vpop.permute.xlu1 %3258  ;;  %v12883_v10 = vpop.permute.xlu0 %4114  ;;  %v4866_v27 = vadd.f32 %v4545_v34, %v4432_v20  ;;  %v3563_v30 = vadd.f32 %v12793_v44, %v3129_v14 }
 0x457   :  { %v2697_v9 = vadd.f32 %v18886_v45, %v2263_v39 }
 0x458   :  { %3708 = vrot.lane.b32.xlu1 %v18792_v12, %s10585_s30  ;;  %4564 = vrot.lane.b32.xlu0 %v11037_v55, %s10587_s22  ;;  %v3997_v34 = vadd.f32 %v12805_v48, %v3563_v30 }
 0x459   :  { %v3131_v2 = vadd.f32 %v12648_v21, %v2697_v9 }
 0x45a   :  { %v12892_v37 = vpop.permute.xlu1 %4118  ;;  %v4975_v40 = vpop.permute.xlu0 %4974  ;;  %v4431_v16 = vadd.f32 %v12833_v56, %v3997_v34  ;;  %v18889_v34 = vld [vmem:[#allocation8_spill] sm:$0xff] }
 0x45b   :  { %v5298_v23 = vadd.f32 %v4975_v40, %v4864_v61  ;;  %v3565_v44 = vadd.f32 %v12799_v25, %v3131_v2 }
 0x45c   :  { %4568 = vrot.lane.b32.xlu1 %v18792_v12, %s10587_s22  ;;  %3336 = vrot.lane.b32.xlu0 %v18869_v4, %s10584_s28  ;;  %v4865_v21 = vadd.f32 %v4543_v7, %v4431_v16  ;;  %v18891_v16 = vld [vmem:[#allocation85_spill] sm:$0xff] }
 0x45d   :  { %v5413_v41 = vadd.f32 %v12900_v59, %v5298_v23  ;;  %v3999_v48 = vadd.f32 %v12811_v32, %v3565_v44 }
 0x45e   :  { %v4979_v29 = vpop.permute.xlu1 %4978  ;;  %v12908_v3 = vpop.permute.xlu0 %3256 }
 0x45f   :  { %v5300_v51 = vadd.f32 %v4979_v29, %v4866_v27  ;;  %v5521_v57 = vmax.f32 %v5413_v41, 0.0  ;;  %v4433_v25 = vadd.f32 %v12839_v49, %v3999_v48  ;;  %v18888_v29 = vld [vmem:[#allocation71_spill] sm:$0xff] }
 0x460   :  { %3340 = vrot.lane.b32.xlu1 %v18887_v19, %s10584_s28  ;;  %3706 = vrot.lane.b32.xlu0 %v11028_v53, %s10585_s30 }
 0x461   :  { %v5415_v35 = vadd.f32 %v12900_v59, %v5300_v51  ;;  %v4867_v56 = vadd.f32 %v4547_v43, %v4433_v25  ;;  %v18894_v25 = vld [vmem:[#allocation97_spill] sm:$0xff] }
 0x462   :  { %v12920_v61 = vpop.permute.xlu1 %3260  ;;  %v12922_v40 = vpop.permute.xlu0 %4116 }
 0x463   :  { %v5523_v18 = vmax.f32 %v5415_v35, 0.0  ;;  %v18890_v35 = vld [vmem:[#allocation73_spill] sm:$0xff] }
 0x464   :  { %3710 = vrot.lane.b32.xlu1 %v18795_v5, %s10585_s30  ;;  %4566 = vrot.lane.b32.xlu0 %v11028_v53, %s10587_s22  ;;  %v1830_v44 = vadd.f32 %v18890_v35, %v18889_v34  ;;  %v18975_v53 = vld [vmem:[#allocation43_spill] sm:$0xff] }
 0x465   :  { %v5629_v20 = vmax.f32 %v5521_v57, %v5523_v18 }
 0x466   :  { %v12931_v23 = vpop.permute.xlu1 %4120  ;;  %v4977_v24 = vpop.permute.xlu0 %4976  ;;  %v2264_v57 = vadd.f32 %v18891_v16, %v1830_v44  ;;  %v18897_v16 = vld [vmem:[#allocation74_spill] sm:$0xff] }
 0x467   :  { %v5299_v39 = vadd.f32 %v4977_v24, %v4865_v21  ;;  %10074 = vmatprep.mubr.msk.f32.mxu0 %vm5685_vm4, %v5629_v20  ;;  %v18892_v21 = vld [vmem:[#allocation10_spill] sm:$0xff]  ;;  %v18893_v20 = vld [vmem:[#allocation81_spill] sm:$0xff] }
 0x468   :  { %4570 = vrot.lane.b32.xlu1 %v18795_v5, %s10587_s22  ;;  %2908 = vrot.lane.b32.xlu0 %v18878_v31, %s10583_s27  ;;  %v1832_v24 = vadd.f32 %v18893_v20, %v18892_v21 }
 0x469   :  { %v5414_v32 = vadd.f32 %v12900_v59, %v5299_v39  ;;  %v2698_v39 = vadd.f32 %v18894_v25, %v2264_v57  ;;  %v18898_v57 = vld [vmem:[#allocation7_spill] sm:$0xff] }
 0x46a   :  { %v4981_v14 = vpop.permute.xlu1 %4980  ;;  %v12939_v27 = vpop.permute.xlu0 %3688  ;;  %v1831_v21 = vadd.f32 %v18898_v57, %v18897_v16 }
 0x46b   :  { %v5301_v7 = vadd.f32 %v4981_v14, %v4867_v56  ;;  %v5522_v30 = vmax.f32 %v5414_v32, 0.0  ;;  %v18895_v56 = vld [vmem:[#allocation93_spill] sm:$0xff]  ;;  %v3132_v32 = vadd.f32 %v12650_v26, %v2698_v39 }
 0x46c   :  { %2912 = vrot.lane.b32.xlu1 %v18888_v29, %s10583_s27  ;;  %3278 = vrot.lane.b32.xlu0 %v18792_v12, %s10584_s28  ;;  %v2266_v14 = vadd.f32 %v18895_v56, %v1832_v24  ;;  %v18899_v24 = vld [vmem:[#allocation70_spill] sm:$0xff] }
 0x46d   :  { %v5416_v49 = vadd.f32 %v12900_v59, %v5301_v7 }
 0x46e   :  { %v12947_v45 = vpop.permute.xlu1 %3692  ;;  %v4549_v9 = vpop.permute.xlu0 %4548 }
 0x46f   :  { %v5524_v41 = vmax.f32 %v5416_v49, 0.0 }
 0x470   :  { %3282 = vrot.lane.b32.xlu1 %v18796_v0, %s10584_s28  ;;  %3768 = vrot.lane.b32.xlu0 %v18878_v31, %s10585_s30  ;;  %v18974_v31 = vld [vmem:[#allocation121_spill] sm:$0xff] }
 0x471   :  { %v5630_v43 = vmax.f32 %v5522_v30, %v5524_v41  ;;  %v18896_v30 = vld [vmem:[#allocation105_spill] sm:$0xff] }
 0x472   :  { %v4553_v51 = vpop.permute.xlu1 %4552  ;;  %v12953_v2 = vpop.permute.xlu0 %3690  ;;  %v2700_v41 = vadd.f32 %v18896_v30, %v2266_v14  ;;  %v18902_v30 = vld [vmem:[#allocation9_spill] sm:$0xff] }
 0x473   :  { %10075 = vmatmul.mubr.msk.f32.vlgmr.msra.gmra.mrb[128].mxu0 %vm5685_vm4, %v5630_v43  ;;  %v3566_v43 = vadd.f32 %v12813_v15, %v3132_v32  ;;  %v18901_v32 = vld [vmem:[#allocation84_spill] sm:$0xff] }
 0x474   :  { %3772 = vrot.lane.b32.xlu1 %v18888_v29, %s10585_s30  ;;  %4138 = vrot.lane.b32.xlu0 %v18792_v12, %s10586_s14  ;;  %v3134_v34 = vadd.f32 %v12659_v17, %v2700_v41  ;;  %v18900_v17 = vld [vmem:[#allocation86_spill] sm:$0xff]  ;;  %v1833_v41 = vadd.f32 %v18902_v30, %v18901_v32 }
 0x475   :  { %v4000_v35 = vadd.f32 %v12841_v54, %v3566_v43  ;;  %v2265_v25 = vadd.f32 %v18900_v17, %v1831_v21 }
 0x476   :  { %v12963_v18 = vpop.permute.xlu1 %3694  ;;  %v4551_v48 = vpop.permute.xlu0 %4550  ;;  %v3568_v20 = vadd.f32 %v12819_v46, %v3134_v34  ;;  %v18903_v46 = vld [vmem:[#allocation98_spill] sm:$0xff] }
 0x477   :  { %v4434_v15 = vadd.f32 %v12883_v10, %v4000_v35  ;;  %v2699_v43 = vadd.f32 %v18903_v46, %v2265_v25  ;;  %v18904_v35 = vld [vmem:[#allocation96_spill] sm:$0xff] }
 0x478   :  { %4142 = vrot.lane.b32.xlu1 %v18796_v0, %s10586_s14  ;;  %4998 = vrot.lane.b32.xlu0 %v18792_v12, %s10588_s0  ;;  %v4002_v54 = vadd.f32 %v12847_v52, %v3568_v20  ;;  %v2267_v52 = vadd.f32 %v18904_v35, %v1833_v41  ;;  %v18905_v20 = vld [vmem:[#allocation108_spill] sm:$0xff]  ;;  %v18976_v12 = vld [vmem:[#allocation129_spill] sm:$0xff] }
 0x479   :  { %v4868_v39 = vadd.f32 %v4549_v9, %v4434_v15  ;;  %v3133_v9 = vadd.f32 %v12657_v47, %v2699_v43 }
 0x47a   :  { %v4555_v7 = vpop.permute.xlu1 %4554  ;;  %v12974_v49 = vpop.permute.xlu0 %3262  ;;  %v4436_v10 = vadd.f32 %v12892_v37, %v4002_v54  ;;  %v2701_v15 = vadd.f32 %v18905_v20, %v2267_v52 }
 0x47b   :  { %v3567_v17 = vadd.f32 %v12825_v58, %v3133_v9  ;;  %v18906_v9 = vld [vmem:[#allocation77_spill] sm:$0xff] }
 0x47c   :  { %5002 = vrot.lane.b32.xlu1 %v18796_v0, %s10588_s0  ;;  %2910 = vrot.lane.b32.xlu0 %v18887_v19, %s10583_s27  ;;  %v4870_v16 = vadd.f32 %v4553_v51, %v4436_v10  ;;  %v3135_v54 = vadd.f32 %v12671_v33, %v2701_v15 }
 0x47d   :  { %v4001_v47 = vadd.f32 %v12853_v8, %v3567_v17 }
 0x47e   :  { %v12984_v44 = vpop.permute.xlu1 %3266  ;;  %v12986_v26 = vpop.permute.xlu0 %4122  ;;  %v3569_v58 = vadd.f32 %v12831_v38, %v3135_v54 }
 0x47f   :  { %v4435_v32 = vadd.f32 %v12922_v40, %v4001_v47  ;;  %v18907_v47 = vld [vmem:[#allocation91_spill] sm:$0xff] }
 0x480   :  { %2914 = vrot.lane.b32.xlu1 %v18899_v24, %s10583_s27  ;;  %3280 = vrot.lane.b32.xlu0 %v18795_v5, %s10584_s28  ;;  %v4003_v33 = vadd.f32 %v12862_v62, %v3569_v58  ;;  %v18908_v58 = vld [vmem:[#allocation103_spill] sm:$0xff] }
 0x481   :  { %v4869_v8 = vadd.f32 %v4551_v48, %v4435_v32 }
 0x482   :  { %v12998_v56 = vpop.permute.xlu1 %4126  ;;  %v4983_v14 = vpop.permute.xlu0 %4982 }
 0x483   :  { %v5302_v34 = vadd.f32 %v4983_v14, %v4868_v39 }
 0x484   :  { %3284 = vrot.lane.b32.xlu1 %v18799_v36, %s10584_s28  ;;  %3770 = vrot.lane.b32.xlu0 %v18887_v19, %s10585_s30 }
 0x485   :  { %v5417_v37 = vadd.f32 %v12900_v59, %v5302_v34  ;;  %v4437_v34 = vadd.f32 %v12931_v23, %v4003_v33  ;;  %v18909_v33 = vld [vmem:[#allocation99_spill] sm:$0xff] }
 0x486   :  { %v4987_v57 = vpop.permute.xlu1 %4986  ;;  %v13010_v21 = vpop.permute.xlu0 %3264 }
 0x487   :  { %v5304_v25 = vadd.f32 %v4987_v57, %v4870_v16  ;;  %v5525_v30 = vmax.f32 %v5417_v37, 0.0  ;;  %v4871_v40 = vadd.f32 %v4555_v7, %v4437_v34 }
 0x488   :  { %3774 = vrot.lane.b32.xlu1 %v18899_v24, %s10585_s30  ;;  %4140 = vrot.lane.b32.xlu0 %v18795_v5, %s10586_s14 }
 0x489   :  { %v5419_v51 = vadd.f32 %v12900_v59, %v5304_v25 }
 0x48a   :  { %v13022_v39 = vpop.permute.xlu1 %3268  ;;  %v13024_v14 = vpop.permute.xlu0 %4124 }
 0x48b   :  { %v5527_v41 = vmax.f32 %v5419_v51, 0.0  ;;  %v1834_v51 = vadd.f32 %v18907_v47, %v18764_v6  ;;  %v18911_v6 = vld [vmem:[#allocation111_spill] sm:$0xff] }
 0x48c   :  { %4144 = vrot.lane.b32.xlu1 %v18799_v36, %s10586_s14  ;;  %5000 = vrot.lane.b32.xlu0 %v18795_v5, %s10588_s0  ;;  %v18913_v47 = vld [vmem:[#allocation11_spill] sm:$0xff] }
 0x48d   :  { %v5631_v46 = vmax.f32 %v5525_v30, %v5527_v41  ;;  %v2268_v32 = vadd.f32 %v18908_v58, %v1834_v51 }
 0x48e   :  { %v13033_v43 = vpop.permute.xlu1 %4128  ;;  %v4985_v10 = vpop.permute.xlu0 %4984 }
 0x48f   :  { %v5303_v38 = vadd.f32 %v4985_v10, %v4869_v8  ;;  %10077 = vmatprep.mubr.msk.f32.mxu0 %vm5685_vm4, %v5631_v46  ;;  %v1836_v8 = vadd.f32 %v18909_v33, %v18768_v1  ;;  %v2702_v46 = vadd.f32 %v12200_v11, %v2268_v32  ;;  %v18910_v10 = vld [vmem:[#allocation76_spill] sm:$0xff] }
 0x490   :  { %5004 = vrot.lane.b32.xlu1 %v18799_v36, %s10588_s0  ;;  %3342 = vrot.lane.b32.xlu0 %v18888_v29, %s10584_s28 }
 0x491   :  { %v5418_v62 = vadd.f32 %v12900_v59, %v5303_v38  ;;  %v2270_v34 = vadd.f32 %v18911_v6, %v1836_v8  ;;  %v3136_v38 = vadd.f32 %v12673_v22, %v2702_v46  ;;  %v18915_v8 = vld [vmem:[#allocation102_spill] sm:$0xff]  ;;  %v18916_v46 = vld [vmem:[#allocation13_spill] sm:$0xff] }
 0x492   :  { %v4989_v35 = vpop.permute.xlu1 %4988  ;;  %v13041_v52 = vpop.permute.xlu0 %3696  ;;  %v1837_v6 = vadd.f32 %v18916_v46, %v18915_v8 }
 0x493   :  { %v5305_v48 = vadd.f32 %v4989_v35, %v4871_v40  ;;  %v5526_v20 = vmax.f32 %v5418_v62, 0.0  ;;  %v2704_v62 = vadd.f32 %v12208_v60, %v2270_v34  ;;  %v3570_v1 = vadd.f32 %v12873_v13, %v3136_v38  ;;  %v18917_v34 = vld [vmem:[#allocation341_spill] sm:$0xff] }
 0x494   :  { %3346 = vrot.lane.b32.xlu1 %v18906_v9, %s10584_s28  ;;  %3712 = vrot.lane.b32.xlu0 %v18796_v0, %s10585_s30 }
 0x495   :  { %v5420_v23 = vadd.f32 %v12900_v59, %v5305_v48  ;;  %v3138_v11 = vadd.f32 %v12693_v50, %v2704_v62  ;;  %v4004_v48 = vadd.f32 %v12939_v27, %v3570_v1  ;;  %v18918_v1 = vld [vmem:[#allocation83_spill] sm:$0xff] }
 0x496   :  { %v13049_v16 = vpop.permute.xlu1 %3700  ;;  %v4557_v57 = vpop.permute.xlu0 %4556 }
 0x497   :  { %v5528_v15 = vmax.f32 %v5420_v23, 0.0  ;;  %v4438_v60 = vadd.f32 %v12986_v26, %v4004_v48  ;;  %v18914_v26 = vld [vmem:[#allocation104_spill] sm:$0xff] }
 0x498   :  { %3716 = vrot.lane.b32.xlu1 %v18800_v63, %s10585_s30  ;;  %4202 = vrot.lane.b32.xlu0 %v18888_v29, %s10586_s14  ;;  %v18973_v29 = vld [vmem:[#allocation20_spill] sm:$0xff] }
 0x499   :  { %v5632_v7 = vmax.f32 %v5526_v20, %v5528_v15  ;;  %v3572_v20 = vadd.f32 %v12881_v42, %v3138_v11  ;;  %v4872_v15 = vadd.f32 %v4557_v57, %v4438_v60  ;;  %v18919_v11 = vld [vmem:[#allocation114_spill] sm:$0xff]  ;;  %v1842_v5 = vadd.f32 %v18974_v31, %v18973_v29  ;;  %v18982_v31 = vld [vmem:[#allocation135_spill] sm:$0xff] }
 0x49a   :  { %v4561_v17 = vpop.permute.xlu1 %4560  ;;  %v13055_v37 = vpop.permute.xlu0 %3698  ;;  %v2271_v48 = vadd.f32 %v18919_v11, %v1837_v6 }
 0x49b   :  { %10078 = vmatmul.mubr.msk.f32.gmra.mrb[130].mxu0 %vm5685_vm4, %v5632_v7  ;;  %v4006_v13 = vadd.f32 %v12947_v45, %v3572_v20  ;;  %v18912_v7 = vld [vmem:[#allocation92_spill] sm:$0xff]  ;;  %v2276_v55 = vadd.f32 %v18976_v12, %v1842_v5 }
 0x49c   :  { %4206 = vrot.lane.b32.xlu1 %v18906_v9, %s10586_s14  ;;  %4572 = vrot.lane.b32.xlu0 %v18796_v0, %s10587_s22  ;;  %v1835_v51 = vadd.f32 %v18913_v47, %v18912_v7  ;;  %v18952_v0 = vld [vmem:[#allocation15_spill] sm:$0xff] }
 0x49d   :  { %v4440_v58 = vadd.f32 %v12998_v56, %v4006_v13 }
 0x49e   :  { %v13062_v25 = vpop.permute.xlu1 %3702  ;;  %v13064_v54 = vpop.permute.xlu0 %4558  ;;  %v2269_v32 = vadd.f32 %v18914_v26, %v1835_v51 }
 0x49f   :  { %v4874_v33 = vadd.f32 %v4561_v17, %v4440_v58  ;;  %v18920_v17 = vld [vmem:[#allocation438_spill] sm:$0xff]  ;;  %v13142_v26 = vpop.f32.mrb[114].mxu0 }
 0x4a0   :  { %4576 = vrot.lane.b32.xlu1 %v18800_v63, %s10587_s22  ;;  %3344 = vrot.lane.b32.xlu0 %v18899_v24, %s10584_s28  ;;  %v2703_v38 = vadd.f32 %v18917_v34, %v2269_v32  ;;  %18923 = vst [vmem:[#allocation4_spill] sm:$0xff] %v13142_v26  ;;  %v18924_v32 = vld [vmem:[#allocation439_spill] sm:$0xff]  ;;  %v13146_v46 = vpop.f32.mrb[115].mxu0 }
 0x4a1   :  { %18925 = vst [vmem:[#allocation66_spill] sm:$0xff] %v13146_v46  ;;  %v18943_v46 = vld [vmem:[#allocation343_spill] sm:$0xff] }
 0x4a2   :  { %v13073_v30 = vpop.permute.xlu1 %4562  ;;  %v13075_v41 = vpop.permute.xlu0 %2900  ;;  %v3137_v20 = vadd.f32 %v18920_v17, %v2703_v38 }
 0x4a4   :  { %3348 = vrot.lane.b32.xlu1 %v18910_v10, %s10584_s28  ;;  %3714 = vrot.lane.b32.xlu0 %v18799_v36, %s10585_s30  ;;  %v3571_v47 = vadd.f32 %v12908_v3, %v3137_v20 }
 0x4a6   :  { %v13086_v40 = vpop.permute.xlu1 %2904  ;;  %v13088_v35 = vpop.permute.xlu0 %3270 }
 0x4a8   :  { %3718 = vrot.lane.b32.xlu1 %v18803_v28, %s10585_s30  ;;  %4204 = vrot.lane.b32.xlu0 %v18899_v24, %s10586_s14 }
 0x4aa   :  { %v13098_v23 = vpop.permute.xlu1 %3274  ;;  %v13100_v22 = vpop.permute.xlu0 %4130 }
 0x4ac   :  { %4208 = vrot.lane.b32.xlu1 %v18910_v10, %s10586_s14  ;;  %4574 = vrot.lane.b32.xlu0 %v18799_v36, %s10587_s22  ;;  %v18946_v36 = vld [vmem:[#allocation345_spill] sm:$0xff] }
 0x4ae   :  { %v13109_v50 = vpop.permute.xlu1 %4134  ;;  %v4991_v27 = vpop.permute.xlu0 %4990 }
 0x4af   :  { %v5306_v42 = vadd.f32 %v4991_v27, %v4872_v15  ;;  %v18921_v27 = vld [vmem:[#allocation342_spill] sm:$0xff] }
 0x4b0   :  { %4578 = vrot.lane.b32.xlu1 %v18803_v28, %s10587_s22  ;;  %2916 = vrot.lane.b32.xlu0 %v18906_v9, %s10583_s27  ;;  %v2705_v7 = vadd.f32 %v18921_v27, %v2271_v48 }
 0x4b1   :  { %v5421_v56 = vadd.f32 %v12900_v59, %v5306_v42  ;;  %v18922_v42 = vld [vmem:[#allocation40_spill] sm:$0xff] }
 0x4b2   :  { %v4995_v45 = vpop.permute.xlu1 %4994  ;;  %v13119_v57 = vpop.permute.xlu0 %2902 }
 0x4b3   :  { %v5308_v62 = vadd.f32 %v4995_v45, %v4874_v33  ;;  %v5529_v51 = vmax.f32 %v5421_v56, 0.0  ;;  %v3139_v33 = vadd.f32 %v18924_v32, %v2705_v7  ;;  %v4005_v45 = vadd.f32 %v12953_v2, %v3571_v47  ;;  %v13155_v56 = vpop.f32.mrb[116].mxu0 }
 0x4b4   :  { %2920 = vrot.lane.b32.xlu1 %v18918_v1, %s10583_s27  ;;  %3286 = vrot.lane.b32.xlu0 %v18800_v63, %s10584_s28  ;;  %18926 = vst [vmem:[#allocation69_spill] sm:$0xff] %v13155_v56  ;;  %v13161_v2 = vpop.f32.mrb[117].mxu0  ;;  %v18941_v56 = vld [vmem:[#allocation18_spill] sm:$0xff] }
 0x4b5   :  { %v5423_v60 = vadd.f32 %v12900_v59, %v5308_v62  ;;  %v3573_v34 = vadd.f32 %v12920_v61, %v3139_v33  ;;  %v4439_v38 = vadd.f32 %v13024_v14, %v4005_v45  ;;  %18927 = vst [vmem:[#allocation6_spill] sm:$0xff] %v13161_v2  ;;  %v13165_v48 = vpop.f32.mrb[118].mxu0  ;;  %v18942_v2 = vld [vmem:[#allocation115_spill] sm:$0xff] }
 0x4b6   :  { %v13132_v13 = vpop.permute.xlu1 %2906  ;;  %v13134_v15 = vpop.permute.xlu0 %3272  ;;  %18928 = vst [vmem:[#allocation72_spill] sm:$0xff] %v13165_v48  ;;  %v1840_v26 = vadd.f32 %v18942_v2, %v18941_v56  ;;  %v18948_v2 = vld [vmem:[#allocation442_spill] sm:$0xff] }
 0x4b7   :  { %v5531_v58 = vmax.f32 %v5423_v60, 0.0  ;;  %v4007_v62 = vadd.f32 %v12963_v18, %v3573_v34  ;;  %v4873_v11 = vadd.f32 %v13064_v54, %v4439_v38  ;;  %v13170_v60 = vpop.f32.mrb[119].mxu0 }
 0x4b8   :  { %3290 = vrot.lane.b32.xlu1 %v18922_v42, %s10584_s28  ;;  %3776 = vrot.lane.b32.xlu0 %v18906_v9, %s10585_s30  ;;  %18929 = vst [vmem:[#allocation79_spill] sm:$0xff] %v13170_v60  ;;  %v13176_v27 = vpop.f32.mrb[120].mxu0 }
 0x4b9   :  { %v5633_v8 = vmax.f32 %v5529_v51, %v5531_v58  ;;  %v4441_v17 = vadd.f32 %v13033_v43, %v4007_v62  ;;  %18930 = vst [vmem:[#allocation75_spill] sm:$0xff] %v13176_v27  ;;  %v13179_v54 = vpop.f32.mrb[121].mxu0  ;;  %v18940_v27 = vld [vmem:[#allocation117_spill] sm:$0xff] }
 0x4ba   :  { %v13148_v6 = vpop.permute.xlu1 %3276  ;;  %v13150_v3 = vpop.permute.xlu0 %4132  ;;  %18931 = vst [vmem:[#allocation87_spill] sm:$0xff] %v13179_v54 }
 0x4bb   :  { %10080 = vmatprep.mubr.msk.f32.mxu0 %vm5685_vm4, %v5633_v8  ;;  %v4875_v18 = vadd.f32 %v13073_v30, %v4441_v17  ;;  %v13184_v58 = vpop.f32.mrb[122].mxu0 }
 0x4bc   :  { %3780 = vrot.lane.b32.xlu1 %v18918_v1, %s10585_s30  ;;  %4146 = vrot.lane.b32.xlu0 %v18800_v63, %s10586_s14  ;;  %18932 = vst [vmem:[#allocation63_spill] sm:$0xff] %v13184_v58  ;;  %v13190_v32 = vpop.f32.mrb[123].mxu0  ;;  %v18939_v58 = vld [vmem:[#allocation109_spill] sm:$0xff] }
 0x4bd   :  { %18933 = vst [vmem:[#allocation3_spill] sm:$0xff] %v13190_v32  ;;  %v13193_v33 = vpop.f32.mrb[124].mxu0 }
 0x4be   :  { %v13167_v61 = vpop.permute.xlu1 %4136  ;;  %v4993_v14 = vpop.permute.xlu0 %4992  ;;  %18934 = vst [vmem:[#allocation68_spill] sm:$0xff] %v13193_v33 }
 0x4bf   :  { %v5307_v20 = vadd.f32 %v4993_v14, %v4873_v11  ;;  %v13199_v62 = vpop.f32.mrb[125].mxu0 }
 0x4c0   :  { %4150 = vrot.lane.b32.xlu1 %v18922_v42, %s10586_s14  ;;  %4636 = vrot.lane.b32.xlu0 %v18906_v9, %s10587_s22  ;;  %18935 = vst [vmem:[#allocation67_spill] sm:$0xff] %v13199_v62  ;;  %v10069_v11 = vpop.f32.mrb[126].mxu0  ;;  %v18938_v62 = vld [vmem:[#allocation16_spill] sm:$0xff] }
 0x4c1   :  { %v5422_v43 = vadd.f32 %v12900_v59, %v5307_v20  ;;  %v1387_v17 = vpop.f32.mrb[127].mxu0  ;;  %v1838_v32 = vadd.f32 %v18939_v58, %v18938_v62  ;;  %v18944_v58 = vld [vmem:[#allocation123_spill] sm:$0xff]  ;;  %v18945_v9 = vld [vmem:[#allocation440_spill] sm:$0xff] }
 0x4c2   :  { %v4997_v7 = vpop.permute.xlu1 %4996  ;;  %v13181_v47 = vpop.permute.xlu0 %3334  ;;  %v2274_v62 = vadd.f32 %v18944_v58, %v1840_v26 }
 0x4c3   :  { %v5309_v51 = vadd.f32 %v4997_v7, %v4875_v18  ;;  %v5530_v34 = vmax.f32 %v5422_v43, 0.0  ;;  %v18936_v7 = vld [vmem:[#allocation82_spill] sm:$0xff]  ;;  %v2272_v54 = vadd.f32 %v18940_v27, %v1838_v32 }
 0x4c4   :  { %4640 = vrot.lane.b32.xlu1 %v18918_v1, %s10587_s22  ;;  %5006 = vrot.lane.b32.xlu0 %v18800_v63, %s10588_s0  ;;  %v2708_v63 = vadd.f32 %v18946_v36, %v2274_v62 }
 0x4c5   :  { %v5424_v30 = vadd.f32 %v12900_v59, %v5309_v51 }
 0x4c6   :  { %v13195_v45 = vpop.permute.xlu1 %3338  ;;  %v13197_v8 = vpop.permute.xlu0 %3704 }
 0x4c7   :  { %v5532_v38 = vmax.f32 %v5424_v30, 0.0  ;;  %v18937_v30 = vld [vmem:[#allocation39_spill] sm:$0xff] }
 0x4c8   :  { %5010 = vrot.lane.b32.xlu1 %v18922_v42, %s10588_s0  ;;  %2918 = vrot.lane.b32.xlu0 %v18910_v10, %s10583_s27 }
 0x4c9   :  { %v5634_v14 = vmax.f32 %v5530_v34, %v5532_v38 }
 0x4ca   :  { %v13205_v20 = vpop.permute.xlu1 %3708  ;;  %v4565_v18 = vpop.permute.xlu0 %4564 }
 0x4cb   :  { %10081 = vmatmul.mubr.msk.f32.gmra.mrb[132].mxu0 %vm5685_vm4, %v5634_v14 }
 0x4cc   :  { %2922 = vrot.lane.b32.xlu1 %v18936_v7, %s10583_s27  ;;  %3288 = vrot.lane.b32.xlu0 %v18803_v28, %s10584_s28 }
 0x4ce   :  { %v4569_v43 = vpop.permute.xlu1 %4568  ;;  %v13212_v51 = vpop.permute.xlu0 %3336 }
 0x4d0   :  { %3292 = vrot.lane.b32.xlu1 %v18937_v30, %s10584_s28  ;;  %3778 = vrot.lane.b32.xlu0 %v18910_v10, %s10585_s30 }
 0x4d2   :  { %v13218_v34 = vpop.permute.xlu1 %3340  ;;  %v13220_v38 = vpop.permute.xlu0 %3706 }
 0x4d4   :  { %3782 = vrot.lane.b32.xlu1 %v18936_v7, %s10585_s30  ;;  %4148 = vrot.lane.b32.xlu0 %v18803_v28, %s10586_s14 }
 0x4d6   :  { %v13226_v11 = vpop.permute.xlu1 %3710  ;;  %v13228_v14 = vpop.permute.xlu0 %4566 }
 0x4d8   :  { %4152 = vrot.lane.b32.xlu1 %v18937_v30, %s10586_s14  ;;  %4638 = vrot.lane.b32.xlu0 %v18910_v10, %s10587_s22  ;;  %v2706_v10 = vadd.f32 %v18943_v46, %v2272_v54  ;;  %v18947_v46 = vld [vmem:[#allocation89_spill] sm:$0xff]  ;;  %v3142_v54 = vadd.f32 %v18948_v2, %v2708_v63 }
 0x4da   :  { %v13234_v17 = vpop.permute.xlu1 %4570  ;;  %v13236_v33 = vpop.permute.xlu0 %2908 }
 0x4dc   :  { %4642 = vrot.lane.b32.xlu1 %v18936_v7, %s10587_s22  ;;  %5008 = vrot.lane.b32.xlu0 %v18803_v28, %s10588_s0  ;;  %v3140_v28 = vadd.f32 %v18945_v9, %v2706_v10  ;;  %v3576_v10 = vadd.f32 %v12984_v44, %v3142_v54 }
 0x4de   :  { %v13245_v48 = vpop.permute.xlu1 %2912  ;;  %v13247_v60 = vpop.permute.xlu0 %3278  ;;  %v3574_v56 = vadd.f32 %v12974_v49, %v3140_v28  ;;  %v18949_v28 = vld [vmem:[#allocation42_spill] sm:$0xff]  ;;  %v4010_v49 = vadd.f32 %v13049_v16, %v3576_v10 }
 0x4e0   :  { %5012 = vrot.lane.b32.xlu1 %v18937_v30, %s10588_s0  ;;  %3350 = vrot.lane.b32.xlu0 %v18918_v1, %s10584_s28  ;;  %v4008_v26 = vadd.f32 %v13041_v52, %v3574_v56  ;;  %v4444_v56 = vadd.f32 %v13109_v50, %v4010_v49  ;;  %v18953_v50 = vld [vmem:[#allocation120_spill] sm:$0xff] }
 0x4e2   :  { %v13258_v27 = vpop.permute.xlu1 %3282  ;;  %v13260_v32 = vpop.permute.xlu0 %3768  ;;  %v4442_v36 = vadd.f32 %v13100_v22, %v4008_v26  ;;  %v4878_v44 = vadd.f32 %v4569_v43, %v4444_v56  ;;  %v18951_v26 = vld [vmem:[#allocation110_spill] sm:$0xff]  ;;  %v18956_v56 = vld [vmem:[#allocation17_spill] sm:$0xff] }
 0x4e3   :  { %v1839_v16 = vadd.f32 %v18952_v0, %v18951_v26  ;;  %v18957_v26 = vld [vmem:[#allocation344_spill] sm:$0xff] }
 0x4e4   :  { %3354 = vrot.lane.b32.xlu1 %v18947_v46, %s10584_s28  ;;  %3720 = vrot.lane.b32.xlu0 %v18922_v42, %s10585_s30  ;;  %v4876_v62 = vadd.f32 %v4565_v18, %v4442_v36 }
 0x4e5   :  { %v2273_v36 = vadd.f32 %v18953_v50, %v1839_v16  ;;  %v18958_v16 = vld [vmem:[#allocation126_spill] sm:$0xff] }
 0x4e6   :  { %v13270_v58 = vpop.permute.xlu1 %3772  ;;  %v13272_v9 = vpop.permute.xlu0 %4138 }
 0x4e8   :  { %3724 = vrot.lane.b32.xlu1 %v18949_v28, %s10585_s30  ;;  %4210 = vrot.lane.b32.xlu0 %v18918_v1, %s10586_s14 }
 0x4ea   :  { %v13281_v63 = vpop.permute.xlu1 %4142  ;;  %v4999_v52 = vpop.permute.xlu0 %4998 }
 0x4eb   :  { %v5310_v2 = vadd.f32 %v4999_v52, %v4876_v62  ;;  %v18955_v52 = vld [vmem:[#allocation116_spill] sm:$0xff] }
 0x4ec   :  { %4214 = vrot.lane.b32.xlu1 %v18947_v46, %s10586_s14  ;;  %4580 = vrot.lane.b32.xlu0 %v18922_v42, %s10587_s22  ;;  %v1841_v0 = vadd.f32 %v18956_v56, %v18955_v52  ;;  %v18960_v52 = vld [vmem:[#allocation346_spill] sm:$0xff] }
 0x4ed   :  { %v5425_v18 = vadd.f32 %v12900_v59, %v5310_v2  ;;  %v2707_v2 = vadd.f32 %v18957_v26, %v2273_v36  ;;  %v18961_v36 = vld [vmem:[#allocation88_spill] sm:$0xff] }
 0x4ee   :  { %v5003_v22 = vpop.permute.xlu1 %5002  ;;  %v13288_v54 = vpop.permute.xlu0 %2910  ;;  %v2275_v50 = vadd.f32 %v18958_v16, %v1841_v0 }
 0x4ef   :  { %18950 = vst [vmem:[#allocation5_spill] sm:$0xff] %v13288_v54  ;;  %v5312_v10 = vadd.f32 %v5003_v22, %v4878_v44  ;;  %v5533_v44 = vmax.f32 %v5425_v18, 0.0  ;;  %v18983_v54 = vld [vmem:[#allocation444_spill] sm:$0xff] }
 0x4f0   :  { %4584 = vrot.lane.b32.xlu1 %v18949_v28, %s10587_s22  ;;  %5070 = vrot.lane.b32.xlu0 %v18918_v1, %s10588_s0  ;;  %v2709_v56 = vadd.f32 %v18960_v52, %v2275_v50 }
 0x4f1   :  { %v5427_v49 = vadd.f32 %v12900_v59, %v5312_v10  ;;  %v18959_v10 = vld [vmem:[#allocation441_spill] sm:$0xff] }
 0x4f2   :  { %v13299_v43 = vpop.permute.xlu1 %2914  ;;  %v13301_v62 = vpop.permute.xlu0 %3280  ;;  %v3141_v42 = vadd.f32 %v18959_v10, %v2707_v2 }
 0x4f3   :  { %18954 = vst [vmem:[#allocation80_spill] sm:$0xff] %v13299_v43  ;;  %v5535_v22 = vmax.f32 %v5427_v49, 0.0  ;;  %v18962_v49 = vld [vmem:[#allocation443_spill] sm:$0xff] }
 0x4f4   :  { %5074 = vrot.lane.b32.xlu1 %v18947_v46, %s10588_s0  ;;  %3352 = vrot.lane.b32.xlu0 %v18936_v7, %s10584_s28  ;;  %v3575_v18 = vadd.f32 %v13010_v21, %v3141_v42  ;;  %v3143_v0 = vadd.f32 %v18962_v49, %v2709_v56  ;;  %v18980_v43 = vld [vmem:[#allocation127_spill] sm:$0xff] }
 0x4f5   :  { %v5635_v1 = vmax.f32 %v5533_v44, %v5535_v22 }
 0x4f6   :  { %v13312_v24 = vpop.permute.xlu1 %3284  ;;  %v13314_v19 = vpop.permute.xlu0 %3770  ;;  %v4009_v26 = vadd.f32 %v13055_v37, %v3575_v18  ;;  %v3577_v22 = vadd.f32 %v13022_v39, %v3143_v0 }
 0x4f7   :  { %10083 = vmatprep.mubr.msk.f32.mxu0 %vm5685_vm4, %v5635_v1  ;;  %v18963_v1 = vld [vmem:[#allocation41_spill] sm:$0xff] }
 0x4f8   :  { %3356 = vrot.lane.b32.xlu1 %v18961_v36, %s10584_s28  ;;  %3722 = vrot.lane.b32.xlu0 %v18937_v30, %s10585_s30  ;;  %v4443_v21 = vadd.f32 %v13150_v3, %v4009_v26  ;;  %v4011_v42 = vadd.f32 %v13062_v25, %v3577_v22 }
 0x4fa   :  { %v13325_v2 = vpop.permute.xlu1 %3774  ;;  %v13327_v44 = vpop.permute.xlu0 %4140  ;;  %v4877_v16 = vadd.f32 %v13228_v14, %v4443_v21  ;;  %v4445_v10 = vadd.f32 %v13167_v61, %v4011_v42  ;;  %v18965_v42 = vld [vmem:[#allocation95_spill] sm:$0xff] }
 0x4fc   :  { %3726 = vrot.lane.b32.xlu1 %v18963_v1, %s10585_s30  ;;  %4212 = vrot.lane.b32.xlu0 %v18936_v7, %s10586_s14  ;;  %v4879_v39 = vadd.f32 %v13234_v17, %v4445_v10  ;;  %v18966_v10 = vld [vmem:[#allocation44_spill] sm:$0xff] }
 0x4fe   :  { %v13337_v50 = vpop.permute.xlu1 %4144  ;;  %v5001_v37 = vpop.permute.xlu0 %5000 }
 0x4ff   :  { %v5311_v52 = vadd.f32 %v5001_v37, %v4877_v16 }
 0x500   :  { %4216 = vrot.lane.b32.xlu1 %v18961_v36, %s10586_s14  ;;  %4582 = vrot.lane.b32.xlu0 %v18937_v30, %s10587_s22  ;;  %v18970_v30 = vld [vmem:[#allocation94_spill] sm:$0xff] }
 0x501   :  { %v5426_v25 = vadd.f32 %v12900_v59, %v5311_v52 }
 0x502   :  { %v5005_v3 = vpop.permute.xlu1 %5004  ;;  %v13345_v56 = vpop.permute.xlu0 %3342 }
 0x503   :  { %v5313_v14 = vadd.f32 %v5005_v3, %v4879_v39  ;;  %v5534_v0 = vmax.f32 %v5426_v25, 0.0 }
 0x504   :  { %4586 = vrot.lane.b32.xlu1 %v18963_v1, %s10587_s22  ;;  %5072 = vrot.lane.b32.xlu0 %v18936_v7, %s10588_s0 }
 0x505   :  { %v5428_v61 = vadd.f32 %v12900_v59, %v5313_v14 }
 0x506   :  { %v13353_v18 = vpop.permute.xlu1 %3346  ;;  %v13355_v49 = vpop.permute.xlu0 %3712 }
 0x507   :  { %18964 = vst [vmem:[#allocation78_spill] sm:$0xff] %v13353_v18  ;;  %v5536_v17 = vmax.f32 %v5428_v61, 0.0 }
 0x508   :  { %5076 = vrot.lane.b32.xlu1 %v18961_v36, %s10588_s0  ;;  %2924 = vrot.lane.b32.xlu0 %v18947_v46, %s10583_s27 }
 0x509   :  { %v5636_v26 = vmax.f32 %v5534_v0, %v5536_v17 }
 0x50a   :  { %v13361_v22 = vpop.permute.xlu1 %3716  ;;  %v13363_v21 = vpop.permute.xlu0 %4202 }
 0x50b   :  { %10084 = vmatmul.mubr.msk.f32.gmra.mrb[134].mxu0 %vm5685_vm4, %v5636_v26 }
 0x50c   :  { %2928 = vrot.lane.b32.xlu1 %v18965_v42, %s10583_s27  ;;  %3294 = vrot.lane.b32.xlu0 %v18949_v28, %s10584_s28 }
 0x50e   :  { %v13370_v16 = vpop.permute.xlu1 %4206  ;;  %v4573_v37 = vpop.permute.xlu0 %4572 }
 0x510   :  { %3298 = vrot.lane.b32.xlu1 %v18966_v10, %s10584_s28  ;;  %3784 = vrot.lane.b32.xlu0 %v18947_v46, %s10585_s30 }
 0x512   :  { %v4577_v52 = vpop.permute.xlu1 %4576  ;;  %v13376_v39 = vpop.permute.xlu0 %3344 }
 0x513   :  { %18967 = vst [vmem:[#allocation90_spill] sm:$0xff] %v13376_v39  ;;  %v18981_v39 = vld [vmem:[#allocation347_spill] sm:$0xff] }
 0x514   :  { %3788 = vrot.lane.b32.xlu1 %v18965_v42, %s10585_s30  ;;  %4154 = vrot.lane.b32.xlu0 %v18949_v28, %s10586_s14 }
 0x516   :  { %v13382_v3 = vpop.permute.xlu1 %3348  ;;  %v13384_v25 = vpop.permute.xlu0 %3714 }
 0x517   :  { %18968 = vst [vmem:[#allocation8_spill] sm:$0xff] %v13382_v3  ;;  %v18979_v3 = vld [vmem:[#allocation22_spill] sm:$0xff] }
 0x518   :  { %4158 = vrot.lane.b32.xlu1 %v18966_v10, %s10586_s14  ;;  %4644 = vrot.lane.b32.xlu0 %v18947_v46, %s10587_s22 }
 0x51a   :  { %v13390_v14 = vpop.permute.xlu1 %3718  ;;  %v13392_v61 = vpop.permute.xlu0 %4204 }
 0x51c   :  { %4648 = vrot.lane.b32.xlu1 %v18965_v42, %s10587_s22  ;;  %5014 = vrot.lane.b32.xlu0 %v18949_v28, %s10588_s0 }
 0x51e   :  { %v13398_v0 = vpop.permute.xlu1 %4208  ;;  %v13400_v17 = vpop.permute.xlu0 %4574 }
 0x520   :  { %5018 = vrot.lane.b32.xlu1 %v18966_v10, %s10588_s0  ;;  %2926 = vrot.lane.b32.xlu0 %v18961_v36, %s10583_s27 }
 0x522   :  { %v13406_v26 = vpop.permute.xlu1 %4578  ;;  %v13408_v46 = vpop.permute.xlu0 %2916 }
 0x523   :  { %18969 = vst [vmem:[#allocation73_spill] sm:$0xff] %v13408_v46 }
 0x524   :  { %2930 = vrot.lane.b32.xlu1 %v18970_v30, %s10583_s27  ;;  %3296 = vrot.lane.b32.xlu0 %v18963_v1, %s10584_s28 }
 0x526   :  { %v13414_v28 = vpop.permute.xlu1 %2920  ;;  %v13416_v7 = vpop.permute.xlu0 %3286 }
 0x527   :  { %18971 = vst [vmem:[#allocation85_spill] sm:$0xff] %v13414_v28  ;;  %18972 = vst [vmem:[#allocation10_spill] sm:$0xff] %v13416_v7  ;;  %v1844_v28 = vadd.f32 %v18980_v43, %v18979_v3  ;;  %v2710_v7 = vadd.f32 %v18981_v39, %v2276_v55  ;;  %v18985_v55 = vld [vmem:[#allocation446_spill] sm:$0xff] }
 0x528   :  { %3300 = vrot.lane.b32.xlu1 %v18975_v53, %s10584_s28  ;;  %3786 = vrot.lane.b32.xlu0 %v18961_v36, %s10585_s30 }
 0x529   :  { %v2278_v29 = vadd.f32 %v18982_v31, %v1844_v28  ;;  %v3144_v18 = vadd.f32 %v18983_v54, %v2710_v7 }
 0x52a   :  { %v13425_v4 = vpop.permute.xlu1 %3290  ;;  %v13427_v46 = vpop.permute.xlu0 %3776 }
 0x52b   :  { %18977 = vst [vmem:[#allocation81_spill] sm:$0xff] %v13425_v4  ;;  %18978 = vst [vmem:[#allocation97_spill] sm:$0xff] %v13427_v46  ;;  %v18984_v4 = vld [vmem:[#allocation349_spill] sm:$0xff]  ;;  %v3578_v43 = vadd.f32 %v13088_v35, %v3144_v18 }
 0x52c   :  { %3790 = vrot.lane.b32.xlu1 %v18970_v30, %s10585_s30  ;;  %4156 = vrot.lane.b32.xlu0 %v18963_v1, %s10586_s14  ;;  %v2712_v46 = vadd.f32 %v18984_v4, %v2278_v29 }
 0x52d   :  { %v4012_v28 = vadd.f32 %v13197_v8, %v3578_v43 }
 0x52e   :  { %v13438_v5 = vpop.permute.xlu1 %3780  ;;  %v13440_v12 = vpop.permute.xlu0 %4146  ;;  %v3146_v39 = vadd.f32 %v18985_v55, %v2712_v46 }
 0x52f   :  { %v4446_v4 = vadd.f32 %v13272_v9, %v4012_v28 }
 0x530   :  { %4160 = vrot.lane.b32.xlu1 %v18975_v53, %s10586_s14  ;;  %4646 = vrot.lane.b32.xlu0 %v18961_v36, %s10587_s22  ;;  %v3580_v54 = vadd.f32 %v13098_v23, %v3146_v39  ;;  %v18986_v23 = vld [vmem:[#allocation46_spill] sm:$0xff]  ;;  %v18994_v36 = vld [vmem:[#allocation128_spill] sm:$0xff] }
 0x531   :  { %v4880_v18 = vadd.f32 %v4573_v37, %v4446_v4  ;;  %v18988_v37 = vld [vmem:[#allocation101_spill] sm:$0xff]  ;;  %v18990_v4 = vld [vmem:[#allocation122_spill] sm:$0xff] }
 0x532   :  { %v13450_v3 = vpop.permute.xlu1 %4150  ;;  %v13452_v7 = vpop.permute.xlu0 %4636  ;;  %v4014_v35 = vadd.f32 %v13205_v20, %v3580_v54 }
 0x534   :  { %4650 = vrot.lane.b32.xlu1 %v18970_v30, %s10587_s22  ;;  %5016 = vrot.lane.b32.xlu0 %v18963_v1, %s10588_s0  ;;  %v4448_v31 = vadd.f32 %v13281_v63, %v4014_v35  ;;  %v18995_v1 = vld [vmem:[#allocation21_spill] sm:$0xff] }
 0x536   :  { %v13461_v46 = vpop.permute.xlu1 %4640  ;;  %v5007_v8 = vpop.permute.xlu0 %5006  ;;  %v4882_v9 = vadd.f32 %v4577_v52, %v4448_v31  ;;  %v18991_v52 = vld [vmem:[#allocation19_spill] sm:$0xff]  ;;  %v18992_v31 = vld [vmem:[#allocation132_spill] sm:$0xff] }
 0x537   :  { %v5314_v29 = vadd.f32 %v5007_v8, %v4880_v18  ;;  %v1843_v35 = vadd.f32 %v18991_v52, %v18990_v4  ;;  %v18998_v52 = vld [vmem:[#allocation445_spill] sm:$0xff] }
 0x538   :  { %5020 = vrot.lane.b32.xlu1 %v18975_v53, %s10588_s0  ;;  %2872 = vrot.lane.b32.xlu0 %v18986_v23, %s10583_s27 }
 0x539   :  { %v5429_v39 = vadd.f32 %v12900_v59, %v5314_v29  ;;  %v2277_v29 = vadd.f32 %v18992_v31, %v1843_v35  ;;  %v18999_v31 = vld [vmem:[#allocation350_spill] sm:$0xff] }
 0x53a   :  { %v5011_v43 = vpop.permute.xlu1 %5010  ;;  %v13468_v55 = vpop.permute.xlu0 %2918 }
 0x53b   :  { %18987 = vst [vmem:[#allocation93_spill] sm:$0xff] %v13468_v55  ;;  %v5316_v20 = vadd.f32 %v5011_v43, %v4882_v9  ;;  %v5537_v18 = vmax.f32 %v5429_v39, 0.0  ;;  %v18996_v55 = vld [vmem:[#allocation348_spill] sm:$0xff]  ;;  %v18997_v39 = vld [vmem:[#allocation138_spill] sm:$0xff] }
 0x53c   :  { %3358 = vrot.lane.b32.xlu1 %v18965_v42, %s10584_s28  ;;  %3362 = vrot.lane.b32.xlu0 %v18988_v37, %s10584_s28  ;;  %v2711_v4 = vadd.f32 %v18996_v55, %v2277_v29 }
 0x53d   :  { %v5431_v63 = vadd.f32 %v12900_v59, %v5316_v20 }
 0x53e   :  { %v13476_v28 = vpop.permute.xlu1 %2922  ;;  %v13478_v54 = vpop.permute.xlu0 %3288  ;;  %v3145_v35 = vadd.f32 %v18998_v52, %v2711_v4 }
 0x53f   :  { %18989 = vst [vmem:[#allocation105_spill] sm:$0xff] %v13476_v28  ;;  %v5539_v8 = vmax.f32 %v5431_v63, 0.0  ;;  %v1845_v28 = vadd.f32 %v18995_v1, %v18994_v36 }
 0x540   :  { %3728 = vrot.lane.b32.xlu1 %v18966_v10, %s10585_s30  ;;  %3732 = vrot.lane.b32.xlu0 %v18986_v23, %s10585_s30  ;;  %v3579_v1 = vadd.f32 %v13134_v15, %v3145_v35 }
 0x541   :  { %v5637_v9 = vmax.f32 %v5537_v18, %v5539_v8  ;;  %v2279_v63 = vadd.f32 %v18997_v39, %v1845_v28  ;;  %v19002_v28 = vld [vmem:[#allocation447_spill] sm:$0xff] }
 0x542   :  { %v13487_v43 = vpop.permute.xlu1 %3292  ;;  %v13489_v20 = vpop.permute.xlu0 %3778  ;;  %v4013_v4 = vadd.f32 %v13220_v38, %v3579_v1 }
 0x543   :  { %18993 = vst [vmem:[#allocation74_spill] sm:$0xff] %v13487_v43  ;;  %10086 = vmatprep.mubr.msk.f32.mxu0 %vm5685_vm4, %v5637_v9  ;;  %v2713_v36 = vadd.f32 %v18999_v31, %v2279_v63 }
 0x544   :  { %4218 = vrot.lane.b32.xlu1 %v18965_v42, %s10586_s14  ;;  %4222 = vrot.lane.b32.xlu0 %v18988_v37, %s10586_s14  ;;  %v4447_v63 = vadd.f32 %v13327_v44, %v4013_v4 }
 0x545   :  { %v3147_v9 = vadd.f32 %v19002_v28, %v2713_v36 }
 0x546   :  { %v13501_v18 = vpop.permute.xlu1 %3782  ;;  %v13503_v8 = vpop.permute.xlu0 %4148  ;;  %v4881_v31 = vadd.f32 %v13400_v17, %v4447_v63 }
 0x547   :  { %v13507_v55 = vpop.f32.mrb[128].mxu0  ;;  %v3581_v15 = vadd.f32 %v13148_v6, %v3147_v9  ;;  %v19003_v6 = vld [vmem:[#allocation45_spill] sm:$0xff] }
 0x548   :  { %19000 = vst [vmem:[#allocation7_spill] sm:$0xff] %v13507_v55  ;;  %v13509_v29 = vpop.f32.mrb[129].mxu0  ;;  %4588 = vrot.lane.b32.xlu1 %v18966_v10, %s10587_s22  ;;  %4592 = vrot.lane.b32.xlu0 %v18986_v23, %s10587_s22  ;;  %v19011_v10 = vld [vmem:[#allocation221_spill] sm:$0xff] }
 0x549   :  { %19001 = vst [vmem:[#allocation86_spill] sm:$0xff] %v13509_v29  ;;  %v4015_v35 = vadd.f32 %v13226_v11, %v3581_v15  ;;  %v19005_v11 = vld [vmem:[#allocation52_spill] sm:$0xff]  ;;  %v19006_v15 = vld [vmem:[#allocation217_spill] sm:$0xff]  ;;  %v19010_v29 = vld [vmem:[#allocation54_spill] sm:$0xff] }
 0x54a   :  { %v13517_v39 = vpop.permute.xlu1 %4152  ;;  %v13519_v52 = vpop.permute.xlu0 %4638  ;;  %v1874_v17 = vadd.f32 %v19006_v15, %v19005_v11  ;;  %v1876_v15 = vadd.f32 %v19011_v10, %v19010_v29  ;;  %v19014_v10 = vld [vmem:[#allocation381_spill] sm:$0xff] }
 0x54b   :  { %v4449_v1 = vadd.f32 %v13337_v50, %v4015_v35  ;;  %v19007_v50 = vld [vmem:[#allocation100_spill] sm:$0xff]  ;;  %v19008_v35 = vld [vmem:[#allocation223_spill] sm:$0xff] }
 0x54c   :  { %5078 = vrot.lane.b32.xlu1 %v18965_v42, %s10588_s0  ;;  %5082 = vrot.lane.b32.xlu0 %v18988_v37, %s10588_s0  ;;  %v19012_v42 = vld [vmem:[#allocation379_spill] sm:$0xff] }
 0x54d   :  { %v4883_v44 = vadd.f32 %v13406_v26, %v4449_v1 }
 0x54e   :  { %v13529_v36 = vpop.permute.xlu1 %4642  ;;  %v5009_v38 = vpop.permute.xlu0 %5008 }
 0x54f   :  { %v5315_v28 = vadd.f32 %v5009_v38, %v4881_v31  ;;  %v2308_v31 = vadd.f32 %v19008_v35, %v1874_v17  ;;  %v19013_v17 = vld [vmem:[#allocation227_spill] sm:$0xff] }
 0x550   :  { %2874 = vrot.lane.b32.xlu1 %v19003_v6, %s10583_s27  ;;  %3360 = vrot.lane.b32.xlu0 %v18970_v30, %s10584_s28  ;;  %v2310_v35 = vadd.f32 %v19013_v17, %v1876_v15 }
 0x551   :  { %v5430_v63 = vadd.f32 %v12900_v59, %v5315_v28  ;;  %v2742_v28 = vadd.f32 %v19012_v42, %v2308_v31 }
 0x552   :  { %v5013_v9 = vpop.permute.xlu1 %5012  ;;  %v13537_v4 = vpop.permute.xlu0 %3350  ;;  %v2744_v43 = vadd.f32 %v19014_v10, %v2310_v35  ;;  %v19016_v35 = vld [vmem:[#allocation51_spill] sm:$0xff] }
 0x553   :  { %19004 = vst [vmem:[#allocation84_spill] sm:$0xff] %v13537_v4  ;;  %v5317_v55 = vadd.f32 %v5013_v9, %v4883_v44  ;;  %v5538_v44 = vmax.f32 %v5430_v63, 0.0  ;;  %v19017_v10 = vld [vmem:[#allocation107_spill] sm:$0xff] }
 0x554   :  { %3364 = vrot.lane.b32.xlu1 %v19007_v50, %s10584_s28  ;;  %3730 = vrot.lane.b32.xlu0 %v18975_v53, %s10585_s30  ;;  %v3178_v63 = vadd.f32 %v13086_v40, %v2744_v43 }
 0x555   :  { %v5432_v38 = vadd.f32 %v12900_v59, %v5317_v55  ;;  %v3176_v59 = vadd.f32 %v13075_v41, %v2742_v28 }
 0x556   :  { %v13548_v26 = vpop.permute.xlu1 %3354  ;;  %v13550_v1 = vpop.permute.xlu0 %3720  ;;  %v3612_v15 = vadd.f32 %v13195_v45, %v3178_v63 }
 0x557   :  { %19009 = vst [vmem:[#allocation9_spill] sm:$0xff] %v13548_v26  ;;  %v5540_v9 = vmax.f32 %v5432_v38, 0.0  ;;  %v3610_v42 = vadd.f32 %v13181_v47, %v3176_v59  ;;  %v13601_v59 = vld [vmem:[%s17986_s2] ss:$0 sm:$0xff] }
 0x558   :  { %3734 = vrot.lane.b32.xlu1 %v19003_v6, %s10585_s30  ;;  %4220 = vrot.lane.b32.xlu0 %v18970_v30, %s10586_s14  ;;  %v4046_v28 = vadd.f32 %v13270_v58, %v3612_v15  ;;  %v19015_v58 = vld [vmem:[#allocation218_spill] sm:$0xff] }
 0x559   :  { %v5638_v55 = vmax.f32 %v5538_v44, %v5540_v9  ;;  %v4044_v41 = vadd.f32 %v13260_v32, %v3610_v42 }
 0x55a   :  { %v13561_v26 = vpop.permute.xlu1 %3724  ;;  %v13563_v4 = vpop.permute.xlu0 %4210  ;;  %v4480_v44 = vadd.f32 %v13370_v16, %v4046_v28  ;;  %v19021_v28 = vld [vmem:[#allocation53_spill] sm:$0xff] }
 0x55b   :  { %10087 = vmatmul.mubr.msk.f32.gmra.mrb[136].mxu0 %vm5685_vm4, %v5638_v55  ;;  %v4478_v47 = vadd.f32 %v13363_v21, %v4044_v41 }
 0x55c   :  { %4224 = vrot.lane.b32.xlu1 %v19007_v50, %s10586_s14  ;;  %4590 = vrot.lane.b32.xlu0 %v18975_v53, %s10587_s22  ;;  %v4914_v45 = vadd.f32 %v13461_v46, %v4480_v44  ;;  %v19018_v46 = vld [vmem:[#allocation224_spill] sm:$0xff] }
 0x55d   :  { %v4912_v40 = vadd.f32 %v13452_v7, %v4478_v47  ;;  %v1875_v7 = vadd.f32 %v19016_v35, %v19015_v58  ;;  %v19020_v47 = vld [vmem:[#allocation222_spill] sm:$0xff]  ;;  %v19024_v58 = vld [vmem:[#allocation228_spill] sm:$0xff] }
 0x55e   :  { %v13574_v31 = vpop.permute.xlu1 %4214  ;;  %v13576_v38 = vpop.permute.xlu0 %4580 }
 0x55f   :  { %v2309_v42 = vadd.f32 %v19018_v46, %v1875_v7 }
 0x560   :  { %4594 = vrot.lane.b32.xlu1 %v19003_v6, %s10587_s22  ;;  %5080 = vrot.lane.b32.xlu0 %v18970_v30, %s10588_s0 }
 0x562   :  { %v13586_v43 = vpop.permute.xlu1 %4584  ;;  %v5071_v32 = vpop.permute.xlu0 %5070 }
 0x563   :  { %v5346_v9 = vadd.f32 %v5071_v32, %v4912_v40  ;;  %v1877_v40 = vadd.f32 %v19021_v28, %v19020_v47  ;;  %v19022_v32 = vld [vmem:[#allocation380_spill] sm:$0xff] }
 0x564   :  { %5084 = vrot.lane.b32.xlu1 %v19007_v50, %s10588_s0  ;;  %2932 = vrot.lane.b32.xlu0 %v18988_v37, %s10583_s27  ;;  %v2743_v44 = vadd.f32 %v19022_v32, %v2309_v42  ;;  %v19025_v47 = vld [vmem:[#allocation12_spill] sm:$0xff] }
 0x565   :  { %v5461_v16 = vadd.f32 %v13601_v59, %v5346_v9  ;;  %v2311_v7 = vadd.f32 %v19024_v58, %v1877_v40 }
 0x566   :  { %v5075_v21 = vpop.permute.xlu1 %5074  ;;  %v13594_v17 = vpop.permute.xlu0 %3352 }
 0x567   :  { %v5348_v55 = vadd.f32 %v5075_v21, %v4914_v45  ;;  %v5569_v9 = vmax.f32 %v5461_v16, 0.0  ;;  %v19023_v21 = vld [vmem:[#allocation48_spill] sm:$0xff] }
 0x568   :  { %2936 = vrot.lane.b32.xlu1 %v19017_v10, %s10583_s27  ;;  %3302 = vrot.lane.b32.xlu0 %v18986_v23, %s10584_s28 }
 0x569   :  { %v5463_v63 = vadd.f32 %v13601_v59, %v5348_v55  ;;  %v3177_v55 = vadd.f32 %v13119_v57, %v2743_v44 }
 0x56a   :  { %v13610_v41 = vpop.permute.xlu1 %3356  ;;  %v13612_v15 = vpop.permute.xlu0 %3722 }
 0x56b   :  { %19019 = vst [vmem:[#allocation98_spill] sm:$0xff] %v13610_v41  ;;  %v5571_v45 = vmax.f32 %v5463_v63, 0.0  ;;  %v2745_v41 = vadd.f32 %v19025_v47, %v2311_v7  ;;  %v3611_v16 = vadd.f32 %v13212_v51, %v3177_v55 }
 0x56c   :  { %3306 = vrot.lane.b32.xlu1 %v19023_v21, %s10584_s28  ;;  %3792 = vrot.lane.b32.xlu0 %v18988_v37, %s10585_s30 }
 0x56d   :  { %v5653_v46 = vmax.f32 %v5569_v9, %v5571_v45  ;;  %v3179_v57 = vadd.f32 %v13132_v13, %v2745_v41  ;;  %v4045_v40 = vadd.f32 %v13314_v19, %v3611_v16  ;;  %v19028_v16 = vld [vmem:[#allocation24_spill] sm:$0xff] }
 0x56e   :  { %v13623_v53 = vpop.permute.xlu1 %3726  ;;  %v13625_v30 = vpop.permute.xlu0 %4212 }
 0x56f   :  { %v13629_v42 = vpop.f32.mrb[130].mxu0  ;;  %10110 = vmatprep.mubr.msk.f32.mxu1 %vm5685_vm4, %v5653_v46  ;;  %v3613_v51 = vadd.f32 %v13218_v34, %v3179_v57  ;;  %v4479_v9 = vadd.f32 %v13392_v61, %v4045_v40 }
 0x570   :  { %19026 = vst [vmem:[#allocation96_spill] sm:$0xff] %v13629_v42  ;;  %v13632_v63 = vpop.f32.mrb[131].mxu0  ;;  %3796 = vrot.lane.b32.xlu1 %v19017_v10, %s10585_s30  ;;  %4162 = vrot.lane.b32.xlu0 %v18986_v23, %s10586_s14  ;;  %v19034_v42 = vld [vmem:[#allocation351_spill] sm:$0xff] }
 0x571   :  { %19027 = vst [vmem:[#allocation108_spill] sm:$0xff] %v13632_v63  ;;  %v4047_v45 = vadd.f32 %v13325_v2, %v3613_v51  ;;  %v4913_v13 = vadd.f32 %v13519_v52, %v4479_v9  ;;  %v19030_v9 = vld [vmem:[#allocation106_spill] sm:$0xff]  ;;  %v19038_v63 = vld [vmem:[#allocation353_spill] sm:$0xff] }
 0x572   :  { %v13640_v32 = vpop.permute.xlu1 %4216  ;;  %v13642_v44 = vpop.permute.xlu0 %4582 }
 0x573   :  { %v4481_v58 = vadd.f32 %v13398_v0, %v4047_v45  ;;  %v19031_v45 = vld [vmem:[#allocation141_spill] sm:$0xff] }
 0x574   :  { %4166 = vrot.lane.b32.xlu1 %v19023_v21, %s10586_s14  ;;  %4652 = vrot.lane.b32.xlu0 %v18988_v37, %s10587_s22 }
 0x575   :  { %v4915_v34 = vadd.f32 %v13529_v36, %v4481_v58  ;;  %v19029_v36 = vld [vmem:[#allocation133_spill] sm:$0xff] }
 0x576   :  { %v13652_v41 = vpop.permute.xlu1 %4586  ;;  %v5073_v19 = vpop.permute.xlu0 %5072  ;;  %v1846_v57 = vadd.f32 %v19029_v36, %v19028_v16 }
 0x577   :  { %v5347_v7 = vadd.f32 %v5073_v19, %v4913_v13 }
 0x578   :  { %4656 = vrot.lane.b32.xlu1 %v19017_v10, %s10587_s22  ;;  %5022 = vrot.lane.b32.xlu0 %v18986_v23, %s10588_s0  ;;  %v2280_v13 = vadd.f32 %v19031_v45, %v1846_v57  ;;  %v19037_v57 = vld [vmem:[#allocation448_spill] sm:$0xff]  ;;  %v19052_v23 = vld [vmem:[#allocation354_spill] sm:$0xff] }
 0x579   :  { %v5462_v2 = vadd.f32 %v13601_v59, %v5347_v7 }
 0x57a   :  { %v5077_v61 = vpop.permute.xlu1 %5076  ;;  %v13660_v55 = vpop.permute.xlu0 %2924  ;;  %v2714_v16 = vadd.f32 %v19034_v42, %v2280_v13  ;;  %v19039_v13 = vld [vmem:[#allocation450_spill] sm:$0xff] }
 0x57b   :  { %v5349_v52 = vadd.f32 %v5077_v61, %v4915_v34  ;;  %v5570_v40 = vmax.f32 %v5462_v2, 0.0  ;;  %v19032_v34 = vld [vmem:[#allocation26_spill] sm:$0xff]  ;;  %v19033_v61 = vld [vmem:[#allocation139_spill] sm:$0xff] }
 0x57c   :  { %5026 = vrot.lane.b32.xlu1 %v19023_v21, %s10588_s0  ;;  %2934 = vrot.lane.b32.xlu0 %v19007_v50, %s10583_s27  ;;  %v19035_v2 = vld [vmem:[#allocation47_spill] sm:$0xff] }
 0x57d   :  { %v5464_v0 = vadd.f32 %v13601_v59, %v5349_v52  ;;  %v1848_v52 = vadd.f32 %v19033_v61, %v19032_v34 }
 0x57e   :  { %v13668_v46 = vpop.permute.xlu1 %2928  ;;  %v13670_v47 = vpop.permute.xlu0 %3294 }
 0x57f   :  { %v5572_v51 = vmax.f32 %v5464_v0, 0.0  ;;  %v19036_v0 = vld [vmem:[#allocation147_spill] sm:$0xff] }
 0x580   :  { %2938 = vrot.lane.b32.xlu1 %v19030_v9, %s10583_s27  ;;  %3304 = vrot.lane.b32.xlu0 %v19003_v6, %s10584_s28  ;;  %v2282_v36 = vadd.f32 %v19036_v0, %v1848_v52 }
 0x581   :  { %v5654_v19 = vmax.f32 %v5570_v40, %v5572_v51  ;;  %v3148_v40 = vadd.f32 %v19037_v57, %v2714_v16 }
 0x582   :  { %v13679_v58 = vpop.permute.xlu1 %3298  ;;  %v13681_v7 = vpop.permute.xlu0 %3784  ;;  %v2716_v34 = vadd.f32 %v19038_v63, %v2282_v36 }
 0x583   :  { %10111 = vmatmul.mubr.msk.f32.vlgmr.msra.gmra.mrb[0].mxu1 %vm5685_vm4, %v5654_v19  ;;  %v3582_v42 = vadd.f32 %v13247_v60, %v3148_v40 }
 0x584   :  { %3308 = vrot.lane.b32.xlu1 %v19035_v2, %s10584_s28  ;;  %3794 = vrot.lane.b32.xlu0 %v19007_v50, %s10585_s30  ;;  %v3150_v19 = vadd.f32 %v19039_v13, %v2716_v34 }
 0x585   :  { %v4016_v61 = vadd.f32 %v13355_v49, %v3582_v42 }
 0x586   :  { %v13693_v51 = vpop.permute.xlu1 %3788  ;;  %v13695_v45 = vpop.permute.xlu0 %4154  ;;  %v3584_v0 = vadd.f32 %v13258_v27, %v3150_v19 }
 0x587   :  { %v4450_v63 = vadd.f32 %v13440_v12, %v4016_v61  ;;  %v19042_v61 = vld [vmem:[#allocation134_spill] sm:$0xff] }
 0x588   :  { %3798 = vrot.lane.b32.xlu1 %v19030_v9, %s10585_s30  ;;  %4164 = vrot.lane.b32.xlu0 %v19003_v6, %s10586_s14  ;;  %v4018_v60 = vadd.f32 %v13361_v22, %v3584_v0 }
 0x589   :  { %v4884_v36 = vadd.f32 %v13576_v38, %v4450_v63 }
 0x58a   :  { %v13705_v52 = vpop.permute.xlu1 %4158  ;;  %v13707_v16 = vpop.permute.xlu0 %4644  ;;  %v4452_v40 = vadd.f32 %v13450_v3, %v4018_v60 }
 0x58c   :  { %4168 = vrot.lane.b32.xlu1 %v19035_v2, %s10586_s14  ;;  %4654 = vrot.lane.b32.xlu0 %v19007_v50, %s10587_s22  ;;  %v4886_v27 = vadd.f32 %v13586_v43, %v4452_v40  ;;  %v19043_v43 = vld [vmem:[#allocation23_spill] sm:$0xff]  ;;  %v19047_v50 = vld [vmem:[#allocation25_spill] sm:$0xff] }
 0x58d   :  { %v1847_v0 = vadd.f32 %v19043_v43, %v19042_v61 }
 0x58e   :  { %v13717_v57 = vpop.permute.xlu1 %4648  ;;  %v5015_v49 = vpop.permute.xlu0 %5014 }
 0x58f   :  { %v5318_v34 = vadd.f32 %v5015_v49, %v4884_v36  ;;  %v19044_v36 = vld [vmem:[#allocation50_spill] sm:$0xff]  ;;  %v19045_v49 = vld [vmem:[#allocation144_spill] sm:$0xff] }
 0x590   :  { %4658 = vrot.lane.b32.xlu1 %v19030_v9, %s10587_s22  ;;  %5024 = vrot.lane.b32.xlu0 %v19003_v6, %s10588_s0  ;;  %v2281_v40 = vadd.f32 %v19045_v49, %v1847_v0  ;;  %v19048_v6 = vld [vmem:[#allocation352_spill] sm:$0xff]  ;;  %v19051_v0 = vld [vmem:[#allocation449_spill] sm:$0xff] }
 0x591   :  { %v5433_v22 = vadd.f32 %v13601_v59, %v5318_v34 }
 0x592   :  { %v5019_v12 = vpop.permute.xlu1 %5018  ;;  %v13725_v42 = vpop.permute.xlu0 %2926  ;;  %v2715_v61 = vadd.f32 %v19048_v6, %v2281_v40 }
 0x593   :  { %19040 = vst [vmem:[#allocation91_spill] sm:$0xff] %v13725_v42  ;;  %v5320_v38 = vadd.f32 %v5019_v12, %v4886_v27  ;;  %v5541_v63 = vmax.f32 %v5433_v22, 0.0  ;;  %v19049_v22 = vld [vmem:[#allocation113_spill] sm:$0xff] }
 0x594   :  { %5028 = vrot.lane.b32.xlu1 %v19035_v2, %s10588_s0  ;;  %2876 = vrot.lane.b32.xlu0 %v19023_v21, %s10583_s27 }
 0x595   :  { %v5435_v3 = vadd.f32 %v13601_v59, %v5320_v38  ;;  %v19046_v38 = vld [vmem:[#allocation140_spill] sm:$0xff] }
 0x596   :  { %v13733_v13 = vpop.permute.xlu1 %2930  ;;  %v13735_v19 = vpop.permute.xlu0 %3296  ;;  %v1849_v37 = vadd.f32 %v19047_v50, %v19046_v38 }
 0x597   :  { %19041 = vst [vmem:[#allocation103_spill] sm:$0xff] %v13733_v13  ;;  %v5543_v60 = vmax.f32 %v5435_v3, 0.0  ;;  %v19050_v3 = vld [vmem:[#allocation150_spill] sm:$0xff] }
 0x598   :  { %2880 = vrot.lane.b32.xlu1 %v19044_v36, %s10583_s27  ;;  %3366 = vrot.lane.b32.xlu0 %v19017_v10, %s10584_s28  ;;  %v2283_v43 = vadd.f32 %v19050_v3, %v1849_v37  ;;  %v19055_v37 = vld [vmem:[#allocation451_spill] sm:$0xff] }
 0x599   :  { %v5639_v34 = vmax.f32 %v5541_v63, %v5543_v60  ;;  %v3149_v63 = vadd.f32 %v19051_v0, %v2715_v61 }
 0x59a   :  { %v13744_v27 = vpop.permute.xlu1 %3300  ;;  %v13746_v12 = vpop.permute.xlu0 %3786  ;;  %v2717_v50 = vadd.f32 %v19052_v23, %v2283_v43 }
 0x59b   :  { %10089 = vmatprep.mubr.msk.f32.mxu0 %vm5685_vm4, %v5639_v34  ;;  %v3583_v6 = vadd.f32 %v13301_v62, %v3149_v63 }
 0x59c   :  { %3370 = vrot.lane.b32.xlu1 %v19049_v22, %s10584_s28  ;;  %3736 = vrot.lane.b32.xlu0 %v19023_v21, %s10585_s30  ;;  %v3151_v38 = vadd.f32 %v19055_v37, %v2717_v50 }
 0x59d   :  { %v4017_v61 = vadd.f32 %v13384_v25, %v3583_v6 }
 0x59e   :  { %v13758_v60 = vpop.permute.xlu1 %3790  ;;  %v13760_v49 = vpop.permute.xlu0 %4156  ;;  %v3585_v62 = vadd.f32 %v13312_v24, %v3151_v38 }
 0x59f   :  { %v13764_v40 = vpop.f32.mrb[132].mxu0  ;;  %v4451_v23 = vadd.f32 %v13503_v8, %v4017_v61 }
 0x5a0   :  { %19053 = vst [vmem:[#allocation99_spill] sm:$0xff] %v13764_v40  ;;  %v13766_v34 = vpop.f32.mrb[133].mxu0  ;;  %3740 = vrot.lane.b32.xlu1 %v19044_v36, %s10585_s30  ;;  %4226 = vrot.lane.b32.xlu0 %v19017_v10, %s10586_s14  ;;  %v4019_v43 = vadd.f32 %v13390_v14, %v3585_v62  ;;  %v19062_v40 = vld [vmem:[#allocation231_spill] sm:$0xff] }
 0x5a1   :  { %19054 = vst [vmem:[#allocation111_spill] sm:$0xff] %v13766_v34  ;;  %v4885_v63 = vadd.f32 %v13642_v44, %v4451_v23  ;;  %v19057_v23 = vld [vmem:[#allocation56_spill] sm:$0xff]  ;;  %v19063_v34 = vld [vmem:[#allocation235_spill] sm:$0xff] }
 0x5a2   :  { %v13774_v3 = vpop.permute.xlu1 %4160  ;;  %v13776_v0 = vpop.permute.xlu0 %4646  ;;  %v4453_v6 = vadd.f32 %v13517_v39, %v4019_v43 }
 0x5a4   :  { %4230 = vrot.lane.b32.xlu1 %v19049_v22, %s10586_s14  ;;  %4596 = vrot.lane.b32.xlu0 %v19023_v21, %s10587_s22  ;;  %v4887_v24 = vadd.f32 %v13652_v41, %v4453_v6  ;;  %v19058_v41 = vld [vmem:[#allocation225_spill] sm:$0xff] }
 0x5a5   :  { %v1878_v43 = vadd.f32 %v19058_v41, %v19057_v23  ;;  %v19064_v41 = vld [vmem:[#allocation382_spill] sm:$0xff] }
 0x5a6   :  { %v13786_v50 = vpop.permute.xlu1 %4650  ;;  %v5017_v25 = vpop.permute.xlu0 %5016 }
 0x5a7   :  { %v5319_v37 = vadd.f32 %v5017_v25, %v4885_v63  ;;  %v19059_v63 = vld [vmem:[#allocation58_spill] sm:$0xff]  ;;  %v19060_v25 = vld [vmem:[#allocation229_spill] sm:$0xff] }
 0x5a8   :  { %4600 = vrot.lane.b32.xlu1 %v19044_v36, %s10587_s22  ;;  %5086 = vrot.lane.b32.xlu0 %v19017_v10, %s10588_s0  ;;  %v1880_v6 = vadd.f32 %v19060_v25, %v19059_v63  ;;  %v19065_v25 = vld [vmem:[#allocation383_spill] sm:$0xff] }
 0x5a9   :  { %v5434_v14 = vadd.f32 %v13601_v59, %v5319_v37 }
 0x5aa   :  { %v5021_v8 = vpop.permute.xlu1 %5020  ;;  %v13794_v38 = vpop.permute.xlu0 %2872  ;;  %v2314_v21 = vadd.f32 %v19063_v34, %v1880_v6 }
 0x5ab   :  { %19056 = vst [vmem:[#allocation92_spill] sm:$0xff] %v13794_v38  ;;  %v5321_v44 = vadd.f32 %v5021_v8, %v4887_v24  ;;  %v5542_v37 = vmax.f32 %v5434_v14, 0.0  ;;  %v19061_v8 = vld [vmem:[#allocation49_spill] sm:$0xff] }
 0x5ac   :  { %5090 = vrot.lane.b32.xlu1 %v19049_v22, %s10588_s0  ;;  %2878 = vrot.lane.b32.xlu0 %v19035_v2, %s10583_s27  ;;  %v2748_v14 = vadd.f32 %v19065_v25, %v2314_v21 }
 0x5ad   :  { %v5436_v39 = vadd.f32 %v13601_v59, %v5321_v44  ;;  %v2312_v44 = vadd.f32 %v19062_v40, %v1878_v43 }
 0x5ae   :  { %v13802_v61 = vpop.permute.xlu1 %3358  ;;  %v13804_v62 = vpop.permute.xlu0 %3362  ;;  %v3182_v34 = vadd.f32 %v13245_v48, %v2748_v14 }
 0x5af   :  { %v5544_v24 = vmax.f32 %v5436_v39, 0.0  ;;  %v2746_v42 = vadd.f32 %v19064_v41, %v2312_v44  ;;  %v19066_v39 = vld [vmem:[#allocation112_spill] sm:$0xff] }
 0x5b0   :  { %2882 = vrot.lane.b32.xlu1 %v19061_v8, %s10583_s27  ;;  %3368 = vrot.lane.b32.xlu0 %v19030_v9, %s10584_s28 }
 0x5b1   :  { %v5640_v10 = vmax.f32 %v5542_v37, %v5544_v24  ;;  %v3180_v40 = vadd.f32 %v13236_v33, %v2746_v42  ;;  %v19067_v24 = vld [vmem:[#allocation78_spill] sm:$0xff] }
 0x5b2   :  { %v13816_v38 = vpop.permute.xlu1 %3728  ;;  %v13818_v13 = vpop.permute.xlu0 %3732  ;;  %v3616_v21 = vadd.f32 %v19067_v24, %v3182_v34 }
 0x5b3   :  { %10090 = vmatmul.mubr.msk.f32.gmra.mrb[138].mxu0 %vm5685_vm4, %v5640_v10  ;;  %v3614_v37 = vadd.f32 %v13345_v56, %v3180_v40  ;;  %v19068_v10 = vld [vmem:[#allocation97_spill] sm:$0xff] }
 0x5b4   :  { %3372 = vrot.lane.b32.xlu1 %v19066_v39, %s10584_s28  ;;  %3738 = vrot.lane.b32.xlu0 %v19035_v2, %s10585_s30  ;;  %v4050_v33 = vadd.f32 %v13438_v5, %v3616_v21 }
 0x5b5   :  { %v4048_v44 = vadd.f32 %v19068_v10, %v3614_v37 }
 0x5b6   :  { %v13829_v43 = vpop.permute.xlu1 %4218  ;;  %v13831_v6 = vpop.permute.xlu0 %4222  ;;  %v4484_v56 = vadd.f32 %v13574_v31, %v4050_v33 }
 0x5b7   :  { %v4482_v41 = vadd.f32 %v13563_v4, %v4048_v44 }
 0x5b8   :  { %3742 = vrot.lane.b32.xlu1 %v19061_v8, %s10585_s30  ;;  %4228 = vrot.lane.b32.xlu0 %v19030_v9, %s10586_s14  ;;  %v4918_v14 = vadd.f32 %v13717_v57, %v4484_v56  ;;  %v19072_v57 = vld [vmem:[#allocation55_spill] sm:$0xff] }
 0x5b9   :  { %v4916_v25 = vadd.f32 %v13707_v16, %v4482_v41  ;;  %v19071_v16 = vld [vmem:[#allocation226_spill] sm:$0xff]  ;;  %v19073_v41 = vld [vmem:[#allocation232_spill] sm:$0xff] }
 0x5ba   :  { %v13841_v42 = vpop.permute.xlu1 %4588  ;;  %v13843_v48 = vpop.permute.xlu0 %4592  ;;  %v1879_v10 = vadd.f32 %v19072_v57, %v19071_v16 }
 0x5bc   :  { %4232 = vrot.lane.b32.xlu1 %v19066_v39, %s10586_s14  ;;  %4598 = vrot.lane.b32.xlu0 %v19035_v2, %s10587_s22  ;;  %v2313_v56 = vadd.f32 %v19073_v41, %v1879_v10  ;;  %v19077_v2 = vld [vmem:[#allocation14_spill] sm:$0xff] }
 0x5be   :  { %v5079_v40 = vpop.permute.xlu1 %5078  ;;  %v5083_v5 = vpop.permute.xlu0 %5082  ;;  %v2747_v16 = vadd.f32 %v19077_v2, %v2313_v56  ;;  %v19083_v56 = vld [vmem:[#allocation80_spill] sm:$0xff] }
 0x5bf   :  { %v5350_v34 = vadd.f32 %v5079_v40, %v4916_v25  ;;  %v5352_v37 = vadd.f32 %v5083_v5, %v4918_v14  ;;  %v19075_v5 = vld [vmem:[#allocation230_spill] sm:$0xff] }
 0x5c0   :  { %4602 = vrot.lane.b32.xlu1 %v19061_v8, %s10587_s22  ;;  %5088 = vrot.lane.b32.xlu0 %v19030_v9, %s10588_s0 }
 0x5c1   :  { %v5465_v4 = vadd.f32 %v13601_v59, %v5350_v34  ;;  %v5467_v31 = vadd.f32 %v13601_v59, %v5352_v37  ;;  %v19076_v34 = vld [vmem:[#allocation57_spill] sm:$0xff] }
 0x5c2   :  { %v13859_v24 = vpop.permute.xlu1 %2874  ;;  %v13861_v21 = vpop.permute.xlu0 %3360  ;;  %v1881_v37 = vadd.f32 %v19076_v34, %v19075_v5 }
 0x5c3   :  { %19069 = vst [vmem:[#allocation11_spill] sm:$0xff] %v13859_v24  ;;  %19070 = vst [vmem:[#allocation104_spill] sm:$0xff] %v13861_v21  ;;  %v5573_v44 = vmax.f32 %v5465_v4, 0.0  ;;  %v5575_v33 = vmax.f32 %v5467_v31, 0.0  ;;  %v19078_v4 = vld [vmem:[#allocation119_spill] sm:$0xff]  ;;  %v19079_v31 = vld [vmem:[#allocation236_spill] sm:$0xff] }
 0x5c4   :  { %5092 = vrot.lane.b32.xlu1 %v19066_v39, %s10588_s0  ;;  %2940 = vrot.lane.b32.xlu0 %v19049_v22, %s10583_s27  ;;  %v2315_v10 = vadd.f32 %v19079_v31, %v1881_v37  ;;  %v19081_v24 = vld [vmem:[#allocation384_spill] sm:$0xff] }
 0x5c5   :  { %v5655_v25 = vmax.f32 %v5573_v44, %v5575_v33  ;;  %v19080_v44 = vld [vmem:[#allocation5_spill] sm:$0xff] }
 0x5c6   :  { %v13870_v14 = vpop.permute.xlu1 %3364  ;;  %v13872_v40 = vpop.permute.xlu0 %3730  ;;  %v3181_v33 = vadd.f32 %v19080_v44, %v2747_v16  ;;  %v2749_v5 = vadd.f32 %v19081_v24, %v2315_v10  ;;  %v19084_v44 = vld [vmem:[#allocation8_spill] sm:$0xff] }
 0x5c7   :  { %19074 = vst [vmem:[#allocation102_spill] sm:$0xff] %v13870_v14  ;;  %10113 = vmatprep.mubr.msk.f32.mxu1 %vm5685_vm4, %v5655_v25  ;;  %v19082_v14 = vld [vmem:[#allocation90_spill] sm:$0xff] }
 0x5c8   :  { %2944 = vrot.lane.b32.xlu1 %v19078_v4, %s10583_s27  ;;  %3310 = vrot.lane.b32.xlu0 %v19044_v36, %s10584_s28  ;;  %v3615_v2 = vadd.f32 %v19082_v14, %v3181_v33  ;;  %v3183_v25 = vadd.f32 %v19083_v56, %v2749_v5 }
 0x5ca   :  { %v13884_v41 = vpop.permute.xlu1 %3734  ;;  %v13886_v9 = vpop.permute.xlu0 %4220  ;;  %v4049_v37 = vadd.f32 %v13489_v20, %v3615_v2  ;;  %v3617_v21 = vadd.f32 %v19084_v44, %v3183_v25  ;;  %v19087_v44 = vld [vmem:[#allocation28_spill] sm:$0xff] }
 0x5cc   :  { %3314 = vrot.lane.b32.xlu1 %v19005_v11, %s10584_s28  ;;  %3800 = vrot.lane.b32.xlu0 %v19049_v22, %s10585_s30  ;;  %v4483_v24 = vadd.f32 %v13625_v30, %v4049_v37  ;;  %v4051_v14 = vadd.f32 %v13501_v18, %v3617_v21 }
 0x5ce   :  { %v13896_v31 = vpop.permute.xlu1 %4224  ;;  %v13898_v16 = vpop.permute.xlu0 %4590  ;;  %v4917_v10 = vadd.f32 %v13776_v0, %v4483_v24  ;;  %v4485_v5 = vadd.f32 %v13640_v32, %v4051_v14 }
 0x5d0   :  { %3804 = vrot.lane.b32.xlu1 %v19078_v4, %s10585_s30  ;;  %4170 = vrot.lane.b32.xlu0 %v19044_v36, %s10586_s14  ;;  %v4919_v30 = vadd.f32 %v13786_v50, %v4485_v5  ;;  %v19088_v50 = vld [vmem:[#allocation145_spill] sm:$0xff] }
 0x5d1   :  { %v1850_v24 = vadd.f32 %v19088_v50, %v19087_v44  ;;  %v19096_v50 = vld [vmem:[#allocation118_spill] sm:$0xff] }
 0x5d2   :  { %v13908_v33 = vpop.permute.xlu1 %4594  ;;  %v5081_v20 = vpop.permute.xlu0 %5080 }
 0x5d3   :  { %v5351_v2 = vadd.f32 %v5081_v20, %v4917_v10  ;;  %v19089_v20 = vld [vmem:[#allocation153_spill] sm:$0xff] }
 0x5d4   :  { %4174 = vrot.lane.b32.xlu1 %v19005_v11, %s10586_s14  ;;  %4660 = vrot.lane.b32.xlu0 %v19049_v22, %s10587_s22  ;;  %v2284_v5 = vadd.f32 %v19089_v20, %v1850_v24  ;;  %v19092_v22 = vld [vmem:[#allocation151_spill] sm:$0xff] }
 0x5d5   :  { %v5466_v18 = vadd.f32 %v13601_v59, %v5351_v2  ;;  %v19097_v24 = vld [vmem:[#allocation159_spill] sm:$0xff] }
 0x5d6   :  { %v5085_v56 = vpop.permute.xlu1 %5084  ;;  %v13916_v25 = vpop.permute.xlu0 %2932 }
 0x5d7   :  { %19085 = vst [vmem:[#allocation13_spill] sm:$0xff] %v13916_v25  ;;  %v5353_v0 = vadd.f32 %v5085_v56, %v4919_v30  ;;  %v5574_v14 = vmax.f32 %v5466_v18, 0.0 }
 0x5d8   :  { %4664 = vrot.lane.b32.xlu1 %v19078_v4, %s10587_s22  ;;  %5030 = vrot.lane.b32.xlu0 %v19044_v36, %s10588_s0 }
 0x5d9   :  { %v5468_v32 = vadd.f32 %v13601_v59, %v5353_v0  ;;  %v19091_v0 = vld [vmem:[#allocation30_spill] sm:$0xff] }
 0x5da   :  { %v13924_v21 = vpop.permute.xlu1 %2936  ;;  %v13926_v37 = vpop.permute.xlu0 %3302  ;;  %v1852_v36 = vadd.f32 %v19092_v22, %v19091_v0  ;;  %v19100_v0 = vld [vmem:[#allocation10_spill] sm:$0xff] }
 0x5db   :  { %19086 = vst [vmem:[#allocation341_spill] sm:$0xff] %v13924_v21  ;;  %v5576_v10 = vmax.f32 %v5468_v32, 0.0  ;;  %v19093_v21 = vld [vmem:[#allocation355_spill] sm:$0xff] }
 0x5dc   :  { %5034 = vrot.lane.b32.xlu1 %v19005_v11, %s10588_s0  ;;  %2942 = vrot.lane.b32.xlu0 %v19066_v39, %s10583_s27  ;;  %v2718_v44 = vadd.f32 %v19093_v21, %v2284_v5  ;;  %v19099_v21 = vld [vmem:[#allocation357_spill] sm:$0xff] }
 0x5dd   :  { %v5656_v2 = vmax.f32 %v5574_v14, %v5576_v10  ;;  %v2286_v14 = vadd.f32 %v19097_v24, %v1852_v36  ;;  %v19098_v10 = vld [vmem:[#allocation452_spill] sm:$0xff] }
 0x5de   :  { %v13935_v30 = vpop.permute.xlu1 %3306  ;;  %v13937_v56 = vpop.permute.xlu0 %3792  ;;  %v3152_v20 = vadd.f32 %v19098_v10, %v2718_v44  ;;  %v19102_v10 = vld [vmem:[#allocation81_spill] sm:$0xff] }
 0x5df   :  { %19090 = vst [vmem:[#allocation114_spill] sm:$0xff] %v13935_v30  ;;  %v13942_v18 = vpop.f32.mrb[134].mxu0  ;;  %10114 = vmatmul.mubr.msk.f32.gmra.mrb[2].mxu1 %vm5685_vm4, %v5656_v2  ;;  %v2720_v5 = vadd.f32 %v19099_v21, %v2286_v14 }
 0x5e0   :  { %19094 = vst [vmem:[#allocation438_spill] sm:$0xff] %v13942_v18  ;;  %v13945_v32 = vpop.f32.mrb[135].mxu0  ;;  %2946 = vrot.lane.b32.xlu1 %v19096_v50, %s10583_s27  ;;  %3312 = vrot.lane.b32.xlu0 %v19061_v8, %s10584_s28  ;;  %v3586_v2 = vadd.f32 %v19100_v0, %v3152_v20  ;;  %v19101_v18 = vld [vmem:[#allocation454_spill] sm:$0xff] }
 0x5e1   :  { %19095 = vst [vmem:[#allocation342_spill] sm:$0xff] %v13945_v32  ;;  %v3154_v32 = vadd.f32 %v19101_v18, %v2720_v5 }
 0x5e2   :  { %v13953_v25 = vpop.permute.xlu1 %3796  ;;  %v13955_v22 = vpop.permute.xlu0 %4162  ;;  %v4020_v36 = vadd.f32 %v13550_v1, %v3586_v2 }
 0x5e3   :  { %v3588_v30 = vadd.f32 %v19102_v10, %v3154_v32  ;;  %v19105_v10 = vld [vmem:[#allocation146_spill] sm:$0xff] }
 0x5e4   :  { %3316 = vrot.lane.b32.xlu1 %v19016_v35, %s10584_s28  ;;  %3802 = vrot.lane.b32.xlu0 %v19066_v39, %s10585_s30  ;;  %v4454_v14 = vadd.f32 %v13695_v45, %v4020_v36 }
 0x5e5   :  { %v4022_v20 = vadd.f32 %v13561_v26, %v3588_v30 }
 0x5e6   :  { %v13965_v24 = vpop.permute.xlu1 %4166  ;;  %v13967_v44 = vpop.permute.xlu0 %4652  ;;  %v4888_v18 = vadd.f32 %v13841_v42, %v4454_v14 }
 0x5e7   :  { %v4456_v5 = vadd.f32 %v13705_v52, %v4022_v20 }
 0x5e8   :  { %3806 = vrot.lane.b32.xlu1 %v19096_v50, %s10585_s30  ;;  %4172 = vrot.lane.b32.xlu0 %v19061_v8, %s10586_s14 }
 0x5e9   :  { %v4890_v45 = vadd.f32 %v13843_v48, %v4456_v5  ;;  %v19106_v48 = vld [vmem:[#allocation27_spill] sm:$0xff] }
 0x5ea   :  { %v13977_v21 = vpop.permute.xlu1 %4656  ;;  %v5023_v1 = vpop.permute.xlu0 %5022  ;;  %v1851_v14 = vadd.f32 %v19106_v48, %v19105_v10  ;;  %v19113_v48 = vld [vmem:[#allocation453_spill] sm:$0xff] }
 0x5eb   :  { %v5322_v0 = vadd.f32 %v5023_v1, %v4888_v18  ;;  %v19107_v1 = vld [vmem:[#allocation156_spill] sm:$0xff] }
 0x5ec   :  { %4176 = vrot.lane.b32.xlu1 %v19016_v35, %s10586_s14  ;;  %4662 = vrot.lane.b32.xlu0 %v19066_v39, %s10587_s22  ;;  %v2285_v5 = vadd.f32 %v19107_v1, %v1851_v14  ;;  %v19110_v39 = vld [vmem:[#allocation29_spill] sm:$0xff]  ;;  %v19114_v1 = vld [vmem:[#allocation358_spill] sm:$0xff] }
 0x5ed   :  { %v5437_v26 = vadd.f32 %v13601_v59, %v5322_v0 }
 0x5ee   :  { %v5027_v32 = vpop.permute.xlu1 %5026  ;;  %v13985_v2 = vpop.permute.xlu0 %2934 }
 0x5ef   :  { %19103 = vst [vmem:[#allocation439_spill] sm:$0xff] %v13985_v2  ;;  %v5324_v42 = vadd.f32 %v5027_v32, %v4890_v45  ;;  %v5545_v20 = vmax.f32 %v5437_v26, 0.0  ;;  %v19112_v26 = vld [vmem:[#allocation162_spill] sm:$0xff] }
 0x5f0   :  { %4666 = vrot.lane.b32.xlu1 %v19096_v50, %s10587_s22  ;;  %5032 = vrot.lane.b32.xlu0 %v19061_v8, %s10588_s0 }
 0x5f1   :  { %v5439_v52 = vadd.f32 %v13601_v59, %v5324_v42  ;;  %v19109_v42 = vld [vmem:[#allocation152_spill] sm:$0xff] }
 0x5f2   :  { %v13993_v30 = vpop.permute.xlu1 %2938  ;;  %v13995_v36 = vpop.permute.xlu0 %3304  ;;  %v1853_v8 = vadd.f32 %v19110_v39, %v19109_v42 }
 0x5f3   :  { %19104 = vst [vmem:[#allocation16_spill] sm:$0xff] %v13993_v30  ;;  %v5547_v18 = vmax.f32 %v5439_v52, 0.0  ;;  %v19111_v30 = vld [vmem:[#allocation356_spill] sm:$0xff] }
 0x5f4   :  { %5036 = vrot.lane.b32.xlu1 %v19016_v35, %s10588_s0  ;;  %2884 = vrot.lane.b32.xlu0 %v19005_v11, %s10583_s27  ;;  %v2719_v10 = vadd.f32 %v19111_v30, %v2285_v5  ;;  %v2287_v52 = vadd.f32 %v19112_v26, %v1853_v8  ;;  %v19115_v5 = vld [vmem:[#allocation125_spill] sm:$0xff] }
 0x5f5   :  { %v5641_v0 = vmax.f32 %v5545_v20, %v5547_v18 }
 0x5f6   :  { %v14004_v45 = vpop.permute.xlu1 %3308  ;;  %v14006_v32 = vpop.permute.xlu0 %3794  ;;  %v3153_v14 = vadd.f32 %v19113_v48, %v2719_v10  ;;  %v2721_v39 = vadd.f32 %v19114_v1, %v2287_v52  ;;  %v19117_v48 = vld [vmem:[#allocation74_spill] sm:$0xff] }
 0x5f7   :  { %19108 = vst [vmem:[#allocation109_spill] sm:$0xff] %v14004_v45  ;;  %10092 = vmatprep.mubr.msk.f32.mxu0 %vm5685_vm4, %v5641_v0  ;;  %v19116_v0 = vld [vmem:[#allocation455_spill] sm:$0xff] }
 0x5f8   :  { %2888 = vrot.lane.b32.xlu1 %v19010_v29, %s10583_s27  ;;  %3374 = vrot.lane.b32.xlu0 %v19078_v4, %s10584_s28  ;;  %v3587_v30 = vadd.f32 %v13478_v54, %v3153_v14  ;;  %v3155_v42 = vadd.f32 %v19116_v0, %v2721_v39 }
 0x5fa   :  { %v14018_v20 = vpop.permute.xlu1 %3798  ;;  %v14020_v18 = vpop.permute.xlu0 %4164  ;;  %v4021_v8 = vadd.f32 %v13612_v15, %v3587_v30  ;;  %v3589_v2 = vadd.f32 %v19117_v48, %v3155_v42 }
 0x5fc   :  { %3378 = vrot.lane.b32.xlu1 %v19115_v5, %s10584_s28  ;;  %3744 = vrot.lane.b32.xlu0 %v19005_v11, %s10585_s30  ;;  %v4455_v52 = vadd.f32 %v13760_v49, %v4021_v8  ;;  %v4023_v54 = vadd.f32 %v13623_v53, %v3589_v2 }
 0x5fe   :  { %v14030_v26 = vpop.permute.xlu1 %4168  ;;  %v14032_v10 = vpop.permute.xlu0 %4654  ;;  %v4889_v14 = vadd.f32 %v13898_v16, %v4455_v52  ;;  %v4457_v39 = vadd.f32 %v13774_v3, %v4023_v54 }
 0x600   :  { %3748 = vrot.lane.b32.xlu1 %v19010_v29, %s10585_s30  ;;  %4234 = vrot.lane.b32.xlu0 %v19078_v4, %s10586_s14  ;;  %v4891_v49 = vadd.f32 %v13908_v33, %v4457_v39  ;;  %v19122_v33 = vld [vmem:[#allocation233_spill] sm:$0xff] }
 0x602   :  { %v14042_v1 = vpop.permute.xlu1 %4658  ;;  %v5025_v15 = vpop.permute.xlu0 %5024 }
 0x603   :  { %v5323_v30 = vadd.f32 %v5025_v15, %v4889_v14  ;;  %v19123_v14 = vld [vmem:[#allocation239_spill] sm:$0xff] }
 0x604   :  { %4238 = vrot.lane.b32.xlu1 %v19115_v5, %s10586_s14  ;;  %4604 = vrot.lane.b32.xlu0 %v19005_v11, %s10587_s22  ;;  %v19121_v11 = vld [vmem:[#allocation60_spill] sm:$0xff] }
 0x605   :  { %v5438_v53 = vadd.f32 %v13601_v59, %v5323_v30  ;;  %v1882_v48 = vadd.f32 %v19122_v33, %v19121_v11 }
 0x606   :  { %v5029_v0 = vpop.permute.xlu1 %5028  ;;  %v14050_v42 = vpop.permute.xlu0 %2876 }
 0x607   :  { %19118 = vst [vmem:[#allocation117_spill] sm:$0xff] %v14050_v42  ;;  %v5325_v16 = vadd.f32 %v5029_v0, %v4891_v49  ;;  %v5546_v52 = vmax.f32 %v5438_v53, 0.0  ;;  %v2316_v15 = vadd.f32 %v19123_v14, %v1882_v48  ;;  %v19125_v0 = vld [vmem:[#allocation62_spill] sm:$0xff]  ;;  %v19128_v53 = vld [vmem:[#allocation243_spill] sm:$0xff]  ;;  %v19129_v48 = vld [vmem:[#allocation73_spill] sm:$0xff] }
 0x608   :  { %4608 = vrot.lane.b32.xlu1 %v19010_v29, %s10587_s22  ;;  %5094 = vrot.lane.b32.xlu0 %v19078_v4, %s10588_s0  ;;  %v19130_v42 = vld [vmem:[#allocation387_spill] sm:$0xff] }
 0x609   :  { %v5440_v3 = vadd.f32 %v13601_v59, %v5325_v16  ;;  %v19126_v16 = vld [vmem:[#allocation237_spill] sm:$0xff] }
 0x60a   :  { %v14058_v2 = vpop.permute.xlu1 %2880  ;;  %v14060_v8 = vpop.permute.xlu0 %3366  ;;  %v1884_v4 = vadd.f32 %v19126_v16, %v19125_v0 }
 0x60b   :  { %19119 = vst [vmem:[#allocation18_spill] sm:$0xff] %v14058_v2  ;;  %19120 = vst [vmem:[#allocation115_spill] sm:$0xff] %v14060_v8  ;;  %v5548_v54 = vmax.f32 %v5440_v3, 0.0  ;;  %v19127_v2 = vld [vmem:[#allocation385_spill] sm:$0xff] }
 0x60c   :  { %5098 = vrot.lane.b32.xlu1 %v19115_v5, %s10588_s0  ;;  %2886 = vrot.lane.b32.xlu0 %v19016_v35, %s10583_s27  ;;  %v2750_v33 = vadd.f32 %v19127_v2, %v2316_v15  ;;  %v2318_v3 = vadd.f32 %v19128_v53, %v1884_v4  ;;  %v19132_v15 = vld [vmem:[#allocation124_spill] sm:$0xff] }
 0x60d   :  { %v5642_v39 = vmax.f32 %v5546_v52, %v5548_v54 }
 0x60e   :  { %v14069_v30 = vpop.permute.xlu1 %3370  ;;  %v14071_v49 = vpop.permute.xlu0 %3736  ;;  %v3184_v52 = vadd.f32 %v19129_v48, %v2750_v33  ;;  %v2752_v16 = vadd.f32 %v19130_v42, %v2318_v3  ;;  %v19134_v48 = vld [vmem:[#allocation9_spill] sm:$0xff] }
 0x60f   :  { %19124 = vst [vmem:[#allocation343_spill] sm:$0xff] %v14069_v30  ;;  %10093 = vmatmul.mubr.msk.f32.gmra.mrb[140].mxu0 %vm5685_vm4, %v5642_v39  ;;  %v19131_v30 = vld [vmem:[#allocation84_spill] sm:$0xff]  ;;  %v19133_v39 = vld [vmem:[#allocation85_spill] sm:$0xff] }
 0x610   :  { %2890 = vrot.lane.b32.xlu1 %v19021_v28, %s10583_s27  ;;  %3376 = vrot.lane.b32.xlu0 %v19096_v50, %s10584_s28  ;;  %v3618_v2 = vadd.f32 %v19131_v30, %v3184_v52  ;;  %v3186_v8 = vadd.f32 %v19133_v39, %v2752_v16 }
 0x612   :  { %v14083_v54 = vpop.permute.xlu1 %3740  ;;  %v14085_v14 = vpop.permute.xlu0 %4226  ;;  %v4052_v4 = vadd.f32 %v13681_v7, %v3618_v2  ;;  %v3620_v45 = vadd.f32 %v19134_v48, %v3186_v8 }
 0x614   :  { %3380 = vrot.lane.b32.xlu1 %v19132_v15, %s10584_s28  ;;  %3746 = vrot.lane.b32.xlu0 %v19016_v35, %s10585_s30  ;;  %v4486_v42 = vadd.f32 %v13829_v43, %v4052_v4  ;;  %v4054_v30 = vadd.f32 %v13693_v51, %v3620_v45 }
 0x616   :  { %v14095_v53 = vpop.permute.xlu1 %4230  ;;  %v14097_v33 = vpop.permute.xlu0 %4596  ;;  %v4920_v3 = vadd.f32 %v13967_v44, %v4486_v42  ;;  %v4488_v16 = vadd.f32 %v13831_v6, %v4054_v30 }
 0x618   :  { %3750 = vrot.lane.b32.xlu1 %v19021_v28, %s10585_s30  ;;  %4236 = vrot.lane.b32.xlu0 %v19096_v50, %s10586_s14  ;;  %v4922_v43 = vadd.f32 %v13977_v21, %v4488_v16  ;;  %v19139_v21 = vld [vmem:[#allocation59_spill] sm:$0xff] }
 0x61a   :  { %v14107_v52 = vpop.permute.xlu1 %4600  ;;  %v5087_v7 = vpop.permute.xlu0 %5086 }
 0x61b   :  { %v5354_v2 = vadd.f32 %v5087_v7, %v4920_v3  ;;  %v19140_v3 = vld [vmem:[#allocation240_spill] sm:$0xff] }
 0x61c   :  { %4240 = vrot.lane.b32.xlu1 %v19132_v15, %s10586_s14  ;;  %4606 = vrot.lane.b32.xlu0 %v19016_v35, %s10587_s22  ;;  %v19138_v35 = vld [vmem:[#allocation234_spill] sm:$0xff] }
 0x61d   :  { %v5469_v51 = vadd.f32 %v13601_v59, %v5354_v2  ;;  %v1883_v48 = vadd.f32 %v19139_v21, %v19138_v35 }
 0x61e   :  { %v5091_v8 = vpop.permute.xlu1 %5090  ;;  %v14115_v39 = vpop.permute.xlu0 %2878 }
 0x61f   :  { %19135 = vst [vmem:[#allocation123_spill] sm:$0xff] %v14115_v39  ;;  %v5356_v44 = vadd.f32 %v5091_v8, %v4922_v43  ;;  %v5577_v42 = vmax.f32 %v5469_v51, 0.0  ;;  %v2317_v7 = vadd.f32 %v19140_v3, %v1883_v48  ;;  %v19142_v8 = vld [vmem:[#allocation238_spill] sm:$0xff]  ;;  %v19145_v51 = vld [vmem:[#allocation131_spill] sm:$0xff] }
 0x620   :  { %4610 = vrot.lane.b32.xlu1 %v19021_v28, %s10587_s22  ;;  %5096 = vrot.lane.b32.xlu0 %v19096_v50, %s10588_s0 }
 0x621   :  { %v5471_v6 = vadd.f32 %v13601_v59, %v5356_v44  ;;  %v19143_v44 = vld [vmem:[#allocation61_spill] sm:$0xff] }
 0x622   :  { %v14123_v45 = vpop.permute.xlu1 %2882  ;;  %v14125_v4 = vpop.permute.xlu0 %3368  ;;  %v1885_v50 = vadd.f32 %v19143_v44, %v19142_v8 }
 0x623   :  { %19136 = vst [vmem:[#allocation440_spill] sm:$0xff] %v14123_v45  ;;  %19137 = vst [vmem:[#allocation345_spill] sm:$0xff] %v14125_v4  ;;  %v5579_v30 = vmax.f32 %v5471_v6, 0.0  ;;  %v19144_v45 = vld [vmem:[#allocation386_spill] sm:$0xff]  ;;  %v19146_v6 = vld [vmem:[#allocation244_spill] sm:$0xff] }
 0x624   :  { %5100 = vrot.lane.b32.xlu1 %v19132_v15, %s10588_s0  ;;  %2948 = vrot.lane.b32.xlu0 %v19115_v5, %s10583_s27  ;;  %v2751_v35 = vadd.f32 %v19144_v45, %v2317_v7  ;;  %v2319_v48 = vadd.f32 %v19146_v6, %v1885_v50  ;;  %v19149_v7 = vld [vmem:[#allocation105_spill] sm:$0xff] }
 0x625   :  { %v5657_v16 = vmax.f32 %v5577_v42, %v5579_v30  ;;  %v19147_v42 = vld [vmem:[#allocation93_spill] sm:$0xff] }
 0x626   :  { %v14134_v2 = vpop.permute.xlu1 %3372  ;;  %v14136_v43 = vpop.permute.xlu0 %3738  ;;  %v3185_v30 = vadd.f32 %v19147_v42, %v2751_v35  ;;  %v19150_v42 = vld [vmem:[#allocation98_spill] sm:$0xff] }
 0x627   :  { %19141 = vst [vmem:[#allocation442_spill] sm:$0xff] %v14134_v2  ;;  %10116 = vmatprep.mubr.msk.f32.mxu1 %vm5685_vm4, %v5657_v16  ;;  %v19148_v2 = vld [vmem:[#allocation388_spill] sm:$0xff] }
 0x628   :  { %2952 = vrot.lane.b32.xlu1 %v19145_v51, %s10583_s27  ;;  %3318 = vrot.lane.b32.xlu0 %v19010_v29, %s10584_s28  ;;  %v2753_v8 = vadd.f32 %v19148_v2, %v2319_v48  ;;  %v3619_v45 = vadd.f32 %v13594_v17, %v3185_v30 }
 0x62a   :  { %v14148_v3 = vpop.permute.xlu1 %3742  ;;  %v14150_v39 = vpop.permute.xlu0 %4228  ;;  %v3187_v16 = vadd.f32 %v19149_v7, %v2753_v8  ;;  %v4053_v50 = vadd.f32 %v13746_v12, %v3619_v45 }
 0x62c   :  { %3322 = vrot.lane.b32.xlu1 %v19057_v23, %s10584_s28  ;;  %3808 = vrot.lane.b32.xlu0 %v19115_v5, %s10585_s30  ;;  %v3621_v4 = vadd.f32 %v19150_v42, %v3187_v16  ;;  %v4487_v2 = vadd.f32 %v13886_v9, %v4053_v50 }
 0x62e   :  { %v14160_v6 = vpop.permute.xlu1 %4232  ;;  %v14162_v35 = vpop.permute.xlu0 %4598  ;;  %v4055_v12 = vadd.f32 %v13758_v60, %v3621_v4  ;;  %v4921_v30 = vadd.f32 %v14032_v10, %v4487_v2 }
 0x62f   :  { %v14166_v48 = vpop.f32.mrb[136].mxu0 }
 0x630   :  { %19151 = vst [vmem:[#allocation110_spill] sm:$0xff] %v14166_v48  ;;  %v14168_v17 = vpop.f32.mrb[137].mxu0  ;;  %3812 = vrot.lane.b32.xlu1 %v19145_v51, %s10585_s30  ;;  %4178 = vrot.lane.b32.xlu0 %v19010_v29, %s10586_s14  ;;  %v4489_v7 = vadd.f32 %v13896_v31, %v4055_v12  ;;  %v19155_v12 = vld [vmem:[#allocation32_spill] sm:$0xff]  ;;  %v19158_v48 = vld [vmem:[#allocation34_spill] sm:$0xff] }
 0x631   :  { %19152 = vst [vmem:[#allocation15_spill] sm:$0xff] %v14168_v17  ;;  %v19159_v17 = vld [vmem:[#allocation163_spill] sm:$0xff] }
 0x632   :  { %v14176_v8 = vpop.permute.xlu1 %4602  ;;  %v5089_v45 = vpop.permute.xlu0 %5088  ;;  %v4923_v16 = vadd.f32 %v14042_v1, %v4489_v7  ;;  %v19156_v1 = vld [vmem:[#allocation157_spill] sm:$0xff] }
 0x633   :  { %v5355_v9 = vadd.f32 %v5089_v45, %v4921_v30  ;;  %v1854_v30 = vadd.f32 %v19156_v1, %v19155_v12 }
 0x634   :  { %4182 = vrot.lane.b32.xlu1 %v19057_v23, %s10586_s14  ;;  %4668 = vrot.lane.b32.xlu0 %v19115_v5, %s10587_s22  ;;  %v1856_v5 = vadd.f32 %v19159_v17, %v19158_v48 }
 0x635   :  { %v5470_v60 = vadd.f32 %v13601_v59, %v5355_v9  ;;  %v19157_v9 = vld [vmem:[#allocation165_spill] sm:$0xff] }
 0x636   :  { %v5093_v50 = vpop.permute.xlu1 %5092  ;;  %v14184_v42 = vpop.permute.xlu0 %2940 }
 0x637   :  { %19153 = vst [vmem:[#allocation120_spill] sm:$0xff] %v14184_v42  ;;  %v5357_v10 = vadd.f32 %v5093_v50, %v4923_v16  ;;  %v5578_v45 = vmax.f32 %v5470_v60, 0.0  ;;  %v2288_v16 = vadd.f32 %v19157_v9, %v1854_v30  ;;  %v19161_v60 = vld [vmem:[#allocation130_spill] sm:$0xff]  ;;  %v19163_v30 = vld [vmem:[#allocation456_spill] sm:$0xff]  ;;  %v19164_v42 = vld [vmem:[#allocation361_spill] sm:$0xff] }
 0x638   :  { %4672 = vrot.lane.b32.xlu1 %v19145_v51, %s10587_s22  ;;  %5038 = vrot.lane.b32.xlu0 %v19010_v29, %s10588_s0 }
 0x639   :  { %v5472_v31 = vadd.f32 %v13601_v59, %v5357_v10 }
 0x63a   :  { %v14192_v4 = vpop.permute.xlu1 %2944  ;;  %v14194_v2 = vpop.permute.xlu0 %3310 }
 0x63b   :  { %19154 = vst [vmem:[#allocation116_spill] sm:$0xff] %v14192_v4  ;;  %v5580_v7 = vmax.f32 %v5472_v31, 0.0  ;;  %v19160_v4 = vld [vmem:[#allocation359_spill] sm:$0xff] }
 0x63c   :  { %5042 = vrot.lane.b32.xlu1 %v19057_v23, %s10588_s0  ;;  %2950 = vrot.lane.b32.xlu0 %v19132_v15, %s10583_s27  ;;  %v2722_v12 = vadd.f32 %v19160_v4, %v2288_v16  ;;  %v19162_v31 = vld [vmem:[#allocation171_spill] sm:$0xff]  ;;  %v19165_v4 = vld [vmem:[#allocation458_spill] sm:$0xff] }
 0x63d   :  { %v5658_v29 = vmax.f32 %v5578_v45, %v5580_v7  ;;  %v2290_v1 = vadd.f32 %v19162_v31, %v1856_v5 }
 0x63e   :  { %v14203_v50 = vpop.permute.xlu1 %3314  ;;  %v14205_v10 = vpop.permute.xlu0 %3800  ;;  %v3156_v45 = vadd.f32 %v19163_v30, %v2722_v12 }
 0x63f   :  { %10117 = vmatmul.mubr.msk.f32.gmra.mrb[4].mxu1 %vm5685_vm4, %v5658_v29  ;;  %v2724_v48 = vadd.f32 %v19164_v42, %v2290_v1 }
 0x640   :  { %2954 = vrot.lane.b32.xlu1 %v19161_v60, %s10583_s27  ;;  %3320 = vrot.lane.b32.xlu0 %v19021_v28, %s10584_s28  ;;  %v3590_v17 = vadd.f32 %v13670_v47, %v3156_v45 }
 0x641   :  { %v3158_v16 = vadd.f32 %v19165_v4, %v2724_v48 }
 0x642   :  { %v14217_v7 = vpop.permute.xlu1 %3804  ;;  %v14219_v9 = vpop.permute.xlu0 %4170  ;;  %v4024_v5 = vadd.f32 %v13816_v38, %v3590_v17 }
 0x643   :  { %v3592_v31 = vadd.f32 %v13679_v58, %v3158_v16 }
 0x644   :  { %3324 = vrot.lane.b32.xlu1 %v19072_v57, %s10584_s28  ;;  %3810 = vrot.lane.b32.xlu0 %v19132_v15, %s10585_s30  ;;  %v4458_v42 = vadd.f32 %v13955_v22, %v4024_v5 }
 0x645   :  { %v4026_v47 = vadd.f32 %v13818_v13, %v3592_v31  ;;  %v19167_v31 = vld [vmem:[#allocation158_spill] sm:$0xff] }
 0x646   :  { %v14229_v29 = vpop.permute.xlu1 %4174  ;;  %v14231_v12 = vpop.permute.xlu0 %4660  ;;  %v4892_v1 = vadd.f32 %v14097_v33, %v4458_v42  ;;  %v19168_v42 = vld [vmem:[#allocation31_spill] sm:$0xff] }
 0x647   :  { %v4460_v45 = vadd.f32 %v13965_v24, %v4026_v47  ;;  %v1855_v47 = vadd.f32 %v19168_v42, %v19167_v31  ;;  %v19176_v42 = vld [vmem:[#allocation457_spill] sm:$0xff] }
 0x648   :  { %3814 = vrot.lane.b32.xlu1 %v19161_v60, %s10585_s30  ;;  %4180 = vrot.lane.b32.xlu0 %v19021_v28, %s10586_s14 }
 0x649   :  { %v4894_v58 = vadd.f32 %v14107_v52, %v4460_v45 }
 0x64a   :  { %v14241_v30 = vpop.permute.xlu1 %4664  ;;  %v5031_v38 = vpop.permute.xlu0 %5030 }
 0x64b   :  { %v5326_v48 = vadd.f32 %v5031_v38, %v4892_v1  ;;  %v19169_v38 = vld [vmem:[#allocation168_spill] sm:$0xff] }
 0x64c   :  { %4184 = vrot.lane.b32.xlu1 %v19072_v57, %s10586_s14  ;;  %4670 = vrot.lane.b32.xlu0 %v19132_v15, %s10587_s22  ;;  %v19187_v15 = vld [vmem:[#allocation389_spill] sm:$0xff] }
 0x64d   :  { %v5441_v13 = vadd.f32 %v13601_v59, %v5326_v48  ;;  %v19171_v48 = vld [vmem:[#allocation164_spill] sm:$0xff] }
 0x64e   :  { %v5035_v22 = vpop.permute.xlu1 %5034  ;;  %v14249_v17 = vpop.permute.xlu0 %2942 }
 0x64f   :  { %v5328_v33 = vadd.f32 %v5035_v22, %v4894_v58  ;;  %v5549_v5 = vmax.f32 %v5441_v13, 0.0  ;;  %v19172_v58 = vld [vmem:[#allocation33_spill] sm:$0xff] }
 0x650   :  { %4674 = vrot.lane.b32.xlu1 %v19161_v60, %s10587_s22  ;;  %5040 = vrot.lane.b32.xlu0 %v19021_v28, %s10588_s0  ;;  %v2289_v28 = vadd.f32 %v19169_v38, %v1855_v47  ;;  %v1857_v22 = vadd.f32 %v19172_v58, %v19171_v48  ;;  %v19177_v48 = vld [vmem:[#allocation362_spill] sm:$0xff] }
 0x651   :  { %v5443_v24 = vadd.f32 %v13601_v59, %v5328_v33 }
 0x652   :  { %v14257_v4 = vpop.permute.xlu1 %2946  ;;  %v14259_v16 = vpop.permute.xlu0 %3312 }
 0x653   :  { %19166 = vst [vmem:[#allocation17_spill] sm:$0xff] %v14257_v4  ;;  %v5551_v52 = vmax.f32 %v5443_v24, 0.0  ;;  %v19174_v24 = vld [vmem:[#allocation360_spill] sm:$0xff] }
 0x654   :  { %5044 = vrot.lane.b32.xlu1 %v19072_v57, %s10588_s0  ;;  %2892 = vrot.lane.b32.xlu0 %v19057_v23, %s10583_s27  ;;  %v2723_v31 = vadd.f32 %v19174_v24, %v2289_v28  ;;  %v19178_v28 = vld [vmem:[#allocation137_spill] sm:$0xff]  ;;  %v19179_v24 = vld [vmem:[#allocation459_spill] sm:$0xff] }
 0x655   :  { %v5643_v1 = vmax.f32 %v5549_v5, %v5551_v52  ;;  %v19175_v5 = vld [vmem:[#allocation174_spill] sm:$0xff] }
 0x656   :  { %v14268_v45 = vpop.permute.xlu1 %3316  ;;  %v14270_v59 = vpop.f32.mrb[0].mxu1  ;;  %v2291_v52 = vadd.f32 %v19175_v5, %v1857_v22  ;;  %v3157_v47 = vadd.f32 %v19176_v42, %v2723_v31 }
 0x657   :  { %19170 = vst [vmem:[#allocation344_spill] sm:$0xff] %v14270_v59  ;;  %v14274_v13 = vpop.permute.xlu0 %3802  ;;  %10095 = vmatprep.mubr.msk.f32.mxu0 %vm5685_vm4, %v5643_v1  ;;  %v14277_v33 = vpop.f32.mrb[1].mxu1 }
 0x658   :  { %19173 = vst [vmem:[#allocation126_spill] sm:$0xff] %v14277_v33  ;;  %2896 = vrot.lane.b32.xlu1 %v19059_v63, %s10583_s27  ;;  %3382 = vrot.lane.b32.xlu0 %v19145_v51, %s10584_s28  ;;  %v2725_v58 = vadd.f32 %v19177_v48, %v2291_v52  ;;  %v3591_v1 = vadd.f32 %v13735_v19, %v3157_v47 }
 0x65a   :  { %v14286_v38 = vpop.permute.xlu1 %3806  ;;  %v3159_v33 = vadd.f32 %v19179_v24, %v2725_v58  ;;  %v4025_v22 = vadd.f32 %v13872_v40, %v3591_v1 }
 0x65b   :  { %v14289_v59 = vpop.permute.xlu0 %4172 }
 0x65c   :  { %3386 = vrot.lane.b32.xlu1 %v19178_v28, %s10584_s28  ;;  %3752 = vrot.lane.b32.xlu0 %v19057_v23, %s10585_s30  ;;  %v3593_v31 = vadd.f32 %v13744_v27, %v3159_v33  ;;  %v4459_v52 = vadd.f32 %v14020_v18, %v4025_v22 }
 0x65e   :  { %v14298_v5 = vpop.permute.xlu1 %4176  ;;  %v4027_v19 = vadd.f32 %v13884_v41, %v3593_v31  ;;  %v4893_v47 = vadd.f32 %v14162_v35, %v4459_v52  ;;  %v14321_v41 = vld [vmem:[%s17986_s2] ss:$0 sm:$0xff]  ;;  %v19182_v52 = vld [vmem:[#allocation65_spill] sm:$0xff] }
 0x65f   :  { %v14301_v42 = vpop.permute.xlu0 %4662 }
 0x660   :  { %3756 = vrot.lane.b32.xlu1 %v19059_v63, %s10585_s30  ;;  %4242 = vrot.lane.b32.xlu0 %v19145_v51, %s10586_s14  ;;  %v4461_v40 = vadd.f32 %v14030_v26, %v4027_v19  ;;  %v19183_v19 = vld [vmem:[#allocation241_spill] sm:$0xff] }
 0x662   :  { %v14310_v48 = vpop.permute.xlu1 %4666  ;;  %v4895_v18 = vadd.f32 %v14176_v8, %v4461_v40 }
 0x663   :  { %v5033_v58 = vpop.permute.xlu0 %5032 }
 0x664   :  { %v5327_v27 = vadd.f32 %v5033_v58, %v4893_v47  ;;  %4246 = vrot.lane.b32.xlu1 %v19178_v28, %s10586_s14  ;;  %4612 = vrot.lane.b32.xlu0 %v19057_v23, %s10587_s22  ;;  %v1886_v47 = vadd.f32 %v19183_v19, %v19182_v52  ;;  %v19184_v58 = vld [vmem:[#allocation247_spill] sm:$0xff] }
 0x666   :  { %v5037_v33 = vpop.permute.xlu1 %5036  ;;  %v5442_v35 = vadd.f32 %v14321_v41, %v5327_v27  ;;  %v2320_v27 = vadd.f32 %v19184_v58, %v1886_v47 }
 0x667   :  { %v5329_v1 = vadd.f32 %v5037_v33, %v4895_v18  ;;  %v14324_v26 = vpop.permute.xlu0 %2884  ;;  %v19185_v33 = vld [vmem:[#allocation71_spill] sm:$0xff] }
 0x668   :  { %19180 = vst [vmem:[#allocation441_spill] sm:$0xff] %v14324_v26  ;;  %4616 = vrot.lane.b32.xlu1 %v19059_v63, %s10587_s22  ;;  %5102 = vrot.lane.b32.xlu0 %v19145_v51, %s10588_s0  ;;  %v5550_v24 = vmax.f32 %v5442_v35, 0.0  ;;  %v2754_v19 = vadd.f32 %v19187_v15, %v2320_v27  ;;  %v19189_v51 = vld [vmem:[#allocation391_spill] sm:$0xff]  ;;  %v19190_v15 = vld [vmem:[#allocation136_spill] sm:$0xff] }
 0x669   :  { %v5444_v23 = vadd.f32 %v14321_v41, %v5329_v1  ;;  %v19186_v1 = vld [vmem:[#allocation245_spill] sm:$0xff] }
 0x66a   :  { %v14331_v8 = vpop.permute.xlu1 %2888  ;;  %v1888_v35 = vadd.f32 %v19186_v1, %v19185_v33  ;;  %v3188_v47 = vadd.f32 %v13660_v55, %v2754_v19 }
 0x66b   :  { %19181 = vst [vmem:[#allocation346_spill] sm:$0xff] %v14331_v8  ;;  %v5552_v22 = vmax.f32 %v5444_v23, 0.0  ;;  %v14333_v31 = vpop.permute.xlu0 %3374 }
 0x66c   :  { %5106 = vrot.lane.b32.xlu1 %v19178_v28, %s10588_s0  ;;  %2894 = vrot.lane.b32.xlu0 %v19072_v57, %s10583_s27 }
 0x66d   :  { %v5644_v40 = vmax.f32 %v5550_v24, %v5552_v22  ;;  %v19188_v24 = vld [vmem:[#allocation251_spill] sm:$0xff] }
 0x66e   :  { %v14342_v18 = vpop.permute.xlu1 %3378  ;;  %v2322_v22 = vadd.f32 %v19188_v24, %v1888_v35 }
 0x66f   :  { %v14346_v23 = vpop.permute.xlu0 %3744  ;;  %10096 = vmatmul.mubr.msk.f32.gmra.mrb[142].mxu0 %vm5685_vm4, %v5644_v40  ;;  %v3622_v40 = vadd.f32 %v13802_v61, %v3188_v47 }
 0x670   :  { %2898 = vrot.lane.b32.xlu1 %v19076_v34, %s10583_s27  ;;  %3384 = vrot.lane.b32.xlu0 %v19161_v60, %s10584_s28  ;;  %v2756_v1 = vadd.f32 %v19189_v51, %v2322_v22 }
 0x671   :  { %v4056_v35 = vadd.f32 %v13937_v56, %v3622_v40 }
 0x672   :  { %v14356_v58 = vpop.permute.xlu1 %3748  ;;  %v3190_v27 = vadd.f32 %v13668_v46, %v2756_v1 }
 0x673   :  { %v14359_v8 = vpop.permute.xlu0 %4234  ;;  %v4490_v51 = vadd.f32 %v14085_v14, %v4056_v35 }
 0x674   :  { %3388 = vrot.lane.b32.xlu1 %v19190_v15, %s10584_s28  ;;  %3754 = vrot.lane.b32.xlu0 %v19072_v57, %s10585_s30  ;;  %v3624_v55 = vadd.f32 %v13804_v62, %v3190_v27 }
 0x675   :  { %v4924_v46 = vadd.f32 %v14231_v12, %v4490_v51  ;;  %v19194_v51 = vld [vmem:[#allocation64_spill] sm:$0xff] }
 0x676   :  { %v14368_v24 = vpop.permute.xlu1 %4238  ;;  %v4058_v61 = vadd.f32 %v13953_v25, %v3624_v55 }
 0x677   :  { %v14371_v19 = vpop.permute.xlu0 %4604 }
 0x678   :  { %3758 = vrot.lane.b32.xlu1 %v19076_v34, %s10585_s30  ;;  %4244 = vrot.lane.b32.xlu0 %v19161_v60, %s10586_s14  ;;  %v4492_v56 = vadd.f32 %v14095_v53, %v4058_v61 }
 0x67a   :  { %v14380_v22 = vpop.permute.xlu1 %4608  ;;  %v4926_v14 = vadd.f32 %v14241_v30, %v4492_v56  ;;  %v19193_v30 = vld [vmem:[#allocation242_spill] sm:$0xff]  ;;  %v19195_v56 = vld [vmem:[#allocation248_spill] sm:$0xff] }
 0x67b   :  { %v5095_v47 = vpop.permute.xlu0 %5094  ;;  %v1887_v61 = vadd.f32 %v19194_v51, %v19193_v30  ;;  %v19201_v30 = vld [vmem:[#allocation390_spill] sm:$0xff] }
 0x67c   :  { %v5358_v62 = vadd.f32 %v5095_v47, %v4924_v46  ;;  %4248 = vrot.lane.b32.xlu1 %v19190_v15, %s10586_s14  ;;  %4614 = vrot.lane.b32.xlu0 %v19072_v57, %s10587_s22 }
 0x67d   :  { %v2321_v47 = vadd.f32 %v19195_v56, %v1887_v61  ;;  %v19204_v61 = vld [vmem:[#allocation91_spill] sm:$0xff] }
 0x67e   :  { %v5099_v1 = vpop.permute.xlu1 %5098  ;;  %v5473_v40 = vadd.f32 %v14321_v41, %v5358_v62 }
 0x67f   :  { %v5360_v25 = vadd.f32 %v5099_v1, %v4926_v14  ;;  %v14389_v27 = vpop.permute.xlu0 %2886  ;;  %v19198_v1 = vld [vmem:[#allocation246_spill] sm:$0xff] }
 0x680   :  { %19191 = vst [vmem:[#allocation443_spill] sm:$0xff] %v14389_v27  ;;  %4618 = vrot.lane.b32.xlu1 %v19076_v34, %s10587_s22  ;;  %5104 = vrot.lane.b32.xlu0 %v19161_v60, %s10588_s0  ;;  %v5581_v35 = vmax.f32 %v5473_v40, 0.0  ;;  %v19199_v40 = vld [vmem:[#allocation70_spill] sm:$0xff]  ;;  %v19202_v27 = vld [vmem:[#allocation143_spill] sm:$0xff] }
 0x681   :  { %v5475_v53 = vadd.f32 %v14321_v41, %v5360_v25  ;;  %v1889_v25 = vadd.f32 %v19199_v40, %v19198_v1  ;;  %v19205_v1 = vld [vmem:[#allocation392_spill] sm:$0xff] }
 0x682   :  { %v14396_v12 = vpop.permute.xlu1 %2890 }
 0x683   :  { %19192 = vst [vmem:[#allocation20_spill] sm:$0xff] %v14396_v12  ;;  %v5583_v57 = vmax.f32 %v5475_v53, 0.0  ;;  %v14398_v55 = vpop.permute.xlu0 %3376  ;;  %v2755_v12 = vadd.f32 %v19201_v30, %v2321_v47  ;;  %v19207_v47 = vld [vmem:[#allocation103_spill] sm:$0xff] }
 0x684   :  { %5108 = vrot.lane.b32.xlu1 %v19190_v15, %s10588_s0  ;;  %2956 = vrot.lane.b32.xlu0 %v19178_v28, %s10583_s27 }
 0x685   :  { %v5659_v46 = vmax.f32 %v5581_v35, %v5583_v57  ;;  %v19203_v35 = vld [vmem:[#allocation252_spill] sm:$0xff]  ;;  %v3189_v56 = vadd.f32 %v19204_v61, %v2755_v12  ;;  %v19208_v12 = vld [vmem:[#allocation102_spill] sm:$0xff] }
 0x686   :  { %v14407_v62 = vpop.permute.xlu1 %3380  ;;  %v14409_v14 = vpop.f32.mrb[138].mxu0  ;;  %v2323_v57 = vadd.f32 %v19203_v35, %v1889_v25 }
 0x687   :  { %19196 = vst [vmem:[#allocation121_spill] sm:$0xff] %v14407_v62  ;;  %19197 = vst [vmem:[#allocation129_spill] sm:$0xff] %v14409_v14  ;;  %v14413_v53 = vpop.permute.xlu0 %3746  ;;  %v14415_v60 = vpop.f32.mrb[139].mxu0  ;;  %10119 = vmatprep.mubr.msk.f32.mxu1 %vm5685_vm4, %v5659_v46 }
 0x688   :  { %19200 = vst [vmem:[#allocation22_spill] sm:$0xff] %v14415_v60  ;;  %2960 = vrot.lane.b32.xlu1 %v19202_v27, %s10583_s27  ;;  %3326 = vrot.lane.b32.xlu0 %v19059_v63, %s10584_s28  ;;  %v2757_v26 = vadd.f32 %v19205_v1, %v2323_v57  ;;  %v19206_v60 = vld [vmem:[#allocation104_spill] sm:$0xff] }
 0x689   :  { %v3623_v46 = vadd.f32 %v19206_v60, %v3189_v56 }
 0x68a   :  { %v14425_v14 = vpop.permute.xlu1 %3750  ;;  %v3191_v30 = vadd.f32 %v19207_v47, %v2757_v26 }
 0x68b   :  { %v14428_v62 = vpop.permute.xlu0 %4236  ;;  %v4057_v25 = vadd.f32 %v14006_v32, %v3623_v46 }
 0x68c   :  { %3330 = vrot.lane.b32.xlu1 %v19121_v11, %s10584_s28  ;;  %3816 = vrot.lane.b32.xlu0 %v19178_v28, %s10585_s30  ;;  %v3625_v61 = vadd.f32 %v19208_v12, %v3191_v30 }
 0x68d   :  { %v4491_v57 = vadd.f32 %v14150_v39, %v4057_v25 }
 0x68e   :  { %v14437_v35 = vpop.permute.xlu1 %4240  ;;  %v4059_v60 = vadd.f32 %v14018_v20, %v3625_v61 }
 0x68f   :  { %v14440_v4 = vpop.permute.xlu0 %4606  ;;  %v4925_v26 = vadd.f32 %v14301_v42, %v4491_v57 }
 0x690   :  { %3820 = vrot.lane.b32.xlu1 %v19202_v27, %s10585_s30  ;;  %4186 = vrot.lane.b32.xlu0 %v19059_v63, %s10586_s14  ;;  %v4493_v32 = vadd.f32 %v14160_v6, %v4059_v60  ;;  %v19212_v60 = vld [vmem:[#allocation169_spill] sm:$0xff] }
 0x692   :  { %v14449_v56 = vpop.permute.xlu1 %4610  ;;  %v4927_v39 = vadd.f32 %v14310_v48, %v4493_v32  ;;  %v19211_v48 = vld [vmem:[#allocation36_spill] sm:$0xff] }
 0x693   :  { %v5097_v1 = vpop.permute.xlu0 %5096 }
 0x694   :  { %v5359_v46 = vadd.f32 %v5097_v1, %v4925_v26  ;;  %4190 = vrot.lane.b32.xlu1 %v19121_v11, %s10586_s14  ;;  %4676 = vrot.lane.b32.xlu0 %v19178_v28, %s10587_s22  ;;  %v1858_v26 = vadd.f32 %v19212_v60, %v19211_v48  ;;  %v19213_v1 = vld [vmem:[#allocation177_spill] sm:$0xff]  ;;  %v19217_v60 = vld [vmem:[#allocation142_spill] sm:$0xff] }
 0x696   :  { %v5101_v47 = vpop.permute.xlu1 %5100  ;;  %v5474_v30 = vadd.f32 %v14321_v41, %v5359_v46 }
 0x697   :  { %v5361_v20 = vadd.f32 %v5101_v47, %v4927_v39  ;;  %v14458_v25 = vpop.permute.xlu0 %2948  ;;  %v19214_v39 = vld [vmem:[#allocation38_spill] sm:$0xff]  ;;  %v19215_v47 = vld [vmem:[#allocation175_spill] sm:$0xff] }
 0x698   :  { %19209 = vst [vmem:[#allocation127_spill] sm:$0xff] %v14458_v25  ;;  %4680 = vrot.lane.b32.xlu1 %v19202_v27, %s10587_s22  ;;  %5046 = vrot.lane.b32.xlu0 %v19059_v63, %s10588_s0  ;;  %v5582_v12 = vmax.f32 %v5474_v30, 0.0  ;;  %v2292_v63 = vadd.f32 %v19213_v1, %v1858_v26  ;;  %v1860_v30 = vadd.f32 %v19215_v47, %v19214_v39  ;;  %v19219_v26 = vld [vmem:[#allocation460_spill] sm:$0xff] }
 0x699   :  { %v5476_v6 = vadd.f32 %v14321_v41, %v5361_v20 }
 0x69a   :  { %v14465_v42 = vpop.permute.xlu1 %2952 }
 0x69b   :  { %19210 = vst [vmem:[#allocation347_spill] sm:$0xff] %v14465_v42  ;;  %v5584_v61 = vmax.f32 %v5476_v6, 0.0  ;;  %v14467_v57 = vpop.permute.xlu0 %3318  ;;  %v19216_v6 = vld [vmem:[#allocation363_spill] sm:$0xff]  ;;  %v19220_v42 = vld [vmem:[#allocation365_spill] sm:$0xff] }
 0x69c   :  { %5050 = vrot.lane.b32.xlu1 %v19121_v11, %s10588_s0  ;;  %2958 = vrot.lane.b32.xlu0 %v19190_v15, %s10583_s27  ;;  %v2726_v48 = vadd.f32 %v19216_v6, %v2292_v63  ;;  %v19221_v63 = vld [vmem:[#allocation92_spill] sm:$0xff] }
 0x69d   :  { %v5660_v32 = vmax.f32 %v5582_v12, %v5584_v61  ;;  %v19218_v12 = vld [vmem:[#allocation183_spill] sm:$0xff] }
 0x69e   :  { %v14476_v46 = vpop.permute.xlu1 %3322  ;;  %v2294_v61 = vadd.f32 %v19218_v12, %v1860_v30  ;;  %v3160_v1 = vadd.f32 %v19219_v26, %v2726_v48  ;;  %v19222_v48 = vld [vmem:[#allocation114_spill] sm:$0xff] }
 0x69f   :  { %v14480_v20 = vpop.permute.xlu0 %3808  ;;  %10120 = vmatmul.mubr.msk.f32.gmra.mrb[6].mxu1 %vm5685_vm4, %v5660_v32 }
 0x6a0   :  { %2962 = vrot.lane.b32.xlu1 %v19217_v60, %s10583_s27  ;;  %3328 = vrot.lane.b32.xlu0 %v19076_v34, %s10584_s28  ;;  %v2728_v39 = vadd.f32 %v19220_v42, %v2294_v61  ;;  %v3594_v32 = vadd.f32 %v13926_v37, %v3160_v1 }
 0x6a2   :  { %v14490_v28 = vpop.permute.xlu1 %3812  ;;  %v3162_v6 = vadd.f32 %v19221_v63, %v2728_v39  ;;  %v4028_v30 = vadd.f32 %v14071_v49, %v3594_v32 }
 0x6a3   :  { %v14493_v47 = vpop.permute.xlu0 %4178 }
 0x6a4   :  { %3332 = vrot.lane.b32.xlu1 %v19139_v21, %s10584_s28  ;;  %3818 = vrot.lane.b32.xlu0 %v19190_v15, %s10585_s30  ;;  %v3596_v26 = vadd.f32 %v19222_v48, %v3162_v6  ;;  %v4462_v42 = vadd.f32 %v14219_v9, %v4028_v30 }
 0x6a6   :  { %v14502_v12 = vpop.permute.xlu1 %4182  ;;  %v4030_v37 = vadd.f32 %v14083_v54, %v3596_v26  ;;  %v4896_v61 = vadd.f32 %v14371_v19, %v4462_v42 }
 0x6a7   :  { %v14505_v25 = vpop.permute.xlu0 %4668 }
 0x6a8   :  { %3822 = vrot.lane.b32.xlu1 %v19217_v60, %s10585_s30  ;;  %4188 = vrot.lane.b32.xlu0 %v19076_v34, %s10586_s14  ;;  %v4464_v49 = vadd.f32 %v14229_v29, %v4030_v37 }
 0x6aa   :  { %v14514_v1 = vpop.permute.xlu1 %4672  ;;  %v4898_v9 = vadd.f32 %v14380_v22, %v4464_v49  ;;  %v19228_v49 = vld [vmem:[#allocation35_spill] sm:$0xff] }
 0x6ab   :  { %v5039_v39 = vpop.permute.xlu0 %5038 }
 0x6ac   :  { %v5330_v32 = vadd.f32 %v5039_v39, %v4896_v61  ;;  %4192 = vrot.lane.b32.xlu1 %v19139_v21, %s10586_s14  ;;  %4678 = vrot.lane.b32.xlu0 %v19190_v15, %s10587_s22  ;;  %v19227_v61 = vld [vmem:[#allocation170_spill] sm:$0xff] }
 0x6ad   :  { %v1859_v39 = vadd.f32 %v19228_v49, %v19227_v61  ;;  %v19233_v49 = vld [vmem:[#allocation149_spill] sm:$0xff] }
 0x6ae   :  { %v5043_v63 = vpop.permute.xlu1 %5042  ;;  %v5445_v6 = vadd.f32 %v14321_v41, %v5330_v32  ;;  %v19229_v32 = vld [vmem:[#allocation180_spill] sm:$0xff] }
 0x6af   :  { %v5332_v54 = vadd.f32 %v5043_v63, %v4898_v9  ;;  %v14523_v30 = vpop.permute.xlu0 %2950  ;;  %v2293_v9 = vadd.f32 %v19229_v32, %v1859_v39  ;;  %v19235_v39 = vld [vmem:[#allocation461_spill] sm:$0xff] }
 0x6b0   :  { %19223 = vst [vmem:[#allocation135_spill] sm:$0xff] %v14523_v30  ;;  %4682 = vrot.lane.b32.xlu1 %v19217_v60, %s10587_s22  ;;  %5048 = vrot.lane.b32.xlu0 %v19076_v34, %s10588_s0  ;;  %v5553_v26 = vmax.f32 %v5445_v6, 0.0  ;;  %v19230_v6 = vld [vmem:[#allocation176_spill] sm:$0xff] }
 0x6b1   :  { %v5447_v29 = vadd.f32 %v14321_v41, %v5332_v54  ;;  %v19231_v54 = vld [vmem:[#allocation37_spill] sm:$0xff] }
 0x6b2   :  { %v14530_v19 = vpop.permute.xlu1 %2954  ;;  %v14532_v48 = vpop.f32.mrb[2].mxu1 }
 0x6b3   :  { %19224 = vst [vmem:[#allocation444_spill] sm:$0xff] %v14530_v19  ;;  %19225 = vst [vmem:[#allocation349_spill] sm:$0xff] %v14532_v48  ;;  %v5555_v22 = vmax.f32 %v5447_v29, 0.0  ;;  %v14534_v42 = vpop.permute.xlu0 %3320  ;;  %v14536_v37 = vpop.f32.mrb[3].mxu1  ;;  %v1861_v29 = vadd.f32 %v19231_v54, %v19230_v6  ;;  %v19236_v19 = vld [vmem:[#allocation366_spill] sm:$0xff] }
 0x6b4   :  { %19226 = vst [vmem:[#allocation446_spill] sm:$0xff] %v14536_v37  ;;  %5052 = vrot.lane.b32.xlu1 %v19139_v21, %s10588_s0  ;;  %3390 = vrot.lane.b32.xlu0 %v19202_v27, %s10584_s28  ;;  %v19232_v37 = vld [vmem:[#allocation364_spill] sm:$0xff] }
 0x6b5   :  { %v5645_v34 = vmax.f32 %v5553_v26, %v5555_v22  ;;  %v2727_v61 = vadd.f32 %v19232_v37, %v2293_v9  ;;  %v19234_v26 = vld [vmem:[#allocation186_spill] sm:$0xff]  ;;  %v19237_v37 = vld [vmem:[#allocation11_spill] sm:$0xff] }
 0x6b6   :  { %v14545_v63 = vpop.permute.xlu1 %3324  ;;  %v2295_v22 = vadd.f32 %v19234_v26, %v1861_v29 }
 0x6b7   :  { %v14549_v48 = vpop.permute.xlu0 %3810  ;;  %10098 = vmatprep.mubr.msk.f32.mxu0 %vm5685_vm4, %v5645_v34  ;;  %v3161_v32 = vadd.f32 %v19235_v39, %v2727_v61  ;;  %v19238_v61 = vld [vmem:[#allocation109_spill] sm:$0xff] }
 0x6b8   :  { %3394 = vrot.lane.b32.xlu1 %v19233_v49, %s10584_s28  ;;  %3760 = vrot.lane.b32.xlu0 %v19121_v11, %s10585_s30  ;;  %v2729_v6 = vadd.f32 %v19236_v19, %v2295_v22 }
 0x6b9   :  { %v3595_v34 = vadd.f32 %v13995_v36, %v3161_v32 }
 0x6ba   :  { %v14559_v15 = vpop.permute.xlu1 %3814  ;;  %v3163_v9 = vadd.f32 %v19237_v37, %v2729_v6 }
 0x6bb   :  { %v14562_v54 = vpop.permute.xlu0 %4180  ;;  %v4029_v29 = vadd.f32 %v14136_v43, %v3595_v34 }
 0x6bc   :  { %3764 = vrot.lane.b32.xlu1 %v19125_v0, %s10585_s30  ;;  %4250 = vrot.lane.b32.xlu0 %v19202_v27, %s10586_s14  ;;  %v3597_v39 = vadd.f32 %v19238_v61, %v3163_v9 }
 0x6bd   :  { %v4463_v19 = vadd.f32 %v14289_v59, %v4029_v29 }
 0x6be   :  { %v14571_v26 = vpop.permute.xlu1 %4184  ;;  %v4031_v36 = vadd.f32 %v14148_v3, %v3597_v39 }
 0x6bf   :  { %v14574_v30 = vpop.permute.xlu0 %4670  ;;  %v4897_v22 = vadd.f32 %v14440_v4, %v4463_v19  ;;  %v19243_v19 = vld [vmem:[#allocation249_spill] sm:$0xff] }
 0x6c0   :  { %4254 = vrot.lane.b32.xlu1 %v19233_v49, %s10586_s14  ;;  %4620 = vrot.lane.b32.xlu0 %v19121_v11, %s10587_s22  ;;  %v4465_v43 = vadd.f32 %v14298_v5, %v4031_v36 }
 0x6c2   :  { %v14583_v32 = vpop.permute.xlu1 %4674  ;;  %v4899_v59 = vadd.f32 %v14449_v56, %v4465_v43  ;;  %v19242_v56 = vld [vmem:[#allocation77_spill] sm:$0xff] }
 0x6c3   :  { %v5041_v6 = vpop.permute.xlu0 %5040  ;;  %v1890_v36 = vadd.f32 %v19243_v19, %v19242_v56 }
 0x6c4   :  { %v5331_v34 = vadd.f32 %v5041_v6, %v4897_v22  ;;  %4624 = vrot.lane.b32.xlu1 %v19125_v0, %s10587_s22  ;;  %5110 = vrot.lane.b32.xlu0 %v19202_v27, %s10588_s0  ;;  %v19244_v22 = vld [vmem:[#allocation148_spill] sm:$0xff]  ;;  %v19245_v6 = vld [vmem:[#allocation255_spill] sm:$0xff]  ;;  %v19249_v27 = vld [vmem:[#allocation393_spill] sm:$0xff] }
 0x6c6   :  { %v5045_v37 = vpop.permute.xlu1 %5044  ;;  %v5446_v11 = vadd.f32 %v14321_v41, %v5331_v34  ;;  %v2324_v34 = vadd.f32 %v19245_v6, %v1890_v36  ;;  %v19251_v36 = vld [vmem:[#allocation13_spill] sm:$0xff] }
 0x6c7   :  { %v5333_v3 = vadd.f32 %v5045_v37, %v4899_v59  ;;  %v14592_v9 = vpop.permute.xlu0 %2892  ;;  %v19247_v37 = vld [vmem:[#allocation83_spill] sm:$0xff] }
 0x6c8   :  { %19239 = vst [vmem:[#allocation122_spill] sm:$0xff] %v14592_v9  ;;  %5114 = vrot.lane.b32.xlu1 %v19233_v49, %s10588_s0  ;;  %3392 = vrot.lane.b32.xlu0 %v19217_v60, %s10584_s28  ;;  %v5554_v29 = vmax.f32 %v5446_v11, 0.0  ;;  %v2758_v19 = vadd.f32 %v19249_v27, %v2324_v34  ;;  %v19252_v9 = vld [vmem:[#allocation395_spill] sm:$0xff]  ;;  %v19254_v27 = vld [vmem:[#allocation341_spill] sm:$0xff] }
 0x6c9   :  { %v5448_v4 = vadd.f32 %v14321_v41, %v5333_v3  ;;  %v19248_v3 = vld [vmem:[#allocation253_spill] sm:$0xff] }
 0x6ca   :  { %v14599_v5 = vpop.permute.xlu1 %2896  ;;  %v1892_v11 = vadd.f32 %v19248_v3, %v19247_v37  ;;  %v3192_v6 = vadd.f32 %v19251_v36, %v2758_v19  ;;  %v19255_v19 = vld [vmem:[#allocation343_spill] sm:$0xff] }
 0x6cb   :  { %19240 = vst [vmem:[#allocation19_spill] sm:$0xff] %v14599_v5  ;;  %v5556_v61 = vmax.f32 %v5448_v4, 0.0  ;;  %v14601_v39 = vpop.permute.xlu0 %3382 }
 0x6cc   :  { %19241 = vst [vmem:[#allocation132_spill] sm:$0xff] %v14601_v39  ;;  %3396 = vrot.lane.b32.xlu1 %v19244_v22, %s10584_s28  ;;  %3762 = vrot.lane.b32.xlu0 %v19139_v21, %s10585_s30 }
 0x6cd   :  { %v5646_v43 = vmax.f32 %v5554_v29, %v5556_v61  ;;  %v19250_v29 = vld [vmem:[#allocation259_spill] sm:$0xff] }
 0x6ce   :  { %v14610_v59 = vpop.permute.xlu1 %3386  ;;  %v2326_v61 = vadd.f32 %v19250_v29, %v1892_v11 }
 0x6cf   :  { %19246 = vst [vmem:[#allocation128_spill] sm:$0xff] %v14610_v59  ;;  %v14614_v4 = vpop.permute.xlu0 %3752  ;;  %10099 = vmatmul.mubr.msk.f32.gmra.mrb[144].mxu0 %vm5685_vm4, %v5646_v43  ;;  %v19253_v59 = vld [vmem:[#allocation115_spill] sm:$0xff] }
 0x6d0   :  { %3766 = vrot.lane.b32.xlu1 %v19143_v44, %s10585_s30  ;;  %4252 = vrot.lane.b32.xlu0 %v19217_v60, %s10586_s14  ;;  %v2760_v37 = vadd.f32 %v19252_v9, %v2326_v61  ;;  %v3626_v43 = vadd.f32 %v19253_v59, %v3192_v6 }
 0x6d2   :  { %v14624_v5 = vpop.permute.xlu1 %3756  ;;  %v3194_v34 = vadd.f32 %v19254_v27, %v2760_v37  ;;  %v4060_v11 = vadd.f32 %v14205_v10, %v3626_v43 }
 0x6d3   :  { %v14627_v3 = vpop.permute.xlu0 %4242 }
 0x6d4   :  { %4256 = vrot.lane.b32.xlu1 %v19244_v22, %s10586_s14  ;;  %4622 = vrot.lane.b32.xlu0 %v19139_v21, %s10587_s22  ;;  %v3628_v36 = vadd.f32 %v19255_v19, %v3194_v34  ;;  %v4494_v9 = vadd.f32 %v14359_v8, %v4060_v11 }
 0x6d6   :  { %v14636_v29 = vpop.permute.xlu1 %4246  ;;  %v4062_v21 = vadd.f32 %v14217_v7, %v3628_v36  ;;  %v4928_v59 = vadd.f32 %v14505_v25, %v4494_v9  ;;  %v19257_v25 = vld [vmem:[#allocation155_spill] sm:$0xff] }
 0x6d7   :  { %v14639_v39 = vpop.permute.xlu0 %4612 }
 0x6d8   :  { %4626 = vrot.lane.b32.xlu1 %v19143_v44, %s10587_s22  ;;  %5112 = vrot.lane.b32.xlu0 %v19217_v60, %s10588_s0  ;;  %v4496_v10 = vadd.f32 %v14368_v24, %v4062_v21 }
 0x6da   :  { %v14648_v61 = vpop.permute.xlu1 %4616  ;;  %v4930_v8 = vadd.f32 %v14514_v1, %v4496_v10  ;;  %v19262_v10 = vld [vmem:[#allocation76_spill] sm:$0xff] }
 0x6db   :  { %v5103_v6 = vpop.permute.xlu0 %5102 }
 0x6dc   :  { %v5362_v37 = vadd.f32 %v5103_v6, %v4928_v59  ;;  %5116 = vrot.lane.b32.xlu1 %v19244_v22, %s10588_s0  ;;  %2964 = vrot.lane.b32.xlu0 %v19233_v49, %s10583_s27  ;;  %v19261_v59 = vld [vmem:[#allocation250_spill] sm:$0xff] }
 0x6dd   :  { %v1891_v6 = vadd.f32 %v19262_v10, %v19261_v59 }
 0x6de   :  { %v5107_v43 = vpop.permute.xlu1 %5106  ;;  %v5477_v27 = vadd.f32 %v14321_v41, %v5362_v37 }
 0x6df   :  { %v5364_v7 = vadd.f32 %v5107_v43, %v4930_v8  ;;  %v14657_v34 = vpop.permute.xlu0 %2894  ;;  %v19263_v8 = vld [vmem:[#allocation256_spill] sm:$0xff] }
 0x6e0   :  { %19256 = vst [vmem:[#allocation21_spill] sm:$0xff] %v14657_v34  ;;  %2968 = vrot.lane.b32.xlu1 %v19257_v25, %s10583_s27  ;;  %3824 = vrot.lane.b32.xlu0 %v19233_v49, %s10585_s30  ;;  %v5585_v36 = vmax.f32 %v5477_v27, 0.0  ;;  %v2325_v43 = vadd.f32 %v19263_v8, %v1891_v6  ;;  %v19265_v27 = vld [vmem:[#allocation254_spill] sm:$0xff]  ;;  %v19269_v6 = vld [vmem:[#allocation439_spill] sm:$0xff]  ;;  %v19270_v34 = vld [vmem:[#allocation396_spill] sm:$0xff] }
 0x6e1   :  { %v5479_v24 = vadd.f32 %v14321_v41, %v5364_v7 }
 0x6e2   :  { %v14664_v11 = vpop.permute.xlu1 %2898  ;;  %v14666_v19 = vpop.f32.mrb[140].mxu0 }
 0x6e3   :  { %19258 = vst [vmem:[#allocation348_spill] sm:$0xff] %v14664_v11  ;;  %19259 = vst [vmem:[#allocation138_spill] sm:$0xff] %v14666_v19  ;;  %v5587_v1 = vmax.f32 %v5479_v24, 0.0  ;;  %v14668_v9 = vpop.permute.xlu0 %3384  ;;  %v14670_v21 = vpop.f32.mrb[141].mxu0  ;;  %v19266_v24 = vld [vmem:[#allocation82_spill] sm:$0xff] }
 0x6e4   :  { %19260 = vst [vmem:[#allocation445_spill] sm:$0xff] %v14670_v21  ;;  %3828 = vrot.lane.b32.xlu1 %v19257_v25, %s10585_s30  ;;  %4194 = vrot.lane.b32.xlu0 %v19125_v0, %s10586_s14  ;;  %v1893_v19 = vadd.f32 %v19266_v24, %v19265_v27  ;;  %v19267_v21 = vld [vmem:[#allocation394_spill] sm:$0xff] }
 0x6e5   :  { %v5661_v37 = vmax.f32 %v5585_v36, %v5587_v1  ;;  %v2759_v59 = vadd.f32 %v19267_v21, %v2325_v43  ;;  %v19268_v36 = vld [vmem:[#allocation260_spill] sm:$0xff] }
 0x6e6   :  { %v14679_v7 = vpop.permute.xlu1 %3388  ;;  %v2327_v1 = vadd.f32 %v19268_v36, %v1893_v19  ;;  %v19272_v21 = vld [vmem:[#allocation16_spill] sm:$0xff] }
 0x6e7   :  { %19264 = vst [vmem:[#allocation350_spill] sm:$0xff] %v14679_v7  ;;  %v14683_v60 = vpop.permute.xlu0 %3754  ;;  %10122 = vmatprep.mubr.msk.f32.mxu1 %vm5685_vm4, %v5661_v37  ;;  %v3193_v8 = vadd.f32 %v19269_v6, %v2759_v59  ;;  %v19271_v7 = vld [vmem:[#allocation345_spill] sm:$0xff]  ;;  %v19273_v59 = vld [vmem:[#allocation442_spill] sm:$0xff] }
 0x6e8   :  { %4198 = vrot.lane.b32.xlu1 %v19182_v52, %s10586_s14  ;;  %4684 = vrot.lane.b32.xlu0 %v19233_v49, %s10587_s22  ;;  %v2761_v27 = vadd.f32 %v19270_v34, %v2327_v1 }
 0x6e9   :  { %v3627_v37 = vadd.f32 %v19271_v7, %v3193_v8 }
 0x6ea   :  { %v14693_v11 = vpop.permute.xlu1 %3758  ;;  %v3195_v43 = vadd.f32 %v19272_v21, %v2761_v27 }
 0x6eb   :  { %v14696_v24 = vpop.permute.xlu0 %4244  ;;  %v4061_v19 = vadd.f32 %v14274_v13, %v3627_v37  ;;  %v19274_v37 = vld [vmem:[#allocation154_spill] sm:$0xff] }
 0x6ec   :  { %4688 = vrot.lane.b32.xlu1 %v19257_v25, %s10587_s22  ;;  %5054 = vrot.lane.b32.xlu0 %v19125_v0, %s10588_s0  ;;  %v3629_v6 = vadd.f32 %v19273_v59, %v3195_v43 }
 0x6ed   :  { %v4495_v34 = vadd.f32 %v14428_v62, %v4061_v19 }
 0x6ee   :  { %v14705_v36 = vpop.permute.xlu1 %4248  ;;  %v4063_v0 = vadd.f32 %v14286_v38, %v3629_v6 }
 0x6ef   :  { %v14708_v49 = vpop.permute.xlu0 %4614  ;;  %v4929_v7 = vadd.f32 %v14574_v30, %v4495_v34 }
 0x6f0   :  { %5058 = vrot.lane.b32.xlu1 %v19182_v52, %s10588_s0  ;;  %2966 = vrot.lane.b32.xlu0 %v19244_v22, %s10583_s27  ;;  %v4497_v13 = vadd.f32 %v14437_v35, %v4063_v0  ;;  %v19277_v0 = vld [vmem:[#allocation181_spill] sm:$0xff] }
 0x6f2   :  { %v14717_v1 = vpop.permute.xlu1 %4618  ;;  %v4931_v62 = vadd.f32 %v14583_v32, %v4497_v13  ;;  %v19276_v32 = vld [vmem:[#allocation40_spill] sm:$0xff] }
 0x6f3   :  { %v5105_v8 = vpop.permute.xlu0 %5104 }
 0x6f4   :  { %v5363_v27 = vadd.f32 %v5105_v8, %v4929_v7  ;;  %2970 = vrot.lane.b32.xlu1 %v19274_v37, %s10583_s27  ;;  %3826 = vrot.lane.b32.xlu0 %v19244_v22, %s10585_s30  ;;  %v1862_v7 = vadd.f32 %v19277_v0, %v19276_v32  ;;  %v19278_v8 = vld [vmem:[#allocation189_spill] sm:$0xff] }
 0x6f5   :  { %v19283_v0 = vld [vmem:[#allocation117_spill] sm:$0xff] }
 0x6f6   :  { %v5109_v21 = vpop.permute.xlu1 %5108  ;;  %v5478_v43 = vadd.f32 %v14321_v41, %v5363_v27  ;;  %v2296_v27 = vadd.f32 %v19278_v8, %v1862_v7 }
 0x6f7   :  { %v5365_v38 = vadd.f32 %v5109_v21, %v4931_v62  ;;  %v14726_v19 = vpop.permute.xlu0 %2956  ;;  %v19279_v21 = vld [vmem:[#allocation42_spill] sm:$0xff] }
 0x6f8   :  { %3830 = vrot.lane.b32.xlu1 %v19274_v37, %s10585_s30  ;;  %4196 = vrot.lane.b32.xlu0 %v19143_v44, %s10586_s14  ;;  %v5586_v59 = vmax.f32 %v5478_v43, 0.0 }
 0x6f9   :  { %v5480_v35 = vadd.f32 %v14321_v41, %v5365_v38  ;;  %v19280_v38 = vld [vmem:[#allocation187_spill] sm:$0xff] }
 0x6fa   :  { %v14733_v30 = vpop.permute.xlu1 %2960  ;;  %v1864_v43 = vadd.f32 %v19280_v38, %v19279_v21 }
 0x6fb   :  { %19275 = vst [vmem:[#allocation447_spill] sm:$0xff] %v14733_v30  ;;  %v5588_v6 = vmax.f32 %v5480_v35, 0.0  ;;  %v14735_v34 = vpop.permute.xlu0 %3326  ;;  %v19281_v30 = vld [vmem:[#allocation367_spill] sm:$0xff] }
 0x6fc   :  { %4200 = vrot.lane.b32.xlu1 %v19194_v51, %s10586_s14  ;;  %4686 = vrot.lane.b32.xlu0 %v19244_v22, %s10587_s22  ;;  %v2730_v32 = vadd.f32 %v19281_v30, %v2296_v27  ;;  %v19284_v22 = vld [vmem:[#allocation369_spill] sm:$0xff]  ;;  %v19285_v30 = vld [vmem:[#allocation18_spill] sm:$0xff] }
 0x6fd   :  { %v5662_v13 = vmax.f32 %v5586_v59, %v5588_v6  ;;  %v19282_v59 = vld [vmem:[#allocation195_spill] sm:$0xff] }
 0x6fe   :  { %v14744_v62 = vpop.permute.xlu1 %3330  ;;  %v2298_v6 = vadd.f32 %v19282_v59, %v1864_v43  ;;  %v3164_v7 = vadd.f32 %v19283_v0, %v2730_v32 }
 0x6ff   :  { %v14748_v35 = vpop.permute.xlu0 %3816  ;;  %10123 = vmatmul.mubr.msk.f32.gmra.mrb[8].mxu1 %vm5685_vm4, %v5662_v13 }
 0x700   :  { %4690 = vrot.lane.b32.xlu1 %v19274_v37, %s10587_s22  ;;  %5056 = vrot.lane.b32.xlu0 %v19143_v44, %s10588_s0  ;;  %v2732_v21 = vadd.f32 %v19284_v22, %v2298_v6  ;;  %v3598_v13 = vadd.f32 %v14194_v2, %v3164_v7  ;;  %v19286_v2 = vld [vmem:[#allocation161_spill] sm:$0xff] }
 0x702   :  { %v14758_v8 = vpop.permute.xlu1 %3820  ;;  %v3166_v44 = vadd.f32 %v19285_v30, %v2732_v21  ;;  %v4032_v27 = vadd.f32 %v14346_v23, %v3598_v13 }
 0x703   :  { %v14761_v38 = vpop.permute.xlu0 %4186 }
 0x704   :  { %5060 = vrot.lane.b32.xlu1 %v19194_v51, %s10588_s0  ;;  %3398 = vrot.lane.b32.xlu0 %v19257_v25, %s10584_s28  ;;  %v3600_v32 = vadd.f32 %v14203_v50, %v3166_v44  ;;  %v4466_v22 = vadd.f32 %v14493_v47, %v4032_v27 }
 0x706   :  { %v14770_v43 = vpop.permute.xlu1 %4190  ;;  %v4034_v6 = vadd.f32 %v14356_v58, %v3600_v32  ;;  %v4900_v0 = vadd.f32 %v14639_v39, %v4466_v22 }
 0x707   :  { %v14773_v59 = vpop.permute.xlu0 %4676 }
 0x708   :  { %3402 = vrot.lane.b32.xlu1 %v19286_v2, %s10584_s28  ;;  %4258 = vrot.lane.b32.xlu0 %v19257_v25, %s10586_s14  ;;  %v4468_v23 = vadd.f32 %v14502_v12, %v4034_v6  ;;  %v19291_v6 = vld [vmem:[#allocation182_spill] sm:$0xff] }
 0x70a   :  { %v14782_v7 = vpop.permute.xlu1 %4680  ;;  %v4902_v47 = vadd.f32 %v14648_v61, %v4468_v23 }
 0x70b   :  { %v5047_v21 = vpop.permute.xlu0 %5046 }
 0x70c   :  { %v5334_v50 = vadd.f32 %v5047_v21, %v4900_v0  ;;  %4262 = vrot.lane.b32.xlu1 %v19286_v2, %s10586_s14  ;;  %4628 = vrot.lane.b32.xlu0 %v19182_v52, %s10587_s22  ;;  %v19292_v0 = vld [vmem:[#allocation39_spill] sm:$0xff] }
 0x70d   :  { %v1863_v23 = vadd.f32 %v19292_v0, %v19291_v6  ;;  %v19297_v0 = vld [vmem:[#allocation160_spill] sm:$0xff] }
 0x70e   :  { %v5051_v13 = vpop.permute.xlu1 %5050  ;;  %v5449_v30 = vadd.f32 %v14321_v41, %v5334_v50  ;;  %v19293_v50 = vld [vmem:[#allocation192_spill] sm:$0xff] }
 0x70f   :  { %v5336_v58 = vadd.f32 %v5051_v13, %v4902_v47  ;;  %v14791_v44 = vpop.permute.xlu0 %2958  ;;  %v2297_v47 = vadd.f32 %v19293_v50, %v1863_v23  ;;  %v19299_v23 = vld [vmem:[#allocation123_spill] sm:$0xff] }
 0x710   :  { %19287 = vst [vmem:[#allocation52_spill] sm:$0xff] %v14791_v44  ;;  %4632 = vrot.lane.b32.xlu1 %v19185_v33, %s10587_s22  ;;  %5118 = vrot.lane.b32.xlu0 %v19257_v25, %s10588_s0  ;;  %v5557_v52 = vmax.f32 %v5449_v30, 0.0  ;;  %v19294_v30 = vld [vmem:[#allocation188_spill] sm:$0xff] }
 0x711   :  { %v5451_v12 = vadd.f32 %v14321_v41, %v5336_v58  ;;  %v19295_v58 = vld [vmem:[#allocation41_spill] sm:$0xff] }
 0x712   :  { %v14798_v39 = vpop.permute.xlu1 %2962  ;;  %v14800_v27 = vpop.f32.mrb[4].mxu1 }
 0x713   :  { %19288 = vst [vmem:[#allocation217_spill] sm:$0xff] %v14798_v39  ;;  %19289 = vst [vmem:[#allocation223_spill] sm:$0xff] %v14800_v27  ;;  %v5559_v61 = vmax.f32 %v5451_v12, 0.0  ;;  %v14802_v32 = vpop.permute.xlu0 %3328  ;;  %v14804_v22 = vpop.f32.mrb[5].mxu1  ;;  %v1865_v12 = vadd.f32 %v19295_v58, %v19294_v30  ;;  %v19300_v39 = vld [vmem:[#allocation370_spill] sm:$0xff] }
 0x714   :  { %19290 = vst [vmem:[#allocation54_spill] sm:$0xff] %v14804_v22  ;;  %5122 = vrot.lane.b32.xlu1 %v19286_v2, %s10588_s0  ;;  %3400 = vrot.lane.b32.xlu0 %v19274_v37, %s10584_s28  ;;  %v19296_v22 = vld [vmem:[#allocation368_spill] sm:$0xff] }
 0x715   :  { %v5647_v21 = vmax.f32 %v5557_v52, %v5559_v61  ;;  %v2731_v6 = vadd.f32 %v19296_v22, %v2297_v47  ;;  %v19298_v52 = vld [vmem:[#allocation198_spill] sm:$0xff]  ;;  %v19301_v22 = vld [vmem:[#allocation440_spill] sm:$0xff] }
 0x716   :  { %v14813_v13 = vpop.permute.xlu1 %3332  ;;  %v2299_v61 = vadd.f32 %v19298_v52, %v1865_v12 }
 0x717   :  { %v14817_v27 = vpop.permute.xlu0 %3818  ;;  %10101 = vmatprep.mubr.msk.f32.mxu0 %vm5685_vm4, %v5647_v21  ;;  %v3165_v50 = vadd.f32 %v19299_v23, %v2731_v6 }
 0x718   :  { %3404 = vrot.lane.b32.xlu1 %v19297_v0, %s10584_s28  ;;  %4260 = vrot.lane.b32.xlu0 %v19274_v37, %s10586_s14  ;;  %v2733_v30 = vadd.f32 %v19300_v39, %v2299_v61 }
 0x719   :  { %v3599_v21 = vadd.f32 %v14259_v16, %v3165_v50 }
 0x71a   :  { %v14827_v25 = vpop.permute.xlu1 %3822  ;;  %v3167_v47 = vadd.f32 %v19301_v22, %v2733_v30 }
 0x71b   :  { %v14830_v58 = vpop.permute.xlu0 %4188  ;;  %v4033_v12 = vadd.f32 %v14413_v53, %v3599_v21 }
 0x71c   :  { %4264 = vrot.lane.b32.xlu1 %v19297_v0, %s10586_s14  ;;  %4630 = vrot.lane.b32.xlu0 %v19194_v51, %s10587_s22  ;;  %v3601_v6 = vadd.f32 %v14268_v45, %v3167_v47  ;;  %v19303_v47 = vld [vmem:[#allocation257_spill] sm:$0xff] }
 0x71d   :  { %v4467_v39 = vadd.f32 %v14562_v54, %v4033_v12 }
 0x71e   :  { %v14839_v52 = vpop.permute.xlu1 %4192  ;;  %v4035_v16 = vadd.f32 %v14425_v14, %v3601_v6 }
 0x71f   :  { %v14842_v23 = vpop.permute.xlu0 %4678  ;;  %v4901_v51 = vadd.f32 %v14708_v49, %v4467_v39  ;;  %v19302_v49 = vld [vmem:[#allocation89_spill] sm:$0xff]  ;;  %v19305_v39 = vld [vmem:[#allocation263_spill] sm:$0xff] }
 0x720   :  { %4634 = vrot.lane.b32.xlu1 %v19199_v40, %s10587_s22  ;;  %5120 = vrot.lane.b32.xlu0 %v19274_v37, %s10588_s0  ;;  %v4469_v53 = vadd.f32 %v14571_v26, %v4035_v16  ;;  %v1894_v12 = vadd.f32 %v19303_v47, %v19302_v49  ;;  %v19304_v26 = vld [vmem:[#allocation167_spill] sm:$0xff]  ;;  %v19309_v49 = vld [vmem:[#allocation397_spill] sm:$0xff] }
 0x722   :  { %v14851_v61 = vpop.permute.xlu1 %4682  ;;  %v4903_v54 = vadd.f32 %v14717_v1, %v4469_v53  ;;  %v2328_v16 = vadd.f32 %v19305_v39, %v1894_v12  ;;  %v19308_v53 = vld [vmem:[#allocation261_spill] sm:$0xff]  ;;  %v19311_v39 = vld [vmem:[#allocation120_spill] sm:$0xff] }
 0x723   :  { %v5049_v50 = vpop.permute.xlu0 %5048 }
 0x724   :  { %v5335_v45 = vadd.f32 %v5049_v50, %v4901_v51  ;;  %5124 = vrot.lane.b32.xlu1 %v19297_v0, %s10588_s0  ;;  %2972 = vrot.lane.b32.xlu0 %v19286_v2, %s10583_s27  ;;  %v19307_v51 = vld [vmem:[#allocation95_spill] sm:$0xff]  ;;  %v2762_v47 = vadd.f32 %v19309_v49, %v2328_v16 }
 0x725   :  { %v1896_v50 = vadd.f32 %v19308_v53, %v19307_v51  ;;  %v19312_v51 = vld [vmem:[#allocation399_spill] sm:$0xff]  ;;  %v19313_v53 = vld [vmem:[#allocation116_spill] sm:$0xff] }
 0x726   :  { %v5053_v30 = vpop.permute.xlu1 %5052  ;;  %v5450_v21 = vadd.f32 %v14321_v41, %v5335_v45  ;;  %v3196_v44 = vadd.f32 %v19311_v39, %v2762_v47 }
 0x727   :  { %v5337_v14 = vadd.f32 %v5053_v30, %v4903_v54  ;;  %v14860_v22 = vpop.permute.xlu0 %3390 }
 0x728   :  { %2976 = vrot.lane.b32.xlu1 %v19304_v26, %s10583_s27  ;;  %3832 = vrot.lane.b32.xlu0 %v19286_v2, %s10585_s30  ;;  %v5558_v45 = vmax.f32 %v5450_v21, 0.0  ;;  %v3630_v16 = vadd.f32 %v14333_v31, %v3196_v44 }
 0x729   :  { %v5452_v6 = vadd.f32 %v14321_v41, %v5337_v14  ;;  %v19310_v14 = vld [vmem:[#allocation267_spill] sm:$0xff] }
 0x72a   :  { %v14870_v1 = vpop.permute.xlu1 %3394  ;;  %v2330_v37 = vadd.f32 %v19310_v14, %v1896_v50 }
 0x72b   :  { %19306 = vst [vmem:[#allocation221_spill] sm:$0xff] %v14870_v1  ;;  %v5560_v54 = vmax.f32 %v5452_v6, 0.0  ;;  %v14874_v30 = vpop.permute.xlu0 %3760 }
 0x72c   :  { %3836 = vrot.lane.b32.xlu1 %v19304_v26, %s10585_s30  ;;  %4692 = vrot.lane.b32.xlu0 %v19286_v2, %s10587_s22  ;;  %v2764_v21 = vadd.f32 %v19312_v51, %v2330_v37 }
 0x72d   :  { %v5648_v12 = vmax.f32 %v5558_v45, %v5560_v54  ;;  %v4064_v45 = vadd.f32 %v14480_v20, %v3630_v16 }
 0x72e   :  { %v14883_v1 = vpop.permute.xlu1 %3764  ;;  %v3198_v50 = vadd.f32 %v19313_v53, %v2764_v21  ;;  %v19316_v21 = vld [vmem:[#allocation88_spill] sm:$0xff] }
 0x72f   :  { %v14886_v6 = vpop.permute.xlu0 %4250  ;;  %10102 = vmatmul.mubr.msk.f32.gmra.mrb[146].mxu0 %vm5685_vm4, %v5648_v12  ;;  %v4498_v47 = vadd.f32 %v14627_v3, %v4064_v45  ;;  %v19314_v12 = vld [vmem:[#allocation166_spill] sm:$0xff]  ;;  %v19317_v53 = vld [vmem:[#allocation264_spill] sm:$0xff] }
 0x730   :  { %4696 = vrot.lane.b32.xlu1 %v19304_v26, %s10587_s22  ;;  %5062 = vrot.lane.b32.xlu0 %v19185_v33, %s10588_s0  ;;  %v3632_v37 = vadd.f32 %v14342_v18, %v3198_v50  ;;  %v19318_v45 = vld [vmem:[#allocation262_spill] sm:$0xff] }
 0x731   :  { %v4932_v33 = vadd.f32 %v14773_v59, %v4498_v47  ;;  %v19315_v59 = vld [vmem:[#allocation258_spill] sm:$0xff] }
 0x732   :  { %v14896_v54 = vpop.permute.xlu1 %4254  ;;  %v4066_v31 = vadd.f32 %v14490_v28, %v3632_v37  ;;  %v1895_v16 = vadd.f32 %v19316_v21, %v19315_v59  ;;  %v19319_v37 = vld [vmem:[#allocation94_spill] sm:$0xff] }
 0x733   :  { %v14899_v49 = vpop.permute.xlu0 %4620  ;;  %v1897_v47 = vadd.f32 %v19319_v37, %v19318_v45 }
 0x734   :  { %5066 = vrot.lane.b32.xlu1 %v19242_v56, %s10588_s0  ;;  %2974 = vrot.lane.b32.xlu0 %v19297_v0, %s10583_s27  ;;  %v4500_v20 = vadd.f32 %v14636_v29, %v4066_v31  ;;  %v2329_v50 = vadd.f32 %v19317_v53, %v1895_v16 }
 0x736   :  { %v14908_v44 = vpop.permute.xlu1 %4624  ;;  %v4934_v56 = vadd.f32 %v14782_v7, %v4500_v20 }
 0x737   :  { %v5111_v14 = vpop.permute.xlu0 %5110 }
 0x738   :  { %v5366_v18 = vadd.f32 %v5111_v14, %v4932_v33  ;;  %2978 = vrot.lane.b32.xlu1 %v19314_v12, %s10583_s27  ;;  %3834 = vrot.lane.b32.xlu0 %v19297_v0, %s10585_s30  ;;  %v19320_v14 = vld [vmem:[#allocation398_spill] sm:$0xff] }
 0x73a   :  { %v5115_v3 = vpop.permute.xlu1 %5114  ;;  %v5481_v39 = vadd.f32 %v14321_v41, %v5366_v18  ;;  %v2763_v18 = vadd.f32 %v19320_v14, %v2329_v50 }
 0x73b   :  { %v5368_v28 = vadd.f32 %v5115_v3, %v4934_v56  ;;  %v14917_v51 = vpop.permute.xlu0 %3392  ;;  %v19321_v56 = vld [vmem:[#allocation268_spill] sm:$0xff] }
 0x73c   :  { %3838 = vrot.lane.b32.xlu1 %v19314_v12, %s10585_s30  ;;  %4694 = vrot.lane.b32.xlu0 %v19297_v0, %s10587_s22  ;;  %v5589_v31 = vmax.f32 %v5481_v39, 0.0  ;;  %v2331_v3 = vadd.f32 %v19321_v56, %v1897_v47  ;;  %v3197_v59 = vadd.f32 %v14249_v17, %v2763_v18  ;;  %v19323_v39 = vld [vmem:[#allocation400_spill] sm:$0xff]  ;;  %v19325_v17 = vld [vmem:[#allocation17_spill] sm:$0xff] }
 0x73d   :  { %v5483_v29 = vadd.f32 %v14321_v41, %v5368_v28 }
 0x73e   :  { %v14927_v7 = vpop.permute.xlu1 %3396  ;;  %v3631_v45 = vadd.f32 %v14398_v55, %v3197_v59  ;;  %v19327_v55 = vld [vmem:[#allocation173_spill] sm:$0xff] }
 0x73f   :  { %v5591_v33 = vmax.f32 %v5483_v29, 0.0  ;;  %v14931_v20 = vpop.permute.xlu0 %3762  ;;  %v2765_v29 = vadd.f32 %v19323_v39, %v2331_v3 }
 0x740   :  { %4698 = vrot.lane.b32.xlu1 %v19314_v12, %s10587_s22  ;;  %5064 = vrot.lane.b32.xlu0 %v19199_v40, %s10588_s0  ;;  %v4065_v37 = vadd.f32 %v14549_v48, %v3631_v45 }
 0x741   :  { %v5663_v28 = vmax.f32 %v5589_v31, %v5591_v33  ;;  %v3199_v40 = vadd.f32 %v19325_v17, %v2765_v29  ;;  %v19326_v31 = vld [vmem:[#allocation121_spill] sm:$0xff] }
 0x742   :  { %v14940_v21 = vpop.permute.xlu1 %3766  ;;  %v14942_v16 = vpop.f32.mrb[142].mxu0  ;;  %v4499_v18 = vadd.f32 %v14696_v24, %v4065_v37  ;;  %v19329_v17 = vld [vmem:[#allocation193_spill] sm:$0xff] }
 0x743   :  { %19322 = vst [vmem:[#allocation379_spill] sm:$0xff] %v14942_v16  ;;  %v14945_v53 = vpop.permute.xlu0 %4252  ;;  %v14947_v50 = vpop.f32.mrb[143].mxu0  ;;  %10125 = vmatprep.mubr.msk.f32.mxu1 %vm5685_vm4, %v5663_v28  ;;  %v3633_v33 = vadd.f32 %v19326_v31, %v3199_v40  ;;  %v19330_v37 = vld [vmem:[#allocation201_spill] sm:$0xff] }
 0x744   :  { %19324 = vst [vmem:[#allocation227_spill] sm:$0xff] %v14947_v50  ;;  %5068 = vrot.lane.b32.xlu1 %v19262_v10, %s10588_s0  ;;  %3406 = vrot.lane.b32.xlu0 %v19304_v26, %s10584_s28  ;;  %v4933_v56 = vadd.f32 %v14842_v23, %v4499_v18  ;;  %v19328_v23 = vld [vmem:[#allocation44_spill] sm:$0xff]  ;;  %v19332_v18 = vld [vmem:[#allocation199_spill] sm:$0xff] }
 0x745   :  { %v4067_v10 = vadd.f32 %v14559_v15, %v3633_v33  ;;  %v1866_v40 = vadd.f32 %v19329_v17, %v19328_v23  ;;  %v19331_v33 = vld [vmem:[#allocation46_spill] sm:$0xff]  ;;  %v19336_v17 = vld [vmem:[#allocation441_spill] sm:$0xff] }
 0x746   :  { %v14957_v47 = vpop.permute.xlu1 %4256 }
 0x747   :  { %v14960_v14 = vpop.permute.xlu0 %4622  ;;  %v4501_v48 = vadd.f32 %v14705_v36, %v4067_v10  ;;  %v2300_v31 = vadd.f32 %v19330_v37, %v1866_v40  ;;  %v1868_v10 = vadd.f32 %v19332_v18, %v19331_v33  ;;  %v19337_v33 = vld [vmem:[#allocation373_spill] sm:$0xff]  ;;  %v19338_v18 = vld [vmem:[#allocation346_spill] sm:$0xff] }
 0x748   :  { %3410 = vrot.lane.b32.xlu1 %v19327_v55, %s10584_s28  ;;  %4266 = vrot.lane.b32.xlu0 %v19304_v26, %s10586_s14 }
 0x749   :  { %v4935_v24 = vadd.f32 %v14851_v61, %v4501_v48 }
 0x74a   :  { %v14969_v3 = vpop.permute.xlu1 %4626 }
 0x74b   :  { %v5113_v28 = vpop.permute.xlu0 %5112 }
 0x74c   :  { %v5367_v59 = vadd.f32 %v5113_v28, %v4933_v56  ;;  %4270 = vrot.lane.b32.xlu1 %v19327_v55, %s10586_s14  ;;  %5126 = vrot.lane.b32.xlu0 %v19304_v26, %s10588_s0 }
 0x74e   :  { %v5117_v39 = vpop.permute.xlu1 %5116  ;;  %v5482_v29 = vadd.f32 %v14321_v41, %v5367_v59  ;;  %v19333_v59 = vld [vmem:[#allocation371_spill] sm:$0xff] }
 0x74f   :  { %v5369_v15 = vadd.f32 %v5117_v39, %v4935_v24  ;;  %v14978_v45 = vpop.permute.xlu0 %2964  ;;  %v2734_v24 = vadd.f32 %v19333_v59, %v2300_v31  ;;  %v19334_v39 = vld [vmem:[#allocation172_spill] sm:$0xff] }
 0x750   :  { %5130 = vrot.lane.b32.xlu1 %v19327_v55, %s10588_s0  ;;  %3408 = vrot.lane.b32.xlu0 %v19314_v12, %s10584_s28  ;;  %v5590_v56 = vmax.f32 %v5482_v29, 0.0 }
 0x751   :  { %v5484_v36 = vadd.f32 %v14321_v41, %v5369_v15  ;;  %v19335_v41 = vld [vmem:[#allocation207_spill] sm:$0xff]  ;;  %v3168_v40 = vadd.f32 %v19336_v17, %v2734_v24 }
 0x752   :  { %v14988_v61 = vpop.permute.xlu1 %2968  ;;  %v2302_v15 = vadd.f32 %v19335_v41, %v1868_v10 }
 0x753   :  { %v5592_v48 = vmax.f32 %v5484_v36, 0.0  ;;  %v14992_v28 = vpop.permute.xlu0 %3824  ;;  %v3602_v31 = vadd.f32 %v14467_v57, %v3168_v40  ;;  %v19339_v40 = vld [vmem:[#allocation179_spill] sm:$0xff] }
 0x754   :  { %3412 = vrot.lane.b32.xlu1 %v19334_v39, %s10584_s28  ;;  %4268 = vrot.lane.b32.xlu0 %v19314_v12, %s10586_s14  ;;  %v2736_v29 = vadd.f32 %v19337_v33, %v2302_v15 }
 0x755   :  { %v5664_v23 = vmax.f32 %v5590_v56, %v5592_v48  ;;  %v4036_v56 = vadd.f32 %v14614_v4, %v3602_v31  ;;  %v19340_v31 = vld [vmem:[#allocation194_spill] sm:$0xff] }
 0x756   :  { %v15001_v37 = vpop.permute.xlu1 %3828  ;;  %v3170_v10 = vadd.f32 %v19338_v18, %v2736_v29  ;;  %v19341_v18 = vld [vmem:[#allocation43_spill] sm:$0xff] }
 0x757   :  { %v15004_v36 = vpop.permute.xlu0 %4194  ;;  %10126 = vmatmul.mubr.msk.f32.gmra.mrb[10].mxu1 %vm5685_vm4, %v5664_v23  ;;  %v4470_v41 = vadd.f32 %v14761_v38, %v4036_v56  ;;  %v19342_v56 = vld [vmem:[#allocation204_spill] sm:$0xff] }
 0x758   :  { %4272 = vrot.lane.b32.xlu1 %v19334_v39, %s10586_s14  ;;  %5128 = vrot.lane.b32.xlu0 %v19314_v12, %s10588_s0  ;;  %v3604_v59 = vadd.f32 %v14476_v46, %v3170_v10  ;;  %v1867_v10 = vadd.f32 %v19341_v18, %v19340_v31 }
 0x759   :  { %v4904_v15 = vadd.f32 %v14899_v49, %v4470_v41 }
 0x75a   :  { %v15014_v48 = vpop.permute.xlu1 %4198  ;;  %v4038_v57 = vadd.f32 %v14624_v5, %v3604_v59  ;;  %v15037_v5 = vld [vmem:[%s17986_s2] ss:$0 sm:$0xff]  ;;  %v2301_v59 = vadd.f32 %v19342_v56, %v1867_v10  ;;  %v19347_v56 = vld [vmem:[#allocation443_spill] sm:$0xff] }
 0x75b   :  { %v15017_v24 = vpop.permute.xlu0 %4684 }
 0x75c   :  { %5132 = vrot.lane.b32.xlu1 %v19334_v39, %s10588_s0  ;;  %2980 = vrot.lane.b32.xlu0 %v19327_v55, %s10583_s27  ;;  %v4472_v4 = vadd.f32 %v14770_v43, %v4038_v57  ;;  %v19343_v57 = vld [vmem:[#allocation200_spill] sm:$0xff] }
 0x75e   :  { %v15026_v23 = vpop.permute.xlu1 %4688  ;;  %v4906_v38 = vadd.f32 %v14908_v44, %v4472_v4 }
 0x75f   :  { %v5055_v17 = vpop.permute.xlu0 %5054 }
 0x760   :  { %v5338_v46 = vadd.f32 %v5055_v17, %v4904_v15  ;;  %2984 = vrot.lane.b32.xlu1 %v19339_v40, %s10583_s27  ;;  %3840 = vrot.lane.b32.xlu0 %v19327_v55, %s10585_s30  ;;  %v19344_v15 = vld [vmem:[#allocation45_spill] sm:$0xff] }
 0x761   :  { %v1869_v4 = vadd.f32 %v19344_v15, %v19343_v57  ;;  %v19348_v57 = vld [vmem:[#allocation374_spill] sm:$0xff] }
 0x762   :  { %v5059_v33 = vpop.permute.xlu1 %5058  ;;  %v5453_v49 = vadd.f32 %v15037_v5, %v5338_v46  ;;  %v19349_v15 = vld [vmem:[#allocation178_spill] sm:$0xff] }
 0x763   :  { %v5340_v29 = vadd.f32 %v5059_v33, %v4906_v38  ;;  %v15040_v43 = vpop.permute.xlu0 %2966  ;;  %v19345_v33 = vld [vmem:[#allocation372_spill] sm:$0xff] }
 0x764   :  { %3844 = vrot.lane.b32.xlu1 %v19339_v40, %s10585_s30  ;;  %4700 = vrot.lane.b32.xlu0 %v19327_v55, %s10587_s22  ;;  %v5561_v17 = vmax.f32 %v5453_v49, 0.0  ;;  %v2735_v31 = vadd.f32 %v19345_v33, %v2301_v59 }
 0x765   :  { %v5455_v44 = vadd.f32 %v15037_v5, %v5340_v29  ;;  %v19346_v29 = vld [vmem:[#allocation210_spill] sm:$0xff] }
 0x766   :  { %v15050_v41 = vpop.permute.xlu1 %2970  ;;  %v2303_v18 = vadd.f32 %v19346_v29, %v1869_v4  ;;  %v3169_v16 = vadd.f32 %v19347_v56, %v2735_v31  ;;  %v19350_v4 = vld [vmem:[#allocation20_spill] sm:$0xff] }
 0x767   :  { %v5563_v46 = vmax.f32 %v5455_v44, 0.0  ;;  %v15054_v38 = vpop.permute.xlu0 %3826 }
 0x768   :  { %4704 = vrot.lane.b32.xlu1 %v19339_v40, %s10587_s22  ;;  %2982 = vrot.lane.b32.xlu0 %v19334_v39, %s10583_s27  ;;  %v2737_v49 = vadd.f32 %v19348_v57, %v2303_v18  ;;  %v3603_v59 = vadd.f32 %v14534_v42, %v3169_v16 }
 0x769   :  { %v5649_v10 = vmax.f32 %v5561_v17, %v5563_v46 }
 0x76a   :  { %v15063_v50 = vpop.permute.xlu1 %3830  ;;  %v3171_v17 = vadd.f32 %v19350_v4, %v2737_v49  ;;  %v4037_v46 = vadd.f32 %v14683_v60, %v3603_v59  ;;  %v19354_v49 = vld [vmem:[#allocation265_spill] sm:$0xff] }
 0x76b   :  { %v15066_v44 = vpop.permute.xlu0 %4196  ;;  %10104 = vmatprep.mubr.msk.f32.mxu0 %vm5685_vm4, %v5649_v10 }
 0x76c   :  { %2986 = vrot.lane.b32.xlu1 %v19349_v15, %s10583_s27  ;;  %3842 = vrot.lane.b32.xlu0 %v19334_v39, %s10585_s30  ;;  %v3605_v31 = vadd.f32 %v14545_v63, %v3171_v17  ;;  %v4471_v18 = vadd.f32 %v14830_v58, %v4037_v46  ;;  %v19353_v58 = vld [vmem:[#allocation101_spill] sm:$0xff] }
 0x76d   :  { %v1898_v59 = vadd.f32 %v19354_v49, %v19353_v58  ;;  %v19359_v58 = vld [vmem:[#allocation185_spill] sm:$0xff] }
 0x76e   :  { %v15076_v33 = vpop.permute.xlu1 %4200  ;;  %v4039_v42 = vadd.f32 %v14693_v11, %v3605_v31  ;;  %v4905_v16 = vadd.f32 %v14960_v14, %v4471_v18  ;;  %v19355_v14 = vld [vmem:[#allocation271_spill] sm:$0xff] }
 0x76f   :  { %v15079_v29 = vpop.permute.xlu0 %4686  ;;  %v2332_v17 = vadd.f32 %v19355_v14, %v1898_v59  ;;  %v19356_v31 = vld [vmem:[#allocation107_spill] sm:$0xff] }
 0x770   :  { %3846 = vrot.lane.b32.xlu1 %v19349_v15, %s10585_s30  ;;  %4702 = vrot.lane.b32.xlu0 %v19334_v39, %s10587_s22  ;;  %v4473_v63 = vadd.f32 %v14839_v52, %v4039_v42  ;;  %v19357_v52 = vld [vmem:[#allocation269_spill] sm:$0xff]  ;;  %v19361_v59 = vld [vmem:[#allocation127_spill] sm:$0xff] }
 0x771   :  { %v1900_v18 = vadd.f32 %v19357_v52, %v19356_v31 }
 0x772   :  { %v15088_v10 = vpop.permute.xlu1 %4690  ;;  %v15090_v60 = vpop.f32.mrb[6].mxu1  ;;  %v4907_v11 = vadd.f32 %v14969_v3, %v4473_v63  ;;  %v19360_v3 = vld [vmem:[#allocation275_spill] sm:$0xff] }
 0x773   :  { %19351 = vst [vmem:[#allocation381_spill] sm:$0xff] %v15090_v60  ;;  %v5057_v56 = vpop.permute.xlu0 %5056  ;;  %v15093_v57 = vpop.f32.mrb[7].mxu1  ;;  %v2334_v63 = vadd.f32 %v19360_v3, %v1900_v18  ;;  %v19364_v18 = vld [vmem:[#allocation347_spill] sm:$0xff] }
 0x774   :  { %19352 = vst [vmem:[#allocation218_spill] sm:$0xff] %v15093_v57  ;;  %v5339_v4 = vadd.f32 %v5057_v56, %v4905_v16  ;;  %4706 = vrot.lane.b32.xlu1 %v19349_v15, %s10587_s22  ;;  %3414 = vrot.lane.b32.xlu0 %v19339_v40, %s10584_s28  ;;  %v19358_v16 = vld [vmem:[#allocation401_spill] sm:$0xff] }
 0x775   :  { %v2766_v56 = vadd.f32 %v19358_v16, %v2332_v17  ;;  %v19363_v17 = vld [vmem:[#allocation132_spill] sm:$0xff] }
 0x776   :  { %v5061_v46 = vpop.permute.xlu1 %5060  ;;  %v5454_v42 = vadd.f32 %v15037_v5, %v5339_v4  ;;  %v19362_v4 = vld [vmem:[#allocation403_spill] sm:$0xff] }
 0x777   :  { %v5341_v60 = vadd.f32 %v5061_v46, %v4907_v11  ;;  %v15106_v57 = vpop.permute.xlu0 %3398  ;;  %v3200_v14 = vadd.f32 %v19361_v59, %v2766_v56  ;;  %v2768_v11 = vadd.f32 %v19362_v4, %v2334_v63  ;;  %v19365_v63 = vld [vmem:[#allocation128_spill] sm:$0xff] }
 0x778   :  { %3418 = vrot.lane.b32.xlu1 %v19359_v58, %s10584_s28  ;;  %4274 = vrot.lane.b32.xlu0 %v19339_v40, %s10586_s14  ;;  %v5562_v46 = vmax.f32 %v5454_v42, 0.0 }
 0x779   :  { %v5456_v49 = vadd.f32 %v15037_v5, %v5341_v60  ;;  %v3634_v16 = vadd.f32 %v19363_v17, %v3200_v14  ;;  %v3202_v60 = vadd.f32 %v19364_v18, %v2768_v11  ;;  %v19366_v17 = vld [vmem:[#allocation266_spill] sm:$0xff] }
 0x77a   :  { %v15116_v31 = vpop.permute.xlu1 %3402 }
 0x77b   :  { %v5564_v52 = vmax.f32 %v5456_v49, 0.0  ;;  %v15119_v39 = vpop.permute.xlu0 %4258  ;;  %v4068_v56 = vadd.f32 %v14748_v35, %v3634_v16  ;;  %v3636_v42 = vadd.f32 %v19365_v63, %v3202_v60  ;;  %v19367_v16 = vld [vmem:[#allocation100_spill] sm:$0xff]  ;;  %v19370_v63 = vld [vmem:[#allocation270_spill] sm:$0xff] }
 0x77c   :  { %4278 = vrot.lane.b32.xlu1 %v19359_v58, %s10586_s14  ;;  %5134 = vrot.lane.b32.xlu0 %v19339_v40, %s10588_s0  ;;  %v1899_v18 = vadd.f32 %v19367_v16, %v19366_v17  ;;  %v19374_v16 = vld [vmem:[#allocation135_spill] sm:$0xff] }
 0x77d   :  { %v5650_v3 = vmax.f32 %v5562_v46, %v5564_v52  ;;  %v4502_v14 = vadd.f32 %v14886_v6, %v4068_v56  ;;  %v4070_v4 = vadd.f32 %v14758_v8, %v3636_v42  ;;  %v19368_v6 = vld [vmem:[#allocation184_spill] sm:$0xff]  ;;  %v19371_v42 = vld [vmem:[#allocation106_spill] sm:$0xff] }
 0x77e   :  { %v15128_v59 = vpop.permute.xlu1 %4262  ;;  %v19369_v8 = vld [vmem:[#allocation272_spill] sm:$0xff] }
 0x77f   :  { %v15131_v49 = vpop.permute.xlu0 %4628  ;;  %10105 = vmatmul.mubr.msk.f32.gmra.mrb[148].mxu0 %vm5685_vm4, %v5650_v3  ;;  %v4936_v35 = vadd.f32 %v15017_v24, %v4502_v14  ;;  %v4504_v46 = vadd.f32 %v14896_v54, %v4070_v4  ;;  %v2333_v56 = vadd.f32 %v19369_v8, %v1899_v18  ;;  %v1901_v14 = vadd.f32 %v19371_v42, %v19370_v63 }
 0x780   :  { %5138 = vrot.lane.b32.xlu1 %v19359_v58, %s10588_s0  ;;  %3416 = vrot.lane.b32.xlu0 %v19349_v15, %s10584_s28 }
 0x781   :  { %v4938_v3 = vadd.f32 %v15026_v23, %v4504_v46  ;;  %v19373_v23 = vld [vmem:[#allocation276_spill] sm:$0xff] }
 0x782   :  { %v15141_v11 = vpop.permute.xlu1 %4632  ;;  %v2335_v46 = vadd.f32 %v19373_v23, %v1901_v14  ;;  %v19376_v14 = vld [vmem:[#allocation444_spill] sm:$0xff] }
 0x783   :  { %v5119_v52 = vpop.permute.xlu0 %5118 }
 0x784   :  { %v5370_v60 = vadd.f32 %v5119_v52, %v4936_v35  ;;  %3420 = vrot.lane.b32.xlu1 %v19368_v6, %s10584_s28  ;;  %4276 = vrot.lane.b32.xlu0 %v19349_v15, %s10586_s14  ;;  %v19372_v35 = vld [vmem:[#allocation402_spill] sm:$0xff] }
 0x785   :  { %v2767_v52 = vadd.f32 %v19372_v35, %v2333_v56 }
 0x786   :  { %v5123_v24 = vpop.permute.xlu1 %5122  ;;  %v5485_v54 = vadd.f32 %v15037_v5, %v5370_v60  ;;  %v19375_v60 = vld [vmem:[#allocation404_spill] sm:$0xff] }
 0x787   :  { %v5372_v4 = vadd.f32 %v5123_v24, %v4938_v3  ;;  %v15155_v40 = vpop.permute.xlu0 %3400  ;;  %v3201_v18 = vadd.f32 %v19374_v16, %v2767_v52  ;;  %v2769_v3 = vadd.f32 %v19375_v60, %v2335_v46  ;;  %v19377_v46 = vld [vmem:[#allocation350_spill] sm:$0xff]  ;;  %v19378_v16 = vld [vmem:[#allocation191_spill] sm:$0xff] }
 0x788   :  { %4280 = vrot.lane.b32.xlu1 %v19368_v6, %s10586_s14  ;;  %5136 = vrot.lane.b32.xlu0 %v19349_v15, %s10588_s0  ;;  %v5593_v24 = vmax.f32 %v5485_v54, 0.0 }
 0x789   :  { %v5487_v17 = vadd.f32 %v15037_v5, %v5372_v4  ;;  %v3635_v56 = vadd.f32 %v14668_v9, %v3201_v18  ;;  %v3203_v4 = vadd.f32 %v19376_v14, %v2769_v3 }
 0x78a   :  { %v15165_v8 = vpop.permute.xlu1 %3404 }
 0x78b   :  { %v5595_v63 = vmax.f32 %v5487_v17, 0.0  ;;  %v15168_v42 = vpop.permute.xlu0 %4260  ;;  %v4069_v52 = vadd.f32 %v14817_v27, %v3635_v56  ;;  %v3637_v54 = vadd.f32 %v19377_v46, %v3203_v4  ;;  %v19380_v56 = vld [vmem:[#allocation205_spill] sm:$0xff]  ;;  %v19383_v46 = vld [vmem:[#allocation211_spill] sm:$0xff] }
 0x78c   :  { %5140 = vrot.lane.b32.xlu1 %v19368_v6, %s10588_s0  ;;  %2988 = vrot.lane.b32.xlu0 %v19359_v58, %s10583_s27 }
 0x78d   :  { %v5665_v35 = vmax.f32 %v5593_v24, %v5595_v63  ;;  %v4503_v9 = vadd.f32 %v14945_v53, %v4069_v52  ;;  %v4071_v18 = vadd.f32 %v14827_v25, %v3637_v54  ;;  %v19379_v63 = vld [vmem:[#allocation48_spill] sm:$0xff]  ;;  %v19381_v25 = vld [vmem:[#allocation213_spill] sm:$0xff]  ;;  %v19382_v52 = vld [vmem:[#allocation50_spill] sm:$0xff] }
 0x78e   :  { %v15177_v23 = vpop.permute.xlu1 %4264  ;;  %v1870_v14 = vadd.f32 %v19380_v56, %v19379_v63  ;;  %v1872_v54 = vadd.f32 %v19383_v46, %v19382_v52  ;;  %v19386_v56 = vld [vmem:[#allocation122_spill] sm:$0xff] }
 0x78f   :  { %v15180_v17 = vpop.permute.xlu0 %4630  ;;  %10128 = vmatprep.mubr.msk.f32.mxu1 %vm5685_vm4, %v5665_v35  ;;  %v4937_v27 = vadd.f32 %v15079_v29, %v4503_v9  ;;  %v4505_v3 = vadd.f32 %v14957_v47, %v4071_v18 }
 0x790   :  { %2992 = vrot.lane.b32.xlu1 %v19378_v16, %s10583_s27  ;;  %3848 = vrot.lane.b32.xlu0 %v19359_v58, %s10585_s30  ;;  %v2304_v35 = vadd.f32 %v19381_v25, %v1870_v14 }
 0x791   :  { %v4939_v53 = vadd.f32 %v15088_v10, %v4505_v3  ;;  %v19385_v10 = vld [vmem:[#allocation219_spill] sm:$0xff] }
 0x792   :  { %v15190_v60 = vpop.permute.xlu1 %4634  ;;  %v2306_v3 = vadd.f32 %v19385_v10, %v1872_v54  ;;  %v19389_v54 = vld [vmem:[#allocation19_spill] sm:$0xff] }
 0x793   :  { %v5121_v24 = vpop.permute.xlu0 %5120 }
 0x794   :  { %v5371_v4 = vadd.f32 %v5121_v24, %v4937_v27  ;;  %3852 = vrot.lane.b32.xlu1 %v19378_v16, %s10585_s30  ;;  %4708 = vrot.lane.b32.xlu0 %v19359_v58, %s10587_s22  ;;  %v19384_v27 = vld [vmem:[#allocation375_spill] sm:$0xff] }
 0x795   :  { %v2738_v24 = vadd.f32 %v19384_v27, %v2304_v35  ;;  %v19388_v27 = vld [vmem:[#allocation190_spill] sm:$0xff] }
 0x796   :  { %v5125_v29 = vpop.permute.xlu1 %5124  ;;  %v5486_v47 = vadd.f32 %v15037_v5, %v5371_v4  ;;  %v19387_v4 = vld [vmem:[#allocation377_spill] sm:$0xff] }
 0x797   :  { %v5373_v9 = vadd.f32 %v5125_v29, %v4939_v53  ;;  %v15204_v18 = vpop.permute.xlu0 %2972  ;;  %v3172_v14 = vadd.f32 %v19386_v56, %v2738_v24  ;;  %v2740_v53 = vadd.f32 %v19387_v4, %v2306_v3 }
 0x798   :  { %4712 = vrot.lane.b32.xlu1 %v19378_v16, %s10587_s22  ;;  %2990 = vrot.lane.b32.xlu0 %v19368_v6, %s10583_s27  ;;  %v5594_v29 = vmax.f32 %v5486_v47, 0.0 }
 0x799   :  { %v5488_v63 = vadd.f32 %v15037_v5, %v5373_v9  ;;  %v3606_v35 = vadd.f32 %v14735_v34, %v3172_v14  ;;  %v3174_v9 = vadd.f32 %v19389_v54, %v2740_v53 }
 0x79a   :  { %v15214_v25 = vpop.permute.xlu1 %2976 }
 0x79b   :  { %v5596_v52 = vmax.f32 %v5488_v63, 0.0  ;;  %v15217_v46 = vpop.permute.xlu0 %3832  ;;  %v4040_v24 = vadd.f32 %v14874_v30, %v3606_v35  ;;  %v3608_v47 = vadd.f32 %v14744_v62, %v3174_v9 }
 0x79c   :  { %2994 = vrot.lane.b32.xlu1 %v19388_v27, %s10583_s27  ;;  %3850 = vrot.lane.b32.xlu0 %v19368_v6, %s10585_s30 }
 0x79d   :  { %v5666_v10 = vmax.f32 %v5594_v29, %v5596_v52  ;;  %v4474_v34 = vadd.f32 %v15004_v36, %v4040_v24  ;;  %v4042_v63 = vadd.f32 %v14883_v1, %v3608_v47  ;;  %v19392_v36 = vld [vmem:[#allocation206_spill] sm:$0xff]  ;;  %v19393_v52 = vld [vmem:[#allocation47_spill] sm:$0xff]  ;;  %v19395_v24 = vld [vmem:[#allocation212_spill] sm:$0xff] }
 0x79e   :  { %v15226_v56 = vpop.permute.xlu1 %3836  ;;  %v1871_v35 = vadd.f32 %v19393_v52, %v19392_v36  ;;  %v19398_v36 = vld [vmem:[#allocation197_spill] sm:$0xff] }
 0x79f   :  { %v15229_v3 = vpop.permute.xlu0 %4692  ;;  %10129 = vmatmul.mubr.msk.f32.gmra.mrb[12].mxu1 %vm5685_vm4, %v5666_v10  ;;  %v4908_v30 = vadd.f32 %v15131_v49, %v4474_v34  ;;  %v4476_v62 = vadd.f32 %v15014_v48, %v4042_v63  ;;  %v19394_v49 = vld [vmem:[#allocation216_spill] sm:$0xff]  ;;  %v19396_v48 = vld [vmem:[#allocation49_spill] sm:$0xff] }
 0x7a0   :  { %3854 = vrot.lane.b32.xlu1 %v19388_v27, %s10585_s30  ;;  %4710 = vrot.lane.b32.xlu0 %v19368_v6, %s10587_s22  ;;  %v2305_v9 = vadd.f32 %v19394_v49, %v1871_v35  ;;  %v1873_v47 = vadd.f32 %v19396_v48, %v19395_v24  ;;  %v19400_v35 = vld [vmem:[#allocation21_spill] sm:$0xff] }
 0x7a1   :  { %v4910_v1 = vadd.f32 %v15141_v11, %v4476_v62  ;;  %v19399_v11 = vld [vmem:[#allocation220_spill] sm:$0xff] }
 0x7a2   :  { %v15239_v14 = vpop.permute.xlu1 %4696  ;;  %v15241_v4 = vpop.f32.mrb[144].mxu0  ;;  %v2307_v62 = vadd.f32 %v19399_v11, %v1873_v47  ;;  %v19402_v47 = vld [vmem:[#allocation348_spill] sm:$0xff] }
 0x7a3   :  { %19390 = vst [vmem:[#allocation51_spill] sm:$0xff] %v15241_v4  ;;  %v5063_v53 = vpop.permute.xlu0 %5062  ;;  %v15244_v29 = vpop.f32.mrb[145].mxu0 }
 0x7a4   :  { %19391 = vst [vmem:[#allocation224_spill] sm:$0xff] %v15244_v29  ;;  %v5342_v54 = vadd.f32 %v5063_v53, %v4908_v30  ;;  %4714 = vrot.lane.b32.xlu1 %v19388_v27, %s10587_s22  ;;  %3422 = vrot.lane.b32.xlu0 %v19378_v16, %s10584_s28  ;;  %v19397_v30 = vld [vmem:[#allocation376_spill] sm:$0xff] }
 0x7a5   :  { %v2739_v53 = vadd.f32 %v19397_v30, %v2305_v9 }
 0x7a6   :  { %v5067_v10 = vpop.permute.xlu1 %5066  ;;  %v5457_v34 = vadd.f32 %v15037_v5, %v5342_v54  ;;  %v19401_v54 = vld [vmem:[#allocation378_spill] sm:$0xff] }
 0x7a7   :  { %v5344_v63 = vadd.f32 %v5067_v10, %v4910_v1  ;;  %v15257_v4 = vpop.permute.xlu0 %2974  ;;  %v3173_v49 = vadd.f32 %v19400_v35, %v2739_v53  ;;  %v2741_v1 = vadd.f32 %v19401_v54, %v2307_v62  ;;  %v19405_v54 = vld [vmem:[#allocation279_spill] sm:$0xff] }
 0x7a8   :  { %3426 = vrot.lane.b32.xlu1 %v19398_v36, %s10584_s28  ;;  %4282 = vrot.lane.b32.xlu0 %v19378_v16, %s10586_s14  ;;  %v5565_v10 = vmax.f32 %v5457_v34, 0.0 }
 0x7a9   :  { %v5459_v52 = vadd.f32 %v15037_v5, %v5344_v63  ;;  %v3607_v9 = vadd.f32 %v14802_v32, %v3173_v49  ;;  %v3175_v63 = vadd.f32 %v19402_v47, %v2741_v1  ;;  %v19403_v32 = vld [vmem:[#allocation113_spill] sm:$0xff] }
 0x7aa   :  { %v15267_v24 = vpop.permute.xlu1 %2978 }
 0x7ab   :  { %v5567_v48 = vmax.f32 %v5459_v52, 0.0  ;;  %v15270_v29 = vpop.permute.xlu0 %3834  ;;  %v4041_v53 = vadd.f32 %v14931_v20, %v3607_v9  ;;  %v3609_v34 = vadd.f32 %v14813_v13, %v3175_v63  ;;  %v19404_v52 = vld [vmem:[#allocation273_spill] sm:$0xff] }
 0x7ac   :  { %4286 = vrot.lane.b32.xlu1 %v19398_v36, %s10586_s14  ;;  %5142 = vrot.lane.b32.xlu0 %v19378_v16, %s10588_s0  ;;  %v1902_v35 = vadd.f32 %v19404_v52, %v19403_v32  ;;  %v19407_v9 = vld [vmem:[#allocation277_spill] sm:$0xff]  ;;  %v19409_v52 = vld [vmem:[#allocation196_spill] sm:$0xff] }
 0x7ad   :  { %v5651_v30 = vmax.f32 %v5565_v10, %v5567_v48  ;;  %v4475_v49 = vadd.f32 %v15066_v44, %v4041_v53  ;;  %v4043_v20 = vadd.f32 %v14940_v21, %v3609_v34  ;;  %v19406_v48 = vld [vmem:[#allocation119_spill] sm:$0xff] }
 0x7ae   :  { %v15279_v11 = vpop.permute.xlu1 %3838  ;;  %v2336_v1 = vadd.f32 %v19405_v54, %v1902_v35  ;;  %v1904_v47 = vadd.f32 %v19407_v9, %v19406_v48  ;;  %v19410_v21 = vld [vmem:[#allocation283_spill] sm:$0xff] }
 0x7af   :  { %v15282_v62 = vpop.permute.xlu0 %4694  ;;  %10107 = vmatprep.mubr.msk.f32.mxu0 %vm5685_vm4, %v5651_v30  ;;  %v4909_v13 = vadd.f32 %v15180_v17, %v4475_v49  ;;  %v4477_v63 = vadd.f32 %v15076_v33, %v4043_v20  ;;  %v19408_v30 = vld [vmem:[#allocation405_spill] sm:$0xff]  ;;  %v19411_v54 = vld [vmem:[#allocation407_spill] sm:$0xff] }
 0x7b0   :  { %5146 = vrot.lane.b32.xlu1 %v19398_v36, %s10588_s0  ;;  %3424 = vrot.lane.b32.xlu0 %v19388_v27, %s10584_s28  ;;  %v2770_v53 = vadd.f32 %v19408_v30, %v2336_v1  ;;  %v2338_v34 = vadd.f32 %v19410_v21, %v1904_v47  ;;  %v19412_v9 = vld [vmem:[#allocation447_spill] sm:$0xff] }
 0x7b1   :  { %v4911_v17 = vadd.f32 %v15190_v60, %v4477_v63 }
 0x7b2   :  { %v15295_v10 = vpop.permute.xlu1 %4698  ;;  %v3204_v35 = vadd.f32 %v14726_v19, %v2770_v53  ;;  %v2772_v48 = vadd.f32 %v19411_v54, %v2338_v34  ;;  %v19415_v34 = vld [vmem:[#allocation112_spill] sm:$0xff] }
 0x7b3   :  { %v5065_v44 = vpop.permute.xlu0 %5064  ;;  %v19416_v54 = vld [vmem:[#allocation280_spill] sm:$0xff] }
 0x7b4   :  { %v5343_v32 = vadd.f32 %v5065_v44, %v4909_v13  ;;  %3428 = vrot.lane.b32.xlu1 %v19409_v52, %s10584_s28  ;;  %4284 = vrot.lane.b32.xlu0 %v19388_v27, %s10586_s14  ;;  %v3638_v13 = vadd.f32 %v14860_v22, %v3204_v35  ;;  %v3206_v60 = vadd.f32 %v19412_v9, %v2772_v48  ;;  %v19413_v44 = vld [vmem:[#allocation221_spill] sm:$0xff]  ;;  %v19414_v22 = vld [vmem:[#allocation274_spill] sm:$0xff] }
 0x7b5   :  { %v19418_v9 = vld [vmem:[#allocation118_spill] sm:$0xff] }
 0x7b6   :  { %v5069_v49 = vpop.permute.xlu1 %5068  ;;  %v5458_v33 = vadd.f32 %v15037_v5, %v5343_v32  ;;  %v4072_v47 = vadd.f32 %v14992_v28, %v3638_v13  ;;  %v3640_v30 = vadd.f32 %v19413_v44, %v3206_v60  ;;  %v19417_v13 = vld [vmem:[#allocation278_spill] sm:$0xff] }
 0x7b7   :  { %v5345_v20 = vadd.f32 %v5069_v49, %v4911_v17  ;;  %v15310_v1 = vpop.permute.xlu0 %3406  ;;  %v1903_v17 = vadd.f32 %v19415_v34, %v19414_v22  ;;  %v1905_v60 = vadd.f32 %v19418_v9, %v19417_v13 }
 0x7b8   :  { %4288 = vrot.lane.b32.xlu1 %v19409_v52, %s10586_s14  ;;  %5144 = vrot.lane.b32.xlu0 %v19388_v27, %s10588_s0  ;;  %v5566_v53 = vmax.f32 %v5458_v33, 0.0  ;;  %v4506_v35 = vadd.f32 %v15119_v39, %v4072_v47  ;;  %v4074_v28 = vadd.f32 %v15001_v37, %v3640_v30  ;;  %v19419_v47 = vld [vmem:[#allocation406_spill] sm:$0xff]  ;;  %v19420_v37 = vld [vmem:[#allocation203_spill] sm:$0xff] }
 0x7b9   :  { %v5460_v19 = vadd.f32 %v15037_v5, %v5345_v20  ;;  %v2337_v48 = vadd.f32 %v19416_v54, %v1903_v17 }
 0x7ba   :  { %v15320_v63 = vpop.permute.xlu1 %3410  ;;  %v4940_v33 = vadd.f32 %v15229_v3, %v4506_v35  ;;  %v4508_v39 = vadd.f32 %v15128_v59, %v4074_v28  ;;  %v19421_v3 = vld [vmem:[#allocation284_spill] sm:$0xff] }
 0x7bb   :  { %v5568_v32 = vmax.f32 %v5460_v19, 0.0  ;;  %v15323_v21 = vpop.permute.xlu0 %4266  ;;  %v2771_v44 = vadd.f32 %v19419_v47, %v2337_v48  ;;  %v2339_v30 = vadd.f32 %v19421_v3, %v1905_v60  ;;  %v19423_v59 = vld [vmem:[#allocation408_spill] sm:$0xff] }
 0x7bc   :  { %5148 = vrot.lane.b32.xlu1 %v19409_v52, %s10588_s0  ;;  %2996 = vrot.lane.b32.xlu0 %v19398_v36, %s10583_s27 }
 0x7bd   :  { %v5652_v49 = vmax.f32 %v5566_v53, %v5568_v32  ;;  %v4942_v53 = vadd.f32 %v15239_v14, %v4508_v39  ;;  %v19422_v32 = vld [vmem:[#allocation52_spill] sm:$0xff]  ;;  %v2773_v35 = vadd.f32 %v19423_v59, %v2339_v30 }
 0x7be   :  { %v15335_v20 = vpop.permute.xlu1 %4270  ;;  %v3205_v34 = vadd.f32 %v19422_v32, %v2771_v44 }
 0x7bf   :  { %v5127_v19 = vpop.permute.xlu0 %5126  ;;  %10108 = vmatmul.mubr.msk.f32.gmra.mrb[150].mxu0 %vm5685_vm4, %v5652_v49 }
 0x7c0   :  { %v5374_v22 = vadd.f32 %v5127_v19, %v4940_v33  ;;  %3000 = vrot.lane.b32.xlu1 %v19420_v37, %s10583_s27  ;;  %3856 = vrot.lane.b32.xlu0 %v19398_v36, %s10585_s30  ;;  %v3639_v48 = vadd.f32 %v14917_v51, %v3205_v34  ;;  %v19424_v33 = vld [vmem:[#allocation217_spill] sm:$0xff] }
 0x7c1   :  { %v3207_v14 = vadd.f32 %v19424_v33, %v2773_v35 }
 0x7c2   :  { %v5131_v17 = vpop.permute.xlu1 %5130  ;;  %v5489_v28 = vadd.f32 %v15037_v5, %v5374_v22  ;;  %v4073_v9 = vadd.f32 %v15054_v38, %v3639_v48 }
 0x7c3   :  { %v5376_v49 = vadd.f32 %v5131_v17, %v4942_v53  ;;  %v15351_v54 = vpop.permute.xlu0 %3408  ;;  %v3641_v39 = vadd.f32 %v14927_v7, %v3207_v14 }
 0x7c4   :  { %3860 = vrot.lane.b32.xlu1 %v19420_v37, %s10585_s30  ;;  %4716 = vrot.lane.b32.xlu0 %v19398_v36, %s10587_s22  ;;  %v5597_v19 = vmax.f32 %v5489_v28, 0.0  ;;  %v4507_v51 = vadd.f32 %v15168_v42, %v4073_v9  ;;  %v19425_v42 = vld [vmem:[#allocation202_spill] sm:$0xff] }
 0x7c5   :  { %v5491_v13 = vadd.f32 %v15037_v5, %v5376_v49  ;;  %v4075_v22 = vadd.f32 %v15063_v50, %v3641_v39  ;;  %v19428_v39 = vld [vmem:[#allocation209_spill] sm:$0xff] }
 0x7c6   :  { %v15361_v60 = vpop.permute.xlu1 %3412  ;;  %v4941_v38 = vadd.f32 %v15282_v62, %v4507_v51 }
 0x7c7   :  { %v5599_v47 = vmax.f32 %v5491_v13, 0.0  ;;  %v15364_v44 = vpop.permute.xlu0 %4268  ;;  %v4509_v7 = vadd.f32 %v15177_v23, %v4075_v22 }
 0x7c8   :  { %4720 = vrot.lane.b32.xlu1 %v19420_v37, %s10587_s22  ;;  %2998 = vrot.lane.b32.xlu0 %v19409_v52, %s10583_s27 }
 0x7c9   :  { %v5667_v3 = vmax.f32 %v5597_v19, %v5599_v47  ;;  %v4943_v34 = vadd.f32 %v15295_v10, %v4509_v7 }
 0x7ca   :  { %v15373_v30 = vpop.permute.xlu1 %4272 }
 0x7cb   :  { %v5129_v53 = vpop.permute.xlu0 %5128  ;;  %10131 = vmatprep.mubr.msk.f32.mxu1 %vm5685_vm4, %v5667_v3  ;;  %v19429_v3 = vld [vmem:[#allocation125_spill] sm:$0xff] }
 0x7cc   :  { %v5375_v32 = vadd.f32 %v5129_v53, %v4941_v38  ;;  %3002 = vrot.lane.b32.xlu1 %v19425_v42, %s10583_s27  ;;  %3858 = vrot.lane.b32.xlu0 %v19409_v52, %s10585_s30  ;;  %v19430_v38 = vld [vmem:[#allocation281_spill] sm:$0xff]  ;;  %v19431_v53 = vld [vmem:[#allocation287_spill] sm:$0xff] }
 0x7cd   :  { %v1906_v7 = vadd.f32 %v19430_v38, %v19429_v3  ;;  %v19436_v3 = vld [vmem:[#allocation291_spill] sm:$0xff] }
 0x7ce   :  { %v5133_v50 = vpop.permute.xlu1 %5132  ;;  %v5490_v17 = vadd.f32 %v15037_v5, %v5375_v32 }
 0x7cf   :  { %v5377_v62 = vadd.f32 %v5133_v50, %v4943_v34  ;;  %v15383_v59 = vpop.permute.xlu0 %2980  ;;  %v2340_v32 = vadd.f32 %v19431_v53, %v1906_v7  ;;  %v19432_v50 = vld [vmem:[#allocation131_spill] sm:$0xff] }
 0x7d0   :  { %3862 = vrot.lane.b32.xlu1 %v19425_v42, %s10585_s30  ;;  %4718 = vrot.lane.b32.xlu0 %v19409_v52, %s10587_s22  ;;  %v5598_v49 = vmax.f32 %v5490_v17, 0.0  ;;  %v19433_v17 = vld [vmem:[#allocation285_spill] sm:$0xff]  ;;  %v19437_v7 = vld [vmem:[#allocation411_spill] sm:$0xff] }
 0x7d1   :  { %v5492_v23 = vadd.f32 %v15037_v5, %v5377_v62  ;;  %v1908_v62 = vadd.f32 %v19433_v17, %v19432_v50 }
 0x7d2   :  { %v15390_v35 = vpop.permute.xlu1 %2984  ;;  %v15392_v28 = vpop.f32.mrb[8].mxu1 }
 0x7d3   :  { %19426 = vst [vmem:[#allocation222_spill] sm:$0xff] %v15392_v28  ;;  %v5600_v10 = vmax.f32 %v5492_v23, 0.0  ;;  %v15394_v48 = vpop.permute.xlu0 %3840  ;;  %v15396_v33 = vpop.f32.mrb[9].mxu1  ;;  %v2342_v38 = vadd.f32 %v19436_v3, %v1908_v62  ;;  %v19439_v3 = vld [vmem:[#allocation124_spill] sm:$0xff] }
 0x7d4   :  { %19427 = vst [vmem:[#allocation53_spill] sm:$0xff] %v15396_v33  ;;  %4722 = vrot.lane.b32.xlu1 %v19425_v42, %s10587_s22  ;;  %3430 = vrot.lane.b32.xlu0 %v19420_v37, %s10584_s28 }
 0x7d5   :  { %v5668_v14 = vmax.f32 %v5598_v49, %v5600_v10  ;;  %v19434_v49 = vld [vmem:[#allocation409_spill] sm:$0xff]  ;;  %v2776_v53 = vadd.f32 %v19437_v7, %v2342_v38 }
 0x7d6   :  { %v15402_v13 = vpop.permute.xlu1 %3844  ;;  %v2774_v10 = vadd.f32 %v19434_v49, %v2340_v32 }
 0x7d7   :  { %v4701_v9 = vpop.permute.xlu0 %4700  ;;  %10132 = vmatmul.mubr.msk.f32.gmra.mrb[14].mxu1 %vm5685_vm4, %v5668_v14  ;;  %v19435_v14 = vld [vmem:[#allocation208_spill] sm:$0xff]  ;;  %v3210_v32 = vadd.f32 %v14988_v61, %v2776_v53 }
 0x7d8   :  { %3434 = vrot.lane.b32.xlu1 %v19428_v39, %s10584_s28  ;;  %4290 = vrot.lane.b32.xlu0 %v19420_v37, %s10586_s14  ;;  %v3208_v28 = vadd.f32 %v14978_v45, %v2774_v10  ;;  %v19438_v10 = vld [vmem:[#allocation282_spill] sm:$0xff] }
 0x7d9   :  { %v3644_v45 = vadd.f32 %v15116_v31, %v3210_v32  ;;  %v1907_v38 = vadd.f32 %v19439_v3, %v19438_v10  ;;  %v19441_v31 = vld [vmem:[#allocation286_spill] sm:$0xff] }
 0x7da   :  { %v4705_v19 = vpop.permute.xlu1 %4704  ;;  %v3642_v50 = vadd.f32 %v15106_v57, %v3208_v28 }
 0x7db   :  { %v15409_v47 = vpop.permute.xlu0 %2982  ;;  %v4078_v61 = vadd.f32 %v15226_v56, %v3644_v45  ;;  %v19445_v56 = vld [vmem:[#allocation292_spill] sm:$0xff] }
 0x7dc   :  { %4294 = vrot.lane.b32.xlu1 %v19428_v39, %s10586_s14  ;;  %5150 = vrot.lane.b32.xlu0 %v19420_v37, %s10588_s0  ;;  %v4076_v17 = vadd.f32 %v15217_v46, %v3642_v50  ;;  %v19440_v46 = vld [vmem:[#allocation288_spill] sm:$0xff]  ;;  %v19442_v50 = vld [vmem:[#allocation130_spill] sm:$0xff]  ;;  %v19444_v37 = vld [vmem:[#allocation215_spill] sm:$0xff] }
 0x7dd   :  { %v2341_v28 = vadd.f32 %v19440_v46, %v1907_v38  ;;  %v1909_v32 = vadd.f32 %v19442_v50, %v19441_v31  ;;  %v4512_v10 = vadd.f32 %v15335_v20, %v4078_v61  ;;  %v19446_v46 = vld [vmem:[#allocation412_spill] sm:$0xff] }
 0x7de   :  { %v15415_v51 = vpop.permute.xlu1 %2986  ;;  %v4510_v57 = vadd.f32 %v15323_v21, %v4076_v17  ;;  %v19443_v21 = vld [vmem:[#allocation410_spill] sm:$0xff] }
 0x7df   :  { %v15417_v22 = vpop.permute.xlu0 %3842  ;;  %v2775_v17 = vadd.f32 %v19443_v21, %v2341_v28  ;;  %v2343_v45 = vadd.f32 %v19445_v56, %v1909_v32 }
 0x7e0   :  { %5154 = vrot.lane.b32.xlu1 %v19428_v39, %s10588_s0  ;;  %3432 = vrot.lane.b32.xlu0 %v19425_v42, %s10584_s28  ;;  %v4944_v7 = vadd.f32 %v4701_v9, %v4510_v57  ;;  %v4946_v9 = vadd.f32 %v4705_v19, %v4512_v10 }
 0x7e1   :  { %v3209_v38 = vadd.f32 %v15040_v43, %v2775_v17  ;;  %v2777_v31 = vadd.f32 %v19446_v46, %v2343_v45 }
 0x7e2   :  { %v15426_v34 = vpop.permute.xlu1 %3846 }
 0x7e3   :  { %v4703_v23 = vpop.permute.xlu0 %4702  ;;  %v3643_v28 = vadd.f32 %v15155_v40, %v3209_v38  ;;  %v3211_v19 = vadd.f32 %v15050_v41, %v2777_v31 }
 0x7e4   :  { %3436 = vrot.lane.b32.xlu1 %v19435_v14, %s10584_s28  ;;  %4292 = vrot.lane.b32.xlu0 %v19425_v42, %s10586_s14 }
 0x7e6   :  { %v4707_v33 = vpop.permute.xlu1 %4706 }
 0x7e7   :  { %v15438_v52 = vpop.permute.xlu0 %3414 }
 0x7e8   :  { %4296 = vrot.lane.b32.xlu1 %v19435_v14, %s10586_s14  ;;  %5152 = vrot.lane.b32.xlu0 %v19425_v42, %s10588_s0 }
 0x7ea   :  { %v15447_v62 = vpop.permute.xlu1 %3418 }
 0x7eb   :  { %v15450_v49 = vpop.permute.xlu0 %4274 }
 0x7ec   :  { %5156 = vrot.lane.b32.xlu1 %v19435_v14, %s10588_s0  ;;  %3004 = vrot.lane.b32.xlu0 %v19428_v39, %s10583_s27 }
 0x7ee   :  { %v15461_v53 = vpop.permute.xlu1 %4278 }
 0x7ef   :  { %v5135_v3 = vpop.permute.xlu0 %5134 }
 0x7f0   :  { %v5378_v42 = vadd.f32 %v5135_v3, %v4944_v7  ;;  %3008 = vrot.lane.b32.xlu1 %v19444_v37, %s10583_s27  ;;  %3864 = vrot.lane.b32.xlu0 %v19428_v39, %s10585_s30  ;;  %v4077_v7 = vadd.f32 %v15270_v29, %v3643_v28 }
 0x7f2   :  { %v5139_v57 = vpop.permute.xlu1 %5138  ;;  %v5493_v20 = vadd.f32 %v15037_v5, %v5378_v42  ;;  %v3645_v42 = vadd.f32 %v15165_v8, %v3211_v19  ;;  %v4511_v40 = vadd.f32 %v15364_v44, %v4077_v7  ;;  %v19447_v44 = vld [vmem:[#allocation214_spill] sm:$0xff]  ;;  %v19450_v7 = vld [vmem:[#allocation317_spill] sm:$0xff] }
 0x7f3   :  { %v5380_v61 = vadd.f32 %v5139_v57, %v4946_v9  ;;  %v15475_v50 = vpop.permute.xlu0 %3416 }
 0x7f4   :  { %3868 = vrot.lane.b32.xlu1 %v19444_v37, %s10585_s30  ;;  %4724 = vrot.lane.b32.xlu0 %v19428_v39, %s10587_s22  ;;  %v5601_v10 = vmax.f32 %v5493_v20, 0.0  ;;  %v4079_v41 = vadd.f32 %v15279_v11, %v3645_v42  ;;  %v4945_v29 = vadd.f32 %v4703_v23, %v4511_v40 }
 0x7f5   :  { %v5495_v43 = vadd.f32 %v15037_v5, %v5380_v61 }
 0x7f6   :  { %v15485_v32 = vpop.permute.xlu1 %3420  ;;  %v4513_v8 = vadd.f32 %v15373_v30, %v4079_v41  ;;  %v19451_v41 = vld [vmem:[#allocation137_spill] sm:$0xff] }
 0x7f7   :  { %v5603_v3 = vmax.f32 %v5495_v43, 0.0  ;;  %v15488_v21 = vpop.permute.xlu0 %4276 }
 0x7f8   :  { %4728 = vrot.lane.b32.xlu1 %v19444_v37, %s10587_s22  ;;  %3006 = vrot.lane.b32.xlu0 %v19435_v14, %s10583_s27  ;;  %v4947_v9 = vadd.f32 %v4707_v33, %v4513_v8  ;;  %v19453_v8 = vld [vmem:[#allocation295_spill] sm:$0xff] }
 0x7f9   :  { %v5669_v39 = vmax.f32 %v5601_v10, %v5603_v3 }
 0x7fa   :  { %v15496_v17 = vpop.permute.xlu1 %4280 }
 0x7fb   :  { %v5137_v56 = vpop.permute.xlu0 %5136  ;;  %10134 = vmatprep.mubr.msk.f32.mxu1 %vm5685_vm4, %v5669_v39  ;;  %v19452_v39 = vld [vmem:[#allocation289_spill] sm:$0xff] }
 0x7fc   :  { %v5379_v45 = vadd.f32 %v5137_v56, %v4945_v29  ;;  %3010 = vrot.lane.b32.xlu1 %v19447_v44, %s10583_s27  ;;  %3866 = vrot.lane.b32.xlu0 %v19435_v14, %s10585_s30  ;;  %v1910_v29 = vadd.f32 %v19452_v39, %v19451_v41 }
 0x7fe   :  { %v5141_v38 = vpop.permute.xlu1 %5140  ;;  %v5494_v11 = vadd.f32 %v15037_v5, %v5379_v45  ;;  %v2344_v56 = vadd.f32 %v19453_v8, %v1910_v29  ;;  %v19459_v29 = vld [vmem:[#allocation415_spill] sm:$0xff] }
 0x7ff   :  { %v5381_v57 = vadd.f32 %v5141_v38, %v4947_v9  ;;  %v15505_v23 = vpop.permute.xlu0 %2988  ;;  %v19454_v9 = vld [vmem:[#allocation143_spill] sm:$0xff]  ;;  %v19455_v38 = vld [vmem:[#allocation293_spill] sm:$0xff] }
 0x800   :  { %3870 = vrot.lane.b32.xlu1 %v19447_v44, %s10585_s30  ;;  %4726 = vrot.lane.b32.xlu0 %v19435_v14, %s10587_s22  ;;  %v5602_v20 = vmax.f32 %v5494_v11, 0.0 }
 0x801   :  { %v5496_v30 = vadd.f32 %v15037_v5, %v5381_v57  ;;  %v19456_v57 = vld [vmem:[#allocation413_spill] sm:$0xff] }
 0x802   :  { %v15512_v46 = vpop.permute.xlu1 %2992  ;;  %v15514_v31 = vpop.f32.mrb[146].mxu0 }
 0x803   :  { %19448 = vst [vmem:[#allocation380_spill] sm:$0xff] %v15514_v31  ;;  %v5604_v33 = vmax.f32 %v5496_v30, 0.0  ;;  %v15516_v61 = vpop.permute.xlu0 %3848  ;;  %v15518_v28 = vpop.f32.mrb[147].mxu0  ;;  %v2778_v30 = vadd.f32 %v19456_v57, %v2344_v56 }
 0x804   :  { %19449 = vst [vmem:[#allocation228_spill] sm:$0xff] %v15518_v28  ;;  %4730 = vrot.lane.b32.xlu1 %v19447_v44, %s10587_s22  ;;  %3438 = vrot.lane.b32.xlu0 %v19444_v37, %s10584_s28  ;;  %v19466_v28 = vld [vmem:[#allocation66_spill] sm:$0xff] }
 0x805   :  { %v5670_v19 = vmax.f32 %v5602_v20, %v5604_v33  ;;  %v19457_v20 = vld [vmem:[#allocation316_spill] sm:$0xff]  ;;  %v19458_v33 = vld [vmem:[#allocation299_spill] sm:$0xff]  ;;  %v3212_v41 = vadd.f32 %v15204_v18, %v2778_v30  ;;  %v19460_v30 = vld [vmem:[#allocation290_spill] sm:$0xff] }
 0x806   :  { %v15524_v14 = vpop.permute.xlu1 %3852 }
 0x807   :  { %v4709_v43 = vpop.permute.xlu0 %4708  ;;  %10135 = vmatmul.mubr.msk.f32.gmra.mrb[16].mxu1 %vm5685_vm4, %v5670_v19 }
 0x808   :  { %3442 = vrot.lane.b32.xlu1 %v19450_v7, %s10584_s28  ;;  %4298 = vrot.lane.b32.xlu0 %v19444_v37, %s10586_s14 }
 0x80a   :  { %v4713_v42 = vpop.permute.xlu1 %4712 }
 0x80b   :  { %v15531_v10 = vpop.permute.xlu0 %2990 }
 0x80c   :  { %4302 = vrot.lane.b32.xlu1 %v19450_v7, %s10586_s14  ;;  %5158 = vrot.lane.b32.xlu0 %v19444_v37, %s10588_s0  ;;  %v1912_v37 = vadd.f32 %v19455_v38, %v19454_v9  ;;  %v3646_v9 = vadd.f32 %v15310_v1, %v3212_v41 }
 0x80e   :  { %v15537_v3 = vpop.permute.xlu1 %2994  ;;  %v2346_v19 = vadd.f32 %v19458_v33, %v1912_v37  ;;  %v4080_v38 = vadd.f32 %v15394_v48, %v3646_v9  ;;  %v19461_v33 = vld [vmem:[#allocation136_spill] sm:$0xff] }
 0x80f   :  { %v15539_v40 = vpop.permute.xlu0 %3850  ;;  %v19462_v48 = vld [vmem:[#allocation296_spill] sm:$0xff] }
 0x810   :  { %5162 = vrot.lane.b32.xlu1 %v19450_v7, %s10588_s0  ;;  %3440 = vrot.lane.b32.xlu0 %v19447_v44, %s10584_s28  ;;  %v2780_v8 = vadd.f32 %v19459_v29, %v2346_v19  ;;  %v1911_v19 = vadd.f32 %v19461_v33, %v19460_v30  ;;  %v4514_v1 = vadd.f32 %v15450_v49, %v4080_v38  ;;  %v19465_v49 = vld [vmem:[#allocation414_spill] sm:$0xff] }
 0x812   :  { %v15548_v45 = vpop.permute.xlu1 %3854  ;;  %v3214_v56 = vadd.f32 %v15214_v25, %v2780_v8  ;;  %v4948_v41 = vadd.f32 %v4709_v43, %v4514_v1  ;;  %v19464_v8 = vld [vmem:[#allocation142_spill] sm:$0xff] }
 0x813   :  { %v4711_v11 = vpop.permute.xlu0 %4710 }
 0x814   :  { %3444 = vrot.lane.b32.xlu1 %v19457_v20, %s10584_s28  ;;  %4300 = vrot.lane.b32.xlu0 %v19447_v44, %s10586_s14  ;;  %v3648_v18 = vadd.f32 %v15320_v63, %v3214_v56  ;;  %v19463_v63 = vld [vmem:[#allocation294_spill] sm:$0xff] }
 0x815   :  { %v1913_v9 = vadd.f32 %v19464_v8, %v19463_v63 }
 0x816   :  { %v4715_v39 = vpop.permute.xlu1 %4714  ;;  %v4082_v25 = vadd.f32 %v15402_v13, %v3648_v18  ;;  %v19467_v13 = vld [vmem:[#allocation300_spill] sm:$0xff] }
 0x817   :  { %v15560_v31 = vpop.permute.xlu0 %3422  ;;  %v2347_v18 = vadd.f32 %v19467_v13, %v1913_v9 }
 0x818   :  { %4304 = vrot.lane.b32.xlu1 %v19457_v20, %s10586_s14  ;;  %5160 = vrot.lane.b32.xlu0 %v19447_v44, %s10588_s0  ;;  %v2345_v44 = vadd.f32 %v19462_v48, %v1911_v19  ;;  %v4516_v56 = vadd.f32 %v15461_v53, %v4082_v25  ;;  %v19468_v48 = vld [vmem:[#allocation416_spill] sm:$0xff] }
 0x819   :  { %v2781_v63 = vadd.f32 %v19468_v48, %v2347_v18 }
 0x81a   :  { %v15569_v37 = vpop.permute.xlu1 %3426  ;;  %v2779_v38 = vadd.f32 %v19465_v49, %v2345_v44  ;;  %v4950_v43 = vadd.f32 %v4713_v42, %v4516_v56 }
 0x81b   :  { %v15572_v57 = vpop.permute.xlu0 %4282  ;;  %v3215_v42 = vadd.f32 %v15267_v24, %v2781_v63 }
 0x81c   :  { %5164 = vrot.lane.b32.xlu1 %v19457_v20, %s10588_s0  ;;  %3012 = vrot.lane.b32.xlu0 %v19450_v7, %s10583_s27  ;;  %v3213_v19 = vadd.f32 %v15257_v4, %v2779_v38 }
 0x81d   :  { %v3649_v56 = vadd.f32 %v15361_v60, %v3215_v42 }
 0x81e   :  { %v15583_v29 = vpop.permute.xlu1 %4286  ;;  %v3647_v44 = vadd.f32 %v15351_v54, %v3213_v19  ;;  %v19471_v19 = vld [vmem:[#allocation4_spill] sm:$0xff] }
 0x81f   :  { %v5143_v30 = vpop.permute.xlu0 %5142  ;;  %v4083_v24 = vadd.f32 %v15426_v34, %v3649_v56 }
 0x820   :  { %v5382_v33 = vadd.f32 %v5143_v30, %v4948_v41  ;;  %3872 = vrot.lane.b32.xlu0 %v19450_v7, %s10585_s30  ;;  %3016 = vrot.lane.b32.xlu1 %v19466_v28, %s10583_s27  ;;  %v4081_v41 = vadd.f32 %v15417_v22, %v3647_v44 }
 0x821   :  { %v4517_v60 = vadd.f32 %v15496_v17, %v4083_v24  ;;  %v19474_v24 = vld [vmem:[#allocation297_spill] sm:$0xff] }
 0x822   :  { %v5147_v1 = vpop.permute.xlu1 %5146  ;;  %v5497_v53 = vadd.f32 %v15037_v5, %v5382_v33  ;;  %v4515_v54 = vadd.f32 %v15488_v21, %v4081_v41 }
 0x823   :  { %v5384_v25 = vadd.f32 %v5147_v1, %v4950_v43  ;;  %v15597_v8 = vpop.permute.xlu0 %3424  ;;  %v4951_v34 = vadd.f32 %v4715_v39, %v4517_v60 }
 0x824   :  { %4732 = vrot.lane.b32.xlu0 %v19450_v7, %s10587_s22  ;;  %3876 = vrot.lane.b32.xlu1 %v19466_v28, %s10585_s30  ;;  %v5605_v30 = vmax.f32 %v5497_v53, 0.0  ;;  %v4949_v22 = vadd.f32 %v4711_v11, %v4515_v54  ;;  %v19473_v54 = vld [vmem:[#allocation149_spill] sm:$0xff] }
 0x825   :  { %v5499_v4 = vadd.f32 %v15037_v5, %v5384_v25 }
 0x826   :  { %v15607_v9 = vpop.permute.xlu1 %3428 }
 0x827   :  { %v5607_v49 = vmax.f32 %v5499_v4, 0.0  ;;  %v15610_v38 = vpop.permute.xlu0 %4284 }
 0x828   :  { %3014 = vrot.lane.b32.xlu0 %v19457_v20, %s10583_s27  ;;  %4736 = vrot.lane.b32.xlu1 %v19466_v28, %s10587_s22 }
 0x829   :  { %v5671_v7 = vmax.f32 %v5605_v30, %v5607_v49 }
 0x82a   :  { %v15618_v33 = vpop.permute.xlu1 %4288  ;;  %v15620_v13 = vpop.f32.mrb[10].mxu1 }
 0x82b   :  { %19469 = vst [vmem:[#allocation12_spill] sm:$0xff] %v15620_v13  ;;  %v5145_v18 = vpop.permute.xlu0 %5144  ;;  %v15623_v43 = vpop.f32.mrb[11].mxu1  ;;  %10137 = vmatprep.mubr.msk.f32.mxu1 %vm5685_vm4, %v5671_v7  ;;  %v1914_v7 = vadd.f32 %v19474_v24, %v19473_v54  ;;  %v19481_v24 = vld [vmem:[#allocation419_spill] sm:$0xff] }
 0x82c   :  { %19470 = vst [vmem:[#allocation24_spill] sm:$0xff] %v15623_v43  ;;  %v5383_v21 = vadd.f32 %v5145_v18, %v4949_v22  ;;  %3874 = vrot.lane.b32.xlu0 %v19457_v20, %s10585_s30  ;;  %3018 = vrot.lane.b32.xlu1 %v19471_v19, %s10583_s27  ;;  %v19475_v22 = vld [vmem:[#allocation303_spill] sm:$0xff]  ;;  %v19529_v43 = vld [vmem:[#allocation425_spill] sm:$0xff] }
 0x82d   :  { %v2348_v60 = vadd.f32 %v19475_v22, %v1914_v7  ;;  %v19488_v13 = vld [vmem:[#allocation79_spill] sm:$0xff] }
 0x82e   :  { %v5149_v11 = vpop.permute.xlu1 %5148  ;;  %v5498_v1 = vadd.f32 %v15037_v5, %v5383_v21  ;;  %v19477_v21 = vld [vmem:[#allocation301_spill] sm:$0xff] }
 0x82f   :  { %v5385_v48 = vadd.f32 %v5149_v11, %v4951_v34  ;;  %v15631_v63 = vpop.permute.xlu0 %2996 }
 0x830   :  { %4734 = vrot.lane.b32.xlu0 %v19457_v20, %s10587_s22  ;;  %3878 = vrot.lane.b32.xlu1 %v19471_v19, %s10585_s30  ;;  %v5606_v25 = vmax.f32 %v5498_v1, 0.0  ;;  %v19478_v1 = vld [vmem:[#allocation417_spill] sm:$0xff] }
 0x831   :  { %v5500_v17 = vadd.f32 %v15037_v5, %v5385_v48  ;;  %v19472_v5 = vld [vmem:[#allocation6_spill] sm:$0xff]  ;;  %v2782_v48 = vadd.f32 %v19478_v1, %v2348_v60 }
 0x832   :  { %v15638_v53 = vpop.permute.xlu1 %3000 }
 0x833   :  { %v5608_v44 = vmax.f32 %v5500_v17, 0.0  ;;  %v15640_v42 = vpop.permute.xlu0 %3856  ;;  %v19479_v17 = vld [vmem:[#allocation69_spill] sm:$0xff] }
 0x834   :  { %3446 = vrot.lane.b32.xlu0 %v19466_v28, %s10584_s28  ;;  %4738 = vrot.lane.b32.xlu1 %v19471_v19, %s10587_s22 }
 0x835   :  { %v5672_v39 = vmax.f32 %v5606_v25, %v5608_v44  ;;  %v19480_v25 = vld [vmem:[#allocation307_spill] sm:$0xff] }
 0x836   :  { %v15646_v4 = vpop.permute.xlu1 %3860 }
 0x837   :  { %v4717_v20 = vpop.permute.xlu0 %4716  ;;  %10138 = vmatmul.mubr.msk.f32.gmra.mrb[18].mxu1 %vm5685_vm4, %v5672_v39  ;;  %v3216_v39 = vadd.f32 %v15383_v59, %v2782_v48  ;;  %v19482_v48 = vld [vmem:[#allocation298_spill] sm:$0xff] }
 0x838   :  { %4306 = vrot.lane.b32.xlu0 %v19466_v28, %s10586_s14  ;;  %3450 = vrot.lane.b32.xlu1 %v19472_v5, %s10584_s28 }
 0x83a   :  { %v4721_v41 = vpop.permute.xlu1 %4720 }
 0x83b   :  { %v15653_v56 = vpop.permute.xlu0 %2998 }
 0x83c   :  { %5166 = vrot.lane.b32.xlu0 %v19466_v28, %s10588_s0  ;;  %4310 = vrot.lane.b32.xlu1 %v19472_v5, %s10586_s14  ;;  %v19476_v28 = vld [vmem:[#allocation155_spill] sm:$0xff] }
 0x83d   :  { %v1916_v34 = vadd.f32 %v19477_v21, %v19476_v28  ;;  %v3650_v28 = vadd.f32 %v15438_v52, %v3216_v39 }
 0x83e   :  { %v15659_v30 = vpop.permute.xlu1 %3002 }
 0x83f   :  { %v15661_v49 = vpop.permute.xlu0 %3858  ;;  %v2350_v44 = vadd.f32 %v19480_v25, %v1916_v34  ;;  %v4084_v21 = vadd.f32 %v15516_v61, %v3650_v28  ;;  %v19483_v25 = vld [vmem:[#allocation148_spill] sm:$0xff] }
 0x840   :  { %3448 = vrot.lane.b32.xlu0 %v19471_v19, %s10584_s28  ;;  %5170 = vrot.lane.b32.xlu1 %v19472_v5, %s10588_s0  ;;  %v19484_v61 = vld [vmem:[#allocation304_spill] sm:$0xff] }
 0x841   :  { %v2784_v7 = vadd.f32 %v19481_v24, %v2350_v44  ;;  %v1915_v44 = vadd.f32 %v19483_v25, %v19482_v48  ;;  %v4518_v52 = vadd.f32 %v15572_v57, %v4084_v21  ;;  %v19487_v57 = vld [vmem:[#allocation418_spill] sm:$0xff] }
 0x842   :  { %v15670_v18 = vpop.permute.xlu1 %3862 }
 0x843   :  { %v4719_v11 = vpop.permute.xlu0 %4718  ;;  %v3218_v60 = vadd.f32 %v15390_v35, %v2784_v7  ;;  %v4952_v39 = vadd.f32 %v4717_v20, %v4518_v52  ;;  %v19486_v7 = vld [vmem:[#allocation154_spill] sm:$0xff] }
 0x844   :  { %4308 = vrot.lane.b32.xlu0 %v19471_v19, %s10586_s14  ;;  %3452 = vrot.lane.b32.xlu1 %v19479_v17, %s10584_s28 }
 0x845   :  { %v3652_v59 = vadd.f32 %v15447_v62, %v3218_v60  ;;  %v19485_v62 = vld [vmem:[#allocation302_spill] sm:$0xff] }
 0x846   :  { %v4723_v54 = vpop.permute.xlu1 %4722  ;;  %v1917_v28 = vadd.f32 %v19486_v7, %v19485_v62  ;;  %v19491_v62 = vld [vmem:[#allocation420_spill] sm:$0xff] }
 0x847   :  { %v15682_v22 = vpop.permute.xlu0 %3430  ;;  %v4086_v35 = vadd.f32 %v15524_v14, %v3652_v59  ;;  %v19489_v14 = vld [vmem:[#allocation308_spill] sm:$0xff] }
 0x848   :  { %5168 = vrot.lane.b32.xlu0 %v19471_v19, %s10588_s0  ;;  %4312 = vrot.lane.b32.xlu1 %v19479_v17, %s10586_s14  ;;  %v2349_v19 = vadd.f32 %v19484_v61, %v1915_v44  ;;  %v2351_v59 = vadd.f32 %v19489_v14, %v1917_v28 }
 0x849   :  { %v4520_v60 = vadd.f32 %v15583_v29, %v4086_v35  ;;  %v15723_v35 = vld [vmem:[%s17986_s2] ss:$0 sm:$0xff] }
 0x84a   :  { %v15691_v34 = vpop.permute.xlu1 %3434  ;;  %v2783_v21 = vadd.f32 %v19487_v57, %v2349_v19  ;;  %v2785_v29 = vadd.f32 %v19491_v62, %v2351_v59  ;;  %v19493_v59 = vld [vmem:[#allocation72_spill] sm:$0xff] }
 0x84b   :  { %v15694_v1 = vpop.permute.xlu0 %4290  ;;  %v4954_v20 = vadd.f32 %v4721_v41, %v4520_v60 }
 0x84c   :  { %3880 = vrot.lane.b32.xlu0 %v19472_v5, %s10585_s30  ;;  %5172 = vrot.lane.b32.xlu1 %v19479_v17, %s10588_s0  ;;  %v3217_v44 = vadd.f32 %v15409_v47, %v2783_v21  ;;  %v3219_v47 = vadd.f32 %v15415_v51, %v2785_v29 }
 0x84e   :  { %v15705_v24 = vpop.permute.xlu1 %4294  ;;  %v3651_v41 = vadd.f32 %v15475_v50, %v3217_v44  ;;  %v3653_v57 = vadd.f32 %v15485_v32, %v3219_v47 }
 0x84f   :  { %v5151_v48 = vpop.permute.xlu0 %5150 }
 0x850   :  { %v5386_v25 = vadd.f32 %v5151_v48, %v4952_v39  ;;  %4740 = vrot.lane.b32.xlu0 %v19472_v5, %s10587_s22  ;;  %3884 = vrot.lane.b32.xlu1 %v19488_v13, %s10585_s30  ;;  %v4085_v60 = vadd.f32 %v15539_v40, %v3651_v41  ;;  %v4087_v51 = vadd.f32 %v15548_v45, %v3653_v57  ;;  %v19495_v57 = vld [vmem:[#allocation75_spill] sm:$0xff] }
 0x852   :  { %v5155_v52 = vpop.permute.xlu1 %5154  ;;  %v15717_v61 = vpop.f32.mrb[148].mxu0  ;;  %v5501_v5 = vadd.f32 %v15723_v35, %v5386_v25  ;;  %v4519_v50 = vadd.f32 %v15610_v38, %v4085_v60  ;;  %v4521_v32 = vadd.f32 %v15618_v33, %v4087_v51  ;;  %v19494_v33 = vld [vmem:[#allocation87_spill] sm:$0xff] }
 0x853   :  { %19490 = vst [vmem:[#allocation133_spill] sm:$0xff] %v15717_v61  ;;  %v5388_v19 = vadd.f32 %v5155_v52, %v4954_v20  ;;  %v15726_v39 = vpop.permute.xlu0 %3432  ;;  %v15728_v7 = vpop.f32.mrb[149].mxu0 }
 0x854   :  { %19492 = vst [vmem:[#allocation141_spill] sm:$0xff] %v15728_v7  ;;  %3882 = vrot.lane.b32.xlu0 %v19479_v17, %s10585_s30  ;;  %4744 = vrot.lane.b32.xlu1 %v19488_v13, %s10587_s22  ;;  %v5609_v21 = vmax.f32 %v5501_v5, 0.0  ;;  %v4953_v40 = vadd.f32 %v4719_v11, %v4519_v50  ;;  %v4955_v38 = vadd.f32 %v4723_v54, %v4521_v32  ;;  %v19498_v32 = vld [vmem:[#allocation311_spill] sm:$0xff] }
 0x855   :  { %v5503_v28 = vadd.f32 %v15723_v35, %v5388_v19 }
 0x856   :  { %v15738_v48 = vpop.permute.xlu1 %3436 }
 0x857   :  { %v5611_v25 = vmax.f32 %v5503_v28, 0.0  ;;  %v15741_v14 = vpop.permute.xlu0 %4292 }
 0x858   :  { %4742 = vrot.lane.b32.xlu0 %v19479_v17, %s10587_s22  ;;  %3886 = vrot.lane.b32.xlu1 %v19493_v59, %s10585_s30 }
 0x859   :  { %v5673_v20 = vmax.f32 %v5609_v21, %v5611_v25 }
 0x85a   :  { %v15749_v44 = vpop.permute.xlu1 %4296 }
 0x85b   :  { %v5153_v52 = vpop.permute.xlu0 %5152  ;;  %10140 = vmatprep.mubr.msk.f32.mxu1 %vm5685_vm4, %v5673_v20  ;;  %v19496_v20 = vld [vmem:[#allocation305_spill] sm:$0xff] }
 0x85c   :  { %v5387_v62 = vadd.f32 %v5153_v52, %v4953_v40  ;;  %4314 = vrot.lane.b32.xlu0 %v19488_v13, %s10586_s14  ;;  %4746 = vrot.lane.b32.xlu1 %v19493_v59, %s10587_s22  ;;  %v1918_v40 = vadd.f32 %v19496_v20, %v19286_v2 }
 0x85e   :  { %v5157_v17 = vpop.permute.xlu1 %5156  ;;  %v5502_v45 = vadd.f32 %v15723_v35, %v5387_v62  ;;  %v2352_v52 = vadd.f32 %v19498_v32, %v1918_v40  ;;  %v19505_v40 = vld [vmem:[#allocation423_spill] sm:$0xff] }
 0x85f   :  { %v5389_v29 = vadd.f32 %v5157_v17, %v4955_v38  ;;  %v15758_v11 = vpop.permute.xlu0 %3004  ;;  %v19500_v17 = vld [vmem:[#allocation309_spill] sm:$0xff] }
 0x860   :  { %5174 = vrot.lane.b32.xlu0 %v19488_v13, %s10588_s0  ;;  %4318 = vrot.lane.b32.xlu1 %v19494_v33, %s10586_s14  ;;  %v5610_v41 = vmax.f32 %v5502_v45, 0.0  ;;  %v1920_v45 = vadd.f32 %v19500_v17, %v19304_v26 }
 0x861   :  { %v5504_v5 = vadd.f32 %v15723_v35, %v5389_v29 }
 0x862   :  { %v15765_v19 = vpop.permute.xlu1 %3008 }
 0x863   :  { %v5612_v47 = vmax.f32 %v5504_v5, 0.0  ;;  %v15767_v28 = vpop.permute.xlu0 %3864  ;;  %v19502_v5 = vld [vmem:[#allocation421_spill] sm:$0xff] }
 0x864   :  { %4316 = vrot.lane.b32.xlu0 %v19493_v59, %s10586_s14  ;;  %5178 = vrot.lane.b32.xlu1 %v19494_v33, %s10588_s0  ;;  %v2786_v2 = vadd.f32 %v19502_v5, %v2352_v52  ;;  %v19506_v52 = vld [vmem:[#allocation67_spill] sm:$0xff] }
 0x865   :  { %v5674_v54 = vmax.f32 %v5610_v41, %v5612_v47  ;;  %v19503_v41 = vld [vmem:[#allocation63_spill] sm:$0xff] }
 0x866   :  { %v15773_v60 = vpop.permute.xlu1 %3868  ;;  %v19504_v47 = vld [vmem:[#allocation315_spill] sm:$0xff] }
 0x867   :  { %v4725_v13 = vpop.permute.xlu0 %4724  ;;  %10141 = vmatmul.mubr.msk.f32.gmra.mrb[20].mxu1 %vm5685_vm4, %v5674_v54  ;;  %v2354_v54 = vadd.f32 %v19504_v47, %v1920_v45 }
 0x868   :  { %5176 = vrot.lane.b32.xlu0 %v19493_v59, %s10588_s0  ;;  %4320 = vrot.lane.b32.xlu1 %v19495_v57, %s10586_s14  ;;  %v19497_v59 = vld [vmem:[#allocation3_spill] sm:$0xff] }
 0x869   :  { %v2788_v32 = vadd.f32 %v19505_v40, %v2354_v54  ;;  %v19509_v54 = vld [vmem:[#allocation108_spill] sm:$0xff] }
 0x86a   :  { %v4729_v21 = vpop.permute.xlu1 %4728 }
 0x86b   :  { %v15780_v25 = vpop.permute.xlu0 %3006 }
 0x86c   :  { %4748 = vrot.lane.b32.xlu0 %v19494_v33, %s10587_s22  ;;  %5180 = vrot.lane.b32.xlu1 %v19495_v57, %s10588_s0 }
 0x86e   :  { %v15786_v50 = vpop.permute.xlu1 %3010 }
 0x86f   :  { %v15788_v51 = vpop.permute.xlu0 %3866 }
 0x870   :  { %4750 = vrot.lane.b32.xlu0 %v19495_v57, %s10587_s22  ;;  %4752 = vrot.lane.b32.xlu1 %v19497_v59, %s10587_s22  ;;  %v3220_v57 = vadd.f32 %v15505_v23, %v2786_v2  ;;  %v19507_v2 = vld [vmem:[#allocation306_spill] sm:$0xff] }
 0x871   :  { %v1919_v47 = vadd.f32 %v19297_v0, %v19507_v2  ;;  %v19513_v2 = vld [vmem:[#allocation96_spill] sm:$0xff] }
 0x872   :  { %v15797_v62 = vpop.permute.xlu1 %3870  ;;  %v15799_v38 = vpop.f32.mrb[12].mxu1  ;;  %v3654_v26 = vadd.f32 %v15560_v31, %v3220_v57 }
 0x873   :  { %19499 = vst [vmem:[#allocation26_spill] sm:$0xff] %v15799_v38  ;;  %v4727_v29 = vpop.permute.xlu0 %4726  ;;  %v15803_v33 = vpop.f32.mrb[13].mxu1 }
 0x874   :  { %19501 = vst [vmem:[#allocation139_spill] sm:$0xff] %v15803_v33  ;;  %5182 = vrot.lane.b32.xlu0 %v19497_v59, %s10588_s0  ;;  %4754 = vrot.lane.b32.xlu1 %v19503_v41, %s10587_s22  ;;  %v3222_v59 = vadd.f32 %v15512_v46, %v2788_v32  ;;  %v4088_v17 = vadd.f32 %v15640_v42, %v3654_v26  ;;  %v19510_v42 = vld [vmem:[#allocation312_spill] sm:$0xff] }
 0x875   :  { %v2353_v57 = vadd.f32 %v19510_v42, %v1919_v47  ;;  %v19516_v42 = vld [vmem:[#allocation424_spill] sm:$0xff] }
 0x876   :  { %v4731_v20 = vpop.permute.xlu1 %4730  ;;  %v3656_v23 = vadd.f32 %v15569_v37, %v3222_v59  ;;  %v4522_v31 = vadd.f32 %v15694_v1, %v4088_v17  ;;  %v19511_v37 = vld [vmem:[#allocation310_spill] sm:$0xff] }
 0x877   :  { %v15813_v38 = vpop.permute.xlu0 %3438  ;;  %v1921_v26 = vadd.f32 %v19314_v12, %v19511_v37  ;;  %v19512_v1 = vld [vmem:[#allocation422_spill] sm:$0xff] }
 0x878   :  { %5184 = vrot.lane.b32.xlu0 %v19503_v41, %s10588_s0  ;;  %5186 = vrot.lane.b32.xlu1 %v19506_v52, %s10588_s0  ;;  %v19508_v41 = vld [vmem:[#allocation68_spill] sm:$0xff]  ;;  %v4090_v46 = vadd.f32 %v15646_v4, %v3656_v23  ;;  %v4956_v40 = vadd.f32 %v4725_v13, %v4522_v31  ;;  %v2787_v59 = vadd.f32 %v19512_v1, %v2353_v57  ;;  %v19515_v4 = vld [vmem:[#allocation318_spill] sm:$0xff] }
 0x879   :  { %v2355_v23 = vadd.f32 %v19515_v4, %v1921_v26  ;;  %v19518_v4 = vld [vmem:[#allocation342_spill] sm:$0xff] }
 0x87a   :  { %v15822_v45 = vpop.permute.xlu1 %3442  ;;  %v4524_v0 = vadd.f32 %v15705_v24, %v4090_v46  ;;  %v3221_v47 = vadd.f32 %v15531_v10, %v2787_v59 }
 0x87b   :  { %v15825_v5 = vpop.permute.xlu0 %4298  ;;  %v2789_v12 = vadd.f32 %v19516_v42, %v2355_v23 }
 0x87c   :  { %5188 = vrot.lane.b32.xlu1 %v19508_v41, %s10588_s0  ;;  %6227 = vrot.lane.b32.xlu0 %v19509_v54, %s10580_s29  ;;  %v19514_v41 = vld [vmem:[#allocation111_spill] sm:$0xff]  ;;  %v4958_v13 = vadd.f32 %v4729_v21, %v4524_v0  ;;  %v3655_v57 = vadd.f32 %v15597_v8, %v3221_v47 }
 0x87d   :  { %v3223_v21 = vadd.f32 %v15537_v3, %v2789_v12 }
 0x87e   :  { %v15836_v32 = vpop.permute.xlu1 %4302  ;;  %v4089_v26 = vadd.f32 %v15661_v49, %v3655_v57 }
 0x87f   :  { %v5159_v52 = vpop.permute.xlu0 %5158 }
 0x880   :  { %v5390_v17 = vadd.f32 %v5159_v52, %v4956_v40  ;;  %6229 = vrot.lane.b32.xlu0 %v19513_v2, %s10580_s29  ;;  %6231 = vrot.lane.b32.xlu1 %v19514_v41, %s10580_s29  ;;  %v19517_v40 = vld [vmem:[#allocation99_spill] sm:$0xff]  ;;  %v3657_v52 = vadd.f32 %v15607_v9, %v3223_v21  ;;  %v4523_v8 = vadd.f32 %v15741_v14, %v4089_v26  ;;  %v19519_v14 = vld [vmem:[#allocation438_spill] sm:$0xff] }
 0x882   :  { %v5163_v31 = vpop.permute.xlu1 %5162  ;;  %v5505_v24 = vadd.f32 %v15723_v35, %v5390_v17  ;;  %v4091_v3 = vadd.f32 %v15670_v18, %v3657_v52  ;;  %v4957_v49 = vadd.f32 %v4727_v29, %v4523_v8 }
 0x883   :  { %v5392_v46 = vadd.f32 %v5163_v31, %v4958_v13  ;;  %v15850_v37 = vpop.permute.xlu0 %3440 }
 0x884   :  { %6389 = vrot.lane.b32.xlu0 %v19514_v41, %s10581_s15  ;;  %6233 = vrot.lane.b32.xlu1 %v19517_v40, %s10580_s29  ;;  %v5613_v1 = vmax.f32 %v5505_v24, 0.0  ;;  %v4525_v9 = vadd.f32 %v15749_v44, %v4091_v3  ;;  %v19520_v44 = vld [vmem:[#allocation15_spill] sm:$0xff]  ;;  %v19523_v3 = vld [vmem:[#allocation110_spill] sm:$0xff]  ;;  %v19540_v41 = vld [vmem:[#allocation445_spill] sm:$0xff] }
 0x885   :  { %v5507_v10 = vadd.f32 %v15723_v35, %v5392_v46 }
 0x886   :  { %v15860_v0 = vpop.permute.xlu1 %3444  ;;  %v4959_v42 = vadd.f32 %v4731_v20, %v4525_v9 }
 0x887   :  { %v5615_v59 = vmax.f32 %v5507_v10, 0.0  ;;  %v15863_v17 = vpop.permute.xlu0 %4300 }
 0x888   :  { %6391 = vrot.lane.b32.xlu0 %v19517_v40, %s10581_s15  ;;  %6393 = vrot.lane.b32.xlu1 %v19518_v4, %s10581_s15 }
 0x889   :  { %v5675_v23 = vmax.f32 %v5613_v1, %v5615_v59 }
 0x88a   :  { %v15871_v13 = vpop.permute.xlu1 %4304 }
 0x88b   :  { %v5161_v47 = vpop.permute.xlu0 %5160  ;;  %10143 = vmatprep.mubr.msk.f32.mxu1 %vm5685_vm4, %v5675_v23 }
 0x88c   :  { %v5391_v31 = vadd.f32 %v5161_v47, %v4957_v49  ;;  %6235 = vrot.lane.b32.xlu0 %v19518_v4, %s10580_s29  ;;  %6395 = vrot.lane.b32.xlu1 %v19519_v14, %s10581_s15 }
 0x88e   :  { %v5165_v12 = vpop.permute.xlu1 %5164  ;;  %v5506_v18 = vadd.f32 %v15723_v35, %v5391_v31  ;;  %v19524_v31 = vld [vmem:[#allocation313_spill] sm:$0xff] }
 0x88f   :  { %v5393_v24 = vadd.f32 %v5165_v12, %v4959_v42  ;;  %v15880_v29 = vpop.permute.xlu0 %3012  ;;  %v1922_v42 = vadd.f32 %v19524_v31, %v19327_v55  ;;  %v19525_v12 = vld [vmem:[#allocation22_spill] sm:$0xff]  ;;  %v19530_v55 = vld [vmem:[#allocation325_spill] sm:$0xff] }
 0x890   :  { %6551 = vrot.lane.b32.xlu0 %v19518_v4, %s10582_s1  ;;  %6239 = vrot.lane.b32.xlu1 %v19520_v44, %s10580_s29  ;;  %v5614_v10 = vmax.f32 %v5506_v18, 0.0  ;;  %v19526_v18 = vld [vmem:[#allocation321_spill] sm:$0xff] }
 0x891   :  { %v5508_v46 = vadd.f32 %v15723_v35, %v5393_v24  ;;  %v2356_v24 = vadd.f32 %v19526_v18, %v1922_v42  ;;  %v19531_v42 = vld [vmem:[#allocation427_spill] sm:$0xff] }
 0x892   :  { %v15887_v57 = vpop.permute.xlu1 %3016  ;;  %v15889_v21 = vpop.f32.mrb[150].mxu0 }
 0x893   :  { %19521 = vst [vmem:[#allocation351_spill] sm:$0xff] %v15889_v21  ;;  %v5616_v20 = vmax.f32 %v5508_v46, 0.0  ;;  %v15891_v26 = vpop.permute.xlu0 %3872  ;;  %v15893_v52 = vpop.f32.mrb[151].mxu0 }
 0x894   :  { %19522 = vst [vmem:[#allocation147_spill] sm:$0xff] %v15893_v52  ;;  %6237 = vrot.lane.b32.xlu0 %v19519_v14, %s10580_s29  ;;  %6555 = vrot.lane.b32.xlu1 %v19520_v44, %s10582_s1 }
 0x895   :  { %v5676_v1 = vmax.f32 %v5614_v10, %v5616_v20  ;;  %v19527_v10 = vld [vmem:[#allocation179_spill] sm:$0xff] }
 0x896   :  { %v15899_v59 = vpop.permute.xlu1 %3876  ;;  %v19528_v20 = vld [vmem:[#allocation319_spill] sm:$0xff] }
 0x897   :  { %v4733_v8 = vpop.permute.xlu0 %4732  ;;  %10144 = vmatmul.mubr.msk.f32.gmra.mrb[22].mxu1 %vm5685_vm4, %v5676_v1  ;;  %v1924_v1 = vadd.f32 %v19528_v20, %v19527_v10 }
 0x898   :  { %6553 = vrot.lane.b32.xlu0 %v19519_v14, %s10582_s1  ;;  %6241 = vrot.lane.b32.xlu1 %v19523_v3, %s10580_s29  ;;  %v2790_v14 = vadd.f32 %v19529_v43, %v2356_v24  ;;  %v19532_v43 = vld [vmem:[#allocation129_spill] sm:$0xff] }
 0x899   :  { %v2358_v31 = vadd.f32 %v19530_v55, %v1924_v1 }
 0x89a   :  { %v4737_v23 = vpop.permute.xlu1 %4736 }
 0x89b   :  { %v15906_v49 = vpop.permute.xlu0 %3014  ;;  %v2792_v18 = vadd.f32 %v19531_v42, %v2358_v31 }
 0x89c   :  { %6397 = vrot.lane.b32.xlu0 %v19520_v44, %s10581_s15  ;;  %6557 = vrot.lane.b32.xlu1 %v19523_v3, %s10582_s1 }
 0x89d   :  { %v3226_v24 = vadd.f32 %v15638_v53, %v2792_v18 }
 0x89e   :  { %v15912_v9 = vpop.permute.xlu1 %3018 }
 0x89f   :  { %v15914_v47 = vpop.permute.xlu0 %3874 }
 0x8a0   :  { %6713 = vrot.lane.b32.xlu0 %v19520_v44, %s10583_s27  ;;  %6401 = vrot.lane.b32.xlu1 %v19525_v12, %s10581_s15  ;;  %v3224_v44 = vadd.f32 %v15631_v63, %v2790_v14  ;;  %v3660_v14 = vadd.f32 %v15691_v34, %v3226_v24  ;;  %v19538_v24 = vld [vmem:[#allocation320_spill] sm:$0xff] }
 0x8a2   :  { %v15923_v46 = vpop.permute.xlu1 %3878  ;;  %v3658_v10 = vadd.f32 %v15682_v22, %v3224_v44  ;;  %v19535_v22 = vld [vmem:[#allocation314_spill] sm:$0xff]  ;;  %v19536_v44 = vld [vmem:[#allocation172_spill] sm:$0xff]  ;;  %v4094_v53 = vadd.f32 %v15773_v60, %v3660_v14 }
 0x8a3   :  { %v4735_v33 = vpop.permute.xlu0 %4734  ;;  %v1923_v42 = vadd.f32 %v19536_v44, %v19535_v22  ;;  %v19541_v60 = vld [vmem:[#allocation326_spill] sm:$0xff] }
 0x8a4   :  { %6399 = vrot.lane.b32.xlu0 %v19523_v3, %s10581_s15  ;;  %6717 = vrot.lane.b32.xlu1 %v19525_v12, %s10583_s27  ;;  %v4092_v20 = vadd.f32 %v15767_v28, %v3658_v10  ;;  %v19537_v28 = vld [vmem:[#allocation322_spill] sm:$0xff]  ;;  %v4528_v22 = vadd.f32 %v15836_v32, %v4094_v53 }
 0x8a5   :  { %v2357_v18 = vadd.f32 %v19537_v28, %v1923_v42  ;;  %v19542_v28 = vld [vmem:[#allocation428_spill] sm:$0xff] }
 0x8a6   :  { %v4739_v40 = vpop.permute.xlu1 %4738 }
 0x8a7   :  { %v15935_v4 = vpop.permute.xlu0 %3446 }
 0x8a8   :  { %6715 = vrot.lane.b32.xlu0 %v19523_v3, %s10583_s27  ;;  %6403 = vrot.lane.b32.xlu1 %v19532_v43, %s10581_s15  ;;  %v4526_v3 = vadd.f32 %v15825_v5, %v4092_v20  ;;  %v19539_v5 = vld [vmem:[#allocation426_spill] sm:$0xff] }
 0x8a9   :  { %v2791_v20 = vadd.f32 %v19539_v5, %v2357_v18 }
 0x8aa   :  { %v15944_v1 = vpop.f32.mrb[14].mxu1  ;;  %v15946_v63 = vpop.permute.xlu1 %3450  ;;  %v4960_v34 = vadd.f32 %v4733_v8, %v4526_v3  ;;  %v4962_v8 = vadd.f32 %v4737_v23, %v4528_v22 }
 0x8ab   :  { %19533 = vst [vmem:[#allocation448_spill] sm:$0xff] %v15944_v1  ;;  %v15949_v55 = vpop.permute.xlu0 %4306  ;;  %v15951_v31 = vpop.f32.mrb[15].mxu1  ;;  %v1925_v1 = vadd.f32 %v19349_v15, %v19538_v24  ;;  %v3225_v3 = vadd.f32 %v15653_v56, %v2791_v20 }
 0x8ac   :  { %19534 = vst [vmem:[#allocation353_spill] sm:$0xff] %v15951_v31  ;;  %6243 = vrot.lane.b32.xlu0 %v19525_v12, %s10580_s29  ;;  %6719 = vrot.lane.b32.xlu1 %v19532_v43, %s10583_s27 }
 0x8ad   :  { %v2359_v14 = vadd.f32 %v19541_v60, %v1925_v1 }
 0x8ae   :  { %v15962_v10 = vpop.permute.xlu1 %4310 }
 0x8af   :  { %v5167_v44 = vpop.permute.xlu0 %5166  ;;  %v2793_v15 = vadd.f32 %v19542_v28, %v2359_v14 }
 0x8b0   :  { %v5394_v31 = vadd.f32 %v5167_v44, %v4960_v34  ;;  %6559 = vrot.lane.b32.xlu0 %v19525_v12, %s10582_s1  ;;  %6247 = vrot.lane.b32.xlu1 %v19540_v41, %s10580_s29  ;;  %v3659_v34 = vadd.f32 %v15726_v39, %v3225_v3 }
 0x8b1   :  { %v3227_v23 = vadd.f32 %v15659_v30, %v2793_v15 }
 0x8b2   :  { %v5171_v42 = vpop.permute.xlu1 %5170  ;;  %v5509_v32 = vadd.f32 %v15723_v35, %v5394_v31  ;;  %v4093_v1 = vadd.f32 %v15788_v51, %v3659_v34 }
 0x8b3   :  { %v15976_v53 = vpop.permute.xlu0 %3448  ;;  %v5396_v18 = vadd.f32 %v5171_v42, %v4962_v8  ;;  %v3661_v31 = vadd.f32 %v15738_v48, %v3227_v23 }
 0x8b4   :  { %6875 = vrot.lane.b32.xlu0 %v19525_v12, %s10584_s28  ;;  %6563 = vrot.lane.b32.xlu1 %v19540_v41, %s10582_s1  ;;  %v5617_v22 = vmax.f32 %v5509_v32, 0.0  ;;  %v4527_v39 = vadd.f32 %v15863_v17, %v4093_v1  ;;  %v19543_v17 = vld [vmem:[#allocation138_spill] sm:$0xff]  ;;  %v19545_v1 = vld [vmem:[#allocation329_spill] sm:$0xff] }
 0x8b5   :  { %v5511_v56 = vadd.f32 %v15723_v35, %v5396_v18  ;;  %v4095_v30 = vadd.f32 %v15797_v62, %v3661_v31 }
 0x8b6   :  { %v15986_v24 = vpop.permute.xlu1 %3452  ;;  %v4961_v51 = vadd.f32 %v4735_v33, %v4527_v39 }
 0x8b7   :  { %v5619_v44 = vmax.f32 %v5511_v56, 0.0  ;;  %v15989_v5 = vpop.permute.xlu0 %4308  ;;  %v4529_v48 = vadd.f32 %v15871_v13, %v4095_v30 }
 0x8b8   :  { %6245 = vrot.lane.b32.xlu0 %v19532_v43, %s10580_s29  ;;  %6879 = vrot.lane.b32.xlu1 %v19540_v41, %s10584_s28 }
 0x8b9   :  { %v5677_v20 = vmax.f32 %v5617_v22, %v5619_v44  ;;  %v4963_v3 = vadd.f32 %v4739_v40, %v4529_v48  ;;  %v19544_v40 = vld [vmem:[#allocation323_spill] sm:$0xff]  ;;  %v19549_v48 = vld [vmem:[#allocation333_spill] sm:$0xff] }
 0x8ba   :  { %v15997_v60 = vpop.permute.xlu1 %4312  ;;  %v1926_v23 = vadd.f32 %v19544_v40, %v19359_v58  ;;  %v19546_v44 = vld [vmem:[#allocation327_spill] sm:$0xff]  ;;  %v19552_v40 = vld [vmem:[#allocation330_spill] sm:$0xff] }
 0x8bb   :  { %v5169_v14 = vpop.permute.xlu0 %5168  ;;  %10146 = vmatprep.mubr.msk.f32.mxu1 %vm5685_vm4, %v5677_v20  ;;  %v1928_v39 = vadd.f32 %v19546_v44, %v19378_v16  ;;  %v19547_v20 = vld [vmem:[#allocation429_spill] sm:$0xff]  ;;  %v19548_v58 = vld [vmem:[#allocation227_spill] sm:$0xff] }
 0x8bc   :  { %v5395_v8 = vadd.f32 %v5169_v14, %v4961_v51  ;;  %6561 = vrot.lane.b32.xlu0 %v19532_v43, %s10582_s1  ;;  %6249 = vrot.lane.b32.xlu1 %v19543_v17, %s10580_s29  ;;  %v2360_v31 = vadd.f32 %v19545_v1, %v1926_v23  ;;  %v19553_v1 = vld [vmem:[#allocation328_spill] sm:$0xff] }
 0x8bd   :  { %v2362_v14 = vadd.f32 %v19549_v48, %v1928_v39 }
 0x8be   :  { %v5173_v42 = vpop.permute.xlu1 %5172  ;;  %v5510_v62 = vadd.f32 %v15723_v35, %v5395_v8  ;;  %v2794_v51 = vadd.f32 %v19547_v20, %v2360_v31  ;;  %v1929_v31 = vadd.f32 %v19388_v27, %v19553_v1 }
 0x8bf   :  { %v16006_v28 = vpop.permute.xlu0 %3880  ;;  %v5397_v33 = vadd.f32 %v5173_v42, %v4963_v3  ;;  %v19550_v42 = vld [vmem:[#allocation431_spill] sm:$0xff] }
 0x8c0   :  { %6877 = vrot.lane.b32.xlu0 %v19532_v43, %s10584_s28  ;;  %6565 = vrot.lane.b32.xlu1 %v19543_v17, %s10582_s1  ;;  %v5618_v32 = vmax.f32 %v5510_v62, 0.0  ;;  %v3228_v8 = vadd.f32 %v15758_v11, %v2794_v51  ;;  %v2796_v16 = vadd.f32 %v19550_v42, %v2362_v14  ;;  %v19556_v14 = vld [vmem:[#allocation432_spill] sm:$0xff] }
 0x8c1   :  { %v5512_v13 = vadd.f32 %v15723_v35, %v5397_v33  ;;  %v19551_v33 = vld [vmem:[#allocation324_spill] sm:$0xff] }
 0x8c2   :  { %v16013_v15 = vpop.permute.xlu1 %3884 }
 0x8c3   :  { %v5620_v18 = vmax.f32 %v5512_v13, 0.0  ;;  %v4741_v34 = vpop.permute.xlu0 %4740  ;;  %v1927_v13 = vadd.f32 %v19368_v6, %v19551_v33 }
 0x8c4   :  { %6405 = vrot.lane.b32.xlu0 %v19540_v41, %s10581_s15  ;;  %6881 = vrot.lane.b32.xlu1 %v19543_v17, %s10584_s28 }
 0x8c5   :  { %v5678_v56 = vmax.f32 %v5618_v32, %v5620_v18  ;;  %v3662_v32 = vadd.f32 %v15813_v38, %v3228_v8  ;;  %v3230_v18 = vadd.f32 %v15765_v19, %v2796_v16  ;;  %v2361_v11 = vadd.f32 %v19552_v40, %v1927_v13  ;;  %v19554_v38 = vld [vmem:[#allocation430_spill] sm:$0xff]  ;;  %v19557_v13 = vld [vmem:[#allocation379_spill] sm:$0xff] }
 0x8c6   :  { %v4745_v22 = vpop.permute.xlu1 %4744  ;;  %v19555_v19 = vld [vmem:[#allocation334_spill] sm:$0xff] }
 0x8c7   :  { %v16024_v30 = vpop.permute.xlu0 %3882  ;;  %10147 = vmatmul.mubr.msk.f32.gmra.mrb[24].mxu1 %vm5685_vm4, %v5678_v56  ;;  %v4096_v23 = vadd.f32 %v15891_v26, %v3662_v32  ;;  %v3664_v6 = vadd.f32 %v15822_v45, %v3230_v18  ;;  %v2795_v39 = vadd.f32 %v19554_v38, %v2361_v11  ;;  %v2363_v26 = vadd.f32 %v19555_v19, %v1929_v31  ;;  %v19558_v11 = vld [vmem:[#allocation331_spill] sm:$0xff] }
 0x8c8   :  { %6721 = vrot.lane.b32.xlu0 %v19540_v41, %s10583_s27  ;;  %6409 = vrot.lane.b32.xlu1 %v19548_v58, %s10581_s15 }
 0x8c9   :  { %v4530_v20 = vadd.f32 %v15949_v55, %v4096_v23  ;;  %v4098_v51 = vadd.f32 %v15899_v59, %v3664_v6  ;;  %v3229_v27 = vadd.f32 %v15780_v25, %v2795_v39  ;;  %v2797_v8 = vadd.f32 %v19556_v14, %v2363_v26  ;;  %v19561_v39 = vld [vmem:[#allocation203_spill] sm:$0xff] }
 0x8ca   :  { %v16034_v3 = vpop.permute.xlu1 %3886  ;;  %v1930_v23 = vadd.f32 %v19558_v11, %v19398_v36  ;;  %v19562_v36 = vld [vmem:[#allocation335_spill] sm:$0xff] }
 0x8cb   :  { %v4743_v62 = vpop.permute.xlu0 %4742  ;;  %v4964_v48 = vadd.f32 %v4741_v34, %v4530_v20  ;;  %v4532_v42 = vadd.f32 %v15962_v10, %v4098_v51  ;;  %v3663_v16 = vadd.f32 %v15850_v37, %v3229_v27  ;;  %v3231_v59 = vadd.f32 %v15786_v50, %v2797_v8  ;;  %v19566_v8 = vld [vmem:[#allocation433_spill] sm:$0xff]  ;;  %v19571_v11 = vld [vmem:[#allocation435_spill] sm:$0xff] }
 0x8cc   :  { %7037 = vrot.lane.b32.xlu0 %v19540_v41, %s10585_s30  ;;  %6725 = vrot.lane.b32.xlu1 %v19548_v58, %s10583_s27  ;;  %v1932_v20 = vadd.f32 %v19562_v36, %v19561_v39 }
 0x8cd   :  { %v4966_v25 = vadd.f32 %v4745_v22, %v4532_v42  ;;  %v4097_v34 = vadd.f32 %v15914_v47, %v3663_v16  ;;  %v3665_v18 = vadd.f32 %v15860_v0, %v3231_v59  ;;  %v19559_v47 = vld [vmem:[#allocation337_spill] sm:$0xff]  ;;  %v19568_v59 = vld [vmem:[#allocation338_spill] sm:$0xff] }
 0x8ce   :  { %v4747_v56 = vpop.permute.xlu1 %4746  ;;  %v2364_v22 = vadd.f32 %v19559_v47, %v1930_v23  ;;  %v19572_v47 = vld [vmem:[#allocation434_spill] sm:$0xff] }
 0x8cf   :  { %v16050_v44 = vpop.permute.xlu0 %4314  ;;  %v4531_v1 = vadd.f32 %v15989_v5, %v4097_v34  ;;  %v4099_v50 = vadd.f32 %v15923_v46, %v3665_v18  ;;  %v19565_v46 = vld [vmem:[#allocation196_spill] sm:$0xff] }
 0x8d0   :  { %6407 = vrot.lane.b32.xlu0 %v19543_v17, %s10581_s15  ;;  %7041 = vrot.lane.b32.xlu1 %v19548_v58, %s10585_s30  ;;  %v2798_v42 = vadd.f32 %v19566_v8, %v2364_v22  ;;  %v19569_v18 = vld [vmem:[#allocation336_spill] sm:$0xff] }
 0x8d1   :  { %v4965_v31 = vadd.f32 %v4743_v62, %v4531_v1  ;;  %v4533_v5 = vadd.f32 %v15997_v60, %v4099_v50  ;;  %v19567_v62 = vld [vmem:[#allocation339_spill] sm:$0xff] }
 0x8d2   :  { %v16061_v45 = vpop.permute.xlu1 %4318  ;;  %v2366_v16 = vadd.f32 %v19567_v62, %v1932_v20  ;;  %v3232_v34 = vadd.f32 %v15880_v29, %v2798_v42  ;;  %v19573_v29 = vld [vmem:[#allocation224_spill] sm:$0xff] }
 0x8d3   :  { %v5175_v55 = vpop.permute.xlu0 %5174  ;;  %v4967_v60 = vadd.f32 %v4747_v56, %v4533_v5 }
 0x8d4   :  { %v5398_v33 = vadd.f32 %v5175_v55, %v4964_v48  ;;  %6723 = vrot.lane.b32.xlu0 %v19543_v17, %s10583_s27  ;;  %6411 = vrot.lane.b32.xlu1 %v19557_v13, %s10581_s15  ;;  %v19564_v48 = vld [vmem:[#allocation332_spill] sm:$0xff]  ;;  %v2800_v23 = vadd.f32 %v19571_v11, %v2366_v16  ;;  %v3666_v56 = vadd.f32 %v15935_v4, %v3232_v34 }
 0x8d5   :  { %v1931_v14 = vadd.f32 %v19565_v46, %v19564_v48 }
 0x8d6   :  { %v5179_v32 = vpop.permute.xlu1 %5178  ;;  %v5513_v10 = vadd.f32 %v15723_v35, %v5398_v33  ;;  %v3234_v36 = vadd.f32 %v15887_v57, %v2800_v23 }
 0x8d7   :  { %v16074_v40 = vpop.permute.xlu0 %4316  ;;  %v5400_v37 = vadd.f32 %v5179_v32, %v4966_v25  ;;  %v2365_v25 = vadd.f32 %v19568_v59, %v1931_v14 }
 0x8d8   :  { %7039 = vrot.lane.b32.xlu0 %v19543_v17, %s10585_s30  ;;  %6727 = vrot.lane.b32.xlu1 %v19557_v13, %s10583_s27  ;;  %v5621_v19 = vmax.f32 %v5513_v10, 0.0  ;;  %v19570_v10 = vld [vmem:[#allocation202_spill] sm:$0xff]  ;;  %v3668_v4 = vadd.f32 %v15946_v63, %v3234_v36 }
 0x8d9   :  { %v5515_v0 = vadd.f32 %v15723_v35, %v5400_v37  ;;  %v1933_v37 = vadd.f32 %v19570_v10, %v19569_v18  ;;  %v2799_v22 = vadd.f32 %v19572_v47, %v2365_v25 }
 0x8da   :  { %v16086_v6 = vpop.f32.mrb[16].mxu1  ;;  %v4321_v38 = vpop.permute.xlu1 %4320 }
 0x8db   :  { %19560 = vst [vmem:[#allocation450_spill] sm:$0xff] %v16086_v6  ;;  %v5623_v26 = vmax.f32 %v5515_v0, 0.0  ;;  %v5177_v51 = vpop.permute.xlu0 %5176  ;;  %v16091_v27 = vpop.f32.mrb[17].mxu1  ;;  %v3233_v5 = vadd.f32 %v15906_v49, %v2799_v22  ;;  %v4102_v49 = vadd.f32 %v16013_v15, %v3668_v4  ;;  %v7466_v22 = vld [vmem:[%s17987_s5] sm:$0xff] }
 0x8dc   :  { %19563 = vst [vmem:[#allocation134_spill] sm:$0xff] %v16091_v27  ;;  %v5399_v55 = vadd.f32 %v5177_v51, %v4965_v31  ;;  %6251 = vrot.lane.b32.xlu0 %v19548_v58, %s10580_s29  ;;  %7043 = vrot.lane.b32.xlu1 %v19557_v13, %s10585_s30  ;;  %v19574_v31 = vld [vmem:[#allocation340_spill] sm:$0xff] }
 0x8dd   :  { %v5679_v33 = vmax.f32 %v5621_v19, %v5623_v26  ;;  %v2367_v39 = vadd.f32 %v19574_v31, %v1933_v37  ;;  %v4100_v19 = vadd.f32 %v16006_v28, %v3666_v56  ;;  %v19575_v51 = vld [vmem:[#allocation436_spill] sm:$0xff]  ;;  %v3667_v42 = vadd.f32 %v15976_v53, %v3233_v5 }
 0x8de   :  { %v5181_v32 = vpop.permute.xlu1 %5180  ;;  %v5514_v1 = vadd.f32 %v15723_v35, %v5399_v55  ;;  %v4536_v53 = vadd.f32 %v16061_v45, %v4102_v49  ;;  %v7467_v56 = vld [vmem:[%s17987_s5 + $0x8] sm:$0x3] }
 0x8df   :  { %v4749_v50 = vpop.permute.xlu0 %4748  ;;  %v5401_v0 = vadd.f32 %v5181_v32, %v4967_v60  ;;  %10149 = vmatprep.mubr.msk.f32.mxu1 %vm5685_vm4, %v5679_v33  ;;  %v2801_v48 = vadd.f32 %v19575_v51, %v2367_v39  ;;  %v4534_v55 = vadd.f32 %v16050_v44, %v4100_v19  ;;  %v4101_v63 = vadd.f32 %v16024_v30, %v3667_v42 }
 0x8e0   :  { %6567 = vrot.lane.b32.xlu0 %v19548_v58, %s10582_s1  ;;  %6255 = vrot.lane.b32.xlu1 %v19573_v29, %s10580_s29  ;;  %v5622_v46 = vmax.f32 %v5514_v1, 0.0  ;;  %v10217_v39 = vpack.c.bf16 %v7467_v56, %v7466_v22 }
 0x8e1   :  { %v5516_v20 = vadd.f32 %v15723_v35, %v5401_v0  ;;  %v3235_v57 = vadd.f32 %v15912_v9, %v2801_v48  ;;  %v4968_v62 = vadd.f32 %v4749_v50, %v4534_v55  ;;  %v4535_v33 = vadd.f32 %v16074_v40, %v4101_v63  ;;  %v19576_v50 = vld [vmem:[#allocation51_spill] sm:$0xff] }
 0x8e2   :  { %v4753_v26 = vpop.permute.xlu1 %4752  ;;  %10219 = vmatprep.subr.msk.bf16.mxu1 %vm12675_vm3, %v10217_v39 }
 0x8e3   :  { %v5624_v14 = vmax.f32 %v5516_v20, 0.0  ;;  %v4751_v8 = vpop.permute.xlu0 %4750  ;;  %v3669_v60 = vadd.f32 %v15986_v24, %v3235_v57  ;;  %v4970_v15 = vadd.f32 %v4753_v26, %v4536_v53  ;;  %10222 = vmatpush3.bf16.msk.msra.mxu1 %vm12675_vm3, %v10217_v39 }
 0x8e4   :  { %6883 = vrot.lane.b32.xlu0 %v19548_v58, %s10584_s28  ;;  %6571 = vrot.lane.b32.xlu1 %v19573_v29, %s10582_s1  ;;  %v4969_v30 = vadd.f32 %v4751_v8, %v4535_v33  ;;  %v19578_v8 = vld [vmem:[#allocation228_spill] sm:$0xff] }
 0x8e5   :  { %v5680_v28 = vmax.f32 %v5622_v46, %v5624_v14  ;;  %v4103_v9 = vadd.f32 %v16034_v3, %v3669_v60  ;;  %v19581_v60 = vld [vmem:[#allocation380_spill] sm:$0xff] }
 0x8e6   :  { %v4755_v16 = vpop.permute.xlu1 %4754 }
 0x8e7   :  { %v5183_v44 = vpop.permute.xlu0 %5182  ;;  %10150 = vmatmul.mubr.msk.f32.gmra.mrb[26].mxu1 %vm5685_vm4, %v5680_v28  ;;  %v4537_v24 = vadd.f32 %v4321_v38, %v4103_v9 }
 0x8e8   :  { %v5402_v59 = vadd.f32 %v5183_v44, %v4968_v62  ;;  %7199 = vrot.lane.b32.xlu0 %v19548_v58, %s10586_s14  ;;  %6887 = vrot.lane.b32.xlu1 %v19573_v29, %s10584_s28 }
 0x8e9   :  { %v4971_v40 = vadd.f32 %v4755_v16, %v4537_v24 }
 0x8ea   :  { %v5187_v25 = vpop.permute.xlu1 %5186  ;;  %v5517_v45 = vadd.f32 %v15723_v35, %v5402_v59 }
 0x8eb   :  { %v5185_v34 = vpop.permute.xlu0 %5184  ;;  %v5404_v32 = vadd.f32 %v5187_v25, %v4970_v15 }
 0x8ec   :  { %v5403_v18 = vadd.f32 %v5185_v34, %v4969_v30  ;;  %6253 = vrot.lane.b32.xlu0 %v19557_v13, %s10580_s29  ;;  %7203 = vrot.lane.b32.xlu1 %v19573_v29, %s10586_s14  ;;  %v5625_v3 = vmax.f32 %v5517_v45, 0.0 }
 0x8ed   :  { %v5519_v10 = vadd.f32 %v15723_v35, %v5404_v32 }
 0x8ee   :  { %v5189_v37 = vpop.permute.xlu1 %5188  ;;  %v5518_v11 = vadd.f32 %v15723_v35, %v5403_v18 }
 0x8ef   :  { %v5627_v23 = vmax.f32 %v5519_v10, 0.0  ;;  %v5405_v38 = vadd.f32 %v5189_v37, %v4971_v40  ;;  %v16146_v1 = vpop.permute.xlu0 %6227 }
 0x8f0   :  { %6569 = vrot.lane.b32.xlu0 %v19557_v13, %s10582_s1  ;;  %6257 = vrot.lane.b32.xlu1 %v19576_v50, %s10580_s29  ;;  %v5626_v36 = vmax.f32 %v5518_v11, 0.0 }
 0x8f1   :  { %v5681_v0 = vmax.f32 %v5625_v3, %v5627_v23  ;;  %v5520_v47 = vadd.f32 %v15723_v35, %v5405_v38 }
 0x8f2   :  { %v16159_v31 = vpop.permute.xlu1 %6231 }
 0x8f3   :  { %v5628_v20 = vmax.f32 %v5520_v47, 0.0  ;;  %v16161_v5 = vpop.permute.xlu0 %6229  ;;  %10152 = vmatprep.mubr.msk.f32.mxu1 %vm5685_vm4, %v5681_v0 }
 0x8f4   :  { %6885 = vrot.lane.b32.xlu0 %v19557_v13, %s10584_s28  ;;  %6573 = vrot.lane.b32.xlu1 %v19576_v50, %s10582_s1 }
 0x8f5   :  { %v5682_v35 = vmax.f32 %v5626_v36, %v5628_v20 }
 0x8f6   :  { %v16170_v26 = vpop.permute.xlu1 %6233 }
 0x8f7   :  { %v16174_v51 = vpop.permute.xlu0 %6389  ;;  %10153 = vmatmul.mubr.msk.f32.gmra.mrb[28].mxu1 %vm5685_vm4, %v5682_v35 }
 0x8f8   :  { %7201 = vrot.lane.b32.xlu0 %v19557_v13, %s10586_s14  ;;  %6889 = vrot.lane.b32.xlu1 %v19576_v50, %s10584_s28  ;;  %v6349_v13 = vadd.f32 %v16159_v31, %v19509_v54 }
 0x8fa   :  { %v16181_v48 = vpop.permute.xlu1 %6393 }
 0x8fb   :  { %v16183_v4 = vpop.permute.xlu0 %6391 }
 0x8fc   :  { %6413 = vrot.lane.b32.xlu0 %v19573_v29, %s10581_s15  ;;  %7205 = vrot.lane.b32.xlu1 %v19576_v50, %s10586_s14 }
 0x8fe   :  { %v16189_v46 = vpop.permute.xlu1 %6395 }
 0x8ff   :  { %v16191_v14 = vpop.permute.xlu0 %6235 }
 0x900   :  { %6729 = vrot.lane.b32.xlu0 %v19573_v29, %s10583_s27  ;;  %6417 = vrot.lane.b32.xlu1 %v19578_v8, %s10581_s15 }
 0x902   :  { %v16197_v42 = vpop.permute.xlu1 %6239 }
 0x903   :  { %v16199_v55 = vpop.permute.xlu0 %6551 }
 0x904   :  { %7045 = vrot.lane.b32.xlu0 %v19573_v29, %s10585_s30  ;;  %6733 = vrot.lane.b32.xlu1 %v19578_v8, %s10583_s27 }
 0x906   :  { %v16205_v57 = vpop.permute.xlu1 %6555 }
 0x907   :  { %v16207_v49 = vpop.permute.xlu0 %6237 }
 0x908   :  { %6415 = vrot.lane.b32.xlu0 %v19576_v50, %s10581_s15  ;;  %7049 = vrot.lane.b32.xlu1 %v19578_v8, %s10585_s30 }
 0x90a   :  { %v16213_v28 = vpop.f32.mrb[18].mxu1  ;;  %v16215_v63 = vpop.permute.xlu1 %6241 }
 0x90b   :  { %19579 = vst [vmem:[#allocation23_spill] sm:$0xff] %v16213_v28  ;;  %v16217_v62 = vpop.permute.xlu0 %6553  ;;  %v16219_v16 = vpop.f32.mrb[19].mxu1 }
 0x90c   :  { %19580 = vst [vmem:[#allocation144_spill] sm:$0xff] %v16219_v16  ;;  %6731 = vrot.lane.b32.xlu0 %v19576_v50, %s10583_s27  ;;  %6419 = vrot.lane.b32.xlu1 %v19581_v60, %s10581_s15 }
 0x90e   :  { %v16225_v53 = vpop.permute.xlu1 %6557 }
 0x90f   :  { %v16227_v44 = vpop.permute.xlu0 %6397 }
 0x910   :  { %7047 = vrot.lane.b32.xlu0 %v19576_v50, %s10585_s30  ;;  %6735 = vrot.lane.b32.xlu1 %v19581_v60, %s10583_s27  ;;  %v19584_v50 = vld [vmem:[#allocation86_spill] sm:$0xff] }
 0x912   :  { %v16233_v33 = vpop.permute.xlu1 %6401 }
 0x913   :  { %v16235_v59 = vpop.permute.xlu0 %6713 }
 0x914   :  { %6259 = vrot.lane.b32.xlu0 %v19578_v8, %s10580_s29  ;;  %7051 = vrot.lane.b32.xlu1 %v19581_v60, %s10585_s30 }
 0x916   :  { %v16241_v9 = vpop.permute.xlu1 %6717 }
 0x917   :  { %v16243_v15 = vpop.permute.xlu0 %6399 }
 0x918   :  { %6575 = vrot.lane.b32.xlu0 %v19578_v8, %s10582_s1  ;;  %6263 = vrot.lane.b32.xlu1 %v15728_v7, %s10580_s29 }
 0x91a   :  { %v16249_v30 = vpop.permute.xlu1 %6403 }
 0x91b   :  { %v16251_v25 = vpop.permute.xlu0 %6715 }
 0x91c   :  { %6891 = vrot.lane.b32.xlu0 %v19578_v8, %s10584_s28  ;;  %6579 = vrot.lane.b32.xlu1 %v15728_v7, %s10582_s1 }
 0x91e   :  { %v16257_v24 = vpop.permute.xlu1 %6719 }
 0x91f   :  { %v16259_v45 = vpop.permute.xlu0 %6243 }
 0x920   :  { %7207 = vrot.lane.b32.xlu0 %v19578_v8, %s10586_s14  ;;  %6895 = vrot.lane.b32.xlu1 %v15728_v7, %s10584_s28  ;;  %v6347_v8 = vadd.f32 %v16146_v1, %v19584_v50  ;;  %v6511_v1 = vadd.f32 %v16181_v48, %v6349_v13  ;;  %v16386_v48 = vld [vmem:[%s17988_s4] ss:$0 sm:$0xff] }
 0x922   :  { %v16265_v34 = vpop.permute.xlu1 %6247  ;;  %v6509_v27 = vadd.f32 %v16174_v51, %v6347_v8  ;;  %v6673_v8 = vadd.f32 %v16205_v57, %v6511_v1  ;;  %v19587_v1 = vld [vmem:[#allocation7_spill] sm:$0xff] }
 0x923   :  { %v16267_v32 = vpop.permute.xlu0 %6559 }
 0x924   :  { %6261 = vrot.lane.b32.xlu0 %v19581_v60, %s10580_s29  ;;  %7211 = vrot.lane.b32.xlu1 %v15728_v7, %s10586_s14  ;;  %v6671_v58 = vadd.f32 %v16199_v55, %v6509_v27  ;;  %v6835_v27 = vadd.f32 %v16241_v9, %v6673_v8  ;;  %v19588_v8 = vld [vmem:[#allocation344_spill] sm:$0xff] }
 0x926   :  { %v16273_v18 = vpop.permute.xlu1 %6563  ;;  %v6833_v50 = vadd.f32 %v16235_v59, %v6671_v58 }
 0x927   :  { %v6876_v40 = vpop.permute.xlu0 %6875 }
 0x928   :  { %6577 = vrot.lane.b32.xlu0 %v19581_v60, %s10582_s1  ;;  %6265 = vrot.lane.b32.xlu1 %v15717_v61, %s10580_s29  ;;  %v6995_v54 = vadd.f32 %v6876_v40, %v6833_v50  ;;  %v6348_v50 = vadd.f32 %v19587_v1, %v16161_v5 }
 0x92a   :  { %v6880_v10 = vpop.permute.xlu1 %6879 }
 0x92b   :  { %v16279_v37 = vpop.permute.xlu0 %6245  ;;  %v6997_v13 = vadd.f32 %v6880_v10, %v6835_v27  ;;  %v6510_v27 = vadd.f32 %v16183_v4, %v6348_v50 }
 0x92c   :  { %6893 = vrot.lane.b32.xlu0 %v19581_v60, %s10584_s28  ;;  %6581 = vrot.lane.b32.xlu1 %v15717_v61, %s10582_s1 }
 0x92d   :  { %v6672_v5 = vadd.f32 %v16217_v62, %v6510_v27 }
 0x92e   :  { %v16285_v3 = vpop.permute.xlu1 %6249 }
 0x92f   :  { %v16287_v11 = vpop.permute.xlu0 %6561 }
 0x930   :  { %7209 = vrot.lane.b32.xlu0 %v19581_v60, %s10586_s14  ;;  %6897 = vrot.lane.b32.xlu1 %v15717_v61, %s10584_s28 }
 0x932   :  { %v16293_v23 = vpop.permute.xlu1 %6565 }
 0x933   :  { %v16295_v38 = vpop.permute.xlu0 %6877 }
 0x934   :  { %6421 = vrot.lane.b32.xlu0 %v15728_v7, %s10581_s15  ;;  %7213 = vrot.lane.b32.xlu1 %v15717_v61, %s10586_s14 }
 0x936   :  { %v16301_v0 = vpop.permute.xlu1 %6881 }
 0x937   :  { %v16303_v47 = vpop.permute.xlu0 %6405 }
 0x938   :  { %6737 = vrot.lane.b32.xlu0 %v15728_v7, %s10583_s27  ;;  %6425 = vrot.lane.b32.xlu1 %v15893_v52, %s10581_s15 }
 0x93a   :  { %v16309_v22 = vpop.f32.mrb[20].mxu1  ;;  %v16311_v56 = vpop.permute.xlu1 %6409 }
 0x93b   :  { %19582 = vst [vmem:[#allocation140_spill] sm:$0xff] %v16309_v22  ;;  %v16313_v39 = vpop.permute.xlu0 %6721  ;;  %v16315_v36 = vpop.f32.mrb[21].mxu1 }
 0x93c   :  { %19583 = vst [vmem:[#allocation25_spill] sm:$0xff] %v16315_v36  ;;  %7053 = vrot.lane.b32.xlu0 %v15728_v7, %s10585_s30  ;;  %6741 = vrot.lane.b32.xlu1 %v15893_v52, %s10583_s27 }
 0x93e   :  { %v16321_v20 = vpop.permute.xlu1 %6725 }
 0x93f   :  { %v7038_v35 = vpop.permute.xlu0 %7037 }
 0x940   :  { %6423 = vrot.lane.b32.xlu0 %v15717_v61, %s10581_s15  ;;  %7057 = vrot.lane.b32.xlu1 %v15893_v52, %s10585_s30  ;;  %v7157_v31 = vadd.f32 %v7038_v35, %v6995_v54 }
 0x942   :  { %v7042_v19 = vpop.permute.xlu1 %7041 }
 0x943   :  { %v16327_v22 = vpop.permute.xlu0 %6407  ;;  %v7159_v59 = vadd.f32 %v7042_v19, %v6997_v13 }
 0x944   :  { %6739 = vrot.lane.b32.xlu0 %v15717_v61, %s10583_s27  ;;  %6427 = vrot.lane.b32.xlu1 %v15889_v21, %s10581_s15 }
 0x946   :  { %v16333_v36 = vpop.permute.xlu1 %6411 }
 0x947   :  { %v16335_v7 = vpop.permute.xlu0 %6723 }
 0x948   :  { %7055 = vrot.lane.b32.xlu0 %v15717_v61, %s10585_s30  ;;  %6743 = vrot.lane.b32.xlu1 %v15889_v21, %s10583_s27  ;;  %v19585_v61 = vld [vmem:[#allocation126_spill] sm:$0xff] }
 0x94a   :  { %v16341_v28 = vpop.permute.xlu1 %6727 }
 0x94b   :  { %v7040_v16 = vpop.permute.xlu0 %7039 }
 0x94c   :  { %6267 = vrot.lane.b32.xlu0 %v15893_v52, %s10580_s29  ;;  %7059 = vrot.lane.b32.xlu1 %v15889_v21, %s10585_s30 }
 0x94e   :  { %v16347_v60 = vpop.permute.xlu1 %7043 }
 0x94f   :  { %v16349_v6 = vpop.permute.xlu0 %6251 }
 0x950   :  { %6583 = vrot.lane.b32.xlu0 %v15893_v52, %s10582_s1  ;;  %6271 = vrot.lane.b32.xlu1 %v19585_v61, %s10580_s29 }
 0x952   :  { %v16358_v29 = vpop.permute.xlu1 %6255 }
 0x953   :  { %19586 = vst [vmem:[#allocation352_spill] sm:$0xff] %v16358_v29  ;;  %v16362_v17 = vpop.permute.xlu0 %6567 }
 0x954   :  { %6899 = vrot.lane.b32.xlu0 %v15893_v52, %s10584_s28  ;;  %6587 = vrot.lane.b32.xlu1 %v19585_v61, %s10582_s1 }
 0x956   :  { %v16371_v51 = vpop.permute.xlu1 %6571 }
 0x957   :  { %v16374_v29 = vpop.permute.xlu0 %6883 }
 0x958   :  { %7215 = vrot.lane.b32.xlu0 %v15893_v52, %s10586_s14  ;;  %6903 = vrot.lane.b32.xlu1 %v19585_v61, %s10584_s28 }
 0x95a   :  { %v16381_v55 = vpop.permute.xlu1 %6887 }
 0x95b   :  { %v7200_v58 = vpop.permute.xlu0 %7199 }
 0x95c   :  { %v7319_v57 = vadd.f32 %v7200_v58, %v7157_v31  ;;  %6269 = vrot.lane.b32.xlu0 %v15889_v21, %s10580_s29  ;;  %7219 = vrot.lane.b32.xlu1 %v19585_v61, %s10586_s14  ;;  %v6350_v31 = vadd.f32 %v19513_v2, %v16170_v26 }
 0x95e   :  { %v7204_v40 = vpop.permute.xlu1 %7203  ;;  %v7366_v9 = vadd.f32 %v16386_v48, %v7319_v57 }
 0x95f   :  { %v16393_v35 = vpop.permute.xlu0 %6253  ;;  %v7321_v10 = vadd.f32 %v7204_v40, %v7159_v59  ;;  %v6512_v59 = vadd.f32 %v16189_v46, %v6350_v31  ;;  %v6834_v40 = vadd.f32 %v16251_v25, %v6672_v5 }
 0x960   :  { %6585 = vrot.lane.b32.xlu0 %v15889_v21, %s10582_s1  ;;  %6273 = vrot.lane.b32.xlu1 %v19588_v8, %s10580_s29  ;;  %v7406_v13 = vmax.f32 %v7366_v9, 0.0 }
 0x961   :  { %v7368_v54 = vadd.f32 %v16386_v48, %v7321_v10  ;;  %v6674_v2 = vadd.f32 %v16225_v53, %v6512_v59  ;;  %v6996_v62 = vadd.f32 %v16295_v38, %v6834_v40 }
 0x962   :  { %v16403_v19 = vpop.permute.xlu1 %6257 }
 0x963   :  { %v7408_v58 = vmax.f32 %v7368_v54, 0.0  ;;  %v16407_v57 = vpop.permute.xlu0 %6569  ;;  %v6836_v46 = vadd.f32 %v16257_v24, %v6674_v2  ;;  %v7158_v9 = vadd.f32 %v7040_v16, %v6996_v62 }
 0x964   :  { %6901 = vrot.lane.b32.xlu0 %v15889_v21, %s10584_s28  ;;  %6589 = vrot.lane.b32.xlu1 %v19588_v8, %s10582_s1 }
 0x965   :  { %v7446_v4 = vmax.f32 %v7406_v13, %v7408_v58  ;;  %v6998_v53 = vadd.f32 %v16301_v0, %v6836_v46  ;;  %v19591_v0 = vld [vmem:[#allocation446_spill] sm:$0xff] }
 0x966   :  { %v16416_v10 = vpop.permute.xlu1 %6573 }
 0x967   :  { %v16419_v26 = vpop.permute.xlu0 %6885  ;;  %10159 = vmatprep.mubr.msk.f32.mxu1 %vm5685_vm4, %v7446_v4  ;;  %v7160_v38 = vadd.f32 %v16347_v60, %v6998_v53  ;;  %v19592_v53 = vld [vmem:[#allocation349_spill] sm:$0xff] }
 0x968   :  { %7217 = vrot.lane.b32.xlu0 %v15889_v21, %s10586_s14  ;;  %6905 = vrot.lane.b32.xlu1 %v19588_v8, %s10584_s28 }
 0x96a   :  { %v16428_v25 = vpop.f32.mrb[22].mxu1  ;;  %v16430_v1 = vpop.permute.xlu1 %6889 }
 0x96b   :  { %19589 = vst [vmem:[#allocation150_spill] sm:$0xff] %v16428_v25  ;;  %v7202_v50 = vpop.permute.xlu0 %7201  ;;  %v16433_v54 = vpop.f32.mrb[23].mxu1 }
 0x96c   :  { %19590 = vst [vmem:[#allocation449_spill] sm:$0xff] %v16433_v54  ;;  %v7320_v27 = vadd.f32 %v7202_v50, %v7158_v9  ;;  %6429 = vrot.lane.b32.xlu0 %v19585_v61, %s10581_s15  ;;  %7221 = vrot.lane.b32.xlu1 %v19588_v8, %s10586_s14 }
 0x96e   :  { %v7206_v24 = vpop.permute.xlu1 %7205  ;;  %v7367_v16 = vadd.f32 %v16386_v48, %v7320_v27 }
 0x96f   :  { %v16441_v31 = vpop.permute.xlu0 %6413  ;;  %v7322_v13 = vadd.f32 %v7206_v24, %v7160_v38 }
 0x970   :  { %6745 = vrot.lane.b32.xlu0 %v19585_v61, %s10583_s27  ;;  %6433 = vrot.lane.b32.xlu1 %v19591_v0, %s10581_s15  ;;  %v7407_v59 = vmax.f32 %v7367_v16, 0.0 }
 0x971   :  { %v7369_v58 = vadd.f32 %v16386_v48, %v7322_v13 }
 0x972   :  { %v16448_v5 = vpop.permute.xlu1 %6417 }
 0x973   :  { %v7409_v4 = vmax.f32 %v7369_v58, 0.0  ;;  %v16450_v40 = vpop.permute.xlu0 %6729  ;;  %v19593_v58 = vld [vmem:[#allocation111_spill] sm:$0xff] }
 0x974   :  { %7061 = vrot.lane.b32.xlu0 %v19585_v61, %s10585_s30  ;;  %6749 = vrot.lane.b32.xlu1 %v19591_v0, %s10583_s27  ;;  %v19595_v61 = vld [vmem:[#allocation342_spill] sm:$0xff] }
 0x975   :  { %v7447_v60 = vmax.f32 %v7407_v59, %v7409_v4  ;;  %v6351_v59 = vadd.f32 %v16191_v14, %v19593_v58  ;;  %v19594_v4 = vld [vmem:[#allocation54_spill] sm:$0xff]  ;;  %v6353_v25 = vadd.f32 %v16197_v42, %v19595_v61 }
 0x976   :  { %v16456_v2 = vpop.permute.xlu1 %6733 }
 0x977   :  { %v7046_v62 = vpop.permute.xlu0 %7045  ;;  %10160 = vmatmul.mubr.msk.f32.vlgmr.msra.gmra.mrb[30].mxu1 %vm5685_vm4, %v7447_v60  ;;  %v6513_v60 = vadd.f32 %v16227_v44, %v6351_v59  ;;  %v6515_v14 = vadd.f32 %v16233_v33, %v6353_v25 }
 0x978   :  { %6431 = vrot.lane.b32.xlu0 %v19588_v8, %s10581_s15  ;;  %7065 = vrot.lane.b32.xlu1 %v19591_v0, %s10585_s30 }
 0x979   :  { %v6675_v21 = vadd.f32 %v16267_v32, %v6513_v60  ;;  %v6677_v59 = vadd.f32 %v16273_v18, %v6515_v14 }
 0x97a   :  { %v7050_v46 = vpop.permute.xlu1 %7049 }
 0x97b   :  { %v16463_v9 = vpop.permute.xlu0 %6415  ;;  %v6837_v58 = vadd.f32 %v16313_v39, %v6675_v21  ;;  %v6839_v42 = vadd.f32 %v16321_v20, %v6677_v59 }
 0x97c   :  { %6747 = vrot.lane.b32.xlu0 %v19588_v8, %s10583_s27  ;;  %6435 = vrot.lane.b32.xlu1 %v19592_v53, %s10581_s15 }
 0x97d   :  { %v6999_v61 = vadd.f32 %v16374_v29, %v6837_v58  ;;  %v7001_v21 = vadd.f32 %v16381_v55, %v6839_v42  ;;  %v19597_v55 = vld [vmem:[#allocation223_spill] sm:$0xff] }
 0x97e   :  { %v16469_v50 = vpop.permute.xlu1 %6419 }
 0x97f   :  { %v16471_v27 = vpop.permute.xlu0 %6731  ;;  %v7161_v32 = vadd.f32 %v7046_v62, %v6999_v61  ;;  %v7163_v29 = vadd.f32 %v7050_v46, %v7001_v21  ;;  %v19596_v62 = vld [vmem:[#allocation99_spill] sm:$0xff] }
 0x980   :  { %7063 = vrot.lane.b32.xlu0 %v19588_v8, %s10585_s30  ;;  %6751 = vrot.lane.b32.xlu1 %v19592_v53, %s10583_s27  ;;  %v6352_v58 = vadd.f32 %v19596_v62, %v16207_v49 }
 0x982   :  { %v16477_v38 = vpop.permute.xlu1 %6735  ;;  %v6514_v61 = vadd.f32 %v16243_v15, %v6352_v58 }
 0x983   :  { %v7048_v24 = vpop.permute.xlu0 %7047 }
 0x984   :  { %6275 = vrot.lane.b32.xlu0 %v19591_v0, %s10580_s29  ;;  %7067 = vrot.lane.b32.xlu1 %v19592_v53, %s10585_s30 }
 0x986   :  { %v16483_v16 = vpop.permute.xlu1 %7051 }
 0x987   :  { %v16485_v13 = vpop.permute.xlu0 %6259 }
 0x988   :  { %6591 = vrot.lane.b32.xlu0 %v19591_v0, %s10582_s1  ;;  %6279 = vrot.lane.b32.xlu1 %v19594_v4, %s10580_s29 }
 0x98a   :  { %v16494_v8 = vpop.permute.xlu1 %6263 }
 0x98b   :  { %v16498_v54 = vpop.permute.xlu0 %6575 }
 0x98c   :  { %6907 = vrot.lane.b32.xlu0 %v19591_v0, %s10584_s28  ;;  %6595 = vrot.lane.b32.xlu1 %v19594_v4, %s10582_s1 }
 0x98e   :  { %v16507_v44 = vpop.permute.xlu1 %6579 }
 0x98f   :  { %v16510_v52 = vpop.permute.xlu0 %6891 }
 0x990   :  { %7223 = vrot.lane.b32.xlu0 %v19591_v0, %s10586_s14  ;;  %6911 = vrot.lane.b32.xlu1 %v19594_v4, %s10584_s28 }
 0x992   :  { %v16518_v33 = vpop.permute.xlu1 %6895 }
 0x993   :  { %v7208_v39 = vpop.permute.xlu0 %7207 }
 0x994   :  { %v7323_v25 = vadd.f32 %v7208_v39, %v7161_v32  ;;  %6277 = vrot.lane.b32.xlu0 %v19592_v53, %s10580_s29  ;;  %7227 = vrot.lane.b32.xlu1 %v19594_v4, %s10586_s14  ;;  %v19599_v32 = vld [vmem:[#allocation438_spill] sm:$0xff] }
 0x995   :  { %v6354_v21 = vadd.f32 %v19599_v32, %v16215_v63 }
 0x996   :  { %v7212_v18 = vpop.permute.xlu1 %7211  ;;  %v7370_v60 = vadd.f32 %v16386_v48, %v7323_v25 }
 0x997   :  { %v16526_v14 = vpop.permute.xlu0 %6261  ;;  %v7325_v20 = vadd.f32 %v7212_v18, %v7163_v29  ;;  %v6676_v18 = vadd.f32 %v16287_v11, %v6514_v61  ;;  %v6516_v15 = vadd.f32 %v16249_v30, %v6354_v21 }
 0x998   :  { %6593 = vrot.lane.b32.xlu0 %v19592_v53, %s10582_s1  ;;  %6281 = vrot.lane.b32.xlu1 %v19597_v55, %s10580_s29  ;;  %v7410_v39 = vmax.f32 %v7370_v60, 0.0 }
 0x999   :  { %v7372_v59 = vadd.f32 %v16386_v48, %v7325_v20  ;;  %v6838_v62 = vadd.f32 %v16335_v7, %v6676_v18  ;;  %v6678_v60 = vadd.f32 %v16293_v23, %v6516_v15 }
 0x99a   :  { %v16536_v46 = vpop.f32.mrb[24].mxu1  ;;  %v16538_v42 = vpop.permute.xlu1 %6265 }
 0x99b   :  { %19598 = vst [vmem:[#allocation354_spill] sm:$0xff] %v16536_v46  ;;  %v7412_v25 = vmax.f32 %v7372_v59, 0.0  ;;  %v16542_v49 = vpop.permute.xlu0 %6577  ;;  %v16544_v29 = vpop.f32.mrb[25].mxu1  ;;  %v7000_v11 = vadd.f32 %v16419_v26, %v6838_v62  ;;  %v6840_v30 = vadd.f32 %v16341_v28, %v6678_v60 }
 0x99c   :  { %6909 = vrot.lane.b32.xlu0 %v19592_v53, %s10584_s28  ;;  %6597 = vrot.lane.b32.xlu1 %v19597_v55, %s10582_s1 }
 0x99d   :  { %v7448_v20 = vmax.f32 %v7410_v39, %v7412_v25  ;;  %v7162_v59 = vadd.f32 %v7048_v24, %v7000_v11  ;;  %v7002_v61 = vadd.f32 %v16430_v1, %v6840_v30  ;;  %v19600_v1 = vld [vmem:[#allocation218_spill] sm:$0xff] }
 0x99e   :  { %v16553_v63 = vpop.permute.xlu1 %6581 }
 0x99f   :  { %v16556_v58 = vpop.permute.xlu0 %6893  ;;  %10162 = vmatprep.mubr.msk.f32.mxu1 %vm5685_vm4, %v7448_v20  ;;  %v7164_v26 = vadd.f32 %v16483_v16, %v7002_v61  ;;  %v19601_v61 = vld [vmem:[#allocation381_spill] sm:$0xff] }
 0x9a0   :  { %7225 = vrot.lane.b32.xlu0 %v19592_v53, %s10586_s14  ;;  %6913 = vrot.lane.b32.xlu1 %v19597_v55, %s10584_s28 }
 0x9a2   :  { %v16565_v7 = vpop.permute.xlu1 %6897 }
 0x9a3   :  { %v7210_v23 = vpop.permute.xlu0 %7209 }
 0x9a4   :  { %v7324_v32 = vadd.f32 %v7210_v23, %v7162_v59  ;;  %6437 = vrot.lane.b32.xlu0 %v19594_v4, %s10581_s15  ;;  %7229 = vrot.lane.b32.xlu1 %v19597_v55, %s10586_s14 }
 0x9a6   :  { %v7214_v21 = vpop.permute.xlu1 %7213  ;;  %v7371_v39 = vadd.f32 %v16386_v48, %v7324_v32 }
 0x9a7   :  { %v16574_v25 = vpop.permute.xlu0 %6421  ;;  %v7326_v28 = vadd.f32 %v7214_v21, %v7164_v26 }
 0x9a8   :  { %6753 = vrot.lane.b32.xlu0 %v19594_v4, %s10583_s27  ;;  %6441 = vrot.lane.b32.xlu1 %v19600_v1, %s10581_s15  ;;  %v7411_v15 = vmax.f32 %v7371_v39, 0.0 }
 0x9a9   :  { %v7373_v24 = vadd.f32 %v16386_v48, %v7326_v28 }
 0x9aa   :  { %v16581_v18 = vpop.permute.xlu1 %6425 }
 0x9ab   :  { %v7413_v20 = vmax.f32 %v7373_v24, 0.0  ;;  %v16583_v62 = vpop.permute.xlu0 %6737 }
 0x9ac   :  { %7069 = vrot.lane.b32.xlu0 %v19594_v4, %s10585_s30  ;;  %6757 = vrot.lane.b32.xlu1 %v19600_v1, %s10583_s27 }
 0x9ad   :  { %v7449_v16 = vmax.f32 %v7411_v15, %v7413_v20  ;;  %v19604_v20 = vld [vmem:[#allocation15_spill] sm:$0xff] }
 0x9ae   :  { %v16589_v60 = vpop.permute.xlu1 %6741 }
 0x9af   :  { %v7054_v11 = vpop.permute.xlu0 %7053  ;;  %10163 = vmatmul.mubr.msk.f32.gmra.mrb[32].mxu1 %vm5685_vm4, %v7449_v16  ;;  %v6355_v16 = vadd.f32 %v16259_v45, %v19604_v20 }
 0x9b0   :  { %6439 = vrot.lane.b32.xlu0 %v19597_v55, %s10581_s15  ;;  %7073 = vrot.lane.b32.xlu1 %v19600_v1, %s10585_s30 }
 0x9b1   :  { %v6517_v4 = vadd.f32 %v16303_v47, %v6355_v16 }
 0x9b2   :  { %v7058_v30 = vpop.permute.xlu1 %7057 }
 0x9b3   :  { %v16596_v59 = vpop.permute.xlu0 %6423 }
 0x9b4   :  { %6755 = vrot.lane.b32.xlu0 %v19597_v55, %s10583_s27  ;;  %6443 = vrot.lane.b32.xlu1 %v19601_v61, %s10581_s15 }
 0x9b6   :  { %v16602_v23 = vpop.permute.xlu1 %6427 }
 0x9b7   :  { %v16604_v32 = vpop.permute.xlu0 %6739 }
 0x9b8   :  { %7071 = vrot.lane.b32.xlu0 %v19597_v55, %s10585_s30  ;;  %6759 = vrot.lane.b32.xlu1 %v19601_v61, %s10583_s27  ;;  %v19605_v55 = vld [vmem:[#allocation53_spill] sm:$0xff] }
 0x9ba   :  { %v16610_v26 = vpop.f32.mrb[26].mxu1  ;;  %v16612_v21 = vpop.permute.xlu1 %6743 }
 0x9bb   :  { %19602 = vst [vmem:[#allocation451_spill] sm:$0xff] %v16610_v26  ;;  %v16614_v39 = vpop.permute.xlu0 %7055  ;;  %v16616_v28 = vpop.f32.mrb[27].mxu1  ;;  %v6357_v26 = vadd.f32 %v16265_v34, %v19525_v12 }
 0x9bc   :  { %19603 = vst [vmem:[#allocation56_spill] sm:$0xff] %v16616_v28  ;;  %6283 = vrot.lane.b32.xlu0 %v19600_v1, %s10580_s29  ;;  %7075 = vrot.lane.b32.xlu1 %v19601_v61, %s10585_s30  ;;  %v6679_v28 = vadd.f32 %v16362_v17, %v6517_v4 }
 0x9bd   :  { %v6519_v45 = vadd.f32 %v16311_v56, %v6357_v26 }
 0x9be   :  { %v16622_v24 = vpop.permute.xlu1 %7059  ;;  %v6841_v20 = vadd.f32 %v16450_v40, %v6679_v28 }
 0x9bf   :  { %v16624_v15 = vpop.permute.xlu0 %6267  ;;  %v6681_v16 = vadd.f32 %v16371_v51, %v6519_v45 }
 0x9c0   :  { %6599 = vrot.lane.b32.xlu0 %v19600_v1, %s10582_s1  ;;  %6287 = vrot.lane.b32.xlu1 %v19605_v55, %s10580_s29  ;;  %v7003_v12 = vadd.f32 %v16510_v52, %v6841_v20 }
 0x9c1   :  { %v6843_v17 = vadd.f32 %v16456_v2, %v6681_v16  ;;  %v19607_v16 = vld [vmem:[#allocation110_spill] sm:$0xff] }
 0x9c2   :  { %v16633_v53 = vpop.permute.xlu1 %6271  ;;  %v7165_v34 = vadd.f32 %v7054_v11, %v7003_v12  ;;  %v19608_v12 = vld [vmem:[#allocation222_spill] sm:$0xff] }
 0x9c3   :  { %v16637_v0 = vpop.permute.xlu0 %6583  ;;  %v7005_v4 = vadd.f32 %v16518_v33, %v6843_v17  ;;  %v6356_v33 = vadd.f32 %v19607_v16, %v16279_v37 }
 0x9c4   :  { %6915 = vrot.lane.b32.xlu0 %v19600_v1, %s10584_s28  ;;  %6603 = vrot.lane.b32.xlu1 %v19605_v55, %s10582_s1 }
 0x9c5   :  { %v7167_v52 = vadd.f32 %v7058_v30, %v7005_v4  ;;  %v6358_v4 = vadd.f32 %v19532_v43, %v16285_v3 }
 0x9c6   :  { %v16646_v47 = vpop.permute.xlu1 %6587 }
 0x9c7   :  { %v16649_v46 = vpop.permute.xlu0 %6899 }
 0x9c8   :  { %7231 = vrot.lane.b32.xlu0 %v19600_v1, %s10586_s14  ;;  %6919 = vrot.lane.b32.xlu1 %v19605_v55, %s10584_s28 }
 0x9ca   :  { %v16657_v56 = vpop.f32.mrb[28].mxu1  ;;  %v16659_v40 = vpop.permute.xlu1 %6903 }
 0x9cb   :  { %19606 = vst [vmem:[#allocation225_spill] sm:$0xff] %v16657_v56  ;;  %v7216_v51 = vpop.permute.xlu0 %7215  ;;  %v16662_v26 = vpop.f32.mrb[29].mxu1 }
 0x9cc   :  { %v7327_v28 = vadd.f32 %v7216_v51, %v7165_v34  ;;  %6285 = vrot.lane.b32.xlu0 %v19601_v61, %s10580_s29  ;;  %7235 = vrot.lane.b32.xlu1 %v19605_v55, %s10586_s14  ;;  %v6518_v34 = vadd.f32 %v16327_v22, %v6356_v33 }
 0x9ce   :  { %v7220_v45 = vpop.permute.xlu1 %7219  ;;  %v7374_v2 = vadd.f32 %v16386_v48, %v7327_v28  ;;  %v6680_v37 = vadd.f32 %v16407_v57, %v6518_v34 }
 0x9cf   :  { %v16669_v11 = vpop.permute.xlu0 %6269  ;;  %v7329_v20 = vadd.f32 %v7220_v45, %v7167_v52  ;;  %v6520_v45 = vadd.f32 %v16333_v36, %v6358_v4 }
 0x9d0   :  { %6601 = vrot.lane.b32.xlu0 %v19601_v61, %s10582_s1  ;;  %6289 = vrot.lane.b32.xlu1 %v19608_v12, %s10580_s29  ;;  %v7414_v51 = vmax.f32 %v7374_v2, 0.0 }
 0x9d1   :  { %v7376_v17 = vadd.f32 %v16386_v48, %v7329_v20  ;;  %v6842_v20 = vadd.f32 %v16471_v27, %v6680_v37  ;;  %v6682_v43 = vadd.f32 %v16416_v10, %v6520_v45 }
 0x9d2   :  { %v16679_v30 = vpop.permute.xlu1 %6273 }
 0x9d3   :  { %v7416_v28 = vmax.f32 %v7376_v17, 0.0  ;;  %v16683_v52 = vpop.permute.xlu0 %6585  ;;  %v7004_v57 = vadd.f32 %v16556_v58, %v6842_v20  ;;  %v6844_v36 = vadd.f32 %v16477_v38, %v6682_v43 }
 0x9d4   :  { %6917 = vrot.lane.b32.xlu0 %v19601_v61, %s10584_s28  ;;  %6605 = vrot.lane.b32.xlu1 %v19608_v12, %s10582_s1 }
 0x9d5   :  { %v7450_v22 = vmax.f32 %v7414_v51, %v7416_v28  ;;  %v7166_v27 = vadd.f32 %v16614_v39, %v7004_v57  ;;  %v7006_v10 = vadd.f32 %v16565_v7, %v6844_v36  ;;  %v19609_v7 = vld [vmem:[#allocation24_spill] sm:$0xff] }
 0x9d6   :  { %v16692_v16 = vpop.permute.xlu1 %6589 }
 0x9d7   :  { %v16695_v3 = vpop.permute.xlu0 %6901  ;;  %10165 = vmatprep.mubr.msk.f32.mxu1 %vm5685_vm4, %v7450_v22  ;;  %v7168_v58 = vadd.f32 %v16622_v24, %v7006_v10 }
 0x9d8   :  { %7233 = vrot.lane.b32.xlu0 %v19601_v61, %s10586_s14  ;;  %6921 = vrot.lane.b32.xlu1 %v19608_v12, %s10584_s28 }
 0x9da   :  { %v16705_v2 = vpop.permute.xlu1 %6905 }
 0x9db   :  { %v7218_v33 = vpop.permute.xlu0 %7217 }
 0x9dc   :  { %v7328_v17 = vadd.f32 %v7218_v33, %v7166_v27  ;;  %6445 = vrot.lane.b32.xlu0 %v19605_v55, %s10581_s15  ;;  %7237 = vrot.lane.b32.xlu1 %v19608_v12, %s10586_s14  ;;  %v19610_v27 = vld [vmem:[#allocation12_spill] sm:$0xff] }
 0x9de   :  { %v7222_v34 = vpop.permute.xlu1 %7221  ;;  %v7375_v4 = vadd.f32 %v16386_v48, %v7328_v17 }
 0x9df   :  { %v16714_v38 = vpop.permute.xlu0 %6429  ;;  %v7330_v39 = vadd.f32 %v7222_v34, %v7168_v58 }
 0x9e0   :  { %6761 = vrot.lane.b32.xlu0 %v19605_v55, %s10583_s27  ;;  %6449 = vrot.lane.b32.xlu1 %v19609_v7, %s10581_s15  ;;  %v7415_v37 = vmax.f32 %v7375_v4, 0.0 }
 0x9e1   :  { %v7377_v51 = vadd.f32 %v16386_v48, %v7330_v39  ;;  %v6359_v39 = vadd.f32 %v16349_v6, %v19540_v41 }
 0x9e2   :  { %v16721_v28 = vpop.permute.xlu1 %6433 }
 0x9e3   :  { %v7417_v45 = vmax.f32 %v7377_v51, 0.0  ;;  %v16723_v22 = vpop.permute.xlu0 %6745  ;;  %v19611_v51 = vld [vmem:[#allocation139_spill] sm:$0xff] }
 0x9e4   :  { %7077 = vrot.lane.b32.xlu0 %v19605_v55, %s10585_s30  ;;  %6765 = vrot.lane.b32.xlu1 %v19609_v7, %s10583_s27 }
 0x9e5   :  { %v7451_v24 = vmax.f32 %v7415_v37, %v7417_v45  ;;  %v6521_v37 = vadd.f32 %v16441_v31, %v6359_v39 }
 0x9e6   :  { %v16729_v20 = vpop.permute.xlu1 %6749 }
 0x9e7   :  { %v7062_v43 = vpop.permute.xlu0 %7061  ;;  %10166 = vmatmul.mubr.msk.f32.gmra.mrb[34].mxu1 %vm5685_vm4, %v7451_v24  ;;  %v19612_v24 = vld [vmem:[#allocation227_spill] sm:$0xff]  ;;  %v6683_v1 = vadd.f32 %v16498_v54, %v6521_v37 }
 0x9e8   :  { %6447 = vrot.lane.b32.xlu0 %v19608_v12, %s10581_s15  ;;  %7081 = vrot.lane.b32.xlu1 %v19609_v7, %s10585_s30 }
 0x9e9   :  { %v6845_v6 = vadd.f32 %v16583_v62, %v6683_v1 }
 0x9ea   :  { %v7066_v57 = vpop.permute.xlu1 %7065 }
 0x9eb   :  { %v16736_v36 = vpop.permute.xlu0 %6431 }
 0x9ec   :  { %6763 = vrot.lane.b32.xlu0 %v19608_v12, %s10583_s27  ;;  %6451 = vrot.lane.b32.xlu1 %v19610_v27, %s10581_s15 }
 0x9ee   :  { %v16742_v10 = vpop.permute.xlu1 %6435 }
 0x9ef   :  { %v16744_v33 = vpop.permute.xlu0 %6747 }
 0x9f0   :  { %7079 = vrot.lane.b32.xlu0 %v19608_v12, %s10585_s30  ;;  %6767 = vrot.lane.b32.xlu1 %v19610_v27, %s10583_s27  ;;  %v19613_v12 = vld [vmem:[#allocation352_spill] sm:$0xff] }
 0x9f1   :  { %v6361_v55 = vadd.f32 %v19613_v12, %v19612_v24  ;;  %v7007_v12 = vadd.f32 %v16649_v46, %v6845_v6 }
 0x9f2   :  { %v16750_v17 = vpop.permute.xlu1 %6751 }
 0x9f3   :  { %v7064_v58 = vpop.permute.xlu0 %7063  ;;  %v6523_v41 = vadd.f32 %v16448_v5, %v6361_v55  ;;  %v7169_v37 = vadd.f32 %v7062_v43, %v7007_v12  ;;  %v19614_v43 = vld [vmem:[#allocation138_spill] sm:$0xff] }
 0x9f4   :  { %6291 = vrot.lane.b32.xlu0 %v19609_v7, %s10580_s29  ;;  %7083 = vrot.lane.b32.xlu1 %v19610_v27, %s10585_s30  ;;  %v6360_v6 = vadd.f32 %v19614_v43, %v16393_v35 }
 0x9f5   :  { %v6685_v39 = vadd.f32 %v16507_v44, %v6523_v41 }
 0x9f6   :  { %v16756_v34 = vpop.permute.xlu1 %7067  ;;  %v6522_v12 = vadd.f32 %v16463_v9, %v6360_v6 }
 0x9f7   :  { %v16758_v4 = vpop.permute.xlu0 %6275  ;;  %v6847_v54 = vadd.f32 %v16589_v60, %v6685_v39 }
 0x9f8   :  { %6607 = vrot.lane.b32.xlu0 %v19609_v7, %s10582_s1  ;;  %6295 = vrot.lane.b32.xlu1 %v19611_v51, %s10580_s29  ;;  %v6684_v35 = vadd.f32 %v16542_v49, %v6522_v12 }
 0x9f9   :  { %v7009_v55 = vadd.f32 %v16659_v40, %v6847_v54  ;;  %v19615_v40 = vld [vmem:[#allocation26_spill] sm:$0xff]  ;;  %v19616_v54 = vld [vmem:[#allocation379_spill] sm:$0xff] }
 0x9fa   :  { %v16767_v45 = vpop.permute.xlu1 %6279 }
 0x9fb   :  { %v16771_v61 = vpop.permute.xlu0 %6591  ;;  %v7171_v44 = vadd.f32 %v7066_v57, %v7009_v55 }
 0x9fc   :  { %6923 = vrot.lane.b32.xlu0 %v19609_v7, %s10584_s28  ;;  %6611 = vrot.lane.b32.xlu1 %v19611_v51, %s10582_s1 }
 0x9fe   :  { %v16780_v31 = vpop.permute.xlu1 %6595 }
 0x9ff   :  { %v16783_v56 = vpop.permute.xlu0 %6907 }
 0xa00   :  { %7239 = vrot.lane.b32.xlu0 %v19609_v7, %s10586_s14  ;;  %6927 = vrot.lane.b32.xlu1 %v19611_v51, %s10584_s28 }
 0xa02   :  { %v16791_v5 = vpop.permute.xlu1 %6911 }
 0xa03   :  { %v7224_v1 = vpop.permute.xlu0 %7223 }
 0xa04   :  { %v7331_v62 = vadd.f32 %v7224_v1, %v7169_v37  ;;  %6293 = vrot.lane.b32.xlu0 %v19610_v27, %s10580_s29  ;;  %7243 = vrot.lane.b32.xlu1 %v19611_v51, %s10586_s14  ;;  %v6362_v37 = vadd.f32 %v19616_v54, %v16403_v19 }
 0xa06   :  { %v7228_v46 = vpop.permute.xlu1 %7227  ;;  %v7378_v24 = vadd.f32 %v16386_v48, %v7331_v62 }
 0xa07   :  { %v16799_v41 = vpop.permute.xlu0 %6277  ;;  %v7333_v60 = vadd.f32 %v7228_v46, %v7171_v44  ;;  %v6524_v44 = vadd.f32 %v16469_v50, %v6362_v37  ;;  %v6846_v46 = vadd.f32 %v16604_v32, %v6684_v35 }
 0xa08   :  { %6609 = vrot.lane.b32.xlu0 %v19610_v27, %s10582_s1  ;;  %6297 = vrot.lane.b32.xlu1 %v19615_v40, %s10580_s29  ;;  %v7418_v55 = vmax.f32 %v7378_v24, 0.0 }
 0xa09   :  { %v7380_v39 = vadd.f32 %v16386_v48, %v7333_v60  ;;  %v6686_v19 = vadd.f32 %v16553_v63, %v6524_v44  ;;  %v7008_v49 = vadd.f32 %v16695_v3, %v6846_v46 }
 0xa0a   :  { %v16809_v57 = vpop.permute.xlu1 %6281 }
 0xa0b   :  { %v7420_v1 = vmax.f32 %v7380_v39, 0.0  ;;  %v16813_v62 = vpop.permute.xlu0 %6593  ;;  %v6848_v50 = vadd.f32 %v16612_v21, %v6686_v19  ;;  %v7170_v43 = vadd.f32 %v7064_v58, %v7008_v49 }
 0xa0c   :  { %6925 = vrot.lane.b32.xlu0 %v19610_v27, %s10584_s28  ;;  %6613 = vrot.lane.b32.xlu1 %v19615_v40, %s10582_s1 }
 0xa0d   :  { %v7452_v9 = vmax.f32 %v7418_v55, %v7420_v1  ;;  %v7010_v6 = vadd.f32 %v16705_v2, %v6848_v50  ;;  %v19617_v2 = vld [vmem:[#allocation353_spill] sm:$0xff]  ;;  %v19618_v50 = vld [vmem:[#allocation448_spill] sm:$0xff] }
 0xa0e   :  { %v16822_v60 = vpop.permute.xlu1 %6597 }
 0xa0f   :  { %v16825_v24 = vpop.permute.xlu0 %6909  ;;  %10168 = vmatprep.mubr.msk.f32.mxu1 %vm5685_vm4, %v7452_v9  ;;  %v7172_v3 = vadd.f32 %v16756_v34, %v7010_v6 }
 0xa10   :  { %7241 = vrot.lane.b32.xlu0 %v19610_v27, %s10586_s14  ;;  %6929 = vrot.lane.b32.xlu1 %v19615_v40, %s10584_s28 }
 0xa12   :  { %v16834_v32 = vpop.permute.xlu1 %6913 }
 0xa13   :  { %v7226_v63 = vpop.permute.xlu0 %7225 }
 0xa14   :  { %v7332_v39 = vadd.f32 %v7226_v63, %v7170_v43  ;;  %6453 = vrot.lane.b32.xlu0 %v19611_v51, %s10581_s15  ;;  %7245 = vrot.lane.b32.xlu1 %v19615_v40, %s10586_s14 }
 0xa16   :  { %v7230_v12 = vpop.permute.xlu1 %7229  ;;  %v7379_v54 = vadd.f32 %v16386_v48, %v7332_v39 }
 0xa17   :  { %v16843_v37 = vpop.permute.xlu0 %6437  ;;  %v7334_v21 = vadd.f32 %v7230_v12, %v7172_v3 }
 0xa18   :  { %6769 = vrot.lane.b32.xlu0 %v19611_v51, %s10583_s27  ;;  %6457 = vrot.lane.b32.xlu1 %v19617_v2, %s10581_s15  ;;  %v7419_v1 = vmax.f32 %v7379_v54, 0.0  ;;  %v19620_v54 = vld [vmem:[#allocation224_spill] sm:$0xff] }
 0xa19   :  { %v7381_v58 = vadd.f32 %v16386_v48, %v7334_v21  ;;  %v6363_v21 = vadd.f32 %v16485_v13, %v19620_v54 }
 0xa1a   :  { %v16850_v55 = vpop.permute.xlu1 %6441 }
 0xa1b   :  { %v7421_v35 = vmax.f32 %v7381_v58, 0.0  ;;  %v16852_v44 = vpop.permute.xlu0 %6753  ;;  %v19621_v58 = vld [vmem:[#allocation134_spill] sm:$0xff] }
 0xa1c   :  { %7085 = vrot.lane.b32.xlu0 %v19611_v51, %s10585_s30  ;;  %6773 = vrot.lane.b32.xlu1 %v19617_v2, %s10583_s27 }
 0xa1d   :  { %v7453_v34 = vmax.f32 %v7419_v1, %v7421_v35  ;;  %v6525_v1 = vadd.f32 %v16574_v25, %v6363_v21 }
 0xa1e   :  { %v16858_v9 = vpop.permute.xlu1 %6757 }
 0xa1f   :  { %v7070_v46 = vpop.permute.xlu0 %7069  ;;  %10169 = vmatmul.mubr.msk.f32.gmra.mrb[36].mxu1 %vm5685_vm4, %v7453_v34  ;;  %v19623_v34 = vld [vmem:[#allocation228_spill] sm:$0xff] }
 0xa20   :  { %6455 = vrot.lane.b32.xlu0 %v19615_v40, %s10581_s15  ;;  %7089 = vrot.lane.b32.xlu1 %v19617_v2, %s10585_s30  ;;  %v6365_v27 = vadd.f32 %v16494_v8, %v19623_v34 }
 0xa22   :  { %v7074_v19 = vpop.permute.xlu1 %7073  ;;  %v6527_v13 = vadd.f32 %v16581_v18, %v6365_v27 }
 0xa23   :  { %v16865_v49 = vpop.permute.xlu0 %6439 }
 0xa24   :  { %6771 = vrot.lane.b32.xlu0 %v19615_v40, %s10583_s27  ;;  %6459 = vrot.lane.b32.xlu1 %v19618_v50, %s10581_s15  ;;  %v6689_v21 = vadd.f32 %v16646_v47, %v6527_v13 }
 0xa26   :  { %v16871_v43 = vpop.permute.xlu1 %6443 }
 0xa27   :  { %v16873_v6 = vpop.permute.xlu0 %6755 }
 0xa28   :  { %7087 = vrot.lane.b32.xlu0 %v19615_v40, %s10585_s30  ;;  %6775 = vrot.lane.b32.xlu1 %v19618_v50, %s10583_s27 }
 0xa2a   :  { %v16879_v63 = vpop.permute.xlu1 %6759 }
 0xa2b   :  { %v7072_v39 = vpop.permute.xlu0 %7071 }
 0xa2c   :  { %6299 = vrot.lane.b32.xlu0 %v19617_v2, %s10580_s29  ;;  %7091 = vrot.lane.b32.xlu1 %v19618_v50, %s10585_s30 }
 0xa2e   :  { %v16885_v3 = vpop.permute.xlu1 %7075 }
 0xa2f   :  { %v16887_v12 = vpop.permute.xlu0 %6283 }
 0xa30   :  { %19619 = vst [vmem:[#allocation58_spill] sm:$0xff] %v16887_v12  ;;  %6615 = vrot.lane.b32.xlu0 %v19617_v2, %s10582_s1  ;;  %6303 = vrot.lane.b32.xlu1 %v19621_v58, %s10580_s29  ;;  %v6687_v12 = vadd.f32 %v16637_v0, %v6525_v1  ;;  %v6851_v0 = vadd.f32 %v16729_v20, %v6689_v21 }
 0xa32   :  { %v16896_v35 = vpop.permute.xlu1 %6287  ;;  %v6849_v54 = vadd.f32 %v16723_v22, %v6687_v12  ;;  %v7013_v22 = vadd.f32 %v16791_v5, %v6851_v0  ;;  %v19625_v5 = vld [vmem:[#allocation450_spill] sm:$0xff]  ;;  %v19626_v0 = vld [vmem:[#allocation380_spill] sm:$0xff] }
 0xa33   :  { %19622 = vst [vmem:[#allocation229_spill] sm:$0xff] %v16896_v35  ;;  %v16900_v7 = vpop.permute.xlu0 %6599 }
 0xa34   :  { %6931 = vrot.lane.b32.xlu0 %v19617_v2, %s10584_s28  ;;  %6619 = vrot.lane.b32.xlu1 %v19621_v58, %s10582_s1  ;;  %v7011_v8 = vadd.f32 %v16783_v56, %v6849_v54  ;;  %v7175_v47 = vadd.f32 %v7074_v19, %v7013_v22 }
 0xa36   :  { %v16909_v25 = vpop.permute.xlu1 %6603  ;;  %v7173_v1 = vadd.f32 %v7070_v46, %v7011_v8  ;;  %v19624_v46 = vld [vmem:[#allocation51_spill] sm:$0xff] }
 0xa37   :  { %v16912_v35 = vpop.permute.xlu0 %6915  ;;  %v6364_v54 = vadd.f32 %v19624_v46, %v16526_v14 }
 0xa38   :  { %7247 = vrot.lane.b32.xlu0 %v19617_v2, %s10586_s14  ;;  %6935 = vrot.lane.b32.xlu1 %v19621_v58, %s10584_s28 }
 0xa39   :  { %v6526_v8 = vadd.f32 %v16596_v59, %v6364_v54 }
 0xa3a   :  { %v16920_v18 = vpop.permute.xlu1 %6919 }
 0xa3b   :  { %v7232_v27 = vpop.permute.xlu0 %7231  ;;  %v6688_v14 = vadd.f32 %v16683_v52, %v6526_v8 }
 0xa3c   :  { %v7335_v12 = vadd.f32 %v7232_v27, %v7173_v1  ;;  %6301 = vrot.lane.b32.xlu0 %v19618_v50, %s10580_s29  ;;  %7251 = vrot.lane.b32.xlu1 %v19621_v58, %s10586_s14  ;;  %v6366_v1 = vadd.f32 %v19626_v0, %v16538_v42 }
 0xa3e   :  { %v7236_v56 = vpop.permute.xlu1 %7235  ;;  %v7382_v34 = vadd.f32 %v16386_v48, %v7335_v12 }
 0xa3f   :  { %v16928_v13 = vpop.permute.xlu0 %6285  ;;  %v7337_v20 = vadd.f32 %v7236_v56, %v7175_v47  ;;  %v6528_v47 = vadd.f32 %v16602_v23, %v6366_v1  ;;  %v6850_v56 = vadd.f32 %v16744_v33, %v6688_v14 }
 0xa40   :  { %6617 = vrot.lane.b32.xlu0 %v19618_v50, %s10582_s1  ;;  %6305 = vrot.lane.b32.xlu1 %v19625_v5, %s10580_s29  ;;  %v7422_v22 = vmax.f32 %v7382_v34, 0.0 }
 0xa41   :  { %v7384_v21 = vadd.f32 %v16386_v48, %v7337_v20  ;;  %v6690_v42 = vadd.f32 %v16692_v16, %v6528_v47  ;;  %v7012_v52 = vadd.f32 %v16825_v24, %v6850_v56 }
 0xa42   :  { %v16938_v19 = vpop.permute.xlu1 %6289 }
 0xa43   :  { %v7424_v27 = vmax.f32 %v7384_v21, 0.0  ;;  %v16942_v12 = vpop.permute.xlu0 %6601  ;;  %v6852_v23 = vadd.f32 %v16750_v17, %v6690_v42  ;;  %v7174_v46 = vadd.f32 %v7072_v39, %v7012_v52 }
 0xa44   :  { %6933 = vrot.lane.b32.xlu0 %v19618_v50, %s10584_s28  ;;  %6621 = vrot.lane.b32.xlu1 %v19625_v5, %s10582_s1 }
 0xa45   :  { %v7454_v59 = vmax.f32 %v7422_v22, %v7424_v27  ;;  %v7014_v16 = vadd.f32 %v16834_v32, %v6852_v23  ;;  %v19629_v32 = vld [vmem:[#allocation144_spill] sm:$0xff] }
 0xa46   :  { %v16951_v20 = vpop.permute.xlu1 %6605 }
 0xa47   :  { %v16954_v34 = vpop.permute.xlu0 %6917  ;;  %10171 = vmatprep.mubr.msk.f32.mxu1 %vm5685_vm4, %v7454_v59  ;;  %v7176_v24 = vadd.f32 %v16885_v3, %v7014_v16 }
 0xa48   :  { %7249 = vrot.lane.b32.xlu0 %v19618_v50, %s10586_s14  ;;  %6937 = vrot.lane.b32.xlu1 %v19625_v5, %s10584_s28 }
 0xa4a   :  { %v16963_v33 = vpop.f32.mrb[30].mxu1  ;;  %v16965_v54 = vpop.permute.xlu1 %6921 }
 0xa4b   :  { %19627 = vst [vmem:[#allocation231_spill] sm:$0xff] %v16963_v33  ;;  %v7234_v21 = vpop.permute.xlu0 %7233  ;;  %v16968_v8 = vpop.f32.mrb[31].mxu1 }
 0xa4c   :  { %19628 = vst [vmem:[#allocation235_spill] sm:$0xff] %v16968_v8  ;;  %v7336_v0 = vadd.f32 %v7234_v21, %v7174_v46  ;;  %6461 = vrot.lane.b32.xlu0 %v19621_v58, %s10581_s15  ;;  %7253 = vrot.lane.b32.xlu1 %v19625_v5, %s10586_s14 }
 0xa4e   :  { %v7238_v17 = vpop.permute.xlu1 %7237  ;;  %v7383_v39 = vadd.f32 %v16386_v48, %v7336_v0 }
 0xa4f   :  { %v16976_v1 = vpop.permute.xlu0 %6445  ;;  %v7338_v22 = vadd.f32 %v7238_v17, %v7176_v24 }
 0xa50   :  { %6777 = vrot.lane.b32.xlu0 %v19621_v58, %s10583_s27  ;;  %6465 = vrot.lane.b32.xlu1 %v19629_v32, %s10581_s15  ;;  %v7423_v47 = vmax.f32 %v7383_v39, 0.0 }
 0xa51   :  { %v7385_v27 = vadd.f32 %v16386_v48, %v7338_v22  ;;  %v19632_v22 = vld [vmem:[#allocation141_spill] sm:$0xff] }
 0xa52   :  { %v16983_v14 = vpop.permute.xlu1 %6449 }
 0xa53   :  { %v7425_v59 = vmax.f32 %v7385_v27, 0.0  ;;  %v16985_v56 = vpop.permute.xlu0 %6761  ;;  %v6367_v27 = vadd.f32 %v16624_v15, %v19632_v22 }
 0xa54   :  { %7093 = vrot.lane.b32.xlu0 %v19621_v58, %s10585_s30  ;;  %6781 = vrot.lane.b32.xlu1 %v19629_v32, %s10583_s27  ;;  %v19630_v58 = vld [vmem:[#allocation23_spill] sm:$0xff] }
 0xa55   :  { %v7455_v3 = vmax.f32 %v7423_v47, %v7425_v59  ;;  %v6529_v47 = vadd.f32 %v16714_v38, %v6367_v27 }
 0xa56   :  { %v16991_v42 = vpop.permute.xlu1 %6765 }
 0xa57   :  { %v7078_v52 = vpop.permute.xlu0 %7077  ;;  %10172 = vmatmul.mubr.msk.f32.gmra.mrb[38].mxu1 %vm5685_vm4, %v7455_v3  ;;  %v19635_v3 = vld [vmem:[#allocation147_spill] sm:$0xff] }
 0xa58   :  { %6463 = vrot.lane.b32.xlu0 %v19625_v5, %s10581_s15  ;;  %7097 = vrot.lane.b32.xlu1 %v19629_v32, %s10585_s30  ;;  %v6369_v33 = vadd.f32 %v16633_v53, %v19635_v3 }
 0xa5a   :  { %v7082_v23 = vpop.permute.xlu1 %7081  ;;  %v6531_v15 = vadd.f32 %v16721_v28, %v6369_v33 }
 0xa5b   :  { %v16998_v46 = vpop.permute.xlu0 %6447 }
 0xa5c   :  { %6779 = vrot.lane.b32.xlu0 %v19625_v5, %s10583_s27  ;;  %6467 = vrot.lane.b32.xlu1 %v19630_v58, %s10581_s15  ;;  %v6693_v27 = vadd.f32 %v16780_v31, %v6531_v15  ;;  %v19636_v31 = vld [vmem:[#allocation140_spill] sm:$0xff] }
 0xa5e   :  { %v17004_v16 = vpop.permute.xlu1 %6451 }
 0xa5f   :  { %v17006_v21 = vpop.permute.xlu0 %6763 }
 0xa60   :  { %7095 = vrot.lane.b32.xlu0 %v19625_v5, %s10585_s30  ;;  %6783 = vrot.lane.b32.xlu1 %v19630_v58, %s10583_s27  ;;  %v19633_v5 = vld [vmem:[#allocation25_spill] sm:$0xff] }
 0xa62   :  { %v17012_v0 = vpop.permute.xlu1 %6767 }
 0xa63   :  { %v7080_v24 = vpop.permute.xlu0 %7079 }
 0xa64   :  { %6623 = vrot.lane.b32.xlu0 %v19629_v32, %s10582_s1  ;;  %7099 = vrot.lane.b32.xlu1 %v19630_v58, %s10585_s30 }
 0xa66   :  { %v17018_v17 = vpop.permute.xlu1 %7083 }
 0xa67   :  { %v17020_v39 = vpop.permute.xlu0 %6291 }
 0xa68   :  { %19631 = vst [vmem:[#allocation382_spill] sm:$0xff] %v17020_v39  ;;  %6939 = vrot.lane.b32.xlu0 %v19629_v32, %s10584_s28  ;;  %6627 = vrot.lane.b32.xlu1 %v19633_v5, %s10582_s1  ;;  %v6691_v39 = vadd.f32 %v16771_v61, %v6529_v47  ;;  %v6855_v61 = vadd.f32 %v16858_v9, %v6693_v27 }
 0xa6a   :  { %v17029_v59 = vpop.permute.xlu1 %6295  ;;  %v6853_v22 = vadd.f32 %v16852_v44, %v6691_v39  ;;  %v7017_v44 = vadd.f32 %v16920_v18, %v6855_v61 }
 0xa6b   :  { %19634 = vst [vmem:[#allocation383_spill] sm:$0xff] %v17029_v59  ;;  %v17033_v8 = vpop.permute.xlu0 %6607 }
 0xa6c   :  { %7255 = vrot.lane.b32.xlu0 %v19629_v32, %s10586_s14  ;;  %6943 = vrot.lane.b32.xlu1 %v19633_v5, %s10584_s28  ;;  %v7015_v53 = vadd.f32 %v16912_v35, %v6853_v22  ;;  %v7179_v35 = vadd.f32 %v7082_v23, %v7017_v44 }
 0xa6e   :  { %v17042_v38 = vpop.permute.xlu1 %6611  ;;  %v7177_v32 = vadd.f32 %v7078_v52, %v7015_v53  ;;  %v19637_v52 = vld [vmem:[#allocation133_spill] sm:$0xff]  ;;  %v19638_v53 = vld [vmem:[#allocation351_spill] sm:$0xff] }
 0xa6f   :  { %v17045_v59 = vpop.permute.xlu0 %6923  ;;  %v6368_v22 = vadd.f32 %v19637_v52, %v16669_v11  ;;  %v6370_v61 = vadd.f32 %v19638_v53, %v16679_v30  ;;  %v19640_v53 = vld [vmem:[#allocation150_spill] sm:$0xff] }
 0xa70   :  { %6625 = vrot.lane.b32.xlu0 %v19630_v58, %s10582_s1  ;;  %7259 = vrot.lane.b32.xlu1 %v19633_v5, %s10586_s14 }
 0xa71   :  { %v6530_v27 = vadd.f32 %v16736_v36, %v6368_v22 }
 0xa72   :  { %v17053_v28 = vpop.permute.xlu1 %6927 }
 0xa73   :  { %v7240_v33 = vpop.permute.xlu0 %7239  ;;  %v6692_v11 = vadd.f32 %v16813_v62, %v6530_v27 }
 0xa74   :  { %v7339_v39 = vadd.f32 %v7240_v33, %v7177_v32  ;;  %6941 = vrot.lane.b32.xlu0 %v19630_v58, %s10584_s28  ;;  %6629 = vrot.lane.b32.xlu1 %v19636_v31, %s10582_s1 }
 0xa76   :  { %v7244_v47 = vpop.permute.xlu1 %7243  ;;  %v7386_v3 = vadd.f32 %v16386_v48, %v7339_v39 }
 0xa77   :  { %v17061_v15 = vpop.permute.xlu0 %6293  ;;  %v7341_v9 = vadd.f32 %v7244_v47, %v7179_v35  ;;  %v19639_v47 = vld [vmem:[#allocation449_spill] sm:$0xff] }
 0xa78   :  { %7257 = vrot.lane.b32.xlu0 %v19630_v58, %s10586_s14  ;;  %6945 = vrot.lane.b32.xlu1 %v19636_v31, %s10584_s28  ;;  %v7426_v32 = vmax.f32 %v7386_v3, 0.0  ;;  %v6854_v58 = vadd.f32 %v16873_v6, %v6692_v11 }
 0xa79   :  { %v7388_v18 = vadd.f32 %v16386_v48, %v7341_v9  ;;  %v6532_v48 = vadd.f32 %v16742_v10, %v6370_v61 }
 0xa7a   :  { %v17071_v23 = vpop.permute.xlu1 %6297  ;;  %v7016_v62 = vadd.f32 %v16954_v34, %v6854_v58 }
 0xa7b   :  { %v7428_v44 = vmax.f32 %v7388_v18, 0.0  ;;  %v17075_v33 = vpop.permute.xlu0 %6609  ;;  %v6694_v30 = vadd.f32 %v16822_v60, %v6532_v48 }
 0xa7c   :  { %6785 = vrot.lane.b32.xlu0 %v19633_v5, %s10583_s27  ;;  %7261 = vrot.lane.b32.xlu1 %v19636_v31, %s10586_s14  ;;  %v7178_v3 = vadd.f32 %v7080_v24, %v7016_v62  ;;  %v17111_v24 = vld [vmem:[%s17988_s4] ss:$0 sm:$0xff] }
 0xa7d   :  { %v7456_v36 = vmax.f32 %v7426_v32, %v7428_v44  ;;  %v6856_v10 = vadd.f32 %v16879_v63, %v6694_v30 }
 0xa7e   :  { %v17084_v39 = vpop.permute.xlu1 %6613 }
 0xa7f   :  { %v17087_v35 = vpop.permute.xlu0 %6925  ;;  %10174 = vmatprep.mubr.msk.f32.mxu1 %vm5685_vm4, %v7456_v36  ;;  %v7018_v60 = vadd.f32 %v16965_v54, %v6856_v10 }
 0xa80   :  { %7101 = vrot.lane.b32.xlu0 %v19633_v5, %s10585_s30  ;;  %6789 = vrot.lane.b32.xlu1 %v19639_v47, %s10583_s27 }
 0xa81   :  { %v7180_v34 = vadd.f32 %v17018_v17, %v7018_v60 }
 0xa82   :  { %v17096_v6 = vpop.f32.mrb[32].mxu1  ;;  %v17098_v9 = vpop.permute.xlu1 %6929 }
 0xa83   :  { %v7242_v52 = vpop.permute.xlu0 %7241  ;;  %v17101_v22 = vpop.f32.mrb[33].mxu1 }
 0xa84   :  { %v7340_v18 = vadd.f32 %v7242_v52, %v7178_v3  ;;  %6787 = vrot.lane.b32.xlu0 %v19636_v31, %s10583_s27  ;;  %7105 = vrot.lane.b32.xlu1 %v19639_v47, %s10585_s30 }
 0xa86   :  { %v7246_v63 = vpop.permute.xlu1 %7245  ;;  %v7387_v54 = vadd.f32 %v17111_v24, %v7340_v18 }
 0xa87   :  { %v17114_v5 = vpop.permute.xlu0 %6453  ;;  %v7342_v27 = vadd.f32 %v7246_v63, %v7180_v34  ;;  %v19642_v34 = vld [vmem:[#allocation126_spill] sm:$0xff] }
 0xa88   :  { %7103 = vrot.lane.b32.xlu0 %v19636_v31, %s10585_s30  ;;  %6791 = vrot.lane.b32.xlu1 %v19640_v53, %s10583_s27  ;;  %v7427_v32 = vmax.f32 %v7387_v54, 0.0  ;;  %v6371_v63 = vadd.f32 %v16758_v4, %v19642_v34  ;;  %v19643_v54 = vld [vmem:[#allocation56_spill] sm:$0xff]  ;;  %v19645_v4 = vld [vmem:[#allocation451_spill] sm:$0xff] }
 0xa89   :  { %v7389_v61 = vadd.f32 %v17111_v24, %v7342_v27 }
 0xa8a   :  { %v17121_v17 = vpop.permute.xlu1 %6457  ;;  %v6533_v27 = vadd.f32 %v16843_v37, %v6371_v63 }
 0xa8b   :  { %v7429_v44 = vmax.f32 %v7389_v61, 0.0  ;;  %v17123_v11 = vpop.permute.xlu0 %6769  ;;  %v19644_v61 = vld [vmem:[#allocation446_spill] sm:$0xff] }
 0xa8c   :  { %6947 = vrot.lane.b32.xlu0 %v19639_v47, %s10584_s28  ;;  %7107 = vrot.lane.b32.xlu1 %v19640_v53, %s10585_s30 }
 0xa8d   :  { %v7457_v48 = vmax.f32 %v7427_v32, %v7429_v44  ;;  %v6695_v44 = vadd.f32 %v16900_v7, %v6533_v27 }
 0xa8e   :  { %v17129_v36 = vpop.permute.xlu1 %6773 }
 0xa8f   :  { %v7086_v31 = vpop.permute.xlu0 %7085  ;;  %10175 = vmatmul.mubr.msk.f32.gmra.mrb[40].mxu1 %vm5685_vm4, %v7457_v48 }
 0xa90   :  { %7263 = vrot.lane.b32.xlu0 %v19639_v47, %s10586_s14  ;;  %6951 = vrot.lane.b32.xlu1 %v16544_v29, %s10584_s28  ;;  %v19641_v47 = vld [vmem:[#allocation354_spill] sm:$0xff] }
 0xa92   :  { %v7090_v58 = vpop.permute.xlu1 %7089 }
 0xa93   :  { %v17136_v30 = vpop.permute.xlu0 %6455 }
 0xa94   :  { %6949 = vrot.lane.b32.xlu0 %v19640_v53, %s10584_s28  ;;  %7267 = vrot.lane.b32.xlu1 %v16544_v29, %s10586_s14 }
 0xa96   :  { %v17142_v62 = vpop.permute.xlu1 %6459 }
 0xa97   :  { %v17144_v10 = vpop.permute.xlu0 %6771 }
 0xa98   :  { %7265 = vrot.lane.b32.xlu0 %v19640_v53, %s10586_s14  ;;  %6953 = vrot.lane.b32.xlu1 %v19641_v47, %s10584_s28  ;;  %s10594_s28 = smov 120  }
 0xa9a   :  { %v17150_v3 = vpop.permute.xlu1 %6775 }
 0xa9b   :  { %v7088_v60 = vpop.permute.xlu0 %7087 }
 0xa9c   :  { %7109 = vrot.lane.b32.xlu0 %v16544_v29, %s10585_s30  ;;  %7269 = vrot.lane.b32.xlu1 %v19641_v47, %s10586_s14  ;;  %v6373_v29 = vadd.f32 %v16767_v45, %v19644_v61 }
 0xa9e   :  { %v7092_v52 = vpop.permute.xlu1 %7091  ;;  %v6535_v48 = vadd.f32 %v16850_v55, %v6373_v29 }
 0xa9f   :  { %v6300_v18 = vpop.permute.xlu0 %6299 }
 0xaa0   :  { %7111 = vrot.lane.b32.xlu0 %v19641_v47, %s10585_s30  ;;  %7113 = vrot.lane.b32.xlu1 %v19643_v54, %s10585_s30  ;;  %v6857_v47 = vadd.f32 %v16985_v56, %v6695_v44  ;;  %v6697_v37 = vadd.f32 %v16909_v25, %v6535_v48  ;;  %v19646_v25 = vld [vmem:[#allocation225_spill] sm:$0xff] }
 0xaa2   :  { %v6304_v53 = vpop.permute.xlu1 %6303  ;;  %v7019_v45 = vadd.f32 %v17045_v59, %v6857_v47  ;;  %v6859_v7 = vadd.f32 %v16991_v42, %v6697_v37  ;;  %v19647_v42 = vld [vmem:[#allocation344_spill] sm:$0xff]  ;;  %v19648_v37 = vld [vmem:[#allocation349_spill] sm:$0xff] }
 0xaa3   :  { %v17165_v32 = vpop.permute.xlu0 %6615 }
 0xaa4   :  { %7271 = vrot.lane.b32.xlu0 %v19643_v54, %s10586_s14  ;;  %7115 = vrot.lane.b32.xlu1 %v19645_v4, %s10585_s30  ;;  %v7181_v54 = vadd.f32 %v7086_v31, %v7019_v45  ;;  %v7021_v56 = vadd.f32 %v17053_v28, %v6859_v7  ;;  %v6372_v31 = vadd.f32 %v19647_v42, %v16799_v41 }
 0xaa5   :  { %v6374_v45 = vadd.f32 %v19648_v37, %v16809_v57 }
 0xaa6   :  { %v17174_v34 = vpop.permute.xlu1 %6619  ;;  %v7183_v59 = vadd.f32 %v7090_v58, %v7021_v56  ;;  %v6534_v28 = vadd.f32 %v16865_v49, %v6372_v31 }
 0xaa7   :  { %v17177_v63 = vpop.permute.xlu0 %6931  ;;  %v6536_v56 = vadd.f32 %v16871_v43, %v6374_v45 }
 0xaa8   :  { %7273 = vrot.lane.b32.xlu0 %v19645_v4, %s10586_s14  ;;  %7275 = vrot.lane.b32.xlu1 %v16662_v26, %s10586_s14  ;;  %v6696_v58 = vadd.f32 %v16942_v12, %v6534_v28 }
 0xaaa   :  { %v17185_v55 = vpop.permute.xlu1 %6935 }
 0xaab   :  { %v7248_v27 = vpop.permute.xlu0 %7247 }
 0xaac   :  { %v7343_v61 = vadd.f32 %v7248_v27, %v7181_v54  ;;  %7708 = vrot.lane.b32.xlu0 %v17101_v22, %s10580_s29  ;;  %7277 = vrot.lane.b32.xlu1 %v19646_v25, %s10586_s14  ;;  %v6858_v25 = vadd.f32 %v17006_v21, %v6696_v58 }
 0xaae   :  { %v7252_v29 = vpop.permute.xlu1 %7251  ;;  %v7390_v44 = vadd.f32 %v17111_v24, %v7343_v61  ;;  %v7020_v57 = vadd.f32 %v17087_v35, %v6858_v25 }
 0xaaf   :  { %v6302_v26 = vpop.permute.xlu0 %6301  ;;  %v7345_v4 = vadd.f32 %v7252_v29, %v7183_v59  ;;  %v6698_v59 = vadd.f32 %v16951_v20, %v6536_v56 }
 0xab0   :  { %v7430_v7 = vmax.f32 %v7390_v44, 0.0  ;;  %v7182_v44 = vadd.f32 %v7088_v60, %v7020_v57  ;;  %v6384_v25 = vadd.f32 %v19615_v40, %v6302_v26  ;;  %v19651_v26 = vld [vmem:[#allocation218_spill] sm:$0xff] }
 0xab1   :  { %v7392_v48 = vadd.f32 %v17111_v24, %v7345_v4  ;;  %v6860_v29 = vadd.f32 %v17012_v0, %v6698_v59  ;;  %v6383_v0 = vadd.f32 %v6300_v18, %v19611_v51 }
 0xab2   :  { %v6306_v47 = vpop.permute.xlu1 %6305 }
 0xab3   :  { %v7432_v54 = vmax.f32 %v7392_v48, 0.0  ;;  %v17199_v27 = vpop.permute.xlu0 %6617  ;;  %v7022_v43 = vadd.f32 %v17098_v9, %v6860_v29  ;;  %v6385_v9 = vadd.f32 %v6304_v53, %v19617_v2  ;;  %v6386_v53 = vadd.f32 %v19618_v50, %v6306_v47 }
 0xab5   :  { %v7458_v61 = vmax.f32 %v7430_v7, %v7432_v54  ;;  %v7184_v20 = vadd.f32 %v7092_v52, %v7022_v43 }
 0xab6   :  { %v17204_v41 = vpop.permute.xlu1 %6621 }
 0xab7   :  { %v17207_v49 = vpop.permute.xlu0 %6933  ;;  %10177 = vmatprep.mubr.msk.f32.mxu1 %vm5685_vm4, %v7458_v61 }
 0xaba   :  { %v17212_v4 = vpop.f32.mrb[34].mxu1  ;;  %v17214_v12 = vpop.permute.xlu1 %6937 }
 0xabb   :  { %v7250_v21 = vpop.permute.xlu0 %7249  ;;  %v17217_v42 = vpop.f32.mrb[35].mxu1 }
 0xabc   :  { %v7344_v31 = vadd.f32 %v7250_v21, %v7182_v44  ;;  %7758 = vrot.lane.b32.xlu0 %v17217_v42, %s10581_s15  ;;  %7712 = vrot.lane.b32.xlu1 %v17217_v42, %s10580_s29 }
 0xabe   :  { %v7254_v35 = vpop.permute.xlu1 %7253  ;;  %v7391_v60 = vadd.f32 %v17111_v24, %v7344_v31 }
 0xabf   :  { %v6462_v48 = vpop.permute.xlu0 %6461  ;;  %v7346_v28 = vadd.f32 %v7254_v35, %v7184_v20  ;;  %v19649_v20 = vld [vmem:[#allocation54_spill] sm:$0xff] }
 0xac0   :  { %v17225_v37 = vadd.f32 %v6462_v48, %v6383_v0  ;;  %7710 = vrot.lane.b32.xlu0 %v17096_v6, %s10580_s29  ;;  %v7431_v54 = vmax.f32 %v7391_v60, 0.0  ;;  %v19650_v0 = vld [vmem:[#allocation58_spill] sm:$0xff]  ;;  %v19652_v48 = vld [vmem:[#allocation229_spill] sm:$0xff] }
 0xac1   :  { %v7393_v45 = vadd.f32 %v17111_v24, %v7346_v28  ;;  %v6375_v35 = vadd.f32 %v19650_v0, %v19649_v20  ;;  %v6377_v28 = vadd.f32 %v19652_v48, %v19651_v26 }
 0xac2   :  { %v6466_v7 = vpop.permute.xlu1 %6465 }
 0xac3   :  { %v7433_v58 = vmax.f32 %v7393_v45, 0.0  ;;  %v17231_v52 = vpop.permute.xlu0 %6777  ;;  %v17233_v51 = vadd.f32 %v6466_v7, %v6385_v9  ;;  %v6537_v60 = vadd.f32 %v16976_v1, %v6375_v35  ;;  %v6539_v47 = vadd.f32 %v16983_v14, %v6377_v28  ;;  %v19653_v14 = vld [vmem:[#allocation223_spill] sm:$0xff]  ;;  %v19654_v35 = vld [vmem:[#allocation381_spill] sm:$0xff] }
 0xac5   :  { %v7459_v18 = vmax.f32 %v7431_v54, %v7433_v58  ;;  %v6699_v50 = vadd.f32 %v17033_v8, %v6537_v60  ;;  %v6701_v54 = vadd.f32 %v17042_v38, %v6539_v47  ;;  %v6378_v60 = vadd.f32 %v19654_v35, %v16938_v19  ;;  %v19655_v35 = vld [vmem:[#allocation53_spill] sm:$0xff] }
 0xac6   :  { %v17235_v56 = vpop.permute.xlu1 %6781 }
 0xac7   :  { %v7094_v61 = vpop.permute.xlu0 %7093  ;;  %10178 = vmatmul.mubr.msk.f32.gmra.mrb[42].mxu1 %vm5685_vm4, %v7459_v18  ;;  %v6861_v45 = vadd.f32 %v17123_v11, %v6699_v50  ;;  %v6863_v18 = vadd.f32 %v17129_v36, %v6701_v54 }
 0xac9   :  { %v7023_v1 = vadd.f32 %v17177_v63, %v6861_v45 }
 0xaca   :  { %v7098_v59 = vpop.permute.xlu1 %7097 }
 0xacb   :  { %v6464_v57 = vpop.permute.xlu0 %6463 }
 0xacc   :  { %v17239_v2 = vadd.f32 %v6464_v57, %v6384_v25  ;;  %v7185_v25 = vadd.f32 %v7094_v61, %v7023_v1 }
 0xace   :  { %v6468_v29 = vpop.permute.xlu1 %6467 }
 0xacf   :  { %v17242_v44 = vpop.permute.xlu0 %6779  ;;  %v17244_v43 = vadd.f32 %v6468_v29, %v6386_v53  ;;  %v7025_v53 = vadd.f32 %v17185_v55, %v6863_v18  ;;  %v6376_v29 = vadd.f32 %v19653_v14, %v16928_v13  ;;  %v6540_v55 = vadd.f32 %v17004_v16, %v6378_v60  ;;  %v19656_v60 = vld [vmem:[#allocation382_spill] sm:$0xff] }
 0xad1   :  { %v7187_v20 = vadd.f32 %v7098_v59, %v7025_v53  ;;  %v6538_v0 = vadd.f32 %v16998_v46, %v6376_v29  ;;  %v6702_v46 = vadd.f32 %v17084_v39, %v6540_v55  ;;  %v19657_v55 = vld [vmem:[#allocation24_spill] sm:$0xff] }
 0xad2   :  { %v17246_v21 = vpop.permute.xlu1 %6783 }
 0xad3   :  { %v7096_v31 = vpop.permute.xlu0 %7095  ;;  %v6700_v26 = vadd.f32 %v17075_v33, %v6538_v0  ;;  %v6864_v45 = vadd.f32 %v17150_v3, %v6702_v46 }
 0xad5   :  { %v6862_v13 = vadd.f32 %v17144_v10, %v6700_v26  ;;  %v7026_v16 = vadd.f32 %v17214_v12, %v6864_v45 }
 0xad6   :  { %v7100_v40 = vpop.permute.xlu1 %7099 }
 0xad7   :  { %v17253_v9 = vpop.permute.xlu0 %6623  ;;  %v7024_v47 = vadd.f32 %v17207_v49, %v6862_v13 }
 0xad9   :  { %v7186_v1 = vadd.f32 %v7096_v31, %v7024_v47 }
 0xada   :  { %v17258_v7 = vpop.permute.xlu1 %6627 }
 0xadb   :  { %v17261_v58 = vpop.permute.xlu0 %6939 }
 0xade   :  { %v17265_v57 = vpop.permute.xlu1 %6943 }
 0xadf   :  { %v7256_v8 = vpop.permute.xlu0 %7255 }
 0xae0   :  { %v7347_v11 = vadd.f32 %v7256_v8, %v7185_v25  ;;  %v7188_v25 = vadd.f32 %v7100_v40, %v7026_v16  ;;  %v19659_v16 = vld [vmem:[#allocation222_spill] sm:$0xff] }
 0xae2   :  { %v7260_v38 = vpop.permute.xlu1 %7259  ;;  %v7394_v63 = vadd.f32 %v17111_v24, %v7347_v11 }
 0xae3   :  { %v17274_v36 = vpop.permute.xlu0 %6625  ;;  %v7349_v61 = vadd.f32 %v7260_v38, %v7187_v20 }
 0xae4   :  { %v7434_v28 = vmax.f32 %v7394_v63, 0.0  ;;  %v6379_v63 = vadd.f32 %v19656_v60, %v19655_v35 }
 0xae5   :  { %v7396_v48 = vadd.f32 %v17111_v24, %v7349_v61 }
 0xae6   :  { %v17280_v59 = vpop.permute.xlu1 %6629  ;;  %v6541_v61 = vadd.f32 %v17114_v5, %v6379_v63 }
 0xae7   :  { %v7436_v50 = vmax.f32 %v7396_v48, 0.0  ;;  %v6942_v19 = vpop.permute.xlu0 %6941  ;;  %v19658_v48 = vld [vmem:[#allocation383_spill] sm:$0xff] }
 0xae8   :  { %v6381_v13 = vadd.f32 %v19658_v48, %v19657_v55 }
 0xae9   :  { %v7460_v54 = vmax.f32 %v7434_v28, %v7436_v50  ;;  %v6703_v28 = vadd.f32 %v17165_v32, %v6541_v61  ;;  %v19660_v32 = vld [vmem:[#allocation12_spill] sm:$0xff] }
 0xaea   :  { %v6946_v33 = vpop.permute.xlu1 %6945  ;;  %v6543_v50 = vadd.f32 %v17121_v17, %v6381_v13  ;;  %v6382_v17 = vadd.f32 %v19660_v32, %v17071_v23 }
 0xaeb   :  { %v7258_v18 = vpop.permute.xlu0 %7257  ;;  %10180 = vmatprep.mubr.msk.f32.mxu1 %vm5685_vm4, %v7460_v54  ;;  %v6865_v47 = vadd.f32 %v17231_v52, %v6703_v28 }
 0xaec   :  { %v7348_v10 = vadd.f32 %v7258_v18, %v7186_v1  ;;  %v6705_v54 = vadd.f32 %v17174_v34, %v6543_v50  ;;  %v6380_v18 = vadd.f32 %v19659_v16, %v17061_v15 }
 0xaed   :  { %v7027_v5 = vadd.f32 %v17261_v58, %v6865_v47  ;;  %v6709_v47 = vadd.f32 %v17258_v7, %v17233_v51 }
 0xaee   :  { %v7262_v53 = vpop.permute.xlu1 %7261  ;;  %v7395_v39 = vadd.f32 %v17111_v24, %v7348_v10  ;;  %v6867_v10 = vadd.f32 %v17235_v56, %v6705_v54 }
 0xaef   :  { %v17288_v8 = vpop.permute.xlu0 %6785  ;;  %v7350_v14 = vadd.f32 %v7262_v53, %v7188_v25  ;;  %v6542_v25 = vadd.f32 %v17136_v30, %v6380_v18  ;;  %v6708_v18 = vadd.f32 %v17274_v36, %v17239_v2 }
 0xaf0   :  { %v7435_v31 = vmax.f32 %v7395_v39, 0.0  ;;  %v7029_v52 = vadd.f32 %v17265_v57, %v6867_v10 }
 0xaf1   :  { %v7397_v49 = vadd.f32 %v17111_v24, %v7350_v14  ;;  %v6704_v34 = vadd.f32 %v17199_v27, %v6542_v25 }
 0xaf2   :  { %v17291_v29 = vpop.f32.mrb[36].mxu1  ;;  %v17293_v3 = vpop.permute.xlu1 %6789 }
 0xaf3   :  { %v7437_v11 = vmax.f32 %v7397_v49, 0.0  ;;  %v7102_v12 = vpop.permute.xlu0 %7101  ;;  %v17295_v20 = vpop.f32.mrb[37].mxu1  ;;  %v6866_v58 = vadd.f32 %v17242_v44, %v6704_v34  ;;  %v6871_v10 = vadd.f32 %v17293_v3, %v6709_v47 }
 0xaf4   :  { %7808 = vrot.lane.b32.xlu0 %v17295_v20, %s10582_s1  ;;  %7762 = vrot.lane.b32.xlu1 %v17295_v20, %s10581_s15  ;;  %v7189_v53 = vadd.f32 %v7102_v12, %v7027_v5 }
 0xaf5   :  { %v7461_v40 = vmax.f32 %v7435_v31, %v7437_v11  ;;  %v6544_v31 = vadd.f32 %v17142_v62, %v6382_v17  ;;  %v7028_v35 = vadd.f32 %v6942_v19, %v6866_v58 }
 0xaf6   :  { %v7106_v0 = vpop.permute.xlu1 %7105 }
 0xaf7   :  { %v17301_v38 = vpop.permute.xlu0 %6787  ;;  %10181 = vmatmul.mubr.msk.f32.gmra.mrb[44].mxu1 %vm5685_vm4, %v7461_v40  ;;  %v7191_v15 = vadd.f32 %v7106_v0, %v7029_v52  ;;  %v6706_v56 = vadd.f32 %v17204_v41, %v6544_v31 }
 0xaf8   :  { %7760 = vrot.lane.b32.xlu0 %v17212_v4, %s10581_s15  ;;  %7714 = vrot.lane.b32.xlu1 %v17212_v4, %s10580_s29 }
 0xaf9   :  { %v6868_v23 = vadd.f32 %v17246_v21, %v6706_v56  ;;  %v6707_v21 = vadd.f32 %v17253_v9, %v17225_v37  ;;  %v6870_v37 = vadd.f32 %v17301_v38, %v6708_v18 }
 0xafa   :  { %v17311_v26 = vpop.permute.xlu1 %6791 }
 0xafb   :  { %v7104_v46 = vpop.permute.xlu0 %7103  ;;  %v7030_v63 = vadd.f32 %v6946_v33, %v6868_v23  ;;  %v6869_v33 = vadd.f32 %v17288_v8, %v6707_v21  ;;  %v6710_v8 = vadd.f32 %v17280_v59, %v17244_v43 }
 0xafc   :  { %v7190_v60 = vadd.f32 %v7104_v46, %v7028_v35 }
 0xafd   :  { %v6872_v52 = vadd.f32 %v17311_v26, %v6710_v8 }
 0xafe   :  { %v7108_v45 = vpop.permute.xlu1 %7107 }
 0xaff   :  { %v6948_v1 = vpop.permute.xlu0 %6947  ;;  %v7192_v44 = vadd.f32 %v7108_v45, %v7030_v63  ;;  %v7947_v63 = vld [vmem:[%s17989_s7 + $0x20] sm:$0x3] }
 0xb00   :  { %v7031_v5 = vadd.f32 %v6948_v1, %v6869_v33 }
 0xb02   :  { %v6952_v39 = vpop.permute.xlu1 %6951 }
 0xb03   :  { %v7264_v14 = vpop.permute.xlu0 %7263  ;;  %v7033_v32 = vadd.f32 %v6952_v39, %v6871_v10 }
 0xb04   :  { %v7351_v49 = vadd.f32 %v7264_v14, %v7189_v53 }
 0xb06   :  { %v7268_v11 = vpop.permute.xlu1 %7267  ;;  %v7398_v30 = vadd.f32 %v17111_v24, %v7351_v49 }
 0xb07   :  { %v6950_v12 = vpop.permute.xlu0 %6949  ;;  %v7353_v40 = vadd.f32 %v7268_v11, %v7191_v15 }
 0xb08   :  { %v7438_v61 = vmax.f32 %v7398_v30, 0.0  ;;  %v7032_v51 = vadd.f32 %v6950_v12, %v6870_v37 }
 0xb09   :  { %v7400_v57 = vadd.f32 %v17111_v24, %v7353_v40 }
 0xb0a   :  { %v6954_v27 = vpop.permute.xlu1 %6953 }
 0xb0b   :  { %v7440_v62 = vmax.f32 %v7400_v57, 0.0  ;;  %v7266_v0 = vpop.permute.xlu0 %7265  ;;  %v7034_v3 = vadd.f32 %v6954_v27, %v6872_v52  ;;  %v7948_v57 = vld [vmem:[%s17989_s7 + $0x28] sm:$0x3]  ;;  %v7943_v27 = vld [vmem:[%s17989_s7] sm:$0xff] }
 0xb0c   :  { %v7352_v55 = vadd.f32 %v7266_v0, %v7190_v60  ;;  %v10590_v0 = vmov 0.0  }
 0xb0d   :  { %v7462_v48 = vmax.f32 %v7438_v61, %v7440_v62  ;;  %v10226_v61 = vpack.c.bf16 %v7947_v63, %v7943_v27  ;;  %10193 = vmatprep.mubr.msk.f32.mxu0 %vm10592_vm5, %v10590_v0 }
 0xb0e   :  { %v7270_v13 = vpop.permute.xlu1 %7269  ;;  %v7399_v41 = vadd.f32 %v17111_v24, %v7352_v55 }
 0xb0f   :  { %v7110_v28 = vpop.permute.xlu0 %7109  ;;  %v7354_v50 = vadd.f32 %v7270_v13, %v7192_v44  ;;  %10183 = vmatprep.mubr.msk.f32.mxu1 %vm5685_vm4, %v7462_v48 }
 0xb10   :  { %v7439_v45 = vmax.f32 %v7399_v41, 0.0  ;;  %v7193_v9 = vadd.f32 %v7110_v28, %v7031_v5 }
 0xb11   :  { %v7401_v19 = vadd.f32 %v17111_v24, %v7354_v50 }
 0xb12   :  { %v7114_v46 = vpop.permute.xlu1 %7113 }
 0xb13   :  { %v7441_v54 = vmax.f32 %v7401_v19, 0.0  ;;  %v7112_v16 = vpop.permute.xlu0 %7111  ;;  %v7195_v2 = vadd.f32 %v7114_v46, %v7033_v32 }
 0xb14   :  { %v7194_v36 = vadd.f32 %v7112_v16, %v7032_v51 }
 0xb15   :  { %v7463_v25 = vmax.f32 %v7439_v45, %v7441_v54 }
 0xb16   :  { %v7116_v53 = vpop.permute.xlu1 %7115 }
 0xb17   :  { %v7272_v17 = vpop.permute.xlu0 %7271  ;;  %10184 = vmatmul.mubr.msk.f32.gmra.mrb[46].mxu1 %vm5685_vm4, %v7463_v25  ;;  %v7196_v31 = vadd.f32 %v7116_v53, %v7034_v3 }
 0xb18   :  { %v7355_v7 = vadd.f32 %v7272_v17, %v7193_v9  ;;  %v19662_v9 = vld [vmem:[#allocation235_spill] sm:$0xff] }
 0xb1a   :  { %v7276_v1 = vpop.permute.xlu1 %7275  ;;  %v7402_v14 = vadd.f32 %v17111_v24, %v7355_v7 }
 0xb1b   :  { %v7274_v38 = vpop.permute.xlu0 %7273  ;;  %v7357_v34 = vadd.f32 %v7276_v1, %v7195_v2  ;;  %v17437_v2 = vld [vmem:[%s17990_s6] ss:$0 sm:$0xff] }
 0xb1c   :  { %v7356_v49 = vadd.f32 %v7274_v38, %v7194_v36  ;;  %v7442_v39 = vmax.f32 %v7402_v14, 0.0 }
 0xb1d   :  { %v7404_v43 = vadd.f32 %v17111_v24, %v7357_v34 }
 0xb1e   :  { %v7278_v59 = vpop.permute.xlu1 %7277  ;;  %v7403_v15 = vadd.f32 %v17111_v24, %v7356_v49 }
 0xb1f   :  { %v7444_v58 = vmax.f32 %v7404_v43, 0.0  ;;  %v7358_v11 = vadd.f32 %v7278_v59, %v7196_v31  ;;  %v7709_v48 = vpop.permute.xlu0 %7708  ;;  %v19663_v43 = vld [vmem:[#allocation231_spill] sm:$0xff] }
 0xb20   :  { %v7443_v30 = vmax.f32 %v7403_v15, 0.0  ;;  %v7744_v53 = vadd.f32 %v7709_v48, %v19662_v9 }
 0xb21   :  { %v7464_v56 = vmax.f32 %v7442_v39, %v7444_v58  ;;  %v7405_v26 = vadd.f32 %v17111_v24, %v7358_v11  ;;  %v7944_v24 = vld [vmem:[%s17989_s7 + $0x8] sm:$0xff] }
 0xb22   :  { %v10223_v60 = vpack.c.bf16 %v7948_v57, %v7944_v24 }
 0xb23   :  { %v7445_v12 = vmax.f32 %v7405_v26, 0.0  ;;  %10186 = vmatprep.mubr.msk.f32.mxu1 %vm5685_vm4, %v7464_v56 }
 0xb24   :  { %10225 = vmatprep.subr.msk.bf16.mxu1 %vm12675_vm3, %v10223_v60 }
 0xb25   :  { %v7465_v40 = vmax.f32 %v7443_v30, %v7445_v12  ;;  %10228 = vmatpush1.bf16.msk.msra.mxu1 %vm12675_vm3, %v10226_v61 }
 0xb27   :  { %10187 = vmatmul.mubr.msk.f32.gmra.mrb[48].mxu1 %vm5685_vm4, %v7465_v40 }
 0xb28   :  { %8045 = vmatprep.mubr.f32.mxu1 %v10590_v0 }
 0xb2a   :  { %v17356_v35 = vpop.f32.mrb[38].mxu1 }
 0xb2b   :  { %v17358_v23 = vpop.f32.mrb[39].mxu1 }
 0xb2c   :  { %7858 = vrot.lane.b32.xlu0 %v17358_v23, %s10583_s27  ;;  %7812 = vrot.lane.b32.xlu1 %v17358_v23, %s10582_s1 }
 0xb2e   :  { %v7759_v13 = vpop.permute.xlu0 %7758  ;;  %v7713_v18 = vpop.permute.xlu1 %7712 }
 0xb2f   :  { %v7794_v8 = vadd.f32 %v7759_v13, %v7744_v53  ;;  %v7746_v32 = vadd.f32 %v7713_v18, %v17101_v22  ;;  %v8188_v18 = vld [vmem:[%s17991_s8 + $0x28] sm:$0xff] }
 0xb30   :  { %7716 = vrot.lane.b32.xlu0 %v17295_v20, %s10580_s29  ;;  %7764 = vrot.lane.b32.xlu1 %v17291_v29, %s10581_s15 }
 0xb32   :  { %v7711_v41 = vpop.permute.xlu0 %7710 }
 0xb33   :  { %v7745_v59 = vadd.f32 %v19663_v43, %v7711_v41 }
 0xb34   :  { %7810 = vrot.lane.b32.xlu0 %v17291_v29, %s10582_s1 }
 0xb38   :  { %7766 = vrot.lane.b32.xlu0 %v17358_v23, %s10581_s15 }
 0xb3c   :  { %7860 = vrot.lane.b32.xlu0 %v17356_v35, %s10583_s27 }
 0xb40   :  { %7718 = vrot.lane.b32.xlu0 %v17291_v29, %s10580_s29 }
 0xb62   :  { %v17393_v55 = vpop.f32.mrb[40].mxu1 }
 0xb63   :  { %v17395_v44 = vpop.f32.mrb[41].mxu1 }
 0xb64   :  { %7816 = vrot.lane.b32.xlu0 %v17395_v44, %s10582_s1  ;;  %7862 = vrot.lane.b32.xlu1 %v17395_v44, %s10583_s27 }
 0xb66   :  { %v7809_v28 = vpop.permute.xlu0 %7808  ;;  %v7763_v5 = vpop.permute.xlu1 %7762 }
 0xb67   :  { %v7844_v17 = vadd.f32 %v7809_v28, %v7794_v8  ;;  %v7796_v7 = vadd.f32 %v7763_v5, %v7746_v32 }
 0xb68   :  { %7768 = vrot.lane.b32.xlu0 %v17356_v35, %s10581_s15  ;;  %7720 = vrot.lane.b32.xlu1 %v17358_v23, %s10580_s29 }
 0xb6a   :  { %v7761_v50 = vpop.permute.xlu0 %7760  ;;  %v7715_v10 = vpop.permute.xlu1 %7714 }
 0xb6b   :  { %v7795_v58 = vadd.f32 %v7761_v50, %v7745_v59  ;;  %v7747_v56 = vadd.f32 %v17096_v6, %v7715_v10 }
 0xb6c   :  { %7814 = vrot.lane.b32.xlu1 %v17356_v35, %s10582_s1 }
 0xb70   :  { %7770 = vrot.lane.b32.xlu1 %v17395_v44, %s10581_s15 }
 0xb74   :  { %7864 = vrot.lane.b32.xlu1 %v17393_v55, %s10583_s27 }
 0xb78   :  { %7722 = vrot.lane.b32.xlu1 %v17356_v35, %s10580_s29 }
 0xb9a   :  { %v10179_v21 = vpop.f32.mrb[42].mxu1 }
 0xb9b   :  { %v7657_v19 = vpop.f32.mrb[43].mxu1 }
 0xb9c   :  { %7866 = vrot.lane.b32.xlu0 %v7657_v19, %s10583_s27  ;;  %7820 = vrot.lane.b32.xlu1 %v7657_v19, %s10582_s1 }
 0xb9e   :  { %v7859_v33 = vpop.permute.xlu0 %7858 }
 0xb9f   :  { %v7894_v52 = vadd.f32 %v7859_v33, %v7844_v17 }
 0xba0   :  { %7724 = vrot.lane.b32.xlu0 %v17395_v44, %s10580_s29  ;;  %7772 = vrot.lane.b32.xlu1 %v17393_v55, %s10581_s15 }
 0xba1   :  { %v7913_v3 = vadd.f32 %v17437_v2, %v7894_v52 }
 0xba2   :  { %v7717_v46 = vpop.permute.xlu0 %7716 }
 0xba3   :  { %v7748_v47 = vadd.f32 %v7717_v46, %v17217_v42  ;;  %v7813_v42 = vpop.permute.xlu1 %7812  ;;  %v7925_v34 = vmax.f32 %v7913_v3, 0.0  ;;  %v7945_v46 = vld [vmem:[%s17989_s7 + $0x10] sm:$0xff] }
 0xba4   :  { %7818 = vrot.lane.b32.xlu0 %v17393_v55, %s10582_s1  ;;  %v7846_v36 = vadd.f32 %v7813_v42, %v7796_v7 }
 0xba6   :  { %v7811_v45 = vpop.permute.xlu0 %7810 }
 0xba7   :  { %v7765_v51 = vpop.permute.xlu1 %7764  ;;  %v7845_v26 = vadd.f32 %v7811_v45, %v7795_v58 }
 0xba8   :  { %7774 = vrot.lane.b32.xlu0 %v7657_v19, %s10581_s15  ;;  %v7797_v30 = vadd.f32 %v7765_v51, %v7747_v56 }
 0xbaa   :  { %v7767_v54 = vpop.permute.xlu0 %7766 }
 0xbab   :  { %v17423_v16 = vadd.f32 %v7767_v54, %v7748_v47  ;;  %v7949_v47 = vld [vmem:[%s17989_s7 + $0x30] sm:$0x3]  ;;  %v8184_v54 = vld [vmem:[%s17991_s8 + $0x8] sm:$0xff] }
 0xbac   :  { %7868 = vrot.lane.b32.xlu0 %v10179_v21, %s10583_s27  ;;  %v10232_v45 = vpack.c.bf16 %v7949_v47, %v7945_v46  ;;  %v17489_v5 = vpack.c.bf16 %v8188_v18, %v8184_v54 }
 0xbae   :  { %v7861_v11 = vpop.permute.xlu0 %7860 }
 0xbaf   :  { %v7895_v12 = vadd.f32 %v7861_v11, %v7845_v26 }
 0xbb0   :  { %7726 = vrot.lane.b32.xlu0 %v17393_v55, %s10580_s29 }
 0xbb1   :  { %v7914_v60 = vadd.f32 %v17437_v2, %v7895_v12 }
 0xbb2   :  { %v7719_v10 = vpop.permute.xlu0 %7718 }
 0xbb3   :  { %v7926_v48 = vmax.f32 %v7914_v60, 0.0 }
 0xbca   :  { %v10182_v25 = vpop.f32.mrb[44].mxu1 }
 0xbcb   :  { %v7667_v37 = vpop.f32.mrb[45].mxu1 }
 0xbcc   :  { %7824 = vrot.lane.b32.xlu0 %v7667_v37, %s10582_s1  ;;  %7870 = vrot.lane.b32.xlu1 %v7667_v37, %s10583_s27 }
 0xbd0   :  { %7776 = vrot.lane.b32.xlu0 %v10179_v21, %s10581_s15  ;;  %7728 = vrot.lane.b32.xlu1 %v7657_v19, %s10580_s29  ;;  %v7950_v19 = vld [vmem:[%s17989_s7 + $0x38] sm:$0x3] }
 0xbd4   :  { %7822 = vrot.lane.b32.xlu1 %v10179_v21, %s10582_s1 }
 0xbd6   :  { %v7863_v1 = vpop.permute.xlu1 %7862 }
 0xbd7   :  { %v7896_v14 = vadd.f32 %v7863_v1, %v7846_v36 }
 0xbd8   :  { %7778 = vrot.lane.b32.xlu1 %v7667_v37, %s10581_s15 }
 0xbd9   :  { %v7915_v22 = vadd.f32 %v17437_v2, %v7896_v14 }
 0xbda   :  { %v7721_v38 = vpop.permute.xlu1 %7720 }
 0xbdb   :  { %v7927_v49 = vmax.f32 %v7915_v22, 0.0  ;;  %v7750_v31 = vadd.f32 %v7721_v38, %v17295_v20 }
 0xbdc   :  { %7872 = vrot.lane.b32.xlu1 %v10182_v25, %s10583_s27 }
 0xbdd   :  { %v17446_v39 = vmax.f32 %v7925_v34, %v7927_v49  ;;  %v7749_v49 = vadd.f32 %v17212_v4, %v7719_v10 }
 0xbde   :  { %v7815_v15 = vpop.permute.xlu1 %7814 }
 0xbdf   :  { %9302 = vmatmul.mubr.msk.f32.vlgmr.msra.gmra.mrb[50].mxu1 %vm5685_vm4, %v17446_v39  ;;  %v7847_v24 = vadd.f32 %v7815_v15, %v7797_v30 }
 0xbe0   :  { %7730 = vrot.lane.b32.xlu1 %v10179_v21, %s10580_s29  ;;  %8051 = vmatprep.mubr.f32.mxu1 %v10590_v0  ;;  %v7946_v21 = vld [vmem:[%s17989_s7 + $0x18] sm:$0xff] }
 0xbe1   :  { %v10229_v33 = vpack.c.bf16 %v7950_v19, %v7946_v21 }
 0xbe2   :  { %v7771_v20 = vpop.permute.xlu1 %7770 }
 0xbe3   :  { %v7800_v40 = vadd.f32 %v7771_v20, %v7750_v31  ;;  %10231 = vmatprep.subr.msk.bf16.mxu1 %vm12675_vm3, %v10229_v33 }
 0xbe4   :  { %10234 = vmatpush1.bf16.msk.msra.mxu1 %vm12675_vm3, %v10232_v45 }
 0xbe5   :  { %10236 = vmatprep.subr.bf16.mxu1 %v17489_v5 }
 0xbe6   :  { %v7865_v57 = vpop.permute.xlu1 %7864 }
 0xbe7   :  { %v7897_v27 = vadd.f32 %v7865_v57, %v7847_v24 }
 0xbe9   :  { %v7916_v63 = vadd.f32 %v17437_v2, %v7897_v27 }
 0xbea   :  { %v10185_v61 = vpop.f32.mrb[46].mxu1  ;;  %v7723_v42 = vpop.permute.xlu1 %7722 }
 0xbeb   :  { %v7928_v13 = vmax.f32 %v7916_v63, 0.0  ;;  %v7677_v41 = vpop.f32.mrb[47].mxu1  ;;  %v7751_v15 = vadd.f32 %v17291_v29, %v7723_v42 }
 0xbec   :  { %7874 = vrot.lane.b32.xlu0 %v7677_v41, %s10583_s27  ;;  %7828 = vrot.lane.b32.xlu1 %v7677_v41, %s10582_s1 }
 0xbed   :  { %v17457_v6 = vmax.f32 %v7926_v48, %v7928_v13 }
 0xbef   :  { %9303 = vmatmul.mubr.msk.f32.gmra.mrb[52].mxu1 %vm5685_vm4, %v17457_v6 }
 0xbf0   :  { %7826 = vrot.lane.b32.xlu0 %v10182_v25, %s10582_s1  ;;  %7780 = vrot.lane.b32.xlu1 %v10182_v25, %s10581_s15  ;;  %v7817_v25 = vpop.permute.xlu0 %7816 }
 0xbf1   :  { %8057 = vmatprep.mubr.f32.mxu1 %v10590_v0  ;;  %v7848_v8 = vadd.f32 %v7817_v25, %v17423_v16 }
 0xbf4   :  { %7876 = vrot.lane.b32.xlu0 %v10185_v61, %s10583_s27  ;;  %v7769_v37 = vpop.permute.xlu0 %7768 }
 0xbf5   :  { %v7799_v16 = vadd.f32 %v7769_v37, %v7749_v49 }
 0xbfa   :  { %v10188_v28 = vpop.f32.mrb[48].mxu1 }
 0xbfb   :  { %v7687_v50 = vpop.f32.mrb[49].mxu1 }
 0xbfc   :  { %7878 = vrot.lane.b32.xlu1 %v7687_v50, %s10583_s27 }
 0xc00   :  { %7830 = vrot.lane.b32.xlu1 %v10185_v61, %s10582_s1 }
 0xc04   :  { %7880 = vrot.lane.b32.xlu1 %v10188_v28, %s10583_s27 }
 0xc0e   :  { %v7867_v62 = vpop.permute.xlu0 %7866  ;;  %v7821_v9 = vpop.permute.xlu1 %7820 }
 0xc0f   :  { %v7898_v17 = vadd.f32 %v7867_v62, %v7848_v8  ;;  %v7850_v7 = vadd.f32 %v7821_v9, %v7800_v40 }
 0xc11   :  { %v7917_v36 = vadd.f32 %v17437_v2, %v7898_v17 }
 0xc12   :  { %v7725_v53 = vpop.permute.xlu0 %7724  ;;  %v7773_v32 = vpop.permute.xlu1 %7772 }
 0xc13   :  { %v7929_v38 = vmax.f32 %v7917_v36, 0.0  ;;  %v7801_v56 = vadd.f32 %v7773_v32, %v7751_v15  ;;  %v7752_v41 = vadd.f32 %v7725_v53, %v17358_v23  ;;  %v8200_v15 = vld [vmem:[%s17991_s8 + $0x88] sm:$0xff] }
 0xc16   :  { %v7819_v51 = vpop.permute.xlu0 %7818 }
 0xc17   :  { %v7849_v58 = vadd.f32 %v7819_v51, %v7799_v16  ;;  %v8191_v16 = vld [vmem:[%s17991_s8 + $0x40] sm:$0xff] }
 0xc1a   :  { %v7775_v14 = vpop.permute.xlu0 %7774 }
 0xc1b   :  { %v7802_v28 = vadd.f32 %v7775_v14, %v7752_v41 }
 0xc1e   :  { %v7869_v59 = vpop.permute.xlu0 %7868 }
 0xc1f   :  { %v7899_v26 = vadd.f32 %v7869_v59, %v7849_v58  ;;  %v8195_v59 = vld [vmem:[%s17991_s8 + $0x60] sm:$0xff]  ;;  %v8204_v58 = vld [vmem:[%s17991_s8 + $0xa8] sm:$0xff] }
 0xc21   :  { %v7918_v4 = vadd.f32 %v17437_v2, %v7899_v26  ;;  %v8199_v26 = vld [vmem:[%s17991_s8 + $0x80] sm:$0xff] }
 0xc22   :  { %v7727_v27 = vpop.permute.xlu0 %7726 }
 0xc23   :  { %v7930_v24 = vmax.f32 %v7918_v4, 0.0  ;;  %v7753_v45 = vadd.f32 %v17356_v35, %v7727_v27 }
 0xc3e   :  { %v7871_v52 = vpop.permute.xlu1 %7870  ;;  %v7825_v29 = vpop.permute.xlu0 %7824 }
 0xc3f   :  { %v7900_v1 = vadd.f32 %v7871_v52, %v7850_v7  ;;  %v7852_v50 = vadd.f32 %v7825_v29, %v7802_v28  ;;  %v8223_v28 = vld [vmem:[%s17991_s8 + $0x140] sm:$0xff] }
 0xc41   :  { %v7919_v3 = vadd.f32 %v17437_v2, %v7900_v1 }
 0xc42   :  { %v7729_v22 = vpop.permute.xlu1 %7728  ;;  %v7777_v63 = vpop.permute.xlu0 %7776 }
 0xc43   :  { %v7931_v34 = vmax.f32 %v7919_v3, 0.0  ;;  %v7754_v21 = vadd.f32 %v7729_v22, %v17395_v44  ;;  %v7803_v10 = vadd.f32 %v7777_v63, %v7753_v45  ;;  %v8183_v22 = vld [vmem:[%s17991_s8] sm:$0xff]  ;;  %v8240_v45 = vld [vmem:[%s17991_s8 + $0x1c8] sm:$0xff] }
 0xc44   :  { %v8215_v63 = vld [vmem:[%s17991_s8 + $0x100] sm:$0xff] }
 0xc45   :  { %v17497_v31 = vmax.f32 %v7929_v38, %v7931_v34  ;;  %v8187_v38 = vld [vmem:[%s17991_s8 + $0x20] sm:$0xff]  ;;  %v8192_v34 = vld [vmem:[%s17991_s8 + $0x48] sm:$0xff] }
 0xc46   :  { %v7823_v43 = vpop.permute.xlu1 %7822  ;;  %v17540_v49 = vpack.c.bf16 %v8187_v38, %v8183_v22  ;;  %v8210_v22 = vld [vmem:[%s17991_s8 + $0xd8] sm:$0xff] }
 0xc47   :  { %9304 = vmatmul.mubr.msk.f32.gmra.mrb[54].mxu1 %vm5685_vm4, %v17497_v31  ;;  %v7851_v20 = vadd.f32 %v7823_v43, %v7801_v56  ;;  %v17563_v56 = vpack.c.bf16 %v8204_v58, %v8200_v15  ;;  %v8214_v38 = vld [vmem:[%s17991_s8 + $0xf8] sm:$0xff] }
 0xc48   :  { %8063 = vmatprep.mubr.f32.mxu1 %v10590_v0  ;;  %v8218_v15 = vld [vmem:[%s17991_s8 + $0x118] sm:$0xff] }
 0xc49   :  { %v8222_v58 = vld [vmem:[%s17991_s8 + $0x138] sm:$0xff] }
 0xc4a   :  { %v7779_v11 = vpop.permute.xlu1 %7778 }
 0xc4b   :  { %v7804_v46 = vadd.f32 %v7779_v11, %v7754_v21  ;;  %v17560_v11 = vpack.c.bf16 %v8195_v59, %v8191_v16  ;;  %v8236_v21 = vld [vmem:[%s17991_s8 + $0x1a8] sm:$0xff]  ;;  %v8209_v16 = vld [vmem:[%s17991_s8 + $0xd0] sm:$0xff] }
 0xc4c   :  { %v8213_v59 = vld [vmem:[%s17991_s8 + $0xf0] sm:$0xff] }
 0xc4e   :  { %v7873_v30 = vpop.permute.xlu1 %7872 }
 0xc4f   :  { %v7901_v12 = vadd.f32 %v7873_v30, %v7851_v20  ;;  %v8203_v20 = vld [vmem:[%s17991_s8 + $0xa0] sm:$0xff]  ;;  %v8212_v30 = vld [vmem:[%s17991_s8 + $0xe8] sm:$0xff] }
 0xc50   :  { %v17581_v4 = vpack.c.bf16 %v8203_v20, %v8199_v26  ;;  %v17759_v26 = vpack.c.bf16 %v8213_v59, %v8209_v16  ;;  %v17762_v20 = vpack.c.bf16 %v8222_v58, %v8218_v15 }
 0xc51   :  { %v7920_v40 = vadd.f32 %v17437_v2, %v7901_v12 }
 0xc52   :  { %v7731_v61 = vpop.permute.xlu1 %7730 }
 0xc53   :  { %v7932_v57 = vmax.f32 %v7920_v40, 0.0  ;;  %v7755_v62 = vadd.f32 %v17393_v55, %v7731_v61  ;;  %v8207_v40 = vld [vmem:[%s17991_s8 + $0xc0] sm:$0xff] }
 0xc54   :  { %v8219_v61 = vld [vmem:[%s17991_s8 + $0x120] sm:$0xff] }
 0xc55   :  { %v17505_v60 = vmax.f32 %v7930_v24, %v7932_v57  ;;  %v8211_v24 = vld [vmem:[%s17991_s8 + $0xe0] sm:$0xff]  ;;  %v8220_v57 = vld [vmem:[%s17991_s8 + $0x128] sm:$0xff] }
 0xc56   :  { %v17602_v27 = vpack.c.bf16 %v8211_v24, %v8207_v40  ;;  %v8226_v40 = vld [vmem:[%s17991_s8 + $0x158] sm:$0xff] }
 0xc57   :  { %9305 = vmatmul.mubr.msk.f32.gmra.mrb[56].mxu1 %vm5685_vm4, %v17505_v60  ;;  %v8230_v24 = vld [vmem:[%s17991_s8 + $0x178] sm:$0xff] }
 0xc58   :  { %8069 = vmatprep.mubr.f32.mxu1 %v10590_v0 }
 0xc5e   :  { %v7875_v48 = vpop.permute.xlu0 %7874  ;;  %v7829_v13 = vpop.permute.xlu1 %7828 }
 0xc5f   :  { %v7902_v47 = vadd.f32 %v7875_v48, %v7852_v50  ;;  %v7854_v54 = vadd.f32 %v7829_v13, %v7804_v46  ;;  %v8228_v48 = vld [vmem:[%s17991_s8 + $0x168] sm:$0xff]  ;;  %v17623_v13 = vpack.c.bf16 %v8219_v61, %v8215_v63  ;;  %v8227_v50 = vld [vmem:[%s17991_s8 + $0x160] sm:$0xff]  ;;  %v8225_v63 = vld [vmem:[%s17991_s8 + $0x150] sm:$0xff] }
 0xc60   :  { %v8231_v46 = vld [vmem:[%s17991_s8 + $0x180] sm:$0xff]  ;;  %v8229_v61 = vld [vmem:[%s17991_s8 + $0x170] sm:$0xff] }
 0xc61   :  { %v7921_v25 = vadd.f32 %v17437_v2, %v7902_v47  ;;  %v8235_v47 = vld [vmem:[%s17991_s8 + $0x1a0] sm:$0xff] }
 0xc62   :  { %v7827_v19 = vpop.permute.xlu0 %7826  ;;  %v7781_v33 = vpop.permute.xlu1 %7780 }
 0xc63   :  { %v7853_v23 = vadd.f32 %v7827_v19, %v7803_v10  ;;  %v7933_v44 = vmax.f32 %v7921_v25, 0.0  ;;  %v7805_v8 = vadd.f32 %v7781_v33, %v7755_v62  ;;  %v17644_v19 = vpack.c.bf16 %v8227_v50, %v8223_v28  ;;  %v8239_v25 = vld [vmem:[%s17991_s8 + $0x1c0] sm:$0xff]  ;;  %v8190_v62 = vld [vmem:[%s17991_s8 + $0x38] sm:$0xff] }
 0xc64   :  { %v17795_v28 = vpack.c.bf16 %v8229_v61, %v8225_v63 }
 0xc66   :  { %v7877_v42 = vpop.permute.xlu0 %7876 }
 0xc67   :  { %v7903_v32 = vadd.f32 %v7877_v42, %v7853_v23  ;;  %v8186_v42 = vld [vmem:[%s17991_s8 + $0x18] sm:$0xff] }
 0xc69   :  { %v7922_v52 = vadd.f32 %v17437_v2, %v7903_v32  ;;  %v8198_v32 = vld [vmem:[%s17991_s8 + $0x78] sm:$0xff] }
 0xc6b   :  { %v7934_v1 = vmax.f32 %v7922_v52, 0.0  ;;  %v8202_v52 = vld [vmem:[%s17991_s8 + $0x98] sm:$0xff] }
 0xc6e   :  { %v7879_v18 = vpop.permute.xlu1 %7878 }
 0xc6f   :  { %v7904_v37 = vadd.f32 %v7879_v18, %v7854_v54  ;;  %v8244_v54 = vld [vmem:[%s17991_s8 + $0x1e8] sm:$0xff]  ;;  %v17664_v18 = vpack.c.bf16 %v8235_v47, %v8231_v46  ;;  %v8242_v46 = vld [vmem:[%s17991_s8 + $0x1d8] sm:$0xff] }
 0xc70   :  { %v17668_v10 = vpack.c.bf16 %v8244_v54, %v8240_v45  ;;  %v8246_v47 = vld [vmem:[%s17991_s8 + $0x1f8] sm:$0xff] }
 0xc71   :  { %v7923_v9 = vadd.f32 %v17437_v2, %v7904_v37  ;;  %v8243_v37 = vld [vmem:[%s17991_s8 + $0x1e0] sm:$0xff]  ;;  %v17816_v54 = vpack.c.bf16 %v8246_v47, %v8242_v46 }
 0xc72   :  { %v7831_v53 = vpop.permute.xlu1 %7830  ;;  %v17683_v23 = vpack.c.bf16 %v8243_v37, %v8239_v25  ;;  %v8241_v25 = vld [vmem:[%s17991_s8 + $0x1d0] sm:$0xff] }
 0xc73   :  { %v7935_v17 = vmax.f32 %v7923_v9, 0.0  ;;  %v7855_v35 = vadd.f32 %v7831_v53, %v7805_v8  ;;  %v17686_v9 = vpack.c.bf16 %v8190_v62, %v8186_v42  ;;  %v8185_v53 = vld [vmem:[%s17991_s8 + $0x10] sm:$0xff]  ;;  %v8194_v8 = vld [vmem:[%s17991_s8 + $0x58] sm:$0xff]  ;;  %v8411_v62 = vlaneseq }
 0xc74   :  { %v8245_v37 = vld [vmem:[%s17991_s8 + $0x1f0] sm:$0xff] }
 0xc75   :  { %v17516_v51 = vmax.f32 %v7933_v44, %v7935_v17  ;;  %v8189_v44 = vld [vmem:[%s17991_s8 + $0x30] sm:$0xff]  ;;  %v17825_v42 = vpack.c.bf16 %v8245_v37, %v8241_v25 }
 0xc76   :  { %v7881_v7 = vpop.permute.xlu1 %7880  ;;  %v17701_v17 = vpack.c.bf16 %v8189_v44, %v8185_v53  ;;  %v17850_v53 = vshrl.u32 %v8411_v62, 7 }
 0xc77   :  { %v7905_v36 = vadd.f32 %v7881_v7, %v7855_v35  ;;  %9306 = vmatmul.mubr.msk.f32.gmra.mrb[58].mxu1 %vm5685_vm4, %v17516_v51  ;;  %v8193_v35 = vld [vmem:[%s17991_s8 + $0x50] sm:$0xff] }
 0xc78   :  { %8075 = vmatprep.mubr.f32.mxu1 %v10590_v0  ;;  %v8197_v7 = vld [vmem:[%s17991_s8 + $0x70] sm:$0xff]  ;;  %v8425_v63 = vsub.s32 3, %v17850_v53 }
 0xc79   :  { %v7924_v55 = vadd.f32 %v17437_v2, %v7905_v36  ;;  %v8196_v2 = vld [vmem:[%s17991_s8 + $0x68] sm:$0xff]  ;;  %v8206_v36 = vld [vmem:[%s17991_s8 + $0xb8] sm:$0xff] }
 0xc7a   :  { %v17542_v43 = vpack.c.bf16 %v8196_v2, %v8192_v34  ;;  %v17744_v2 = vpack.c.bf16 %v8214_v38, %v8210_v22 }
 0xc7b   :  { %v7936_v3 = vmax.f32 %v7924_v55, 0.0  ;;  %v17721_v55 = vpack.c.bf16 %v8197_v7, %v8193_v35  ;;  %v8413_v35 = vsub.s32 0, %v17850_v53 }
 0xc7d   :  { %v17523_v14 = vmax.f32 %v7934_v1, %v7936_v3  ;;  %v17724_v1 = vpack.c.bf16 %v8206_v36, %v8202_v52  ;;  %v8201_v3 = vld [vmem:[%s17991_s8 + $0x90] sm:$0xff] }
 0xc7f   :  { %9307 = vmatmul.mubr.msk.f32.gmra.mrb[60].mxu1 %vm5685_vm4, %v17523_v14 }
 0xc80   :  { %8146 = vmatprep.mubr.f32.mxu1 %v10590_v0 }
 0xc83   :  { %9310 = vmatmul.mubr.msk.f32.vlgmr.msra.gmra.mrb[62].mxu1 %vm5685_vm4, %v17446_v39  ;;  %v8208_v39 = vld [vmem:[%s17991_s8 + $0xc8] sm:$0xff] }
 0xc84   :  { %10238 = vmatpush1.bf16.msra.mxu1 %v17540_v49  ;;  %8152 = vmatprep.mubr.f32.mxu1 %v10590_v0  ;;  %v17584_v12 = vpack.c.bf16 %v8212_v30, %v8208_v39  ;;  %v8217_v39 = vld [vmem:[%s17991_s8 + $0x110] sm:$0xff] }
 0xc85   :  { %10240 = vmatprep.subr.bf16.mxu1 %v17542_v43  ;;  %v8221_v30 = vld [vmem:[%s17991_s8 + $0x130] sm:$0xff] }
 0xc87   :  { %9311 = vmatmul.mubr.msk.f32.gmra.mrb[64].mxu1 %vm5685_vm4, %v17457_v6  ;;  %v8216_v6 = vld [vmem:[%s17991_s8 + $0x108] sm:$0xff] }
 0xc88   :  { %10242 = vmatpush1.bf16.msra.mxu1 %v17560_v11  ;;  %8158 = vmatprep.mubr.f32.mxu1 %v10590_v0  ;;  %v17605_v29 = vpack.c.bf16 %v8220_v57, %v8216_v6  ;;  %v17777_v6 = vpack.c.bf16 %v8221_v30, %v8217_v39  ;;  %v17780_v57 = vpack.c.bf16 %v8230_v24, %v8226_v40  ;;  %v8421_v40 = vsub.s32 2, %v17850_v53 }
 0xc89   :  { %10244 = vmatprep.subr.bf16.mxu1 %v17563_v56 }
 0xc8b   :  { %9312 = vmatmul.mubr.msk.f32.gmra.mrb[66].mxu1 %vm5685_vm4, %v17497_v31  ;;  %v8224_v31 = vld [vmem:[%s17991_s8 + $0x148] sm:$0xff] }
 0xc8c   :  { %10246 = vmatpush1.bf16.msra.mxu1 %v17581_v4  ;;  %8164 = vmatprep.mubr.f32.mxu1 %v10590_v0  ;;  %v17626_v41 = vpack.c.bf16 %v8228_v48, %v8224_v31  ;;  %v8234_v31 = vld [vmem:[%s17991_s8 + $0x198] sm:$0xff] }
 0xc8d   :  { %10248 = vmatprep.subr.bf16.mxu1 %v17584_v12  ;;  %v8238_v48 = vld [vmem:[%s17991_s8 + $0x1b8] sm:$0xff] }
 0xc8e   :  { %v17798_v50 = vpack.c.bf16 %v8238_v48, %v8234_v31 }
 0xc8f   :  { %9313 = vmatmul.mubr.msk.f32.gmra.mrb[68].mxu1 %vm5685_vm4, %v17505_v60  ;;  %v8232_v60 = vld [vmem:[%s17991_s8 + $0x188] sm:$0xff] }
 0xc90   :  { %10250 = vmatpush1.bf16.msra.mxu1 %v17602_v27  ;;  %8170 = vmatprep.mubr.f32.mxu1 %v10590_v0  ;;  %v17647_v33 = vpack.c.bf16 %v8236_v21, %v8232_v60  ;;  %v8233_v60 = vld [vmem:[%s17991_s8 + $0x190] sm:$0xff] }
 0xc91   :  { %10252 = vmatprep.subr.bf16.mxu1 %v17605_v29  ;;  %v8237_v21 = vld [vmem:[%s17991_s8 + $0x1b0] sm:$0xff] }
 0xc92   :  { %v17813_v45 = vpack.c.bf16 %v8237_v21, %v8233_v60 }
 0xc93   :  { %9314 = vmatmul.mubr.msk.f32.gmra.mrb[70].mxu1 %vm5685_vm4, %v17516_v51  ;;  %v17704_v51 = vpack.c.bf16 %v8198_v32, %v8194_v8  ;;  %v8417_v8 = vsub.s32 1, %v17850_v53  ;;  %v8247_v32 = vld [vmem:[%s17992_s9] sm:$0xf] }
 0xc94   :  { %10254 = vmatpush1.bf16.msra.mxu1 %v17623_v13  ;;  %8176 = vmatprep.mubr.f32.mxu1 %v10590_v0  ;;  %v17869_v60 = vrot.slane %v8247_v32, %v8421_v40  ;;  %v17871_v47 = vrot.slane %v8247_v32, %v8425_v63 }
 0xc95   :  { %10256 = vmatprep.subr.bf16.mxu1 %v17626_v41  ;;  %v17857_v52 = vrot.slane %v8247_v32, %v8417_v8 }
 0xc97   :  { %9315 = vmatmul.mubr.msk.f32.gmra.mrb[72].mxu1 %vm5685_vm4, %v17523_v14  ;;  %v8205_v14 = vld [vmem:[%s17991_s8 + $0xb0] sm:$0xff] }
 0xc98   :  { %10258 = vmatpush1.bf16.msra.mxu1 %v17644_v19  ;;  %8312 = vmatprep.mubr.f32.mxu1 %v10590_v0  ;;  %v17740_v34 = vpack.c.bf16 %v8205_v14, %v8201_v3  ;;  %v17861_v3 = vrot.slane %v8247_v32, %v8413_v35 }
 0xc99   :  { %10260 = vmatprep.subr.bf16.mxu1 %v17647_v33 }
 0xc9c   :  { %10262 = vmatpush1.bf16.msra.mxu1 %v17664_v18 }
 0xc9d   :  { %10264 = vmatprep.subr.bf16.mxu1 %v17668_v10 }
 0xca0   :  { %10266 = vmatpush1.bf16.msra.mxu1 %v17683_v23 }
 0xca1   :  { %10268 = vmatprep.subr.bf16.mxu1 %v17686_v9 }
 0xca3   :  { %8313 = vmatmul.mubr.f32.vlgmr.msra.gmra.mrb[50].mxu1 %v10590_v0 }
 0xca4   :  { %10270 = vmatpush1.bf16.msra.mxu1 %v17701_v17  ;;  %8318 = vmatprep.mubr.f32.mxu1 %v10590_v0 }
 0xca5   :  { %10272 = vmatprep.subr.bf16.mxu1 %v17704_v51 }
 0xca7   :  { %8319 = vmatmul.mubr.f32.gmra.mrb[52].mxu1 %v10590_v0 }
 0xca8   :  { %10274 = vmatpush1.bf16.msra.mxu1 %v17721_v55  ;;  %8389 = vmatprep.mubr.f32.mxu1 %v10590_v0 }
 0xca9   :  { %10276 = vmatprep.subr.bf16.mxu1 %v17724_v1 }
 0xcac   :  { %10278 = vmatpush1.bf16.msra.mxu1 %v17740_v34 }
 0xcad   :  { %10280 = vmatprep.subr.bf16.mxu1 %v17744_v2 }
 0xcb0   :  { %10282 = vmatpush1.bf16.msra.mxu1 %v17759_v26 }
 0xcb1   :  { %10284 = vmatprep.subr.bf16.mxu1 %v17762_v20 }
 0xcb4   :  { %10286 = vmatpush1.bf16.msra.mxu1 %v17777_v6 }
 0xcb5   :  { %10288 = vmatprep.subr.bf16.mxu1 %v17780_v57 }
 0xcb8   :  { %10290 = vmatpush1.bf16.msra.mxu1 %v17795_v28 }
 0xcb9   :  { %10292 = vmatprep.subr.bf16.mxu1 %v17798_v50 }
 0xcbc   :  { %10294 = vmatpush1.bf16.msra.mxu1 %v17813_v45 }
 0xcbd   :  { %10296 = vmatprep.subr.bf16.mxu1 %v17816_v54 }
 0xcc0   :  { %10298 = vmatpush1.bf16.msra.mxu1 %v17825_v42 }
 0xcc1   :  { %10300 = vmatprep.subr.bf16.mxu1 %v17489_v5 }
 0xcc3   :  { %8390 = vmatmul.mubr.f32.vlgmr.msra.gmra.mrb[62].mxu1 %v10590_v0 }
 0xcc4   :  { %8395 = vmatprep.mubr.f32.mxu1 %v10590_v0  ;;  %10302 = vmatpush1.bf16.msra.mxu1 %v17540_v49 }
 0xcc5   :  { %10304 = vmatprep.subr.bf16.mxu1 %v17542_v43 }
 0xcc7   :  { %8396 = vmatmul.mubr.f32.gmra.mrb[64].mxu1 %v10590_v0 }
 0xcc8   :  { %10306 = vmatpush1.bf16.msra.mxu1 %v17560_v11  ;;  %8551 = vmatprep.mubr.f32.mxu1 %v10590_v0 }
 0xcc9   :  { %10308 = vmatprep.subr.bf16.mxu1 %v17563_v56 }
 0xccc   :  { %10310 = vmatpush1.bf16.msra.mxu1 %v17581_v4 }
 0xccd   :  { %10312 = vmatprep.subr.bf16.mxu1 %v17584_v12 }
 0xcd0   :  { %10314 = vmatpush1.bf16.msra.mxu1 %v17602_v27 }
 0xcd1   :  { %10316 = vmatprep.subr.bf16.mxu1 %v17605_v29 }
 0xcd4   :  { %10318 = vmatpush1.bf16.msra.mxu1 %v17623_v13 }
 0xcd5   :  { %10320 = vmatprep.subr.bf16.mxu1 %v17626_v41 }
 0xcd8   :  { %10322 = vmatpush1.bf16.msra.mxu1 %v17644_v19 }
 0xcd9   :  { %10324 = vmatprep.subr.bf16.mxu1 %v17647_v33 }
 0xcdc   :  { %10326 = vmatpush1.bf16.msra.mxu1 %v17664_v18 }
 0xcdd   :  { %10328 = vmatprep.subr.bf16.mxu1 %v17668_v10 }
 0xce0   :  { %10330 = vmatpush1.bf16.msra.mxu1 %v17683_v23 }
 0xce1   :  { %10332 = vmatprep.subr.bf16.mxu1 %v17686_v9 }
 0xd76   :  { %v8314_v44 = vpop.f32.mrb[50].mxu1 }
 0xd77   :  { %v8316_v7 = vpop.f32.mrb[51].mxu1  ;;  %v8431_v38 = vadd.f32 %v17861_v3, %v8314_v44 }
 0xd78   :  { %v8432_v22 = vadd.f32 %v17857_v52, %v8316_v7 }
 0xd79   :  { %v9316_v58 = vmul.f32 -1.442695, %v8431_v38 }
 0xd7a   :  { %v8320_v36 = vpop.f32.mrb[52].mxu1  ;;  %v9318_v59 = vmul.f32 -1.442695, %v8432_v22 }
 0xd7b   :  { %v8322_v14 = vpop.f32.mrb[53].mxu1  ;;  %v8435_v16 = vadd.f32 %v17861_v3, %v8320_v36 }
 0xd7c   :  { %v8436_v15 = vadd.f32 %v17857_v52, %v8322_v14  ;;  %10475 = vpow2.f32 %v9318_v59 }
 0xd7d   :  { %v9317_v39 = vmul.f32 -1.442695, %v8435_v16  ;;  %10477 = vpow2.f32 %v9316_v58 }
 0xd7e   :  { %v9319_v30 = vmul.f32 -1.442695, %v8436_v15 }
 0xd7f   :  { %10479 = vpow2.f32 %v9317_v39 }
 0xd80   :  { %10481 = vpow2.f32 %v9319_v30 }
 0xd86   :  { %v10476_v24 = vpop.eup %10475 }
 0xd87   :  { %v10478_v61 = vpop.eup %10477  ;;  %v8457_v48 = vadd.f32 1.0, %v10476_v24 }
 0xd88   :  { %v8445_v46 = vadd.f32 1.0, %v10478_v61 }
 0xd89   :  { %v10480_v31 = vpop.eup %10479  ;;  %10483 = vrcp.f32 %v8457_v48 }
 0xd8a   :  { %v10482_v21 = vpop.eup %10481  ;;  %v8446_v25 = vadd.f32 1.0, %v10480_v31  ;;  %10485 = vrcp.f32 %v8445_v46 }
 0xd8b   :  { %v8458_v62 = vadd.f32 1.0, %v10482_v21 }
 0xd93   :  { %v10484_v59 = vpop.eup %10483 }
 0xd94   :  { %v10486_v15 = vpop.eup %10485  ;;  %v8477_v30 = vmul.f32 0.0, %v10484_v59 }
 0xd96   :  { %v8391_v37 = vpop.f32.mrb[62].mxu1 }
 0xd97   :  { %v8433_v44 = vadd.f32 %v17869_v60, %v8391_v37  ;;  %v8393_v8 = vpop.f32.mrb[63].mxu1 }
 0xd98   :  { %v8434_v7 = vadd.f32 %v17871_v47, %v8393_v8 }
 0xd99   :  { %10487 = vtanh.f32 %v8433_v44 }
 0xd9a   :  { %10489 = vrcp.f32 %v8446_v25  ;;  %v9320_v36 = vmul.f32 -1.442695, %v8434_v7  ;;  %v8397_v14 = vpop.f32.mrb[64].mxu1 }
 0xd9b   :  { %10491 = vrcp.f32 %v8458_v62  ;;  %v8437_v22 = vadd.f32 %v17869_v60, %v8397_v14  ;;  %v8399_v38 = vpop.f32.mrb[65].mxu1 }
 0xd9c   :  { %10493 = vpow2.f32 %v9320_v36  ;;  %v8438_v32 = vadd.f32 %v17871_v47, %v8399_v38 }
 0xd9d   :  { %10495 = vtanh.f32 %v8437_v22 }
 0xd9e   :  { %v9321_v16 = vmul.f32 -1.442695, %v8438_v32 }
 0xda0   :  { %10497 = vpow2.f32 %v9321_v16 }
 0xda3   :  { %v10488_v58 = vpop.eup %10487 }
 0xda4   :  { %v10490_v39 = vpop.eup %10489  ;;  %v8479_v40 = vmul.f32 %v10488_v58, %v10486_v15 }
 0xda5   :  { %v10492_v24 = vpop.eup %10491 }
 0xda6   :  { %v10494_v63 = vpop.eup %10493  ;;  %v17877_v61 = vadd.f32 %v8479_v40, %v8477_v30  ;;  %v8478_v21 = vmul.f32 0.0, %v10492_v24 }
 0xda7   :  { %v10496_v31 = vpop.eup %10495  ;;  %v8471_v48 = vadd.f32 1.0, %v10494_v63 }
 0xda8   :  { %10499 = vtanh.f32 %v17877_v61  ;;  %v8480_v46 = vmul.f32 %v10496_v31, %v10490_v39 }
 0xda9   :  { %10501 = vrcp.f32 %v8471_v48 }
 0xdaa   :  { %v10498_v25 = vpop.eup %10497  ;;  %v17880_v37 = vadd.f32 %v8480_v46, %v8478_v21 }
 0xdab   :  { %v8472_v62 = vadd.f32 1.0, %v10498_v25 }
 0xdac   :  { %10503 = vtanh.f32 %v17880_v37 }
 0xdad   :  { %10505 = vrcp.f32 %v8472_v62 }
 0xdb2   :  { %v10500_v44 = vpop.eup %10499 }
 0xdb3   :  { %v10502_v8 = vpop.eup %10501 }
 0xdb4   :  { %v8485_v7 = vmul.f32 %v10502_v8, %v10500_v44 }
 0xdb6   :  { %v10504_v36 = vpop.eup %10503  ;;  %8552 = vmatmul.mubr.f32.vlgmr.msra.gmra.mrb[54].mxu1 %v8485_v7 }
 0xdb7   :  { %v10506_v14 = vpop.eup %10505  ;;  %10334 = vmatpush1.bf16.msra.mxu1 %v17701_v17  ;;  %8557 = vmatprep.mubr.f32.mxu1 %v10590_v0 }
 0xdb8   :  { %10336 = vmatprep.subr.bf16.mxu1 %v17704_v51  ;;  %v8486_v22 = vmul.f32 %v10506_v14, %v10504_v36 }
 0xdba   :  { %8558 = vmatmul.mubr.f32.gmra.mrb[56].mxu1 %v8486_v22 }
 0xdbb   :  { %10338 = vmatpush1.bf16.msra.mxu1 %v17721_v55  ;;  %8628 = vmatprep.mubr.f32.mxu1 %v10590_v0 }
 0xdbc   :  { %10340 = vmatprep.subr.bf16.mxu1 %v17724_v1 }
 0xdbf   :  { %10342 = vmatpush1.bf16.msra.mxu1 %v17740_v34 }
 0xdc0   :  { %10344 = vmatprep.subr.bf16.mxu1 %v17744_v2 }
 0xdc3   :  { %10346 = vmatpush1.bf16.msra.mxu1 %v17759_v26 }
 0xdc4   :  { %10348 = vmatprep.subr.bf16.mxu1 %v17762_v20 }
 0xdc7   :  { %10350 = vmatpush1.bf16.msra.mxu1 %v17777_v6 }
 0xdc8   :  { %10352 = vmatprep.subr.bf16.mxu1 %v17780_v57 }
 0xdcb   :  { %10354 = vmatpush1.bf16.msra.mxu1 %v17795_v28 }
 0xdcc   :  { %10356 = vmatprep.subr.bf16.mxu1 %v17798_v50 }
 0xdcf   :  { %10358 = vmatpush1.bf16.msra.mxu1 %v17813_v45 }
 0xdd0   :  { %10360 = vmatprep.subr.bf16.mxu1 %v17816_v54 }
 0xdd3   :  { %10362 = vmatpush1.bf16.msra.mxu1 %v17825_v42 }
 0xdd4   :  { %10364 = vmatprep.subr.bf16.mxu1 %v17489_v5 }
 0xdd6   :  { %8629 = vmatmul.mubr.f32.vlgmr.msra.gmra.mrb[66].mxu1 %v8485_v7 }
 0xdd7   :  { %8634 = vmatprep.mubr.f32.mxu1 %v10590_v0  ;;  %10366 = vmatpush1.bf16.msra.mxu1 %v17540_v49 }
 0xdd8   :  { %10368 = vmatprep.subr.bf16.mxu1 %v17542_v43 }
 0xdda   :  { %8635 = vmatmul.mubr.f32.gmra.mrb[68].mxu1 %v8486_v22 }
 0xddb   :  { %10370 = vmatpush1.bf16.msra.mxu1 %v17560_v11  ;;  %8769 = vmatprep.mubr.f32.mxu1 %v10590_v0 }
 0xddc   :  { %10372 = vmatprep.subr.bf16.mxu1 %v17563_v56 }
 0xddf   :  { %10374 = vmatpush1.bf16.msra.mxu1 %v17581_v4 }
 0xde0   :  { %10376 = vmatprep.subr.bf16.mxu1 %v17584_v12 }
 0xde3   :  { %10378 = vmatpush1.bf16.msra.mxu1 %v17602_v27 }
 0xde4   :  { %10380 = vmatprep.subr.bf16.mxu1 %v17605_v29 }
 0xde7   :  { %10382 = vmatpush1.bf16.msra.mxu1 %v17623_v13 }
 0xde8   :  { %10384 = vmatprep.subr.bf16.mxu1 %v17626_v41 }
 0xdeb   :  { %10386 = vmatpush1.bf16.msra.mxu1 %v17644_v19 }
 0xdec   :  { %10388 = vmatprep.subr.bf16.mxu1 %v17647_v33 }
 0xdef   :  { %10390 = vmatpush1.bf16.msra.mxu1 %v17664_v18 }
 0xdf0   :  { %10392 = vmatprep.subr.bf16.mxu1 %v17668_v10 }
 0xdf3   :  { %10394 = vmatpush1.bf16.msra.mxu1 %v17683_v23 }
 0xdf4   :  { %10396 = vmatprep.subr.bf16.mxu1 %v17686_v9 }
 0xe89   :  { %v8553_v5 = vpop.f32.mrb[54].mxu1 }
 0xe8a   :  { %v8555_v49 = vpop.f32.mrb[55].mxu1  ;;  %v8649_v4 = vadd.f32 %v8553_v5, %v17861_v3 }
 0xe8b   :  { %v8650_v56 = vadd.f32 %v8555_v49, %v17857_v52 }
 0xe8c   :  { %v9322_v13 = vmul.f32 -1.442695, %v8649_v4 }
 0xe8d   :  { %v8559_v43 = vpop.f32.mrb[56].mxu1  ;;  %v9324_v27 = vmul.f32 -1.442695, %v8650_v56 }
 0xe8e   :  { %v8561_v11 = vpop.f32.mrb[57].mxu1  ;;  %v8653_v12 = vadd.f32 %v8559_v43, %v17861_v3 }
 0xe8f   :  { %v8654_v29 = vadd.f32 %v8561_v11, %v17857_v52  ;;  %10507 = vpow2.f32 %v9324_v27 }
 0xe90   :  { %v9323_v41 = vmul.f32 -1.442695, %v8653_v12  ;;  %10509 = vpow2.f32 %v9322_v13 }
 0xe91   :  { %v9325_v19 = vmul.f32 -1.442695, %v8654_v29 }
 0xe92   :  { %10511 = vpow2.f32 %v9323_v41 }
 0xe93   :  { %10513 = vpow2.f32 %v9325_v19 }
 0xe99   :  { %v10508_v33 = vpop.eup %10507 }
 0xe9a   :  { %v10510_v18 = vpop.eup %10509  ;;  %v8675_v23 = vadd.f32 1.0, %v10508_v33 }
 0xe9b   :  { %v8663_v38 = vadd.f32 1.0, %v10510_v18 }
 0xe9c   :  { %v10512_v10 = vpop.eup %10511  ;;  %10515 = vrcp.f32 %v8675_v23 }
 0xe9d   :  { %v10514_v9 = vpop.eup %10513  ;;  %v8664_v32 = vadd.f32 1.0, %v10512_v10  ;;  %10517 = vrcp.f32 %v8663_v38 }
 0xe9e   :  { %v8676_v59 = vadd.f32 1.0, %v10514_v9 }
 0xea6   :  { %v10516_v21 = vpop.eup %10515 }
 0xea7   :  { %v10518_v46 = vpop.eup %10517  ;;  %v8695_v44 = vmul.f32 %v10516_v21, %v17877_v61 }
 0xea9   :  { %v8630_v16 = vpop.f32.mrb[66].mxu1 }
 0xeaa   :  { %v8651_v15 = vadd.f32 %v8630_v16, %v17869_v60  ;;  %v8632_v58 = vpop.f32.mrb[67].mxu1 }
 0xeab   :  { %v8652_v39 = vadd.f32 %v8632_v58, %v17871_v47 }
 0xeac   :  { %10519 = vtanh.f32 %v8651_v15 }
 0xead   :  { %10521 = vrcp.f32 %v8664_v32  ;;  %v9326_v30 = vmul.f32 -1.442695, %v8652_v39  ;;  %v8636_v40 = vpop.f32.mrb[68].mxu1 }
 0xeae   :  { %10523 = vrcp.f32 %v8676_v59  ;;  %v8655_v24 = vadd.f32 %v8636_v40, %v17869_v60  ;;  %v8638_v63 = vpop.f32.mrb[69].mxu1 }
 0xeaf   :  { %10525 = vpow2.f32 %v9326_v30  ;;  %v8656_v31 = vadd.f32 %v8638_v63, %v17871_v47 }
 0xeb0   :  { %10527 = vtanh.f32 %v8655_v24 }
 0xeb1   :  { %v9327_v48 = vmul.f32 -1.442695, %v8656_v31 }
 0xeb3   :  { %10529 = vpow2.f32 %v9327_v48 }
 0xeb6   :  { %v10520_v25 = vpop.eup %10519 }
 0xeb7   :  { %v10522_v62 = vpop.eup %10521  ;;  %v8697_v8 = vmul.f32 %v10520_v25, %v10518_v46 }
 0xeb8   :  { %v10524_v7 = vpop.eup %10523 }
 0xeb9   :  { %v10526_v36 = vpop.eup %10525  ;;  %v17928_v14 = vadd.f32 %v8697_v8, %v8695_v44  ;;  %v8696_v49 = vmul.f32 %v10524_v7, %v17880_v37 }
 0xeba   :  { %v10528_v22 = vpop.eup %10527  ;;  %v8689_v5 = vadd.f32 1.0, %v10526_v36 }
 0xebb   :  { %10531 = vtanh.f32 %v17928_v14  ;;  %v8698_v43 = vmul.f32 %v10528_v22, %v10522_v62 }
 0xebc   :  { %10533 = vrcp.f32 %v8689_v5 }
 0xebd   :  { %v10530_v11 = vpop.eup %10529  ;;  %v17932_v56 = vadd.f32 %v8698_v43, %v8696_v49 }
 0xebe   :  { %v8690_v4 = vadd.f32 1.0, %v10530_v11 }
 0xebf   :  { %10535 = vtanh.f32 %v17932_v56 }
 0xec0   :  { %10537 = vrcp.f32 %v8690_v4 }
 0xec5   :  { %v10532_v61 = vpop.eup %10531 }
 0xec6   :  { %v10534_v12 = vpop.eup %10533 }
 0xec7   :  { %v8703_v27 = vmul.f32 %v10534_v12, %v10532_v61 }
 0xec9   :  { %v10536_v29 = vpop.eup %10535  ;;  %8770 = vmatmul.mubr.f32.vlgmr.msra.gmra.mrb[58].mxu1 %v8703_v27 }
 0xeca   :  { %v10538_v13 = vpop.eup %10537  ;;  %10398 = vmatpush1.bf16.msra.mxu1 %v17701_v17  ;;  %8775 = vmatprep.mubr.f32.mxu1 %v10590_v0  ;;  %v10591_v17 = vmov 0.0|0.0  }
 0xecb   :  { %10400 = vmatprep.subr.bf16.mxu1 %v17704_v51  ;;  %v8704_v37 = vmul.f32 %v10538_v13, %v10536_v29  ;;  %10427 = vmatprep.subr.bf16.mxu0 %v10591_v17  ;;  %v10593_v51 = vmov 0   ;;  %v8994_v29 = vld [vmem:[%s17995_s11] sm:$0x1] }
 0xecc   :  { %10474 = vset.pattern.permute.xlu0 %v10593_v51 }
 0xecd   :  { %8776 = vmatmul.mubr.f32.gmra.mrb[60].mxu1 %v8704_v37 }
 0xece   :  { %10402 = vmatpush1.bf16.msra.mxu1 %v17721_v55  ;;  %8846 = vmatprep.mubr.f32.mxu1 %v10590_v0  ;;  %v18_v55 = vstv %s17993_s12 }
 0xecf   :  { %10404 = vmatprep.subr.bf16.mxu1 %v17724_v1  ;;  %19 = vst [vmem:[#allocation2] sm:$0x1] %v18_v55 }
 0xed2   :  { %10406 = vmatpush1.bf16.msra.mxu1 %v17740_v34 }
 0xed3   :  { %10408 = vmatprep.subr.bf16.mxu1 %v17744_v2 }
 0xed6   :  { %10410 = vmatpush1.bf16.msra.mxu1 %v17759_v26  ;;  %v9070_v1 = vld [vmem:[#allocation2] sm:$0x1] }
 0xed7   :  { %10412 = vmatprep.subr.bf16.mxu1 %v17762_v20  ;;  %9073 = vperm.xlu0 %10474, %v9070_v1  }
 0xeda   :  { %10414 = vmatpush1.bf16.msra.mxu1 %v17777_v6 }
 0xedb   :  { %10416 = vmatprep.subr.bf16.mxu1 %v17780_v57 }
 0xede   :  { %10418 = vmatpush1.bf16.msra.mxu1 %v17795_v28 }
 0xedf   :  { %10420 = vmatprep.subr.bf16.mxu1 %v17798_v50 }
 0xee2   :  { %10422 = vmatpush1.bf16.msra.mxu1 %v17813_v45 }
 0xee3   :  { %10424 = vmatprep.subr.bf16.mxu1 %v17816_v54 }
 0xee6   :  { %10426 = vmatpush1.bf16.msra.mxu1 %v17825_v42 }
 0xee9   :  { %8847 = vmatmul.mubr.f32.vlgmr.msra.gmra.mrb[70].mxu1 %v8703_v27 }
 0xeea   :  { %8852 = vmatprep.mubr.f32.mxu1 %v10590_v0 }
 0xeed   :  { %8853 = vmatmul.mubr.f32.gmra.mrb[72].mxu1 %v8704_v37 }
 0xf56   :  { %v9074_v55 = vpop.permute.xlu0 %9073 }
 0xf57   :  { %v9079_v1 = vrot.slane %v9074_v55, %v8413_v35 }
 0xf9c   :  { %v8771_v34 = vpop.f32.mrb[58].mxu1 }
 0xf9d   :  { %v8773_v2 = vpop.f32.mrb[59].mxu1  ;;  %v8867_v57 = vadd.f32 %v8771_v34, %v17861_v3 }
 0xf9e   :  { %v8868_v6 = vadd.f32 %v8773_v2, %v17857_v52 }
 0xf9f   :  { %v9328_v54 = vmul.f32 -1.442695, %v8867_v57 }
 0xfa0   :  { %v8777_v26 = vpop.f32.mrb[60].mxu1  ;;  %v9330_v50 = vmul.f32 -1.442695, %v8868_v6 }
 0xfa1   :  { %v8779_v20 = vpop.f32.mrb[61].mxu1  ;;  %v8871_v28 = vadd.f32 %v8777_v26, %v17861_v3 }
 0xfa2   :  { %v8872_v45 = vadd.f32 %v8779_v20, %v17857_v52  ;;  %10539 = vpow2.f32 %v9330_v50 }
 0xfa3   :  { %v9329_v42 = vmul.f32 -1.442695, %v8871_v28  ;;  %10541 = vpow2.f32 %v9328_v54 }
 0xfa4   :  { %v9331_v41 = vmul.f32 -1.442695, %v8872_v45 }
 0xfa5   :  { %10543 = vpow2.f32 %v9329_v42 }
 0xfa6   :  { %10545 = vpow2.f32 %v9331_v41 }
 0xfac   :  { %v10540_v19 = vpop.eup %10539 }
 0xfad   :  { %v10542_v33 = vpop.eup %10541  ;;  %v8893_v10 = vadd.f32 1.0, %v10540_v19 }
 0xfae   :  { %v8881_v9 = vadd.f32 1.0, %v10542_v33 }
 0xfaf   :  { %v10544_v18 = vpop.eup %10543  ;;  %10547 = vrcp.f32 %v8893_v10 }
 0xfb0   :  { %v10546_v23 = vpop.eup %10545  ;;  %v8882_v38 = vadd.f32 1.0, %v10544_v18  ;;  %10549 = vrcp.f32 %v8881_v9 }
 0xfb1   :  { %v8894_v3 = vadd.f32 1.0, %v10546_v23 }
 0xfb9   :  { %v10548_v63 = vpop.eup %10547 }
 0xfba   :  { %v10550_v31 = vpop.eup %10549  ;;  %v8913_v46 = vmul.f32 %v10548_v63, %v17928_v14 }
 0xfbc   :  { %v8848_v32 = vpop.f32.mrb[70].mxu1 }
 0xfbd   :  { %v8869_v16 = vadd.f32 %v8848_v32, %v17869_v60  ;;  %v8850_v52 = vpop.f32.mrb[71].mxu1 }
 0xfbe   :  { %v8870_v59 = vadd.f32 %v8850_v52, %v17871_v47 }
 0xfbf   :  { %10551 = vtanh.f32 %v8869_v16 }
 0xfc0   :  { %10553 = vrcp.f32 %v8882_v38  ;;  %v9332_v15 = vmul.f32 -1.442695, %v8870_v59  ;;  %v8854_v58 = vpop.f32.mrb[72].mxu1 }
 0xfc1   :  { %10555 = vrcp.f32 %v8894_v3  ;;  %v8873_v39 = vadd.f32 %v8854_v58, %v17869_v60  ;;  %v8856_v30 = vpop.f32.mrb[73].mxu1 }
 0xfc2   :  { %10557 = vpow2.f32 %v9332_v15  ;;  %v8874_v40 = vadd.f32 %v8856_v30, %v17871_v47 }
 0xfc3   :  { %10559 = vtanh.f32 %v8873_v39 }
 0xfc4   :  { %v9333_v24 = vmul.f32 -1.442695, %v8874_v40 }
 0xfc6   :  { %10561 = vpow2.f32 %v9333_v24 }
 0xfc9   :  { %v10552_v48 = vpop.eup %10551 }
 0xfca   :  { %v10554_v21 = vpop.eup %10553  ;;  %v8915_v25 = vmul.f32 %v10552_v48, %v10550_v31 }
 0xfcb   :  { %v10556_v62 = vpop.eup %10555 }
 0xfcc   :  { %v10558_v44 = vpop.eup %10557  ;;  %v8917_v8 = vadd.f32 %v8915_v25, %v8913_v46  ;;  %v8914_v60 = vmul.f32 %v10556_v62, %v17932_v56  ;;  %v8923_v56 = vld [vmem:[%s17994_s10] sm:$0x1] }
 0xfcd   :  { %v10560_v7 = vpop.eup %10559  ;;  %v8907_v36 = vadd.f32 1.0, %v10558_v44 }
 0xfce   :  { %10563 = vtanh.f32 %v8917_v8  ;;  %v8916_v22 = vmul.f32 %v10560_v7, %v10554_v21 }
 0xfcf   :  { %10565 = vrcp.f32 %v8907_v36 }
 0xfd0   :  { %v10562_v47 = vpop.eup %10561  ;;  %v8918_v5 = vadd.f32 %v8916_v22, %v8914_v60 }
 0xfd1   :  { %v8908_v49 = vadd.f32 1.0, %v10562_v47 }
 0xfd2   :  { %10567 = vtanh.f32 %v8918_v5 }
 0xfd3   :  { %10569 = vrcp.f32 %v8908_v49 }
 0xfd8   :  { %v10564_v43 = vpop.eup %10563 }
 0xfd9   :  { %v10566_v11 = vpop.eup %10565 }
 0xfda   :  { %v8921_v4 = vmul.f32 %v10566_v11, %v10564_v43 }
 0xfdc   :  { %v10568_v14 = vpop.eup %10567 }
 0xfdd   :  { %v10570_v61 = vpop.eup %10569 }
 0xfde   :  { %v8922_v12 = vmul.f32 %v10570_v61, %v10568_v14 }
 0xfe0   :  { %v10428_v27 = vpack.c.bf16 %v8922_v12, %v8921_v4 }
 0xfe2   :  { %10429 = vmatpush3.bf16.xpose.msra.mxu0 %v10428_v27 }
 0xfe3   :  { %10430 = vmatprep.subr.bf16.mxu0 %v10591_v17 }
 0xfe9   :  { %10194 = vmatmul.mubr.f32.vlgmr.msra.gmra.mrb[152].mxu0 %v8923_v56 }
 0xfea   :  { %10432 = vmatpush3.bf16.xpose.msra.mxu0 %v10428_v27  ;;  %10200 = vmatprep.mubr.msk.f32.mxu0 %vm10592_vm5, %v10590_v0 }
 0xff1   :  { %10201 = vmatmul.mubr.f32.vlgmr.msra.gmra.mrb[154].mxu0 %v8994_v29 }
0x10bc   :  { %v8990_v13 = vpop.f32.mrb[152].mxu0 }
0x10bd   :  { %v10195_v37 = vpop.f32.mrb[153].mxu0 }
0x10c4   :  { %v9061_v51 = vpop.f32.mrb[154].mxu0 }
0x10c5   :  { %9066 = vrot.lane.b32.xlu1 %v9061_v51, %s10594_s28  ;;  %v10202_v17 = vpop.f32.mrb[155].mxu0 }
0x1137   :  { %v9067_v34 = vpop.permute.xlu1 %9066 }
0x1138   :  { %v9069_v2 = vadd.f32 %v9067_v34, %v8990_v13 }
0x113a   :  { %v9080_v26 = vadd.f32 %v9079_v1, %v9069_v2 }
0x113c   :  { %v9334_v20 = vmul.f32 -1.442695, %v9080_v26 }
0x113e   :  { %10571 = vpow2.f32 %v9334_v20 }
0x1148   :  { %v10572_v0 = vpop.eup %10571 }
0x1149   :  { %v9084_v6 = vadd.f32 1.0, %v10572_v0 }
0x114b   :  { %10573 = vrcp.f32 %v9084_v6 }
0x1155   :  { %v10574_v57 = vpop.eup %10573 }
0x1156   :  { %9088 = vst.msk [vmem:[%s17996_s13] sm:$0x1] %vm9087_vm6, %v10574_v57 }

</bundles_post_ra>
